<compile_context>
chip_gen: v5e
topology: v5e:2x2
jax: 0.10.0
libtpu: 0.0.40
codegen_flags: <defaults>
</compile_context>

<pallas_src>
import functools
import math

import numpy as np
import jax
import jax.numpy as jnp
from jax.experimental import pallas as pl
from jax.experimental.pallas import tpu as pltpu


def _round_up(v, m):
  return ((v + m - 1) // m) * m


# ----------------------------- Pallas kernel ------------------------------- #

def _transformer_agg_kernel(
    x_ref, mask_ref, pe_ref,
    wqkv_ref, bqkv_ref, wo_ref, bo_ref,
    ln1w_ref, ln1b_ref,
    w1_ref, b1_ref, w2_ref, b2_ref,
    ln2w_ref, ln2b_ref,
    out_ref,
    *, num_heads, d_real, dh_real, seq_denom):
  f32, bf16 = jnp.float32, jnp.bfloat16
  Bb, Np, Dp = x_ref.shape
  R = Bb * Np
  Dh = d_real // num_heads

  # Positional encoding (dropout == identity at inference); f32 residual path.
  x = x_ref[...] + pe_ref[...]                       # (Bb, Np, Dp)
  xf = x.reshape(R, Dp)                              # (R, Dp) tall MXU matrix

  # Fused QKV projection, bf16 operands / f32 accumulation.
  # Column layout: [q | k | v], each Dp=128 wide; both heads live in the real
  # D columns of each slot, padded lanes are structural zeros.
  qkv = jnp.dot(xf.astype(bf16), wqkv_ref[...],
                preferred_element_type=f32) + bqkv_ref[...]       # (R, 3*Dp)
  q = qkv[:, 0 * Dp:1 * Dp].reshape(Bb, Np, Dp)                   # f32
  k = qkv[:, 1 * Dp:2 * Dp].reshape(Bb, Np, Dp).astype(bf16)
  v = qkv[:, 2 * Dp:3 * Dp].reshape(Bb, Np, Dp)                   # f32

  # Per-graph key-valid bias (batched attention, no (R,R) block-diag matrix).
  mask = mask_ref[...]                               # (Bb, Np) 1.0 valid / 0.0
  bias = jnp.where(mask > 0.0, 0.0, -1e30)[:, None, :]            # (Bb, 1, Np)
  # Fully-masked query rows (padded nodes / padded graphs) end up with a
  # uniform softmax over -1e30-biased scores; they are zeroed by the masked
  # mean at the end, exactly like the torch code.

  scale = 1.0 / math.sqrt(dh_real)
  lane = jax.lax.broadcasted_iota(jnp.int32, (1, 1, Dp), 2)
  o = jnp.zeros((Bb, Np, Dp), f32)
  for h in range(num_heads):
    hm = ((lane >= h * Dh) & (lane < (h + 1) * Dh)).astype(f32)   # (1,1,Dp)
    # Zero the other head's lanes of q and fold in the 1/sqrt(dh) scale;
    # zeroed lanes contribute 0 to the 128-wide contraction against full k.
    qh = (q * (hm * scale)).astype(bf16)
    s = jnp.einsum('bqd,bkd->bqk', qh, k,
                   preferred_element_type=f32) + bias             # (Bb,Np,Np)
    m = jnp.max(s, axis=-1, keepdims=True)
    p = jnp.exp(s - m)                                            # f32 softmax
    p = p * pl.reciprocal(jnp.sum(p, axis=-1, keepdims=True), approx=True)
    vh = (v * hm).astype(bf16)                       # head-h columns only
    o = o + jnp.einsum('bqk,bkd->bqd', p.astype(bf16), vh,
                       preferred_element_type=f32)   # heads land in disjoint lanes

  # Output projection: heads are already concatenated in the packed lane
  # layout, so this is a single (R, Dp) x (Dp, Dp) matmul.
  attn = jnp.dot(o.reshape(R, Dp).astype(bf16), wo_ref[...],
                 preferred_element_type=f32) + bo_ref[...]        # (R, Dp)

  # LayerNorm statistics over the REAL feature width only (padded cols are 0).
  col_mask = (jax.lax.broadcasted_iota(jnp.int32, (1, Dp), 1)
              < d_real).astype(f32)
  inv_d = 1.0 / d_real

  # residual + LayerNorm1 (eps = 1e-5, torch default) -- all f32
  y = xf + attn
  mu = jnp.sum(y, axis=-1, keepdims=True) * inv_d
  dy = (y - mu) * col_mask
  var = jnp.sum(dy * dy, axis=-1, keepdims=True) * inv_d
  y = dy * jax.lax.rsqrt(var + 1e-5) * ln1w_ref[...] + ln1b_ref[...]

  # feed-forward (ReLU, dim_feedforward = 4 * d_model), bf16 matmul inputs
  h1 = jnp.dot(y.astype(bf16), w1_ref[...],
               preferred_element_type=f32) + b1_ref[...]
  h1 = jnp.maximum(h1, 0.0)
  h2 = jnp.dot(h1.astype(bf16), w2_ref[...],
               preferred_element_type=f32) + b2_ref[...]

  # residual + LayerNorm2
  z = y + h2
  mu2 = jnp.sum(z, axis=-1, keepdims=True) * inv_d
  dz = (z - mu2) * col_mask
  var2 = jnp.sum(dz * dz, axis=-1, keepdims=True) * inv_d
  z = dz * jax.lax.rsqrt(var2 + 1e-5) * ln2w_ref[...] + ln2b_ref[...]

  # `out[~mask] = 0; out.mean(dim=1)`: masked sum over nodes divided by the
  # ORIGINAL max_nodes (torch semantics), lane-dense (Bb, 128) store.
  z3 = z.reshape(Bb, Np, Dp)
  out_ref[...] = jnp.sum(z3 * mask[:, :, None], axis=1) * (1.0 / seq_denom)


# --------------------------- weight packing (host) -------------------------- #

def _pack_params(params, D, Dp, Fp):
  """Zero-pad & fuse weights; matmul weights in bf16, biases/LN in f32."""
  f32, bf16 = jnp.float32, jnp.bfloat16

  def padw(a, rows, cols):       # bf16 zero-padded matmul weight
    return (jnp.zeros((rows, cols), f32)
            .at[:a.shape[0], :a.shape[1]].set(a).astype(bf16))

  def padb(a, cols):             # f32 zero-padded bias / LN row vector
    return jnp.zeros((1, cols), f32).at[:, :a.shape[1]].set(a)

  # fused QKV: columns [q | k | v], each Dp wide (heads share the real D cols)
  wqkv = jnp.zeros((Dp, 3 * Dp), f32)
  bqkv = jnp.zeros((1, 3 * Dp), f32)
  for i, (w, b) in enumerate(((params["wq"], params["bq"]),
                              (params["wk"], params["bk"]),
                              (params["wv"], params["bv"]))):
    wqkv = wqkv.at[:D, i * Dp:i * Dp + D].set(w)
    bqkv = bqkv.at[:, i * Dp:i * Dp + D].set(b)
  wqkv = wqkv.astype(bf16)

  return [
      wqkv, bqkv,
      padw(params["wo"], Dp, Dp), padb(params["bo"], Dp),
      padb(params["ln1w"], Dp), padb(params["ln1b"], Dp),
      padw(params["w1"], Dp, Fp), padb(params["b1"], Fp),
      padw(params["w2"], Fp, Dp), padb(params["b2"], Dp),
      padb(params["ln2w"], Dp), padb(params["ln2b"], Dp),
  ]


# --------------------------------- wrapper ---------------------------------- #

@functools.partial(jax.jit, static_argnames=("num_heads", "block_graphs"))
def transformer_agg_forward(x_dense, mask, pe, params, *, num_heads=2,
                            block_graphs=32):
  """x_dense: (B, N, D) f32, mask: (B, N) bool, pe: (N, D) f32 -> (B, D)."""
  B, N, D = x_dense.shape
  H = num_heads
  Dh = D // H
  Np = _round_up(max(N, 8), 8)          # sublane-aligned padded seq length
  Dp = _round_up(D, 128)                # lane-aligned padded feature width
  Fp = _round_up(params["w1"].shape[1], 128)
  Bb = block_graphs                     # graphs per grid step
  B_pad = _round_up(B, Bb)
  nblk = B_pad // Bb

  xp = jnp.zeros((B_pad, Np, Dp), jnp.float32).at[:B, :N, :D].set(x_dense)
  mp = jnp.zeros((B_pad, Np), jnp.float32).at[:B, :N].set(mask.astype(jnp.float32))
  pep = jnp.zeros((Np, Dp), jnp.float32).at[:N, :D].set(pe)

  weights = _pack_params(params, D, Dp, Fp)

  def replicated(shape):
    nd = len(shape)
    return pl.BlockSpec(shape, lambda i, _nd=nd: (0,) * _nd)

  in_specs = (
      [pl.BlockSpec((Bb, Np, Dp), lambda i: (i, 0, 0)),   # activations
       pl.BlockSpec((Bb, Np), lambda i: (i, 0)),          # node-valid mask
       replicated((Np, Dp))]                              # positional encoding
      + [replicated(tuple(w.shape)) for w in weights]     # resident weights
  )

  out = pl.pallas_call(
      functools.partial(_transformer_agg_kernel, num_heads=H, d_real=D,
                        dh_real=float(Dh), seq_denom=float(N)),
      out_shape=jax.ShapeDtypeStruct((B_pad, Dp), jnp.float32),
      grid=(nblk,),
      in_specs=in_specs,
      out_specs=pl.BlockSpec((Bb, Dp), lambda i: (i, 0)),
      compiler_params=pltpu.CompilerParams(dimension_semantics=("parallel",)),
  )(xp, mp, pep, *weights)
  return out[:B, :D]


# ----------------------------- plain-JAX glue ------------------------------ #

def make_positional_encoding(max_len, d_model):
  position = np.arange(max_len, dtype=np.float32)[:, None]
  div_term = np.exp(np.arange(0, d_model, 2, dtype=np.float32)
                    * (-math.log(10000.0) / d_model))
  pe = np.zeros((max_len, d_model), np.float32)
  pe[:, 0::2] = np.sin(position * div_term)
  pe[:, 1::2] = np.cos(position * div_term)
  return jnp.asarray(pe)


def init_params(key, d_model, d_ff):
  ks = jax.random.split(key, 6)
  s_in = 1.0 / math.sqrt(d_model)
  s_ff = 1.0 / math.sqrt(d_ff)
  w = lambda k, shape, s: jax.random.normal(k, shape, jnp.float32) * s
  z = lambda n: jnp.zeros((1, n), jnp.float32)
  return dict(
      wq=w(ks[0], (d_model, d_model), s_in), wk=w(ks[1], (d_model, d_model), s_in),
      wv=w(ks[2], (d_model, d_model), s_in), wo=w(ks[3], (d_model, d_model), s_in),
      bq=z(d_model), bk=z(d_model), bv=z(d_model), bo=z(d_model),
      w1=w(ks[4], (d_model, d_ff), s_in), b1=z(d_ff),
      w2=w(ks[5], (d_ff, d_model), s_ff), b2=z(d_model),
      ln1w=jnp.ones((1, d_model), jnp.float32), ln1b=z(d_model),
      ln2w=jnp.ones((1, d_model), jnp.float32), ln2b=z(d_model),
  )


def preprocess(x, index, timestamps, num_graphs, max_nodes):
  """cat timestamp column, to_dense_batch, then sort_wrt_time (drop timestamp)."""
  feats = jnp.concatenate([timestamps[:, None], x], axis=1)       # (E, 1+D)
  E = feats.shape[0]
  sort_ids = jnp.argsort(index)
  s_index = index[sort_ids]
  s_feats = feats[sort_ids]
  offsets = jnp.searchsorted(s_index, jnp.arange(num_graphs))
  pos = jnp.arange(E) - offsets[s_index]                          # pos within graph
  dense = jnp.zeros((num_graphs, max_nodes, feats.shape[1]), feats.dtype)
  dense = dense.at[s_index, pos].set(s_feats)
  mask = jnp.zeros((num_graphs, max_nodes), bool).at[s_index, pos].set(True)
  # sort_wrt_time: argsort on (padded) timestamp column, like the torch code
  first = dense[:, :, 0]
  sidx = jnp.argsort(first, axis=1)
  dense = jnp.take_along_axis(dense, sidx[:, :, None], axis=1)
  mask = jnp.take_along_axis(mask, sidx, axis=1)
  return dense[:, :, 1:], mask


def reference_forward(x_dense, mask, pe, params, *, num_heads=2):
  """Pure-JAX f32 reference for numerical verification of the Pallas kernel."""
  D = x_dense.shape[-1]
  hd = D // num_heads

  def one(xb, mb):
    x = xb + pe
    q = x @ params["wq"] + params["bq"][0]
    k = x @ params["wk"] + params["bk"][0]
    v = x @ params["wv"] + params["bv"][0]
    bias = jnp.where(mb, 0.0, -1e30)[None, :]
    outs = []
    for h in range(num_heads):
      sl = slice(h * hd, (h + 1) * hd)
      s = (q[:, sl] @ k[:, sl].T) / math.sqrt(hd) + bias
      outs.append(jax.nn.softmax(s, axis=-1) @ v[:, sl])
    attn = jnp.concatenate(outs, -1) @ params["wo"] + params["bo"][0]
    y = x + attn
    y = ((y - y.mean(-1, keepdims=True))
         * jax.lax.rsqrt(y.var(-1, keepdims=True) + 1e-5)
         * params["ln1w"][0] + params["ln1b"][0])
    h2 = jnp.maximum(y @ params["w1"] + params["b1"][0], 0.0) @ params["w2"] + params["b2"][0]
    z = y + h2
    z = ((z - z.mean(-1, keepdims=True))
         * jax.lax.rsqrt(z.var(-1, keepdims=True) + 1e-5)
         * params["ln2w"][0] + params["ln2b"][0])
    z = z * mb[:, None].astype(z.dtype)
    return z.mean(0)

  return jax.vmap(one)(x_dense, mask)


# ---------------------------------- main ----------------------------------- #

if __name__ == "__main__":
  d_model = 64          # constructor arg of TransformerAgg (small, TPU-friendly)
  num_heads = 2
  d_ff = 4 * d_model
  counts = [3, 5, 2, 4, 1, 6, 2, 3] * 8    # 64 graphs -> 2 grid blocks of 32
  num_graphs = len(counts)
  max_nodes = max(counts)
  E = sum(counts)

  key = jax.random.PRNGKey(0)
  kx, kt, kperm, kp = jax.random.split(key, 4)
  x = jax.random.normal(kx, (E, d_model), jnp.float32)
  timestamps_ = jax.random.uniform(kt, (E,), jnp.float32, minval=0.5, maxval=10.0)
  index = jnp.asarray(np.repeat(np.arange(num_graphs), counts), jnp.int32)
  perm = jax.random.permutation(kperm, E)
  x, timestamps_, index = x[perm], timestamps_[perm], index[perm]

  params = init_params(kp, d_model, d_ff)
  pe = make_positional_encoding(max_nodes, d_model)

  x_dense, mask = preprocess(x, index, timestamps_, num_graphs, max_nodes)

  out = transformer_agg_forward(x_dense, mask, pe, params,
                                num_heads=num_heads, block_graphs=32)
  out = jax.block_until_ready(out)

  ref = reference_forward(x_dense, mask, pe, params, num_heads=num_heads)
  assert out.shape == (num_graphs, d_model)
  # bf16 MXU operands (f32 accumulation) vs f32 reference: a few-percent tol.
  assert np.allclose(np.asarray(out), np.asarray(ref), rtol=3e-2, atol=3e-2), \
      "Pallas kernel output mismatch vs JAX reference"

  print("KERNEL_OK")
</pallas_src>

<mosaic_0001>
module attributes {stable_mosaic.version = 11 : i64} {
  func.func @_transformer_agg_kernel(%arg0: i32, %arg1: memref<32x8x128xf32, #tpu.memory_space<vmem>>, %arg2: memref<32x8xf32, #tpu.memory_space<vmem>>, %arg3: memref<8x128xf32, #tpu.memory_space<vmem>>, %arg4: memref<128x384xbf16, #tpu.memory_space<vmem>>, %arg5: memref<1x384xf32, #tpu.memory_space<vmem>>, %arg6: memref<128x128xbf16, #tpu.memory_space<vmem>>, %arg7: memref<1x128xf32, #tpu.memory_space<vmem>>, %arg8: memref<1x128xf32, #tpu.memory_space<vmem>>, %arg9: memref<1x128xf32, #tpu.memory_space<vmem>>, %arg10: memref<128x256xbf16, #tpu.memory_space<vmem>>, %arg11: memref<1x256xf32, #tpu.memory_space<vmem>>, %arg12: memref<256x128xbf16, #tpu.memory_space<vmem>>, %arg13: memref<1x128xf32, #tpu.memory_space<vmem>>, %arg14: memref<1x128xf32, #tpu.memory_space<vmem>>, %arg15: memref<1x128xf32, #tpu.memory_space<vmem>>, %arg16: memref<32x128xf32, #tpu.memory_space<vmem>>) attributes {dimension_semantics = [#tpu.dimension_semantics<parallel>], iteration_bounds = array<i64: 2>, scalar_prefetch = 0 : i64, scratch_operands = 0 : i64, tpu.core_type = #tpu.core_type<tc>, window_params = [{transform_indices = @transform_0, window_bounds = array<i64: 32, 8, 128>}, {transform_indices = @transform_1, window_bounds = array<i64: 32, 8>}, {pipeline_mode = #tpu.pipeline_mode<synchronous>, transform_indices = @transform_2, window_bounds = array<i64: 8, 128>}, {pipeline_mode = #tpu.pipeline_mode<synchronous>, transform_indices = @transform_3, window_bounds = array<i64: 128, 384>}, {pipeline_mode = #tpu.pipeline_mode<synchronous>, transform_indices = @transform_4, window_bounds = array<i64: 1, 384>}, {pipeline_mode = #tpu.pipeline_mode<synchronous>, transform_indices = @transform_5, window_bounds = array<i64: 128, 128>}, {pipeline_mode = #tpu.pipeline_mode<synchronous>, transform_indices = @transform_6, window_bounds = array<i64: 1, 128>}, {pipeline_mode = #tpu.pipeline_mode<synchronous>, transform_indices = @transform_7, window_bounds = array<i64: 1, 128>}, {pipeline_mode = #tpu.pipeline_mode<synchronous>, transform_indices = @transform_8, window_bounds = array<i64: 1, 128>}, {pipeline_mode = #tpu.pipeline_mode<synchronous>, transform_indices = @transform_9, window_bounds = array<i64: 128, 256>}, {pipeline_mode = #tpu.pipeline_mode<synchronous>, transform_indices = @transform_10, window_bounds = array<i64: 1, 256>}, {pipeline_mode = #tpu.pipeline_mode<synchronous>, transform_indices = @transform_11, window_bounds = array<i64: 256, 128>}, {pipeline_mode = #tpu.pipeline_mode<synchronous>, transform_indices = @transform_12, window_bounds = array<i64: 1, 128>}, {pipeline_mode = #tpu.pipeline_mode<synchronous>, transform_indices = @transform_13, window_bounds = array<i64: 1, 128>}, {pipeline_mode = #tpu.pipeline_mode<synchronous>, transform_indices = @transform_14, window_bounds = array<i64: 1, 128>}, {transform_indices = @transform_15, window_bounds = array<i64: 32, 128>}]} {
    %c0 = arith.constant 0 : index
    %c0_0 = arith.constant 0 : index
    %c0_1 = arith.constant 0 : index
    %0 = vector.load %arg1[%c0, %c0_0, %c0_1] : memref<32x8x128xf32, #tpu.memory_space<vmem>>, vector<32x8x128xf32>
    %c0_2 = arith.constant 0 : index
    %c0_3 = arith.constant 0 : index
    %1 = vector.load %arg3[%c0_2, %c0_3] : memref<8x128xf32, #tpu.memory_space<vmem>>, vector<8x128xf32>
    %2 = vector.shape_cast %1 : vector<8x128xf32> to vector<1x8x128xf32>
    %3 = vector.broadcast %2 : vector<1x8x128xf32> to vector<32x8x128xf32>
    %4 = arith.addf %0, %3 : vector<32x8x128xf32>
    %5 = vector.shape_cast %4 : vector<32x8x128xf32> to vector<256x128xf32>
    %6 = arith.truncf %5 : vector<256x128xf32> to vector<256x128xbf16>
    %c0_4 = arith.constant 0 : index
    %c0_5 = arith.constant 0 : index
    %7 = vector.load %arg4[%c0_4, %c0_5] : memref<128x384xbf16, #tpu.memory_space<vmem>>, vector<128x384xbf16>
    %cst = arith.constant dense<0.000000e+00> : vector<256x384xf32>
    %8 = tpu.matmul %6, %7, %cst {dimension_numbers = #tpu.dot_dimension_numbers<[1], [0], [0], [1], [0, 0, 1, 1], [], []>} : vector<256x128xbf16>, vector<128x384xbf16>, vector<256x384xf32> -> vector<256x384xf32>
    %c0_6 = arith.constant 0 : index
    %c0_7 = arith.constant 0 : index
    %9 = vector.load %arg5[%c0_6, %c0_7] : memref<1x384xf32, #tpu.memory_space<vmem>>, vector<1x384xf32>
    %10 = vector.broadcast %9 : vector<1x384xf32> to vector<256x384xf32>
    %11 = arith.addf %8, %10 : vector<256x384xf32>
    %12 = vector.extract_strided_slice %11 {offsets = [0, 0], sizes = [256, 128], strides = [1, 1]} : vector<256x384xf32> to vector<256x128xf32>
    %13 = vector.shape_cast %12 : vector<256x128xf32> to vector<32x8x128xf32>
    %14 = vector.extract_strided_slice %11 {offsets = [0, 128], sizes = [256, 128], strides = [1, 1]} : vector<256x384xf32> to vector<256x128xf32>
    %15 = vector.shape_cast %14 : vector<256x128xf32> to vector<32x8x128xf32>
    %16 = arith.truncf %15 : vector<32x8x128xf32> to vector<32x8x128xbf16>
    %17 = vector.extract_strided_slice %11 {offsets = [0, 256], sizes = [256, 128], strides = [1, 1]} : vector<256x384xf32> to vector<256x128xf32>
    %18 = vector.shape_cast %17 : vector<256x128xf32> to vector<32x8x128xf32>
    %c0_8 = arith.constant 0 : index
    %c0_9 = arith.constant 0 : index
    %19 = vector.load %arg2[%c0_8, %c0_9] : memref<32x8xf32, #tpu.memory_space<vmem>>, vector<32x8xf32>
    %cst_10 = arith.constant 0.000000e+00 : f32
    %20 = vector.broadcast %cst_10 : f32 to vector<32x8xf32>
    %21 = arith.cmpf ogt, %19, %20 : vector<32x8xf32>
    %cst_11 = arith.constant 0.000000e+00 : f32
    %cst_12 = arith.constant -1.000000e+30 : f32
    %22 = vector.broadcast %cst_11 : f32 to vector<32x8xf32>
    %23 = vector.broadcast %cst_12 : f32 to vector<32x8xf32>
    %24 = arith.select %21, %22, %23 : vector<32x8xi1>, vector<32x8xf32>
    %25 = vector.shape_cast %24 : vector<32x8xf32> to vector<32x1x8xf32>
    %26 = tpu.iota {dimensions = array<i32: 2>} : vector<1x1x128xi32>
    %cst_13 = arith.constant 0.000000e+00 : f32
    %27 = vector.broadcast %cst_13 : f32 to vector<32x8x128xf32>
    %c0_i32 = arith.constant 0 : i32
    %28 = vector.broadcast %c0_i32 : i32 to vector<1x1x128xi32>
    %29 = arith.cmpi sge, %26, %28 : vector<1x1x128xi32>
    %c32_i32 = arith.constant 32 : i32
    %30 = vector.broadcast %c32_i32 : i32 to vector<1x1x128xi32>
    %31 = arith.cmpi slt, %26, %30 : vector<1x1x128xi32>
    %32 = arith.andi %29, %31 : vector<1x1x128xi1>
    %33 = arith.extui %32 : vector<1x1x128xi1> to vector<1x1x128xi32>
    %34 = arith.sitofp %33 : vector<1x1x128xi32> to vector<1x1x128xf32>
    %cst_14 = arith.constant 0.176776692 : f32
    %35 = vector.broadcast %cst_14 : f32 to vector<1x1x128xf32>
    %36 = arith.mulf %34, %35 : vector<1x1x128xf32>
    %37 = vector.broadcast %36 : vector<1x1x128xf32> to vector<32x8x128xf32>
    %38 = arith.mulf %13, %37 : vector<32x8x128xf32>
    %39 = arith.truncf %38 : vector<32x8x128xf32> to vector<32x8x128xbf16>
    "tpu.trace_start"() <{level = 10 : i32, message = "bqd,bkd->bqk"}> : () -> ()
    %cst_15 = arith.constant dense<0.000000e+00> : vector<32x8x8xf32>
    %40 = tpu.matmul %39, %16, %cst_15 {dimension_numbers = #tpu.dot_dimension_numbers<[2], [2], [1], [1], [0, 0, 0, 1, 1, 1], [0], [0]>} : vector<32x8x128xbf16>, vector<32x8x128xbf16>, vector<32x8x8xf32> -> vector<32x8x8xf32>
    "tpu.trace_stop"() : () -> ()
    %41 = vector.broadcast %25 : vector<32x1x8xf32> to vector<32x8x8xf32>
    %42 = arith.addf %40, %41 : vector<32x8x8xf32>
    %cst_16 = arith.constant dense<0xFF800000> : vector<32x8xf32>
    %43 = vector.multi_reduction <maximumf>, %42, %cst_16 [2] : vector<32x8x8xf32> to vector<32x8xf32>
    %44 = vector.shape_cast %43 : vector<32x8xf32> to vector<32x8x1xf32>
    %45 = vector.broadcast %44 : vector<32x8x1xf32> to vector<32x8x8xf32>
    %46 = arith.subf %42, %45 : vector<32x8x8xf32>
    %47 = math.exp %46 : vector<32x8x8xf32>
    %cst_17 = arith.constant dense<0.000000e+00> : vector<32x8xf32>
    %48 = vector.multi_reduction <add>, %47, %cst_17 [2] : vector<32x8x8xf32> to vector<32x8xf32>
    %49 = vector.shape_cast %48 : vector<32x8xf32> to vector<32x8x1xf32>
    %50 = tpu.reciprocal %49 {approx = true} : vector<32x8x1xf32> -> vector<32x8x1xf32>
    %51 = vector.broadcast %50 : vector<32x8x1xf32> to vector<32x8x8xf32>
    %52 = arith.mulf %47, %51 : vector<32x8x8xf32>
    %53 = vector.broadcast %34 : vector<1x1x128xf32> to vector<32x8x128xf32>
    %54 = arith.mulf %18, %53 : vector<32x8x128xf32>
    %55 = arith.truncf %54 : vector<32x8x128xf32> to vector<32x8x128xbf16>
    %56 = arith.truncf %52 : vector<32x8x8xf32> to vector<32x8x8xbf16>
    "tpu.trace_start"() <{level = 10 : i32, message = "bqk,bkd->bqd"}> : () -> ()
    %cst_18 = arith.constant dense<0.000000e+00> : vector<32x8x128xf32>
    %57 = tpu.matmul %56, %55, %cst_18 {dimension_numbers = #tpu.dot_dimension_numbers<[2], [1], [1], [2], [0, 0, 0, 1, 1, 2], [0], [0]>} : vector<32x8x8xbf16>, vector<32x8x128xbf16>, vector<32x8x128xf32> -> vector<32x8x128xf32>
    "tpu.trace_stop"() : () -> ()
    %58 = arith.addf %27, %57 : vector<32x8x128xf32>
    %c32_i32_19 = arith.constant 32 : i32
    %59 = vector.broadcast %c32_i32_19 : i32 to vector<1x1x128xi32>
    %60 = arith.cmpi sge, %26, %59 : vector<1x1x128xi32>
    %c64_i32 = arith.constant 64 : i32
    %61 = vector.broadcast %c64_i32 : i32 to vector<1x1x128xi32>
    %62 = arith.cmpi slt, %26, %61 : vector<1x1x128xi32>
    %63 = arith.andi %60, %62 : vector<1x1x128xi1>
    %64 = arith.extui %63 : vector<1x1x128xi1> to vector<1x1x128xi32>
    %65 = arith.sitofp %64 : vector<1x1x128xi32> to vector<1x1x128xf32>
    %cst_20 = arith.constant 0.176776692 : f32
    %66 = vector.broadcast %cst_20 : f32 to vector<1x1x128xf32>
    %67 = arith.mulf %65, %66 : vector<1x1x128xf32>
    %68 = vector.broadcast %67 : vector<1x1x128xf32> to vector<32x8x128xf32>
    %69 = arith.mulf %13, %68 : vector<32x8x128xf32>
    %70 = arith.truncf %69 : vector<32x8x128xf32> to vector<32x8x128xbf16>
    "tpu.trace_start"() <{level = 10 : i32, message = "bqd,bkd->bqk"}> : () -> ()
    %cst_21 = arith.constant dense<0.000000e+00> : vector<32x8x8xf32>
    %71 = tpu.matmul %70, %16, %cst_21 {dimension_numbers = #tpu.dot_dimension_numbers<[2], [2], [1], [1], [0, 0, 0, 1, 1, 1], [0], [0]>} : vector<32x8x128xbf16>, vector<32x8x128xbf16>, vector<32x8x8xf32> -> vector<32x8x8xf32>
    "tpu.trace_stop"() : () -> ()
    %72 = vector.broadcast %25 : vector<32x1x8xf32> to vector<32x8x8xf32>
    %73 = arith.addf %71, %72 : vector<32x8x8xf32>
    %cst_22 = arith.constant dense<0xFF800000> : vector<32x8xf32>
    %74 = vector.multi_reduction <maximumf>, %73, %cst_22 [2] : vector<32x8x8xf32> to vector<32x8xf32>
    %75 = vector.shape_cast %74 : vector<32x8xf32> to vector<32x8x1xf32>
    %76 = vector.broadcast %75 : vector<32x8x1xf32> to vector<32x8x8xf32>
    %77 = arith.subf %73, %76 : vector<32x8x8xf32>
    %78 = math.exp %77 : vector<32x8x8xf32>
    %cst_23 = arith.constant dense<0.000000e+00> : vector<32x8xf32>
    %79 = vector.multi_reduction <add>, %78, %cst_23 [2] : vector<32x8x8xf32> to vector<32x8xf32>
    %80 = vector.shape_cast %79 : vector<32x8xf32> to vector<32x8x1xf32>
    %81 = tpu.reciprocal %80 {approx = true} : vector<32x8x1xf32> -> vector<32x8x1xf32>
    %82 = vector.broadcast %81 : vector<32x8x1xf32> to vector<32x8x8xf32>
    %83 = arith.mulf %78, %82 : vector<32x8x8xf32>
    %84 = vector.broadcast %65 : vector<1x1x128xf32> to vector<32x8x128xf32>
    %85 = arith.mulf %18, %84 : vector<32x8x128xf32>
    %86 = arith.truncf %85 : vector<32x8x128xf32> to vector<32x8x128xbf16>
    %87 = arith.truncf %83 : vector<32x8x8xf32> to vector<32x8x8xbf16>
    "tpu.trace_start"() <{level = 10 : i32, message = "bqk,bkd->bqd"}> : () -> ()
    %cst_24 = arith.constant dense<0.000000e+00> : vector<32x8x128xf32>
    %88 = tpu.matmul %87, %86, %cst_24 {dimension_numbers = #tpu.dot_dimension_numbers<[2], [1], [1], [2], [0, 0, 0, 1, 1, 2], [0], [0]>} : vector<32x8x8xbf16>, vector<32x8x128xbf16>, vector<32x8x128xf32> -> vector<32x8x128xf32>
    "tpu.trace_stop"() : () -> ()
    %89 = arith.addf %58, %88 : vector<32x8x128xf32>
    %90 = vector.shape_cast %89 : vector<32x8x128xf32> to vector<256x128xf32>
    %91 = arith.truncf %90 : vector<256x128xf32> to vector<256x128xbf16>
    %c0_25 = arith.constant 0 : index
    %c0_26 = arith.constant 0 : index
    %92 = vector.load %arg6[%c0_25, %c0_26] : memref<128x128xbf16, #tpu.memory_space<vmem>>, vector<128x128xbf16>
    %cst_27 = arith.constant dense<0.000000e+00> : vector<256x128xf32>
    %93 = tpu.matmul %91, %92, %cst_27 {dimension_numbers = #tpu.dot_dimension_numbers<[1], [0], [0], [1], [0, 0, 1, 1], [], []>} : vector<256x128xbf16>, vector<128x128xbf16>, vector<256x128xf32> -> vector<256x128xf32>
    %c0_28 = arith.constant 0 : index
    %c0_29 = arith.constant 0 : index
    %94 = vector.load %arg7[%c0_28, %c0_29] : memref<1x128xf32, #tpu.memory_space<vmem>>, vector<1x128xf32>
    %95 = vector.broadcast %94 : vector<1x128xf32> to vector<256x128xf32>
    %96 = arith.addf %93, %95 : vector<256x128xf32>
    %97 = tpu.iota {dimensions = array<i32: 1>} : vector<1x128xi32>
    %c64_i32_30 = arith.constant 64 : i32
    %98 = vector.broadcast %c64_i32_30 : i32 to vector<1x128xi32>
    %99 = arith.cmpi slt, %97, %98 : vector<1x128xi32>
    %100 = arith.extui %99 : vector<1x128xi1> to vector<1x128xi32>
    %101 = arith.sitofp %100 : vector<1x128xi32> to vector<1x128xf32>
    %102 = arith.addf %5, %96 : vector<256x128xf32>
    %cst_31 = arith.constant dense<0.000000e+00> : vector<256xf32>
    %103 = vector.multi_reduction <add>, %102, %cst_31 [1] : vector<256x128xf32> to vector<256xf32>
    %104 = vector.shape_cast %103 : vector<256xf32> to vector<256x1xf32>
    %cst_32 = arith.constant 1.562500e-02 : f32
    %105 = vector.broadcast %cst_32 : f32 to vector<256x1xf32>
    %106 = arith.mulf %104, %105 : vector<256x1xf32>
    %107 = vector.broadcast %106 : vector<256x1xf32> to vector<256x128xf32>
    %108 = arith.subf %102, %107 : vector<256x128xf32>
    %109 = vector.broadcast %101 : vector<1x128xf32> to vector<256x128xf32>
    %110 = arith.mulf %108, %109 : vector<256x128xf32>
    %111 = arith.mulf %110, %110 : vector<256x128xf32>
    %cst_33 = arith.constant dense<0.000000e+00> : vector<256xf32>
    %112 = vector.multi_reduction <add>, %111, %cst_33 [1] : vector<256x128xf32> to vector<256xf32>
    %113 = vector.shape_cast %112 : vector<256xf32> to vector<256x1xf32>
    %cst_34 = arith.constant 1.562500e-02 : f32
    %114 = vector.broadcast %cst_34 : f32 to vector<256x1xf32>
    %115 = arith.mulf %113, %114 : vector<256x1xf32>
    %cst_35 = arith.constant 9.99999974E-6 : f32
    %116 = vector.broadcast %cst_35 : f32 to vector<256x1xf32>
    %117 = arith.addf %115, %116 : vector<256x1xf32>
    %118 = math.rsqrt %117 : vector<256x1xf32>
    %119 = vector.broadcast %118 : vector<256x1xf32> to vector<256x128xf32>
    %120 = arith.mulf %110, %119 : vector<256x128xf32>
    %c0_36 = arith.constant 0 : index
    %c0_37 = arith.constant 0 : index
    %121 = vector.load %arg8[%c0_36, %c0_37] : memref<1x128xf32, #tpu.memory_space<vmem>>, vector<1x128xf32>
    %122 = vector.broadcast %121 : vector<1x128xf32> to vector<256x128xf32>
    %123 = arith.mulf %120, %122 : vector<256x128xf32>
    %c0_38 = arith.constant 0 : index
    %c0_39 = arith.constant 0 : index
    %124 = vector.load %arg9[%c0_38, %c0_39] : memref<1x128xf32, #tpu.memory_space<vmem>>, vector<1x128xf32>
    %125 = vector.broadcast %124 : vector<1x128xf32> to vector<256x128xf32>
    %126 = arith.addf %123, %125 : vector<256x128xf32>
    %127 = arith.truncf %126 : vector<256x128xf32> to vector<256x128xbf16>
    %c0_40 = arith.constant 0 : index
    %c0_41 = arith.constant 0 : index
    %128 = vector.load %arg10[%c0_40, %c0_41] : memref<128x256xbf16, #tpu.memory_space<vmem>>, vector<128x256xbf16>
    %cst_42 = arith.constant dense<0.000000e+00> : vector<256x256xf32>
    %129 = tpu.matmul %127, %128, %cst_42 {dimension_numbers = #tpu.dot_dimension_numbers<[1], [0], [0], [1], [0, 0, 1, 1], [], []>} : vector<256x128xbf16>, vector<128x256xbf16>, vector<256x256xf32> -> vector<256x256xf32>
    %c0_43 = arith.constant 0 : index
    %c0_44 = arith.constant 0 : index
    %130 = vector.load %arg11[%c0_43, %c0_44] : memref<1x256xf32, #tpu.memory_space<vmem>>, vector<1x256xf32>
    %131 = vector.broadcast %130 : vector<1x256xf32> to vector<256x256xf32>
    %132 = arith.addf %129, %131 : vector<256x256xf32>
    %cst_45 = arith.constant 0.000000e+00 : f32
    %133 = vector.broadcast %cst_45 : f32 to vector<256x256xf32>
    %134 = arith.maximumf %132, %133 : vector<256x256xf32>
    %135 = arith.truncf %134 : vector<256x256xf32> to vector<256x256xbf16>
    %c0_46 = arith.constant 0 : index
    %c0_47 = arith.constant 0 : index
    %136 = vector.load %arg12[%c0_46, %c0_47] : memref<256x128xbf16, #tpu.memory_space<vmem>>, vector<256x128xbf16>
    %cst_48 = arith.constant dense<0.000000e+00> : vector<256x128xf32>
    %137 = tpu.matmul %135, %136, %cst_48 {dimension_numbers = #tpu.dot_dimension_numbers<[1], [0], [0], [1], [0, 0, 1, 1], [], []>} : vector<256x256xbf16>, vector<256x128xbf16>, vector<256x128xf32> -> vector<256x128xf32>
    %c0_49 = arith.constant 0 : index
    %c0_50 = arith.constant 0 : index
    %138 = vector.load %arg13[%c0_49, %c0_50] : memref<1x128xf32, #tpu.memory_space<vmem>>, vector<1x128xf32>
    %139 = vector.broadcast %138 : vector<1x128xf32> to vector<256x128xf32>
    %140 = arith.addf %137, %139 : vector<256x128xf32>
    %141 = arith.addf %126, %140 : vector<256x128xf32>
    %cst_51 = arith.constant dense<0.000000e+00> : vector<256xf32>
    %142 = vector.multi_reduction <add>, %141, %cst_51 [1] : vector<256x128xf32> to vector<256xf32>
    %143 = vector.shape_cast %142 : vector<256xf32> to vector<256x1xf32>
    %cst_52 = arith.constant 1.562500e-02 : f32
    %144 = vector.broadcast %cst_52 : f32 to vector<256x1xf32>
    %145 = arith.mulf %143, %144 : vector<256x1xf32>
    %146 = vector.broadcast %145 : vector<256x1xf32> to vector<256x128xf32>
    %147 = arith.subf %141, %146 : vector<256x128xf32>
    %148 = vector.broadcast %101 : vector<1x128xf32> to vector<256x128xf32>
    %149 = arith.mulf %147, %148 : vector<256x128xf32>
    %150 = arith.mulf %149, %149 : vector<256x128xf32>
    %cst_53 = arith.constant dense<0.000000e+00> : vector<256xf32>
    %151 = vector.multi_reduction <add>, %150, %cst_53 [1] : vector<256x128xf32> to vector<256xf32>
    %152 = vector.shape_cast %151 : vector<256xf32> to vector<256x1xf32>
    %cst_54 = arith.constant 1.562500e-02 : f32
    %153 = vector.broadcast %cst_54 : f32 to vector<256x1xf32>
    %154 = arith.mulf %152, %153 : vector<256x1xf32>
    %cst_55 = arith.constant 9.99999974E-6 : f32
    %155 = vector.broadcast %cst_55 : f32 to vector<256x1xf32>
    %156 = arith.addf %154, %155 : vector<256x1xf32>
    %157 = math.rsqrt %156 : vector<256x1xf32>
    %158 = vector.broadcast %157 : vector<256x1xf32> to vector<256x128xf32>
    %159 = arith.mulf %149, %158 : vector<256x128xf32>
    %c0_56 = arith.constant 0 : index
    %c0_57 = arith.constant 0 : index
    %160 = vector.load %arg14[%c0_56, %c0_57] : memref<1x128xf32, #tpu.memory_space<vmem>>, vector<1x128xf32>
    %161 = vector.broadcast %160 : vector<1x128xf32> to vector<256x128xf32>
    %162 = arith.mulf %159, %161 : vector<256x128xf32>
    %c0_58 = arith.constant 0 : index
    %c0_59 = arith.constant 0 : index
    %163 = vector.load %arg15[%c0_58, %c0_59] : memref<1x128xf32, #tpu.memory_space<vmem>>, vector<1x128xf32>
    %164 = vector.broadcast %163 : vector<1x128xf32> to vector<256x128xf32>
    %165 = arith.addf %162, %164 : vector<256x128xf32>
    %166 = vector.shape_cast %165 : vector<256x128xf32> to vector<32x8x128xf32>
    %167 = vector.shape_cast %19 : vector<32x8xf32> to vector<32x8x1xf32>
    %168 = vector.broadcast %167 : vector<32x8x1xf32> to vector<32x8x128xf32>
    %169 = arith.mulf %166, %168 : vector<32x8x128xf32>
    %cst_60 = arith.constant dense<0.000000e+00> : vector<32x128xf32>
    %170 = vector.multi_reduction <add>, %169, %cst_60 [1] : vector<32x8x128xf32> to vector<32x128xf32>
    %cst_61 = arith.constant 0.166666672 : f32
    %171 = vector.broadcast %cst_61 : f32 to vector<32x128xf32>
    %172 = arith.mulf %170, %171 : vector<32x128xf32>
    %c0_62 = arith.constant 0 : index
    %c0_63 = arith.constant 0 : index
    %173 = vector.load %arg16[%c0_62, %c0_63] : memref<32x128xf32, #tpu.memory_space<vmem>>, vector<32x128xf32>
    tpu.vector_store %arg16[%c0_62, %c0_63], %172 {strides = array<i32>} : memref<32x128xf32, #tpu.memory_space<vmem>>, vector<32x128xf32>,
    return
  }
  func.func @transform_0(%arg0: i32) -> (i32, i32, i32) {
    %c0_i32 = arith.constant 0 : i32
    %c0_i32_0 = arith.constant 0 : i32
    %c0_i32_1 = arith.constant 0 : i32
    return %arg0, %c0_i32, %c0_i32_0 : i32, i32, i32
  }
  func.func @transform_1(%arg0: i32) -> (i32, i32) {
    %c0_i32 = arith.constant 0 : i32
    %c0_i32_0 = arith.constant 0 : i32
    return %arg0, %c0_i32 : i32, i32
  }
  func.func @transform_2(%arg0: i32) -> (i32, i32) {
    %c0_i32 = arith.constant 0 : i32
    %c0_i32_0 = arith.constant 0 : i32
    %c0_i32_1 = arith.constant 0 : i32
    return %c0_i32, %c0_i32_0 : i32, i32
  }
  func.func @transform_3(%arg0: i32) -> (i32, i32) {
    %c0_i32 = arith.constant 0 : i32
    %c0_i32_0 = arith.constant 0 : i32
    %c0_i32_1 = arith.constant 0 : i32
    return %c0_i32, %c0_i32_0 : i32, i32
  }
  func.func @transform_4(%arg0: i32) -> (i32, i32) {
    %c0_i32 = arith.constant 0 : i32
    %c0_i32_0 = arith.constant 0 : i32
    %c0_i32_1 = arith.constant 0 : i32
    return %c0_i32, %c0_i32_0 : i32, i32
  }
  func.func @transform_5(%arg0: i32) -> (i32, i32) {
    %c0_i32 = arith.constant 0 : i32
    %c0_i32_0 = arith.constant 0 : i32
    %c0_i32_1 = arith.constant 0 : i32
    return %c0_i32, %c0_i32_0 : i32, i32
  }
  func.func @transform_6(%arg0: i32) -> (i32, i32) {
    %c0_i32 = arith.constant 0 : i32
    %c0_i32_0 = arith.constant 0 : i32
    %c0_i32_1 = arith.constant 0 : i32
    return %c0_i32, %c0_i32_0 : i32, i32
  }
  func.func @transform_7(%arg0: i32) -> (i32, i32) {
    %c0_i32 = arith.constant 0 : i32
    %c0_i32_0 = arith.constant 0 : i32
    %c0_i32_1 = arith.constant 0 : i32
    return %c0_i32, %c0_i32_0 : i32, i32
  }
  func.func @transform_8(%arg0: i32) -> (i32, i32) {
    %c0_i32 = arith.constant 0 : i32
    %c0_i32_0 = arith.constant 0 : i32
    %c0_i32_1 = arith.constant 0 : i32
    return %c0_i32, %c0_i32_0 : i32, i32
  }
  func.func @transform_9(%arg0: i32) -> (i32, i32) {
    %c0_i32 = arith.constant 0 : i32
    %c0_i32_0 = arith.constant 0 : i32
    %c0_i32_1 = arith.constant 0 : i32
    return %c0_i32, %c0_i32_0 : i32, i32
  }
  func.func @transform_10(%arg0: i32) -> (i32, i32) {
    %c0_i32 = arith.constant 0 : i32
    %c0_i32_0 = arith.constant 0 : i32
    %c0_i32_1 = arith.constant 0 : i32
    return %c0_i32, %c0_i32_0 : i32, i32
  }
  func.func @transform_11(%arg0: i32) -> (i32, i32) {
    %c0_i32 = arith.constant 0 : i32
    %c0_i32_0 = arith.constant 0 : i32
    %c0_i32_1 = arith.constant 0 : i32
    return %c0_i32, %c0_i32_0 : i32, i32
  }
  func.func @transform_12(%arg0: i32) -> (i32, i32) {
    %c0_i32 = arith.constant 0 : i32
    %c0_i32_0 = arith.constant 0 : i32
    %c0_i32_1 = arith.constant 0 : i32
    return %c0_i32, %c0_i32_0 : i32, i32
  }
  func.func @transform_13(%arg0: i32) -> (i32, i32) {
    %c0_i32 = arith.constant 0 : i32
    %c0_i32_0 = arith.constant 0 : i32
    %c0_i32_1 = arith.constant 0 : i32
    return %c0_i32, %c0_i32_0 : i32, i32
  }
  func.func @transform_14(%arg0: i32) -> (i32, i32) {
    %c0_i32 = arith.constant 0 : i32
    %c0_i32_0 = arith.constant 0 : i32
    %c0_i32_1 = arith.constant 0 : i32
    return %c0_i32, %c0_i32_0 : i32, i32
  }
  func.func @transform_15(%arg0: i32) -> (i32, i32) {
    %c0_i32 = arith.constant 0 : i32
    %c0_i32_0 = arith.constant 0 : i32
    return %arg0, %c0_i32 : i32, i32
  }
}

</mosaic_0001>

<bundles_post_ra>
// kernel: transformer_agg_forward.1
= control target key start
LH: loop header
LB: loop body
LE: loop exit
PB: predicated region body
PF: predicated region fallthrough
CT: control target
= control target key end

     0   :  { %s13075_s0 = inlined_call_operand.vmem [shape: f32[64,8,128], index: 0, kind: input, shape index: {}]   ;;  %s13076_s1 = inlined_call_operand.vmem [shape: f32[64,8], index: 1, kind: input, shape index: {}]   ;;  %s13077_s2 = inlined_call_operand.vmem [shape: f32[8,128], index: 2, kind: input, shape index: {}]   ;;  %s13078_s3 = inlined_call_operand.vmem [shape: bf16[128,384], index: 3, kind: input, shape index: {}]   ;;  %s13079_s4 = inlined_call_operand.vmem [shape: f32[1,384], index: 4, kind: input, shape index: {}]   ;;  %s13080_s5 = inlined_call_operand.vmem [shape: bf16[128,128], index: 5, kind: input, shape index: {}]   ;;  %s13081_s6 = inlined_call_operand.vmem [shape: f32[1,128], index: 6, kind: input, shape index: {}]   ;;  %s13082_s7 = inlined_call_operand.vmem [shape: f32[1,128], index: 7, kind: input, shape index: {}]   ;;  %s13083_s8 = inlined_call_operand.vmem [shape: f32[1,128], index: 8, kind: input, shape index: {}]   ;;  %s13084_s9 = inlined_call_operand.vmem [shape: bf16[128,256], index: 9, kind: input, shape index: {}]   ;;  %s13085_s10 = inlined_call_operand.vmem [shape: f32[1,256], index: 10, kind: input, shape index: {}]   ;;  %s13086_s11 = inlined_call_operand.vmem [shape: bf16[256,128], index: 11, kind: input, shape index: {}]   ;;  %s13087_s12 = inlined_call_operand.vmem [shape: f32[1,128], index: 12, kind: input, shape index: {}]   ;;  %s13088_s13 = inlined_call_operand.vmem [shape: f32[1,128], index: 13, kind: input, shape index: {}]   ;;  %s13089_s14 = inlined_call_operand.vmem [shape: f32[1,128], index: 14, kind: input, shape index: {}]   ;;  %s13090_s15 = inlined_call_operand.hbm [shape: f32[64,128], index: 15, kind: output, shape index: {}]  }
   0x1   :  { %13212 = sst [smem:[#allocation125_spill]] %s13075_s0 }
   0x2   :  { %13213 = sst [smem:[#allocation126_spill]] %s13076_s1 }
   0x3   :  { %20 = vsyncpa [#allocation3], 0 }
   0x4   :  { %22 = vsyncpa [#allocation3 + $0x1], 0  ;;  %s8361_s18 = smov 0   ;;  %s8363_s19 = smov 0  }
   0x5   :  { %s8365_s20 = smov 0   ;;  %s8367_s21 = smov 0  }
   0x6 LB: > { %13214 = sst [smem:[#allocation5_spill]] %s8263_s18  ;;  %s8382_s22 = sadd.s32 4294967295, %s8275_s21   ;;  %s8275_s21 = sphi %s8367_s21, %s13671_s21   ;;  %s8271_s20 = sphi %s8365_s20, %s13673_s20   ;;  %s8267_s19 = sphi %s8363_s19, %s13675_s19   ;;  %s8263_s18 = sphi %s8361_s18, %s13674_s18  }
   0x7   : > { %13215 = sst [smem:[#allocation6_spill]] %s8271_s20  ;;  %s7337_s23 = sadd.s32 4294967294, %s8275_s21  }
   0x8   : > { %13216 = sst [smem:[#allocation7_spill]] %s8275_s21  ;;  %s8386_s24 = sadd.s32 1, %s8275_s21  }
   0x9   : > { %13217 = sst [smem:[#allocation8_spill]] %s8386_s24  ;;  %s360_s25 = sadd.s32 1, %s8271_s20 }
   0xa   : > { %s357_s26 = ssub.s32 %s8275_s21, %s8386_s24  ;;  %p370_p0 = scmp.ne.s32.totalorder %s8271_s20, %s8267_s19 }
   0xb   : > { %p358_p1 = scmp.eq.s32.totalorder %s357_s26, 0  ;;  %p371_p2 = scmp.eq.s32.totalorder %s8382_s22, 1 }
   0xc   : > { %p376_p3 = scmp.ne.s32.totalorder %s8267_s19, %s8263_s18  ;;  %p377_p4 = scmp.eq.s32.totalorder %s7337_s23, 1 }
   0xd   : > { %s8397_s27 = scalar_select %p358_p1, %s8271_s20, %s360_s25  }
   0xe   : > { %p8399_p5 = por %p371_p2, %p370_p0  ;;  %p8403_p6 = por %p377_p4, %p376_p3 }
   0xf   : > { %13218 = sst [smem:[#allocation9_spill]] %s8397_s27  ;;  %p7340_p7 = scmp.ge.s32.totalorder %s8275_s21, 1 }
  0x10   : > { %s13219_s28 = scalar_select %p8399_p5, 1, 0 }
  0x11   : > { %s13221_s29 = scalar_select %p8403_p6, 1, 0 }
  0x12   : > { %13220 = sst [smem:[#allocation10_spill]] %s13219_s28  ;;  %p452_p8 = scmp.lt.s32.totalorder %s8275_s21, 3 }
  0x13   : > { %13222 = sst [smem:[#allocation11_spill]] %s13221_s29 }
  0x14   : > { %p453_p9 = pnand %p7340_p7, %p452_p8 }
  0x16   : > { %456 = sbr.rel (%p453_p9) target bundleno = 2931 (0xb73), region = 80 }
  0x1b   : > { %v7432_v0 = vld [vmem:[%s13078_s3 + $0xa8] sm:$0xf]  ;;  %v7696_v1 = vld [vmem:[%s13078_s3 + $0xb0] sm:$0xf0]  ;;  %v7420_v2 = vld [vmem:[%s13078_s3 + $0x90] sm:$0xf] }
  0x1c   : > { %v7433_v3 = vor.u32 %v7696_v1, %v7432_v0  ;;  %v7693_v4 = vld [vmem:[%s13078_s3 + $0x98] sm:$0xf0]  ;;  %v7408_v6 = vld [vmem:[%s13078_s3 + $0x78] sm:$0xf]  ;;  %v7690_v7 = vld [vmem:[%s13078_s3 + $0x80] sm:$0xf0] }
  0x1d   : > { %v7421_v5 = vor.u32 %v7693_v4, %v7420_v2  ;;  %s8428_s17 = sshll.u32 %s8382_s22, 5  ;;  %v7409_v8 = vor.u32 %v7690_v7, %v7408_v6  ;;  %v7396_v9 = vld [vmem:[%s13078_s3 + $0x60] sm:$0xf]  ;;  %v7687_v10 = vld [vmem:[%s13078_s3 + $0x68] sm:$0xf0]  ;;  %s13223_s0 = sld [smem:[#allocation125_spill]] }
  0x1e   : > { %7739 = vmatpush.bf16.msra.mxu1 %v7433_v3  ;;  %768 = vmatpush.bf16.msra.mxu0 %v7433_v3  ;;  %p506_p10 = scmp.lt.s32.totalorder %s8428_s17, 63  ;;  %v7397_v11 = vor.u32 %v7687_v10, %v7396_v9  ;;  %v7384_v12 = vld [vmem:[%s13078_s3 + $0x48] sm:$0xf]  ;;  %v7684_v13 = vld [vmem:[%s13078_s3 + $0x50] sm:$0xf0]  ;;  %v8466_v23 = vld [vmem:[%s13077_s2] sm:$0xff] }
  0x1f   : > { %v7385_v14 = vor.u32 %v7684_v13, %v7384_v12  ;;  %v7372_v15 = vld [vmem:[%s13078_s3 + $0x30] sm:$0xf]  ;;  %v7681_v16 = vld [vmem:[%s13078_s3 + $0x38] sm:$0xf0]  ;;  %v7360_v18 = vld [vmem:[%s13078_s3 + $0x18] sm:$0xf] }
  0x20   : > { %s507_s16 = scalar_select %p506_p10, %s8428_s17, 63  ;;  %v7373_v17 = vor.u32 %v7681_v16, %v7372_v15  ;;  %v7678_v19 = vld [vmem:[%s13078_s3 + $0x20] sm:$0xf0]  ;;  %v7348_v24 = vld [vmem:[%s13078_s3] sm:$0xf]  ;;  %vm3049_vm4 = vcmask 1043456  }
  0x21   : > { %v7361_v20 = vor.u32 %v7678_v19, %v7360_v18  ;;  %v7675_v25 = vld [vmem:[%s13078_s3 + $0x8] sm:$0xf0]  ;;  %v7434_v27 = vld [vmem:[%s13078_s3 + $0xb4] sm:$0xf0]  ;;  %v7692_v36 = vld [vmem:[%s13078_s3 + $0x94] sm:$0xf] }
  0x22   : > { %7740 = vmatpush.bf16.msra.mxu1 %v7421_v5  ;;  %769 = vmatpush.bf16.msra.mxu0 %v7421_v5  ;;  %s7343_s18 = sshll.u32 %s507_s16, 3  ;;  %v7695_v26 = vld [vmem:[%s13078_s3 + $0xac] sm:$0xf]  ;;  %v7349_v32 = vor.u32 %v7675_v25, %v7348_v24  ;;  %v7422_v37 = vld [vmem:[%s13078_s3 + $0x9c] sm:$0xf0]  ;;  %s13346_s1 = sld [smem:[#allocation126_spill]] }
  0x23   : > { %s8459_s20 = scalar_lea.vmem %s13223_s0, %s7343_s18  ;;  %v7437_v35 = vor.u32 %v7695_v26, %v7434_v27  ;;  %v7425_v40 = vor.u32 %v7692_v36, %v7422_v37  ;;  %v7689_v41 = vld [vmem:[%s13078_s3 + $0x7c] sm:$0xf]  ;;  %v7410_v42 = vld [vmem:[%s13078_s3 + $0x84] sm:$0xf0]  ;;  %v7686_v44 = vld [vmem:[%s13078_s3 + $0x64] sm:$0xf]  ;;  %s7259_s16 = scalar_lea.hbm %s13090_s15, %s8428_s17 }
  0x24   : > { %v547_v21 = vld [vmem:[%s8459_s20 + $0xe0] sm:$0xff]  ;;  %v548_v22 = vld [vmem:[%s8459_s20 + $0xe8] sm:$0xff]  ;;  %v7413_v43 = vor.u32 %v7689_v41, %v7410_v42  ;;  %v7398_v45 = vld [vmem:[%s13078_s3 + $0x6c] sm:$0xf0]  ;;  %vm1663_vm7 = vcmask 64512   ;;  %s502_s18 = sand.u32 1, %s8267_s19  }
  0x25   : > { %v8481_v28 = vadd.f32 %v8466_v23, %v547_v21  ;;  %v8484_v29 = vadd.f32 %v8466_v23, %v548_v22  ;;  %v519_v30 = vld [vmem:[%s8459_s20] sm:$0xff]  ;;  %v520_v31 = vld [vmem:[%s8459_s20 + $0x8] sm:$0xff]  ;;  %v549_v46 = vld [vmem:[%s8459_s20 + $0xf0] sm:$0xff]  ;;  %v7401_v48 = vor.u32 %v7686_v44, %v7398_v45  ;;  %s7341_s21 = sshll.u32 %s502_s18, 5  ;;  %s13037_s23 = sshll.u32 %s7259_s16, 4  ;;  %s7263_s23 = int_to_ptr.hbm [resolvable:$true] %s13037_s23 }
  0x26   : > { %7741 = vmatpush.bf16.msra.mxu1 %v7409_v8  ;;  %770 = vmatpush.bf16.msra.mxu0 %v7409_v8  ;;  %v8489_v33 = vadd.f32 %v8466_v23, %v519_v30  ;;  %v8492_v34 = vadd.f32 %v8466_v23, %v520_v31  ;;  %v550_v47 = vld [vmem:[%s8459_s20 + $0xf8] sm:$0xff]  ;;  %v7683_v49 = vld [vmem:[%s13078_s3 + $0x4c] sm:$0xf]  ;;  %v521_v51 = vld [vmem:[%s8459_s20 + $0x10] sm:$0xff]  ;;  %v8533_v53 = vadd.f32 %v8466_v23, %v549_v46  ;;  %s7248_s17 = scalar_lea.sflag [#allocation3], %s502_s18  ;;  %s8233_s24 = scalar_lea.hbm %s13090_s15, 64 }
  0x27   : > { %13224 = vst [vmem:[#allocation12_spill] sm:$0xff] %v8481_v28  ;;  %v8502_v38 = vpack.c.bf16 %v8484_v29, %v8481_v28  ;;  %v7386_v50 = vld [vmem:[%s13078_s3 + $0x54] sm:$0xf0]  ;;  %v8536_v54 = vadd.f32 %v8466_v23, %v550_v47  ;;  %v8539_v56 = vadd.f32 %v8466_v23, %v521_v51  ;;  %v7680_v58 = vld [vmem:[%s13078_s3 + $0x34] sm:$0xf]  ;;  %v523_v5 = vld [vmem:[%s8459_s20 + $0x20] sm:$0xff] }
  0x28   : > { %13225 = vst [vmem:[#allocation13_spill] sm:$0xff] %v8484_v29  ;;  %v8506_v39 = vpack.c.bf16 %v8492_v34, %v8489_v33  ;;  %v522_v52 = vld [vmem:[%s8459_s20 + $0x18] sm:$0xff]  ;;  %v7389_v55 = vor.u32 %v7683_v49, %v7386_v50  ;;  %v7374_v59 = vld [vmem:[%s13078_s3 + $0x3c] sm:$0xf0]  ;;  %v7362_v0 = vld [vmem:[%s13078_s3 + $0x24] sm:$0xf0]  ;;  %v8575_v7 = vadd.f32 %v8466_v23, %v523_v5 }
  0x29   : > { %13226 = vst [vmem:[#allocation14_spill] sm:$0xff] %v8489_v33  ;;  %v8542_v57 = vadd.f32 %v8466_v23, %v522_v52  ;;  %v8552_v60 = vpack.c.bf16 %v8536_v54, %v8533_v53  ;;  %v7377_v61 = vor.u32 %v7680_v58, %v7374_v59  ;;  %v7677_v63 = vld [vmem:[%s13078_s3 + $0x1c] sm:$0xf]  ;;  %v7674_v2 = vld [vmem:[%s13078_s3 + $0x4] sm:$0xf]  ;;  %v524_v6 = vld [vmem:[%s8459_s20 + $0x28] sm:$0xff] }
  0x2a   : > { %7742 = vmatpush.bf16.msra.mxu1 %v7397_v11  ;;  %771 = vmatpush.bf16.msra.mxu0 %v7397_v11  ;;  %13227 = vst [vmem:[#allocation15_spill] sm:$0xff] %v8492_v34  ;;  %v7365_v1 = vor.u32 %v7677_v63, %v7362_v0  ;;  %v7350_v3 = vld [vmem:[%s13078_s3 + $0xc] sm:$0xf0]  ;;  %v8578_v8 = vadd.f32 %v8466_v23, %v524_v6  ;;  %v7697_v11 = vld [vmem:[%s13078_s3 + $0xb8] sm:$0xf0]  ;;  %v527_v37 = vld [vmem:[%s8459_s20 + $0x40] sm:$0xff] }
  0x2b   : > { %13228 = vst [vmem:[#allocation16_spill] sm:$0xff] %v8533_v53  ;;  %v8556_v62 = vpack.c.bf16 %v8542_v57, %v8539_v56  ;;  %v7353_v4 = vor.u32 %v7674_v2, %v7350_v3  ;;  %v7440_v10 = vld [vmem:[%s13078_s3 + $0xb0] sm:$0xf]  ;;  %v7428_v12 = vld [vmem:[%s13078_s3 + $0x98] sm:$0xf]  ;;  %v8639_v42 = vadd.f32 %v8466_v23, %v527_v37  ;;  %v532_v0 = vld [vmem:[%s8459_s20 + $0x68] sm:$0xff] }
  0x2c   : > { %13229 = vst [vmem:[#allocation17_spill] sm:$0xff] %v8536_v54  ;;  %v8582_v9 = vpack.c.bf16 %v8578_v8, %v8575_v7  ;;  %v7441_v13 = vor.u32 %v7697_v11, %v7440_v10  ;;  %v525_v16 = vld [vmem:[%s8459_s20 + $0x30] sm:$0xff]  ;;  %v7416_v21 = vld [vmem:[%s13078_s3 + $0x80] sm:$0xf]  ;;  %v7691_v22 = vld [vmem:[%s13078_s3 + $0x88] sm:$0xf0]  ;;  %v8685_v2 = vadd.f32 %v8466_v23, %v532_v0 }
  0x2d   : > { %13230 = vst [vmem:[#allocation18_spill] sm:$0xff] %v8539_v56  ;;  %v8601_v18 = vadd.f32 %v8466_v23, %v525_v16  ;;  %v7417_v24 = vor.u32 %v7691_v22, %v7416_v21  ;;  %v7404_v25 = vld [vmem:[%s13078_s3 + $0x68] sm:$0xf]  ;;  %v7688_v26 = vld [vmem:[%s13078_s3 + $0x70] sm:$0xf0]  ;;  %v530_v52 = vld [vmem:[%s8459_s20 + $0x58] sm:$0xff] }
  0x2e   : > { %7743 = vmatpush.bf16.msra.mxu1 %v7385_v14  ;;  %772 = vmatpush.bf16.msra.mxu0 %v7385_v14  ;;  %13231 = vst [vmem:[#allocation19_spill] sm:$0xff] %v8542_v57  ;;  %v7694_v14 = vld [vmem:[%s13078_s3 + $0xa0] sm:$0xf0]  ;;  %v7405_v27 = vor.u32 %v7688_v26, %v7404_v25  ;;  %v7392_v30 = vld [vmem:[%s13078_s3 + $0x50] sm:$0xf]  ;;  %v8666_v58 = vadd.f32 %v8466_v23, %v530_v52  ;;  %v534_v6 = vld [vmem:[%s8459_s20 + $0x78] sm:$0xff] }
  0x2f   : > { %13232 = vst [vmem:[#allocation20_spill] sm:$0xff] %v8575_v7  ;;  %946 = vmatpush.bf16.msra.mxu2 %v7441_v13  ;;  %v7429_v15 = vor.u32 %v7694_v14, %v7428_v12  ;;  %v7685_v31 = vld [vmem:[%s13078_s3 + $0x58] sm:$0xf0]  ;;  %v7682_v36 = vld [vmem:[%s13078_s3 + $0x40] sm:$0xf0]  ;;  %v529_v51 = vld [vmem:[%s8459_s20 + $0x50] sm:$0xff]  ;;  %v8698_v11 = vadd.f32 %v8466_v23, %v534_v6 }
  0x30   : > { %13233 = vst [vmem:[#allocation21_spill] sm:$0xff] %v8578_v8  ;;  %v7368_v45 = vld [vmem:[%s13078_s3 + $0x20] sm:$0xf]  ;;  %v7679_v46 = vld [vmem:[%s13078_s3 + $0x28] sm:$0xf0]  ;;  %v533_v5 = vld [vmem:[%s8459_s20 + $0x70] sm:$0xff] }
  0x31   : > { %13234 = vst [vmem:[#allocation22_spill] sm:$0xff] %v8601_v18  ;;  %v7369_v47 = vor.u32 %v7679_v46, %v7368_v45  ;;  %v7676_v49 = vld [vmem:[%s13078_s3 + $0x10] sm:$0xf0]  ;;  %v8695_v10 = vadd.f32 %v8466_v23, %v533_v5  ;;  %v536_v13 = vld [vmem:[%s8459_s20 + $0x88] sm:$0xff]  ;;  %v538_v22 = vld [vmem:[%s8459_s20 + $0x98] sm:$0xff] }
  0x32   : > { %7744 = vmatpush.bf16.msra.mxu1 %v7373_v17  ;;  %773 = vmatpush.bf16.msra.mxu0 %v7373_v17  ;;  %v526_v17 = vld [vmem:[%s8459_s20 + $0x38] sm:$0xff]  ;;  %13236 = vst [vmem:[#allocation24_spill] sm:$0xff] %v8639_v42  ;;  %v8729_v25 = vadd.f32 %v8466_v23, %v538_v22  ;;  %v545_v28 = vld [vmem:[%s8459_s20 + $0xd0] sm:$0xff] }
  0x33   : > { %947 = vmatpush.bf16.msra.mxu2 %v7429_v15  ;;  %v8604_v19 = vadd.f32 %v8466_v23, %v526_v17  ;;  %13239 = vst [vmem:[#allocation27_spill] sm:$0xff] %v8666_v58  ;;  %v8702_v12 = vpack.c.bf16 %v8698_v11, %v8695_v10  ;;  %v8712_v15 = vadd.f32 %v8466_v23, %v536_v13  ;;  %v541_v13 = vld [vmem:[%s8459_s20 + $0xb0] sm:$0xff] }
  0x34   : > { %13241 = vst [vmem:[#allocation29_spill] sm:$0xff] %v8685_v2 }
  0x35   : > { %13235 = vst [vmem:[#allocation23_spill] sm:$0xff] %v8604_v19 }
  0x36   : > { %7745 = vmatpush.bf16.msra.mxu1 %v7361_v20  ;;  %774 = vmatpush.bf16.msra.mxu0 %v7361_v20  ;;  %v8608_v20 = vpack.c.bf16 %v8604_v19, %v8601_v18  ;;  %13242 = vst [vmem:[#allocation30_spill] sm:$0xff] %v8695_v10 }
  0x37   : > { %948 = vmatpush.bf16.msra.mxu2 %v7417_v24  ;;  %13243 = vst [vmem:[#allocation31_spill] sm:$0xff] %v8698_v11 }
  0x38   : > { %13245 = vst [vmem:[#allocation33_spill] sm:$0xff] %v8712_v15 }
  0x39   : > { %13247 = vst [vmem:[#allocation35_spill] sm:$0xff] %v8729_v25 }
  0x3a   : > { %7746 = vmatpush.bf16.msra.mxu1 %v7349_v32  ;;  %775 = vmatpush.bf16.msra.mxu0 %v7349_v32  ;;  %v7393_v32 = vor.u32 %v7685_v31, %v7392_v30 }
  0x3b   : > { %949 = vmatpush.bf16.msra.mxu2 %v7405_v27 }
  0x3d   : > { %846 = vmatmul.bf16.vlgmr.msra.gmra.mxu1 %v8502_v38  ;;  %776 = vmatmul.bf16.vlgmr.msra.gmra.mxu0 %v8506_v39 }
  0x3e   : > { %857 = vmatpush.bf16.msrb.mxu1 %v7437_v35  ;;  %v7380_v35 = vld [vmem:[%s13078_s3 + $0x38] sm:$0xf] }
  0x3f   : > { %950 = vmatpush.bf16.msra.mxu2 %v7393_v32  ;;  %v7381_v41 = vor.u32 %v7682_v36, %v7380_v35  ;;  %v8750_v36 = vld [vmem:[%s13079_s4] sm:$0x7] }
  0x40   : > { %v8753_v37 = vperm.slane %v8750_v36, 1 }
  0x42   : > { %858 = vmatpush.bf16.msrb.mxu1 %v7425_v40  ;;  %v528_v40 = vld [vmem:[%s8459_s20 + $0x48] sm:$0xff] }
  0x43   : > { %951 = vmatpush.bf16.msra.mxu2 %v7381_v41  ;;  %v540_v41 = vld [vmem:[%s8459_s20 + $0xa8] sm:$0xff] }
  0x44   : > { %v8761_v45 = vadd.f32 %v8466_v23, %v540_v41 }
  0x46   : > { %859 = vmatpush.bf16.msrb.mxu1 %v7413_v43  ;;  %v8642_v43 = vadd.f32 %v8466_v23, %v528_v40  ;;  %v539_v40 = vld [vmem:[%s8459_s20 + $0xa0] sm:$0xff]  ;;  %13250 = vst [vmem:[#allocation38_spill] sm:$0xff] %v8761_v45 }
  0x47   : > { %952 = vmatpush.bf16.msra.mxu2 %v7369_v47 }
  0x48   : > { %13237 = vst [vmem:[#allocation25_spill] sm:$0xff] %v8642_v43  ;;  %v588_v44 = vpack.c.bf16 %v8642_v43, %v8639_v42 }
  0x4a   : > { %860 = vmatpush.bf16.msrb.mxu1 %v7401_v48  ;;  %v7356_v48 = vld [vmem:[%s13078_s3 + $0x8] sm:$0xf] }
  0x4b   : > { %v7357_v50 = vor.u32 %v7676_v49, %v7356_v48 }
  0x4d   : > { %851 = vmatmul.bf16.gmra.mxu1 %v8552_v60  ;;  %781 = vmatmul.bf16.gmra.mxu0 %v8556_v62 }
  0x4e   : > { %861 = vmatpush.bf16.msrb.mxu1 %v7389_v55  ;;  %953 = vmatpush.bf16.msra.mxu2 %v7357_v50  ;;  %v8663_v55 = vadd.f32 %v8466_v23, %v529_v51  ;;  %v8775_v51 = vperm.slane %v8750_v36, 0 }
  0x50   : > { %13238 = vst [vmem:[#allocation26_spill] sm:$0xff] %v8663_v55  ;;  %v589_v59 = vpack.c.bf16 %v8666_v58, %v8663_v55 }
  0x51   : > { %954 = vmatmul.bf16.vlgmr.msra.gmra.mxu2 %v8506_v39 }
  0x52   : > { %862 = vmatpush.bf16.msrb.mxu1 %v7377_v61  ;;  %v13099_v61 = vlaneseq }
  0x54   : > { %v8673_v63 = vand.u32 127, %v13099_v61 }
  0x56   : > { %863 = vmatpush.bf16.msrb.mxu1 %v7365_v1  ;;  %vm2112_vm0 = vcmp.ge.s32.totalorder %v8673_v63, 32  ;;  %vm2113_vm1 = vcmp.lt.s32.totalorder %v8673_v63, 64  ;;  %vm1114_vm3 = vcmp.lt.s32.totalorder %v8673_v63, 32 }
  0x57   : > { %vm2114_vm2 = vmand %vm2112_vm0, %vm2113_vm1 }
  0x5a   : > { %864 = vmatpush.bf16.msrb.mxu1 %v7353_v4 }
  0x5d   : > { %865 = vmatmul.bf16.vlgmr.msrb.gmra.mxu1 %v8506_v39  ;;  %786 = vmatmul.bf16.gmra.mxu0 %v8582_v9  ;;  %v531_v39 = vld [vmem:[%s8459_s20 + $0x60] sm:$0xff] }
  0x5e   : > { %v8682_v1 = vadd.f32 %v8466_v23, %v531_v39 }
  0x60   : > { %13240 = vst [vmem:[#allocation28_spill] sm:$0xff] %v8682_v1  ;;  %v590_v4 = vpack.c.bf16 %v8685_v2, %v8682_v1 }
  0x61   : > { %959 = vmatmul.bf16.gmra.mxu2 %v8556_v62 }
  0x6d   : > { %870 = vmatmul.bf16.gmra.mxu1 %v8556_v62  ;;  %791 = vmatmul.bf16.gmra.mxu0 %v8608_v20  ;;  %v8277_v62 = vmov 0.0  }
  0x6e   : > { %v8687_v3 = vsel %vm2114_vm2, 1.0, %v8277_v62  ;;  %v8743_v31 = vsel %vm2113_vm1, 1.0, %v8277_v62 }
  0x6f   : > { %13248 = vst [vmem:[#allocation36_spill] sm:$0xff] %v8743_v31 }
  0x71   : > { %964 = vmatmul.bf16.gmra.mxu2 %v8582_v9 }
  0x7d   : > { %875 = vmatmul.bf16.gmra.mxu1 %v8582_v9  ;;  %796 = vmatmul.bf16.gmra.mxu0 %v588_v44  ;;  %v535_v9 = vld [vmem:[%s8459_s20 + $0x80] sm:$0xff] }
  0x7e   : > { %v8709_v14 = vadd.f32 %v8466_v23, %v535_v9 }
  0x80   : > { %13244 = vst [vmem:[#allocation32_spill] sm:$0xff] %v8709_v14  ;;  %v8718_v17 = vpack.c.bf16 %v8712_v15, %v8709_v14 }
  0x81   : > { %969 = vmatmul.bf16.gmra.mxu2 %v8608_v20 }
  0x8d   : > { %880 = vmatmul.bf16.gmra.mxu1 %v8608_v20  ;;  %801 = vmatmul.bf16.gmra.mxu0 %v589_v59  ;;  %v537_v20 = vld [vmem:[%s8459_s20 + $0x90] sm:$0xff] }
  0x8e   : > { %v8726_v24 = vadd.f32 %v8466_v23, %v537_v20  ;;  %v8794_v20 = vadd.f32 %v8466_v23, %v541_v13 }
  0x90   : > { %13246 = vst [vmem:[#allocation34_spill] sm:$0xff] %v8726_v24  ;;  %v8737_v30 = vpack.c.bf16 %v8729_v25, %v8726_v24 }
  0x91   : > { %974 = vmatmul.bf16.gmra.mxu2 %v588_v44  ;;  %13253 = vst [vmem:[#allocation41_spill] sm:$0xff] %v8794_v20 }
  0x9d   : > { %885 = vmatmul.bf16.gmra.mxu1 %v588_v44  ;;  %806 = vmatmul.bf16.gmra.mxu0 %v590_v4  ;;  %v8758_v44 = vadd.f32 %v8466_v23, %v539_v40 }
  0x9f   : > { %13249 = vst [vmem:[#allocation37_spill] sm:$0xff] %v8758_v44  ;;  %v8766_v48 = vpack.c.bf16 %v8761_v45, %v8758_v44 }
  0xa1   : > { %979 = vmatmul.bf16.gmra.mxu2 %v589_v59 }
  0xad   : > { %890 = vmatmul.bf16.gmra.mxu1 %v589_v59  ;;  %811 = vmatmul.bf16.gmra.mxu0 %v8702_v12  ;;  %v8777_v59 = vsel %vm1114_vm3, 1.0, %v8277_v62  ;;  %v542_v62 = vld [vmem:[%s8459_s20 + $0xb8] sm:$0xff] }
  0xae   : > { %13251 = vst [vmem:[#allocation39_spill] sm:$0xff] %v8777_v59  ;;  %v8786_v6 = vmul.f32 0.17677669, %v8777_v59  ;;  %v8797_v22 = vadd.f32 %v8466_v23, %v542_v62 }
  0xb0   : > { %13254 = vst [vmem:[#allocation42_spill] sm:$0xff] %v8797_v22 }
  0xb1   : > { %984 = vmatmul.bf16.gmra.mxu2 %v590_v4 }
  0xba   : > { %v8714_v16 = vpop.f32.mrf.mxu1  ;;  %v8733_v27 = vpop.f32.mrf.mxu0 }
  0xbd   : > { %895 = vmatmul.bf16.gmra.mxu1 %v590_v4  ;;  %816 = vmatmul.bf16.gmra.mxu0 %v8718_v17  ;;  %v8802_v4 = vpack.c.bf16 %v8797_v22, %v8794_v20 }
  0xc1   : > { %989 = vmatmul.bf16.gmra.mxu2 %v8702_v12 }
  0xc2   : > { %v8721_v21 = vpop.f32.mrf.mxu1  ;;  %v779_v35 = vpop.f32.mrf.mxu0 }
  0xc3   : > { %v8781_v0 = vadd.f32 %v779_v35, %v8775_v51 }
  0xc5   : > { %13252 = vst [vmem:[#allocation40_spill] sm:$0xff] %v8781_v0  ;;  %v1120_v9 = vmul.f32 %v8786_v6, %v8781_v0 }
  0xc7   : > { %v1152_v41 = vpack.c.bf16 %v1120_v9, %v1120_v9 }
  0xca   : > { %v8731_v26 = vpop.f32.mrf.mxu1  ;;  %v782_v50 = vpop.f32.mrf.mxu0 }
  0xcd   : > { %900 = vmatmul.bf16.gmra.mxu1 %v8702_v12  ;;  %821 = vmatmul.bf16.gmra.mxu0 %v8737_v30 }
  0xd1   : > { %994 = vmatmul.bf16.gmra.mxu2 %v8718_v17 }
  0xd2   : > { %v8745_v32 = vpop.f32.mrf.mxu1  ;;  %v784_v63 = vpop.f32.mrf.mxu0 }
  0xda   : > { %v866_v46 = vpop.f32.mrf.mxu1 }
  0xdb   : > { %v867_v47 = vadd.f32 %v866_v46, %v8753_v37 }
  0xdd   : > { %v8768_v49 = vpack.c.bf16 %v867_v47, %v867_v47  ;;  %905 = vmatmul.bf16.gmra.mxu1 %v8718_v17  ;;  %826 = vmatmul.bf16.gmra.mxu0 %v8766_v48  ;;  %v787_v47 = vpop.f32.mrf.mxu0 }
  0xdf   : > { %1254 = vmatpush.bf16.xpose.msra.mxu1 %v8768_v49 }
  0xe1   : > { %999 = vmatmul.bf16.gmra.mxu2 %v8737_v30 }
  0xe2   : > { %v868_v52 = vpop.f32.mrf.mxu1 }
  0xe3   : > { %v869_v39 = vadd.f32 %v868_v52, %v8753_v37 }
  0xe5   : > { %v8783_v5 = vpack.c.bf16 %v869_v39, %v869_v39  ;;  %v8810_v39 = vadd.f32 %v782_v50, %v8775_v51 }
  0xe7   : > { %1267 = vmatpush.bf16.xpose.msra.mxu3 %v8783_v5  ;;  %v1121_v9 = vmul.f32 %v8786_v6, %v8810_v39 }
  0xe9   : > { %v1153_v54 = vpack.c.bf16 %v1121_v9, %v1121_v9 }
  0xea   : > { %v871_v35 = vpop.f32.mrf.mxu1 }
  0xeb   : > { %v872_v40 = vadd.f32 %v871_v35, %v8753_v37  ;;  %v789_v35 = vpop.f32.mrf.mxu0 }
  0xed   : > { %v8804_v46 = vpack.c.bf16 %v872_v40, %v872_v40  ;;  %910 = vmatmul.bf16.gmra.mxu1 %v8737_v30  ;;  %831 = vmatmul.bf16.gmra.mxu0 %v8802_v4  ;;  %v543_v40 = vld [vmem:[%s8459_s20 + $0xc0] sm:$0xff] }
  0xee   : > { %1268 = vmatmul.bf16.vlgmr.msra.gmra.mxu3 %v1152_v41  ;;  %v544_v41 = vld [vmem:[%s8459_s20 + $0xc8] sm:$0xff]  ;;  %v8822_v61 = vadd.f32 %v8466_v23, %v543_v40 }
  0xef   : > { %1280 = vmatpush.bf16.xpose.msrb.mxu3 %v8804_v46  ;;  %v8825_v50 = vadd.f32 %v8466_v23, %v544_v41  ;;  %v8838_v41 = vadd.f32 %v784_v63, %v8775_v51 }
  0xf0   : > { %13255 = vst [vmem:[#allocation43_spill] sm:$0xff] %v8822_v61 }
  0xf1   : > { %13256 = vst [vmem:[#allocation44_spill] sm:$0xff] %v8825_v50  ;;  %v8830_v12 = vpack.c.bf16 %v8825_v50, %v8822_v61  ;;  %v546_v50 = vld [vmem:[%s8459_s20 + $0xd8] sm:$0xff]  ;;  %v8848_v61 = vpop.f32.mrf.mxu2  ;;  %1004 = vmatmul.bf16.gmra.mxu2 %v8766_v48  ;;  %s7344_s20 = sshll.u32 %s8382_s22, 2 }
  0xf2   : > { %v873_v52 = vpop.f32.mrf.mxu1  ;;  %13257 = vst [vmem:[#allocation45_spill] sm:$0xff] %v8848_v61  ;;  %v8854_v22 = vadd.f32 %v8466_v23, %v546_v50  ;;  %p512_p11 = scmp.lt.s32.totalorder %s7344_s20, 7 }
  0xf3   : > { %v874_v13 = vadd.f32 %v873_v52, %v8753_v37  ;;  %v792_v40 = vpop.f32.mrf.mxu0 }
  0xf4   : > { %13259 = vst [vmem:[#allocation47_spill] sm:$0xff] %v8854_v22  ;;  %s13677_s20 = smov (!%p512_p11, %s7344_s20), 7 }
  0xf5   : > { %v8813_v62 = vpack.c.bf16 %v874_v13, %v874_v13  ;;  %s7345_s22 = sshll.u32 %s13677_s20, 3  ;;  %s12578_s20 = scalar_lea.vmem [#allocation2], %s7341_s21 }
  0xf6   : > { %s9425_s29 = scalar_lea.vmem %s13346_s1, %s7345_s22  ;;  %s7260_s27 = sshll.u32 %s12578_s20, 4  ;;  %s7261_s27 = int_to_ptr.vmem [resolvable:$true] %s7260_s27 }
  0xf7   : > { %1293 = vmatpush.bf16.xpose.msra.mxu3 %v8813_v62  ;;  %s8227_s21 = sshra.s32 %s7263_s23, 4  ;;  %s8228_s21 = int_to_ptr.hbm [resolvable:$true] %s8227_s21 }
  0xf8   : > { %p8234_p1 = scmp.lt.s32.totalorder %s8228_s21, %s13090_s15 }
  0xf9   : > { %v8867_v45 = vpop.f32.mrf.mxu2 }
  0xfa   : > { %v876_v52 = vpop.f32.mrf.mxu1  ;;  %13260 = vst [vmem:[#allocation48_spill] sm:$0xff] %v8867_v45 }
  0xfb   : > { %v877_v13 = vadd.f32 %v876_v52, %v8753_v37  ;;  %v8842_v29 = vpop.f32.mrf.mxu0 }
  0xfd   : > { %v8832_v53 = vpack.c.bf16 %v877_v13, %v877_v13  ;;  %915 = vmatmul.bf16.gmra.mxu1 %v8766_v48  ;;  %836 = vmatmul.bf16.gmra.mxu0 %v8830_v12  ;;  %v1122_v13 = vmul.f32 %v8786_v6, %v8838_v41 }
  0xfe   : > { %1281 = vmatmul.bf16.vlgmr.msrb.gmra.mxu3 %v1153_v54  ;;  %v8851_v54 = vadd.f32 %v8466_v23, %v545_v28  ;;  %v8870_v23 = vadd.f32 %v787_v47, %v8775_v51 }
  0xff   : > { %1306 = vmatpush.bf16.xpose.msrb.mxu3 %v8832_v53 }
 0x100   : > { %13258 = vst [vmem:[#allocation46_spill] sm:$0xff] %v8851_v54  ;;  %v8860_v17 = vpack.c.bf16 %v8854_v22, %v8851_v54 }
 0x101   : > { %1009 = vmatmul.bf16.gmra.mxu2 %v8802_v4 }
 0x102   : > { %v878_v9 = vpop.f32.mrf.mxu1 }
 0x103   : > { %v879_v52 = vadd.f32 %v878_v9, %v8753_v37  ;;  %v1154_v9 = vpack.c.bf16 %v1122_v13, %v1122_v13  ;;  %v8865_v28 = vpop.f32.mrf.mxu0 }
 0x105   : > { %v8856_v20 = vpack.c.bf16 %v879_v52, %v879_v52  ;;  %v1123_v52 = vmul.f32 %v8786_v6, %v8870_v23 }
 0x107   : > { %v1155_v54 = vpack.c.bf16 %v1123_v52, %v1123_v52 }
 0x10a   : > { %v881_v63 = vpop.f32.mrf.mxu1 }
 0x10b   : > { %v882_v13 = vadd.f32 %v881_v63, %v8753_v37  ;;  %v8876_v22 = vpop.f32.mrf.mxu0  ;;  %v8889_v63 = vadd.f32 %v789_v35, %v8775_v51 }
 0x10d   : > { %920 = vmatmul.bf16.gmra.mxu1 %v8802_v4  ;;  %841 = vmatmul.bf16.gmra.mxu0 %v8860_v17  ;;  %v8880_v25 = vpack.c.bf16 %v882_v13, %v882_v13  ;;  %13263 = vst [vmem:[#allocation51_spill] sm:$0xff] %v8889_v63  ;;  %v1124_v13 = vmul.f32 %v8786_v6, %v8889_v63 }
 0x10e   : > { %1294 = vmatmul.bf16.vlgmr.msra.gmra.mxu3 %v1154_v9  ;;  %v8878_v9 = vpop.f32.mrf.mxu2 }
 0x10f   : > { %1319 = vmatpush.bf16.xpose.msra.mxu3 %v8856_v20  ;;  %13261 = vst [vmem:[#allocation49_spill] sm:$0xff] %v8878_v9  ;;  %v1156_v10 = vpack.c.bf16 %v1124_v13, %v1124_v13 }
 0x111   : > { %1014 = vmatmul.bf16.gmra.mxu2 %v8830_v12 }
 0x112   : > { %v883_v50 = vpop.f32.mrf.mxu1 }
 0x113   : > { %v8884_v47 = vpop.f32.mrf.mxu0  ;;  %v884_v52 = vadd.f32 %v883_v50, %v8753_v37  ;;  %v8908_v50 = vadd.f32 %v792_v40, %v8775_v51 }
 0x115   : > { %v8899_v11 = vpack.c.bf16 %v884_v52, %v884_v52  ;;  %v1125_v1 = vmul.f32 %v8786_v6, %v8908_v50 }
 0x116   : > { %v8886_v24 = vpop.f32.mrf.mxu2 }
 0x117   : > { %13262 = vst [vmem:[#allocation50_spill] sm:$0xff] %v8886_v24  ;;  %v1157_v58 = vpack.c.bf16 %v1125_v1, %v1125_v1 }
 0x11a   : > { %v886_v44 = vpop.f32.mrf.mxu1 }
 0x11b   : > { %v8893_v15 = vpop.f32.mrf.mxu0  ;;  %v887_v52 = vadd.f32 %v886_v44, %v8753_v37  ;;  %v8932_v44 = vadd.f32 %v8842_v29, %v8775_v51 }
 0x11d   : > { %925 = vmatmul.bf16.gmra.mxu1 %v8830_v12  ;;  %v8920_v43 = vpack.c.bf16 %v887_v52, %v887_v52  ;;  %v1126_v52 = vmul.f32 %v8786_v6, %v8932_v44 }
 0x11e   : > { %1307 = vmatmul.bf16.vlgmr.msrb.gmra.mxu3 %v1155_v54  ;;  %v8897_v54 = vpop.f32.mrf.mxu2 }
 0x11f   : > { %1332 = vmatpush.bf16.xpose.msrb.mxu3 %v8880_v25  ;;  %13264 = vst [vmem:[#allocation52_spill] sm:$0xff] %v8897_v54  ;;  %v1158_v18 = vpack.c.bf16 %v1126_v52, %v1126_v52  ;;  %v8960_v52 = vadd.f32 %v8865_v28, %v8775_v51 }
 0x121   : > { %1019 = vmatmul.bf16.gmra.mxu2 %v8860_v17  ;;  %v1127_v57 = vmul.f32 %v8786_v6, %v8960_v52 }
 0x122   : > { %v888_v30 = vpop.f32.mrf.mxu1 }
 0x123   : > { %v8903_v35 = vpop.f32.mrf.mxu0  ;;  %v1159_v59 = vpack.c.bf16 %v1127_v57, %v1127_v57 }
 0x126   : > { %v8905_v48 = vpop.f32.mrf.mxu2 }
 0x127   : > { %13265 = vst [vmem:[#allocation53_spill] sm:$0xff] %v8905_v48 }
 0x12a   : > { %v891_v14 = vpop.f32.mrf.mxu1 }
 0x12b   : > { %v8914_v13 = vpop.f32.mrf.mxu0  ;;  %v892_v56 = vadd.f32 %v891_v14, %v8753_v37  ;;  %v8983_v14 = vadd.f32 %v8876_v22, %v8775_v51 }
 0x12d   : > { %930 = vmatmul.bf16.gmra.mxu1 %v8860_v17  ;;  %v8974_v28 = vpack.c.bf16 %v892_v56, %v892_v56  ;;  %13273 = vst [vmem:[#allocation61_spill] sm:$0xff] %v8983_v14  ;;  %v1128_v56 = vmul.f32 %v8786_v6, %v8983_v14 }
 0x12e   : > { %1320 = vmatmul.bf16.vlgmr.msra.gmra.mxu3 %v1156_v10  ;;  %v8916_v10 = vpop.f32.mrf.mxu2 }
 0x12f   : > { %1345 = vmatpush.bf16.xpose.msra.mxu3 %v8899_v11  ;;  %13266 = vst [vmem:[#allocation54_spill] sm:$0xff] %v8916_v10  ;;  %v1160_v48 = vpack.c.bf16 %v1128_v56, %v1128_v56 }
 0x131   : > { %1024 = vmatmul.bf16.gmra.mxu2 %v8502_v38 }
 0x132   : > { %v893_v2 = vpop.f32.mrf.mxu1 }
 0x133   : > { %v8924_v40 = vpop.f32.mrf.mxu0 }
 0x136   : > { %v8926_v31 = vpop.f32.mrf.mxu2 }
 0x137   : > { %13267 = vst [vmem:[#allocation55_spill] sm:$0xff] %v8926_v31 }
 0x13a   : > { %v8918_v55 = vpop.f32.mrf.mxu1 }
 0x13b   : > { %v8935_v1 = vpop.f32.mrf.mxu0 }
 0x13d   : > { %935 = vmatmul.bf16.gmra.mxu1 %v8502_v38 }
 0x13e   : > { %1333 = vmatmul.bf16.vlgmr.msrb.gmra.mxu3 %v1157_v58  ;;  %v889_v58 = vadd.f32 %v888_v30, %v8753_v37  ;;  %v8940_v42 = vpop.f32.mrf.mxu2  ;;  %v8956_v30 = vadd.f32 %v8733_v27, %v8775_v51 }
 0x13f   : > { %1358 = vmatpush.bf16.xpose.msrb.mxu3 %v8920_v43  ;;  %13268 = vst [vmem:[#allocation56_spill] sm:$0xff] %v8940_v42 }
 0x140   : > { %v8944_v8 = vpack.c.bf16 %v889_v58, %v889_v58 }
 0x141   : > { %1029 = vmatmul.bf16.gmra.mxu2 %v8552_v60 }
 0x142   : > { %v8928_v4 = vpop.f32.mrf.mxu1  ;;  %13269 = vst [vmem:[#allocation57_spill] sm:$0xff] %v8944_v8 }
 0x143   : > { %v8948_v29 = vpop.f32.mrf.mxu0 }
 0x146   : > { %v8950_v12 = vpop.f32.mrf.mxu2 }
 0x147   : > { %13270 = vst [vmem:[#allocation58_spill] sm:$0xff] %v8950_v12 }
 0x14a   : > { %v8942_v19 = vpop.f32.mrf.mxu1 }
 0x14b   : > { %v8965_v58 = vpop.f32.mrf.mxu0 }
 0x14d   : > { %940 = vmatmul.bf16.gmra.mxu1 %v8552_v60 }
 0x14e   : > { %1346 = vmatmul.bf16.vlgmr.msra.gmra.mxu3 %v1158_v18  ;;  %v1119_v18 = vmul.f32 %v8786_v6, %v8956_v30  ;;  %v8970_v34 = vpop.f32.mrf.mxu2 }
 0x14f   : > { %1371 = vmatpush.bf16.xpose.msra.mxu3 %v8944_v8  ;;  %13271 = vst [vmem:[#allocation59_spill] sm:$0xff] %v8970_v34 }
 0x150   : > { %v1151_v33 = vpack.c.bf16 %v1119_v18, %v1119_v18 }
 0x152   : > { %v8952_v7 = vpop.f32.mrf.mxu1 }
 0x153   : > { %v822_v17 = vpop.f32.mrf.mxu0 }
 0x154   : > { %v8992_v18 = vadd.f32 %v822_v17, %v8775_v51 }
 0x156   : > { %v8977_v12 = vpop.f32.mrf.mxu2  ;;  %v1137_v38 = vmul.f32 %v8786_v6, %v8992_v18 }
 0x157   : > { %13272 = vst [vmem:[#allocation60_spill] sm:$0xff] %v8977_v12 }
 0x15a   : > { %v8972_v27 = vpop.f32.mrf.mxu1 }
 0x15b   : > { %v824_v34 = vpop.f32.mrf.mxu0 }
 0x15c   : > { %v9008_v56 = vadd.f32 %v824_v34, %v8775_v51 }
 0x15d   : > { %1255 = vmatmul.bf16.vlgmr.msra.gmra.mxu1 %v1151_v33  ;;  %v894_v33 = vadd.f32 %v893_v2, %v8753_v37 }
 0x15e   : > { %1359 = vmatmul.bf16.vlgmr.msrb.gmra.mxu3 %v1159_v59  ;;  %v8989_v57 = vpop.f32.mrf.mxu2  ;;  %13277 = vst [vmem:[#allocation65_spill] sm:$0xff] %v9008_v56  ;;  %v1138_v10 = vmul.f32 %v8786_v6, %v9008_v56 }
 0x15f   : > { %1384 = vmatpush.bf16.xpose.msrb.mxu3 %v8974_v28  ;;  %13274 = vst [vmem:[#allocation62_spill] sm:$0xff] %v8989_v57  ;;  %v8995_v45 = vpack.c.bf16 %v894_v33, %v894_v33 }
 0x162   : > { %v8979_v42 = vpop.f32.mrf.mxu1 }
 0x163   : > { %v827_v2 = vpop.f32.mrf.mxu0 }
 0x164   : > { %v9030_v14 = vadd.f32 %v827_v2, %v8775_v51 }
 0x166   : > { %v9005_v17 = vpop.f32.mrf.mxu2  ;;  %v1139_v9 = vmul.f32 %v8786_v6, %v9030_v14 }
 0x167   : > { %13276 = vst [vmem:[#allocation64_spill] sm:$0xff] %v9005_v17 }
 0x16a   : > { %v911_v59 = vpop.f32.mrf.mxu1 }
 0x16b   : > { %v912_v12 = vadd.f32 %v911_v59, %v8753_v37  ;;  %v1169_v59 = vpack.c.bf16 %v1137_v38, %v1137_v38  ;;  %v9021_v38 = vpop.f32.mrf.mxu0 }
 0x16d   : > { %v8997_v22 = vpack.c.bf16 %v912_v12, %v912_v12 }
 0x16e   : > { %1372 = vmatmul.bf16.vlgmr.msra.gmra.mxu3 %v1160_v48  ;;  %v9013_v48 = vadd.f32 %v8884_v47, %v8775_v51  ;;  %v9027_v17 = vpop.f32.mrf.mxu2 }
 0x16f   : > { %1397 = vmatpush.bf16.xpose.msra.mxu3 %v8995_v45  ;;  %1488 = vmatpush.bf16.xpose.msrb.mxu0 %v8997_v22  ;;  %13278 = vst [vmem:[#allocation66_spill] sm:$0xff] %v9027_v17 }
 0x170   : > { %v1129_v34 = vmul.f32 %v8786_v6, %v9013_v48 }
 0x171   : > { %v9003_v57 = vpop.f32.mrf.mxu3 }
 0x172   : > { %13275 = vst [vmem:[#allocation63_spill] sm:$0xff] %v9003_v57  ;;  %v913_v31 = vpop.f32.mrf.mxu1  ;;  %v1170_v57 = vpack.c.bf16 %v1138_v10, %v1138_v10 }
 0x173   : > { %v914_v12 = vadd.f32 %v913_v31, %v8753_v37  ;;  %v897_v31 = vadd.f32 %v8918_v55, %v8753_v37  ;;  %v832_v55 = vpop.f32.mrf.mxu0 }
 0x175   : > { %v9015_v33 = vpack.c.bf16 %v914_v12, %v914_v12  ;;  %v9033_v24 = vpack.c.bf16 %v897_v31, %v897_v31  ;;  %v9049_v31 = vadd.f32 %v8893_v15, %v8775_v51 }
 0x176   : > { %1489 = vmatmul.bf16.vlgmr.msrb.gmra.mxu0 %v1169_v59  ;;  %v1161_v59 = vpack.c.bf16 %v1129_v34, %v1129_v34  ;;  %v9043_v2 = vpop.f32.mrf.mxu2  ;;  %v1171_v34 = vpack.c.bf16 %v1139_v9, %v1139_v9 }
 0x177   : > { %1501 = vmatpush.bf16.xpose.msrb.mxu1 %v9015_v33  ;;  %13280 = vst [vmem:[#allocation68_spill] sm:$0xff] %v9043_v2  ;;  %v9058_v2 = vadd.f32 %v832_v55, %v8775_v51 }
 0x179   : > { %v1271_v47 = vpop.f32.mrf.mxu3  ;;  %13282 = vst [vmem:[#allocation70_spill] sm:$0xff] %v9058_v2  ;;  %v1141_v8 = vmul.f32 %v8786_v6, %v9058_v2 }
 0x17a   : > { %v916_v12 = vpop.f32.mrf.mxu1 }
 0x17b   : > { %v917_v60 = vadd.f32 %v916_v12, %v8753_v37  ;;  %v834_v12 = vpop.f32.mrf.mxu0 }
 0x17d   : > { %v9035_v54 = vpack.c.bf16 %v917_v60, %v917_v60  ;;  %v899_v60 = vadd.f32 %v8928_v4, %v8753_v37 }
 0x17e   : > { %1385 = vmatmul.bf16.vlgmr.msrb.gmra.mxu3 %v1161_v59  ;;  %1502 = vmatmul.bf16.vlgmr.msrb.gmra.mxu1 %v1170_v57  ;;  %v1130_v57 = vmul.f32 %v8786_v6, %v9049_v31  ;;  %v9055_v17 = vpop.f32.mrf.mxu2 }
 0x17f   : > { %1410 = vmatpush.bf16.xpose.msrb.mxu3 %v9033_v24  ;;  %1514 = vmatpush.bf16.xpose.msrb.mxu2 %v9035_v54  ;;  %13281 = vst [vmem:[#allocation69_spill] sm:$0xff] %v9055_v17  ;;  %v9061_v15 = vpack.c.bf16 %v899_v60, %v899_v60 }
 0x180   : > { %v1162_v63 = vpack.c.bf16 %v1130_v57, %v1130_v57  ;;  %v9074_v57 = vadd.f32 %v834_v12, %v8775_v51  ;;  %v902_v12 = vadd.f32 %v8942_v19, %v8753_v37 }
 0x181   : > { %v9041_v10 = vpop.f32.mrf.mxu3  ;;  %13283 = vst [vmem:[#allocation71_spill] sm:$0xff] %v9061_v15 }
 0x182   : > { %13279 = vst [vmem:[#allocation67_spill] sm:$0xff] %v9041_v10  ;;  %v9045_v47 = vpop.f32.mrf.mxu1  ;;  %v9098_v61 = vpack.c.bf16 %v902_v12, %v902_v12 }
 0x183   : > { %v837_v4 = vpop.f32.mrf.mxu0  ;;  %13286 = vst [vmem:[#allocation74_spill] sm:$0xff] %v9074_v57 }
 0x186   : > { %1515 = vmatmul.bf16.vlgmr.msrb.gmra.mxu2 %v1171_v34  ;;  %v9071_v55 = vpop.f32.mrf.mxu2 }
 0x187   : > { %13285 = vst [vmem:[#allocation73_spill] sm:$0xff] %v9071_v55 }
 0x189   : > { %v1284_v59 = vpop.f32.mrf.mxu3 }
 0x18a   : > { %v921_v10 = vpop.f32.mrf.mxu1 }
 0x18b   : > { %v922_v9 = vadd.f32 %v921_v10, %v8753_v37  ;;  %v1173_v10 = vpack.c.bf16 %v1141_v8, %v1141_v8 }
 0x18d   : > { %v9063_v34 = vpack.c.bf16 %v922_v9, %v922_v9 }
 0x18e   : > { %1398 = vmatmul.bf16.vlgmr.msra.gmra.mxu3 %v1162_v63  ;;  %v9079_v63 = vadd.f32 %v8903_v35, %v8775_v51 }
 0x18f   : > { %1423 = vmatpush.bf16.xpose.msra.mxu3 %v9061_v15  ;;  %1540 = vmatpush.bf16.xpose.msra.mxu0 %v9063_v34  ;;  %v1142_v15 = vmul.f32 %v8786_v6, %v9074_v57  ;;  %v9096_v57 = vpop.f32.mrf.mxu0 }
 0x190   : > { %v1131_v8 = vmul.f32 %v8786_v6, %v9079_v63 }
 0x191   : > { %v9069_v59 = vpop.f32.mrf.mxu3  ;;  %v1174_v35 = vpack.c.bf16 %v1142_v15, %v1142_v15 }
 0x192   : > { %13284 = vst [vmem:[#allocation72_spill] sm:$0xff] %v9069_v59  ;;  %v923_v17 = vpop.f32.mrf.mxu1 }
 0x193   : > { %v924_v60 = vadd.f32 %v923_v17, %v8753_v37  ;;  %v9090_v17 = vpop.f32.mrf.mxu2 }
 0x194   : > { %13287 = vst [vmem:[#allocation75_spill] sm:$0xff] %v9090_v17 }
 0x195   : > { %v9081_v9 = vpack.c.bf16 %v924_v60, %v924_v60  ;;  %v9093_v60 = vadd.f32 %v837_v4, %v8775_v51 }
 0x196   : > { %1541 = vmatmul.bf16.vlgmr.msra.gmra.mxu0 %v1173_v10  ;;  %v1163_v10 = vpack.c.bf16 %v1131_v8, %v1131_v8 }
 0x197   : > { %1553 = vmatpush.bf16.xpose.msra.mxu1 %v9081_v9  ;;  %13288 = vst [vmem:[#allocation76_spill] sm:$0xff] %v9093_v60  ;;  %v1143_v19 = vmul.f32 %v8786_v6, %v9093_v60  ;;  %v842_v8 = vpop.f32.mrf.mxu0 }
 0x199   : > { %v1297_v55 = vpop.f32.mrf.mxu3 }
 0x19a   : > { %v926_v59 = vpop.f32.mrf.mxu1  ;;  %v1175_v55 = vpack.c.bf16 %v1143_v19, %v1143_v19 }
 0x19b   : > { %v927_v2 = vadd.f32 %v926_v59, %v8753_v37  ;;  %v9108_v4 = vpop.f32.mrf.mxu2 }
 0x19c   : > { %13290 = vst [vmem:[#allocation78_spill] sm:$0xff] %v9108_v4  ;;  %v9123_v4 = vadd.f32 %v842_v8, %v8775_v51 }
 0x19d   : > { %v9100_v56 = vpack.c.bf16 %v927_v2, %v927_v2  ;;  %v9114_v2 = vadd.f32 %v8914_v13, %v8775_v51 }
 0x19e   : > { %1411 = vmatmul.bf16.vlgmr.msrb.gmra.mxu3 %v1163_v10  ;;  %1554 = vmatmul.bf16.vlgmr.msra.gmra.mxu1 %v1174_v35  ;;  %v904_v35 = vadd.f32 %v8952_v7, %v8753_v37  ;;  %13293 = vst [vmem:[#allocation81_spill] sm:$0xff] %v9123_v4 }
 0x19f   : > { %1436 = vmatpush.bf16.xpose.msrb.mxu3 %v9098_v61  ;;  %1566 = vmatpush.bf16.xpose.msra.mxu2 %v9100_v56  ;;  %13291 = vst [vmem:[#allocation79_spill] sm:$0xff] %v9114_v2  ;;  %v1132_v12 = vmul.f32 %v8786_v6, %v9114_v2  ;;  %v844_v7 = vpop.f32.mrf.mxu0 }
 0x1a0   : > { %v9126_v13 = vpack.c.bf16 %v904_v35, %v904_v35 }
 0x1a1   : > { %v9106_v15 = vpop.f32.mrf.mxu3  ;;  %v1164_v60 = vpack.c.bf16 %v1132_v12, %v1132_v12  ;;  %v9139_v12 = vadd.f32 %v844_v7, %v8775_v51  ;;  %v907_v7 = vadd.f32 %v8972_v27, %v8753_v37 }
 0x1a2   : > { %13289 = vst [vmem:[#allocation77_spill] sm:$0xff] %v9106_v15  ;;  %v9110_v59 = vpop.f32.mrf.mxu1 }
 0x1a3   : > { %v9120_v17 = vpop.f32.mrf.mxu2  ;;  %13296 = vst [vmem:[#allocation84_spill] sm:$0xff] %v9139_v12  ;;  %v1146_v2 = vmul.f32 %v8786_v6, %v9139_v12 }
 0x1a4   : > { %13292 = vst [vmem:[#allocation80_spill] sm:$0xff] %v9120_v17 }
 0x1a6   : > { %1567 = vmatmul.bf16.vlgmr.msra.gmra.mxu2 %v1175_v55  ;;  %v1145_v55 = vmul.f32 %v8786_v6, %v9123_v4  ;;  %v9162_v4 = vpack.c.bf16 %v907_v7, %v907_v7 }
 0x1a9   : > { %v1310_v10 = vpop.f32.mrf.mxu3 }
 0x1aa   : > { %v931_v15 = vpop.f32.mrf.mxu1 }
 0x1ab   : > { %v932_v19 = vadd.f32 %v931_v15, %v8753_v37  ;;  %v9136_v8 = vpop.f32.mrf.mxu2  ;;  %v1177_v15 = vpack.c.bf16 %v1145_v55, %v1145_v55 }
 0x1ac   : > { %13295 = vst [vmem:[#allocation83_spill] sm:$0xff] %v9136_v8 }
 0x1ad   : > { %v9128_v0 = vpack.c.bf16 %v932_v19, %v932_v19 }
 0x1ae   : > { %1424 = vmatmul.bf16.vlgmr.msra.gmra.mxu3 %v1164_v60  ;;  %v9144_v60 = vadd.f32 %v8924_v40, %v8775_v51  ;;  %v1178_v40 = vpack.c.bf16 %v1146_v2, %v1146_v2 }
 0x1af   : > { %1449 = vmatpush.bf16.xpose.msra.mxu3 %v9126_v13  ;;  %1592 = vmatpush.bf16.xpose.msrb.mxu0 %v9128_v0 }
 0x1b0   : > { %v1133_v55 = vmul.f32 %v8786_v6, %v9144_v60 }
 0x1b1   : > { %v9134_v10 = vpop.f32.mrf.mxu3 }
 0x1b2   : > { %13294 = vst [vmem:[#allocation82_spill] sm:$0xff] %v9134_v10  ;;  %v933_v17 = vpop.f32.mrf.mxu1  ;;  %v1165_v12 = vpack.c.bf16 %v1133_v55, %v1133_v55 }
 0x1b3   : > { %v934_v35 = vadd.f32 %v933_v17, %v8753_v37  ;;  %v9155_v17 = vpop.f32.mrf.mxu2 }
 0x1b4   : > { %13298 = vst [vmem:[#allocation86_spill] sm:$0xff] %v9155_v17  ;;  %v9198_v17 = vmul.f32 0.17677669, %v8687_v3 }
 0x1b5   : > { %v9146_v19 = vpack.c.bf16 %v934_v35, %v934_v35 }
 0x1b6   : > { %1593 = vmatmul.bf16.vlgmr.msrb.gmra.mxu0 %v1177_v15  ;;  %v9160_v15 = vadd.f32 %v8714_v16, %v8775_v51 }
 0x1b7   : > { %13297 = vst [vmem:[#allocation85_spill] sm:$0xff] %v9146_v19  ;;  %1605 = vmatpush.bf16.xpose.msrb.mxu1 %v9146_v19 }
 0x1b8   : > { %v1147_v27 = vmul.f32 %v8786_v6, %v9160_v15 }
 0x1b9   : > { %v1323_v10 = vpop.f32.mrf.mxu3 }
 0x1ba   : > { %v936_v8 = vpop.f32.mrf.mxu1 }
 0x1bb   : > { %v937_v35 = vadd.f32 %v936_v8, %v8753_v37  ;;  %v9173_v16 = vpop.f32.mrf.mxu2  ;;  %v1179_v8 = vpack.c.bf16 %v1147_v27, %v1147_v27  ;;  %v9191_v27 = vadd.f32 %v8731_v26, %v8775_v51  ;;  %v2118_v26 = vmul.f32 %v9198_v17, %v8956_v30 }
 0x1bc   : > { %13300 = vst [vmem:[#allocation88_spill] sm:$0xff] %v9173_v16 }
 0x1bd   : > { %v9164_v19 = vpack.c.bf16 %v937_v35, %v937_v35 }
 0x1be   : > { %1437 = vmatmul.bf16.vlgmr.msrb.gmra.mxu3 %v1165_v12  ;;  %1606 = vmatmul.bf16.vlgmr.msrb.gmra.mxu1 %v1178_v40  ;;  %v9179_v12 = vadd.f32 %v8935_v1, %v8775_v51 }
 0x1bf   : > { %1462 = vmatpush.bf16.xpose.msrb.mxu3 %v9162_v4  ;;  %1618 = vmatpush.bf16.xpose.msrb.mxu2 %v9164_v19 }
 0x1c0   : > { %v1134_v55 = vmul.f32 %v8786_v6, %v9179_v12 }
 0x1c1   : > { %v9171_v2 = vpop.f32.mrf.mxu3 }
 0x1c2   : > { %13299 = vst [vmem:[#allocation87_spill] sm:$0xff] %v9171_v2  ;;  %v9175_v10 = vpop.f32.mrf.mxu1  ;;  %v1166_v1 = vpack.c.bf16 %v1134_v55, %v1134_v55  ;;  %v9218_v2 = vadd.f32 %v8948_v29, %v8775_v51  ;;  %v919_v29 = vadd.f32 %v9045_v47, %v8753_v37 }
 0x1c3   : > { %v9186_v40 = vpop.f32.mrf.mxu2 }
 0x1c4   : > { %13301 = vst [vmem:[#allocation89_spill] sm:$0xff] %v9186_v40  ;;  %v2150_v40 = vpack.c.bf16 %v2118_v26, %v2118_v26 }
 0x1c6   : > { %1619 = vmatmul.bf16.vlgmr.msrb.gmra.mxu2 %v1179_v8 }
 0x1c7   : > { %2189 = vmatpush.bf16.xpose.msra.mxu2 %v8768_v49  ;;  %v909_v49 = vadd.f32 %v8979_v42, %v8753_v37  ;;  %v1149_v42 = vmul.f32 %v8786_v6, %v9191_v27 }
 0x1c9   : > { %v1336_v7 = vpop.f32.mrf.mxu3  ;;  %v9193_v8 = vpack.c.bf16 %v909_v49, %v909_v49 }
 0x1ca   : > { %v941_v35 = vpop.f32.mrf.mxu1 }
 0x1cb   : > { %v942_v16 = vadd.f32 %v941_v35, %v8753_v37  ;;  %v1181_v35 = vpack.c.bf16 %v1149_v42, %v1149_v42 }
 0x1ce   : > { %1450 = vmatmul.bf16.vlgmr.msra.gmra.mxu3 %v1166_v1  ;;  %v9214_v1 = vadd.f32 %v8745_v32, %v8775_v51  ;;  %v1135_v32 = vmul.f32 %v8786_v6, %v9218_v2 }
 0x1cf   : > { %2241 = vmatpush.bf16.xpose.msrb.mxu2 %v8832_v53  ;;  %v9195_v53 = vpack.c.bf16 %v942_v16, %v942_v16  ;;  %1475 = vmatpush.bf16.xpose.msra.mxu3 %v9193_v8  ;;  %v9209_v16 = vpop.f32.mrf.mxu2 }
 0x1d1   : > { %1644 = vmatpush.bf16.xpose.msra.mxu0 %v9195_v53  ;;  %v9207_v55 = vpop.f32.mrf.mxu3 }
 0x1d2   : > { %13302 = vst [vmem:[#allocation90_spill] sm:$0xff] %v9207_v55  ;;  %v943_v49 = vpop.f32.mrf.mxu1 }
 0x1d3   : > { %v944_v7 = vadd.f32 %v943_v49, %v8753_v37  ;;  %v1167_v49 = vpack.c.bf16 %v1135_v32, %v1135_v32 }
 0x1d5   : > { %v9220_v30 = vpack.c.bf16 %v944_v7, %v944_v7  ;;  %v9236_v7 = vpack.c.bf16 %v919_v29, %v919_v29 }
 0x1d6   : > { %2190 = vmatmul.bf16.vlgmr.msra.gmra.mxu2 %v2150_v40 }
 0x1d7   : > { %2293 = vmatpush.bf16.xpose.msra.mxu2 %v8920_v43  ;;  %1657 = vmatpush.bf16.xpose.msra.mxu1 %v9220_v30  ;;  %v9232_v26 = vpop.f32.mrf.mxu2 }
 0x1d8   : > { %1645 = vmatmul.bf16.vlgmr.msra.gmra.mxu0 %v1181_v35 }
 0x1d9   : > { %2215 = vmatpush.bf16.xpose.msrb.mxu0 %v8804_v46  ;;  %v1150_v46 = vmul.f32 %v8786_v6, %v9214_v1  ;;  %v1349_v42 = vpop.f32.mrf.mxu3 }
 0x1da   : > { %v9234_v40 = vpop.f32.mrf.mxu1  ;;  %v9250_v42 = vadd.f32 %v8965_v58, %v8775_v51 }
 0x1db   : > { %v1182_v43 = vpack.c.bf16 %v1150_v46, %v1150_v46 }
 0x1de   : > { %1463 = vmatmul.bf16.vlgmr.msrb.gmra.mxu3 %v1167_v49  ;;  %1658 = vmatmul.bf16.vlgmr.msra.gmra.mxu1 %v1182_v43 }
 0x1df   : > { %2228 = vmatpush.bf16.xpose.msrb.mxu1 %v8813_v62  ;;  %1527 = vmatpush.bf16.xpose.msrb.mxu3 %v9236_v7  ;;  %v2122_v62 = vmul.f32 %v9198_v17, %v8870_v23  ;;  %v9246_v35 = vpop.f32.mrf.mxu2  ;;  %v929_v23 = vadd.f32 %v9110_v59, %v8753_v37 }
 0x1e0   : > { %13304 = vst [vmem:[#allocation92_spill] sm:$0xff] %v9246_v35 }
 0x1e1   : > { %2267 = vmatpush.bf16.xpose.msra.mxu0 %v8880_v25  ;;  %v2120_v25 = vmul.f32 %v9198_v17, %v8810_v39  ;;  %v9244_v47 = vpop.f32.mrf.mxu3  ;;  %v2154_v29 = vpack.c.bf16 %v2122_v62, %v2122_v62  ;;  %v1136_v39 = vmul.f32 %v8786_v6, %v9250_v42  ;;  %v9262_v62 = vpack.c.bf16 %v929_v23, %v929_v23 }
 0x1e2   : > { %13303 = vst [vmem:[#allocation91_spill] sm:$0xff] %v9244_v47  ;;  %v1258_v46 = vpop.f32.mrf.mxu1 }
 0x1e3   : > { %v2152_v32 = vpack.c.bf16 %v2120_v25, %v2120_v25  ;;  %v1168_v25 = vpack.c.bf16 %v1136_v39, %v1136_v39 }
 0x1e6   : > { %2242 = vmatmul.bf16.vlgmr.msrb.gmra.mxu2 %v2154_v29  ;;  %v9276_v29 = vadd.f32 %v9021_v38, %v8775_v51 }
 0x1e7   : > { %2280 = vmatpush.bf16.xpose.msra.mxu1 %v8899_v11  ;;  %2345 = vmatpush.bf16.xpose.msrb.mxu2 %v9033_v24  ;;  %v2121_v11 = vmul.f32 %v9198_v17, %v8838_v41  ;;  %v9260_v49 = vpop.f32.mrf.mxu2  ;;  %v2124_v24 = vmul.f32 %v9198_v17, %v8908_v50  ;;  %v2126_v41 = vmul.f32 %v9198_v17, %v8960_v52 }
 0x1e8   : > { %2216 = vmatmul.bf16.vlgmr.msrb.gmra.mxu0 %v2152_v32  ;;  %13305 = vst [vmem:[#allocation93_spill] sm:$0xff] %v9260_v49  ;;  %v1140_v50 = vmul.f32 %v8786_v6, %v9276_v29  ;;  %v939_v52 = vadd.f32 %v9175_v10, %v8753_v37  ;;  %v2128_v37 = vmul.f32 %v9198_v17, %v9013_v48 }
 0x1e9   : > { %2319 = vmatpush.bf16.xpose.msrb.mxu0 %v8974_v28  ;;  %v1362_v43 = vpop.f32.mrf.mxu3  ;;  %v2153_v58 = vpack.c.bf16 %v2121_v11, %v2121_v11  ;;  %v2156_v46 = vpack.c.bf16 %v2124_v24, %v2124_v24  ;;  %v2158_v32 = vpack.c.bf16 %v2126_v41, %v2126_v41  ;;  %v2129_v48 = vmul.f32 %v9198_v17, %v9049_v31 }
 0x1ea   : > { %v2160_v41 = vpack.c.bf16 %v2128_v37, %v2128_v37 }
 0x1ee   : > { %1476 = vmatmul.bf16.vlgmr.msra.gmra.mxu3 %v1168_v25  ;;  %2229 = vmatmul.bf16.vlgmr.msrb.gmra.mxu1 %v2153_v58  ;;  %v9292_v58 = vpack.c.bf16 %v939_v52, %v939_v52 }
 0x1ef   : > { %2332 = vmatpush.bf16.xpose.msrb.mxu1 %v8995_v45  ;;  %1579 = vmatpush.bf16.xpose.msra.mxu3 %v9262_v62  ;;  %v9272_v59 = vpop.f32.mrf.mxu2  ;;  %v2125_v45 = vmul.f32 %v9198_v17, %v8932_v44  ;;  %v2130_v44 = vmul.f32 %v9198_v17, %v9079_v63 }
 0x1f0   : > { %13307 = vst [vmem:[#allocation95_spill] sm:$0xff] %v9272_v59  ;;  %v13384_v59 = vld [vmem:[#allocation59_spill] sm:$0xff] }
 0x1f1   : > { %v9270_v28 = vpop.f32.mrf.mxu3  ;;  %v2157_v43 = vpack.c.bf16 %v2125_v45, %v2125_v45 }
 0x1f2   : > { %13306 = vst [vmem:[#allocation94_spill] sm:$0xff] %v9270_v28 }
 0x1f3   : > { %v9288_v38 = vpop.f32.mrf.mxu0 }
 0x1f4   : > { %13309 = vst [vmem:[#allocation97_spill] sm:$0xff] %v9288_v38 }
 0x1f6   : > { %2294 = vmatmul.bf16.vlgmr.msra.gmra.mxu2 %v2158_v32  ;;  %v9306_v32 = vadd.f32 %v9096_v57, %v8775_v51 }
 0x1f7   : > { %2397 = vmatpush.bf16.xpose.msra.mxu2 %v9162_v4  ;;  %v9286_v39 = vpop.f32.mrf.mxu2 }
 0x1f8   : > { %2268 = vmatmul.bf16.vlgmr.msra.gmra.mxu0 %v2156_v46  ;;  %13308 = vst [vmem:[#allocation96_spill] sm:$0xff] %v9286_v39  ;;  %v2162_v46 = vpack.c.bf16 %v2130_v44, %v2130_v44  ;;  %v1144_v63 = vmul.f32 %v8786_v6, %v9306_v32 }
 0x1f9   : > { %2371 = vmatpush.bf16.xpose.msra.mxu0 %v9098_v61  ;;  %v1375_v11 = vpop.f32.mrf.mxu3  ;;  %v1172_v61 = vpack.c.bf16 %v1140_v50, %v1140_v50  ;;  %v2161_v50 = vpack.c.bf16 %v2129_v48, %v2129_v48 }
 0x1fa   : > { %v1176_v52 = vpack.c.bf16 %v1144_v63, %v1144_v63  ;;  %v13321_v63 = vld [vmem:[#allocation45_spill] sm:$0xff] }
 0x1fb   : > { %v9290_v23 = vpop.f32.mrf.mxu1  ;;  %v1492_v25 = vpop.f32.mrf.mxu0 }
 0x1fc   : > { %13310 = vst [vmem:[#allocation98_spill] sm:$0xff] %v9290_v23 }
 0x1fe   : > { %1528 = vmatmul.bf16.vlgmr.msrb.gmra.mxu3 %v1172_v61  ;;  %2281 = vmatmul.bf16.vlgmr.msra.gmra.mxu1 %v2157_v43  ;;  %v9328_v43 = vadd.f32 %v8721_v21, %v8775_v51 }
 0x1ff   : > { %2384 = vmatpush.bf16.xpose.msra.mxu1 %v9126_v13  ;;  %1631 = vmatpush.bf16.xpose.msrb.mxu3 %v9292_v58  ;;  %v9302_v10 = vpop.f32.mrf.mxu2 }
 0x200   : > { %13312 = vst [vmem:[#allocation100_spill] sm:$0xff] %v9302_v10 }
 0x201   : > { %v9300_v4 = vpop.f32.mrf.mxu3 }
 0x202   : > { %13311 = vst [vmem:[#allocation99_spill] sm:$0xff] %v9300_v4 }
 0x203   : > { %v1505_v24 = vpop.f32.mrf.mxu1 }
 0x206   : > { %2346 = vmatmul.bf16.vlgmr.msrb.gmra.mxu2 %v2162_v46 }
 0x207   : > { %2449 = vmatpush.bf16.xpose.msrb.mxu2 %v9035_v54  ;;  %v2132_v54 = vmul.f32 %v9198_v17, %v9144_v60 }
 0x208   : > { %2320 = vmatmul.bf16.vlgmr.msrb.gmra.mxu0 %v2160_v41  ;;  %v9347_v41 = vperm.slane %v8750_v36, 2 }
 0x209   : > { %2423 = vmatpush.bf16.xpose.msrb.mxu0 %v8997_v22  ;;  %v1388_v13 = vpop.f32.mrf.mxu3  ;;  %v9314_v45 = vpop.f32.mrf.mxu2  ;;  %v2134_v22 = vmul.f32 %v9198_v17, %v9218_v2  ;;  %v2164_v61 = vpack.c.bf16 %v2132_v54, %v2132_v54  ;;  %v13325_v54 = vld [vmem:[#allocation70_spill] sm:$0xff] }
 0x20a   : > { %13313 = vst [vmem:[#allocation101_spill] sm:$0xff] %v9314_v45  ;;  %v9359_v13 = vadd.f32 %v13321_v63, %v9347_v41  ;;  %v9823_v4 = vadd.f32 %v13384_v59, %v9347_v41 }
 0x20b   : > { %v2166_v37 = vpack.c.bf16 %v2134_v22, %v2134_v22  ;;  %v2140_v22 = vmul.f32 %v9198_v17, %v13325_v54  ;;  %v13337_v54 = vld [vmem:[#allocation81_spill] sm:$0xff] }
 0x20e   : > { %1580 = vmatmul.bf16.vlgmr.msra.gmra.mxu3 %v1176_v52  ;;  %2333 = vmatmul.bf16.vlgmr.msrb.gmra.mxu1 %v2161_v50  ;;  %v13324_v52 = vld [vmem:[#allocation85_spill] sm:$0xff] }
 0x20f   : > { %2202 = vmatpush.bf16.xpose.msra.mxu3 %v8783_v5  ;;  %2436 = vmatpush.bf16.xpose.msrb.mxu1 %v9015_v33  ;;  %v1148_v5 = vmul.f32 %v8786_v6, %v9328_v43  ;;  %v2133_v33 = vmul.f32 %v9198_v17, %v9179_v12  ;;  %v2138_v6 = vmul.f32 %v9198_v17, %v9030_v14 }
 0x211   : > { %v9322_v31 = vpop.f32.mrf.mxu3  ;;  %v1518_v57 = vpop.f32.mrf.mxu2  ;;  %v1180_v21 = vpack.c.bf16 %v1148_v5, %v1148_v5  ;;  %v2165_v51 = vpack.c.bf16 %v2133_v33, %v2133_v33  ;;  %v2170_v24 = vpack.c.bf16 %v2138_v6, %v2138_v6 }
 0x212   : > { %13314 = vst [vmem:[#allocation102_spill] sm:$0xff] %v9322_v31  ;;  %v13326_v57 = vld [vmem:[#allocation76_spill] sm:$0xff] }
 0x213   : > { %v9324_v11 = vpop.f32.mrf.mxu0 }
 0x214   : > { %13315 = vst [vmem:[#allocation103_spill] sm:$0xff] %v9324_v11 }
 0x216   : > { %2398 = vmatmul.bf16.vlgmr.msra.gmra.mxu2 %v2166_v37 }
 0x217   : > { %2501 = vmatpush.bf16.xpose.msra.mxu2 %v9100_v56  ;;  %v2136_v56 = vmul.f32 %v9198_v17, %v8992_v18 }
 0x218   : > { %2372 = vmatmul.bf16.vlgmr.msra.gmra.mxu0 %v2164_v61  ;;  %v2142_v61 = vmul.f32 %v9198_v17, %v13326_v57 }
 0x219   : > { %2475 = vmatpush.bf16.xpose.msra.mxu0 %v9063_v34  ;;  %v1401_v60 = vpop.f32.mrf.mxu3  ;;  %v2168_v25 = vpack.c.bf16 %v2136_v56, %v2136_v56  ;;  %v13329_v56 = vld [vmem:[#allocation51_spill] sm:$0xff] }
 0x21a   : > { %v2123_v6 = vmul.f32 %v9198_v17, %v13329_v56 }
 0x21b   : > { %v1544_v2 = vpop.f32.mrf.mxu0  ;;  %v9336_v44 = vpop.f32.mrf.mxu1 }
 0x21c   : > { %13316 = vst [vmem:[#allocation104_spill] sm:$0xff] %v9336_v44  ;;  %v2172_v2 = vpack.c.bf16 %v2140_v22, %v2140_v22  ;;  %v2144_v22 = vmul.f32 %v9198_v17, %v13337_v54 }
 0x21e   : > { %1632 = vmatmul.bf16.vlgmr.msrb.gmra.mxu3 %v1180_v21  ;;  %2385 = vmatmul.bf16.vlgmr.msra.gmra.mxu1 %v2165_v51  ;;  %v2174_v21 = vpack.c.bf16 %v2142_v61, %v2142_v61  ;;  %v2176_v56 = vpack.c.bf16 %v2144_v22, %v2144_v22  ;;  %v2148_v22 = vmul.f32 %v9198_v17, %v9191_v27  ;;  %v13150_v27 = vmov -1e+30  }
 0x21f   : > { %2254 = vmatpush.bf16.xpose.msrb.mxu3 %v8856_v20  ;;  %2488 = vmatpush.bf16.xpose.msra.mxu1 %v9081_v9  ;;  %v13318_v20 = vld [vmem:[#allocation40_spill] sm:$0xff]  ;;  %v13319_v9 = vld [vmem:[#allocation65_spill] sm:$0xff] }
 0x220   : > { %v2119_v18 = vmul.f32 %v9198_v17, %v13318_v20  ;;  %v2137_v14 = vmul.f32 %v9198_v17, %v13319_v9  ;;  %13322 = vst [vmem:[#allocation65_spill] sm:$0xff] %v9359_v13  ;;  %v13331_v20 = vld [vmem:[#allocation49_spill] sm:$0xff]  ;;  %v13333_v9 = vld [vmem:[#allocation52_spill] sm:$0xff] }
 0x221   : > { %v9344_v34 = vpop.f32.mrf.mxu3 }
 0x222   : > { %13317 = vst [vmem:[#allocation105_spill] sm:$0xff] %v9344_v34  ;;  %v2151_v36 = vpack.c.bf16 %v2119_v18, %v2119_v18  ;;  %v2169_v50 = vpack.c.bf16 %v2137_v14, %v2137_v14  ;;  %v9381_v18 = vadd.f32 %v13331_v20, %v9347_v41  ;;  %v9385_v14 = vadd.f32 %v13333_v9, %v9347_v41 }
 0x223   : > { %v1557_v12 = vpop.f32.mrf.mxu1 }
 0x224   : > { %v13330_v12 = vld [vmem:[#allocation74_spill] sm:$0xff]  ;;  %13332 = vst [vmem:[#allocation85_spill] sm:$0xff] %v9381_v18 }
 0x225   : > { %13334 = vst [vmem:[#allocation70_spill] sm:$0xff] %v9385_v14 }
 0x226   : > { %2450 = vmatmul.bf16.vlgmr.msrb.gmra.mxu2 %v2170_v24 }
 0x227   : > { %2553 = vmatpush.bf16.xpose.msrb.mxu2 %v9164_v19  ;;  %v2950_v19 = vmul.f32 %v8687_v3, %v9359_v13 }
 0x228   : > { %2424 = vmatmul.bf16.vlgmr.msrb.gmra.mxu0 %v2168_v25  ;;  %v2141_v25 = vmul.f32 %v9198_v17, %v13330_v12  ;;  %v13341_v12 = vld [vmem:[#allocation61_spill] sm:$0xff] }
 0x229   : > { %2527 = vmatpush.bf16.xpose.msrb.mxu0 %v9128_v0  ;;  %v1414_v46 = vpop.f32.mrf.mxu3  ;;  %v9355_v48 = vpop.f32.mrf.mxu2  ;;  %v13323_v0 = vld [vmem:[#allocation57_spill] sm:$0xff]  ;;  %v2982_v33 = vpack.c.bf16 %v2950_v19, %v2950_v19  ;;  %v2954_v19 = vmul.f32 %v8687_v3, %v9385_v14 }
 0x22a   : > { %13320 = vst [vmem:[#allocation40_spill] sm:$0xff] %v9355_v48 }
 0x22b   : > { %v3051_v51 = vsel %vm3049_vm4, %v2982_v33, 0 }
 0x22e   : > { %2203 = vmatmul.bf16.vlgmr.msra.gmra.mxu3 %v2151_v36  ;;  %2437 = vmatmul.bf16.vlgmr.msrb.gmra.mxu1 %v2169_v50  ;;  %v2173_v36 = vpack.c.bf16 %v2141_v25, %v2141_v25  ;;  %v2952_v50 = vmul.f32 %v8687_v3, %v9381_v18  ;;  %v2127_v25 = vmul.f32 %v9198_v17, %v13341_v12 }
 0x22f   : > { %2306 = vmatpush.bf16.xpose.msra.mxu3 %v13323_v0  ;;  %2540 = vmatpush.bf16.xpose.msrb.mxu1 %v13324_v52  ;;  %v13336_v0 = vld [vmem:[#allocation71_spill] sm:$0xff]  ;;  %v2146_v52 = vmul.f32 %v9198_v17, %v9160_v15 }
 0x230   : > { %v2984_v61 = vpack.c.bf16 %v2952_v50, %v2952_v50 }
 0x231   : > { %v9369_v37 = vpop.f32.mrf.mxu3  ;;  %v1570_v5 = vpop.f32.mrf.mxu2 }
 0x232   : > { %13327 = vst [vmem:[#allocation45_spill] sm:$0xff] %v9369_v37  ;;  %v13339_v5 = vld [vmem:[#allocation50_spill] sm:$0xff]  ;;  %v3089_v15 = vsel %vm3049_vm4, %v2984_v61, 0  ;;  %v1067_v61 = vld [vmem:[%s9425_s29] sm:$0xff] }
 0x233   : > { %v9371_v60 = vpop.f32.mrf.mxu0  ;;  %v9404_v33 = vadd.f32 %v13339_v5, %v9347_v41  ;;  %vm1071_vm5 = vcmp.gt.f32.partialorder %v1067_v61, 0.0 }
 0x234   : > { %13328 = vst [vmem:[#allocation57_spill] sm:$0xff] %v9371_v60  ;;  %v9444_v12 = vsel %vm1071_vm5, 0.0, %v13150_v27 }
 0x235   : > { %13340 = vst [vmem:[#allocation74_spill] sm:$0xff] %v9404_v33 }
 0x236   : > { %2502 = vmatmul.bf16.vlgmr.msra.gmra.mxu2 %v2174_v21 }
 0x237   : > { %3060 = vmatpush.bf16.msra.mxu2 %v3051_v51  ;;  %v2178_v51 = vpack.c.bf16 %v2146_v52, %v2146_v52 }
 0x238   : > { %2476 = vmatmul.bf16.vlgmr.msra.gmra.mxu0 %v2172_v2  ;;  %v2986_v2 = vpack.c.bf16 %v2954_v19, %v2954_v19  ;;  %v2159_v19 = vpack.c.bf16 %v2127_v25, %v2127_v25  ;;  %v1069_v25 = vld [vmem:[%s9425_s29 + $0x10] sm:$0xff] }
 0x239   : > { %2579 = vmatpush.bf16.xpose.msra.mxu0 %v9195_v53  ;;  %v1427_v24 = vpop.f32.mrf.mxu3  ;;  %v2155_v53 = vpack.c.bf16 %v2123_v6, %v2123_v6  ;;  %vm1073_vm6 = vcmp.gt.f32.partialorder %v1069_v25, 0.0 }
 0x23a   : > { %v3127_v6 = vsel %vm3049_vm4, %v2986_v2, 0  ;;  %v13342_v24 = vld [vmem:[#allocation84_spill] sm:$0xff] }
 0x23b   : > { %v1596_v46 = vpop.f32.mrf.mxu0  ;;  %v9387_v63 = vpop.f32.mrf.mxu1  ;;  %v2145_v20 = vmul.f32 %v9198_v17, %v13342_v24  ;;  %v2149_v24 = vmul.f32 %v9198_v17, %v9214_v1 }
 0x23c   : > { %13335 = vst [vmem:[#allocation76_spill] sm:$0xff] %v9387_v63 }
 0x23d   : > { %v2181_v61 = vpack.c.bf16 %v2149_v24, %v2149_v24 }
 0x23e   : > { %2255 = vmatmul.bf16.vlgmr.msrb.gmra.mxu3 %v2155_v53  ;;  %2489 = vmatmul.bf16.vlgmr.msra.gmra.mxu1 %v2173_v36  ;;  %v13344_v36 = vld [vmem:[#allocation54_spill] sm:$0xff] }
 0x23f   : > { %2358 = vmatpush.bf16.xpose.msrb.mxu3 %v13336_v0  ;;  %2592 = vmatpush.bf16.xpose.msra.mxu1 %v9220_v30  ;;  %v2953_v30 = vmul.f32 %v8687_v3, %v9404_v33  ;;  %v9418_v50 = vadd.f32 %v13344_v36, %v9347_v41  ;;  %v2177_v0 = vpack.c.bf16 %v2145_v20, %v2145_v20  ;;  %v13351_v20 = vld [vmem:[#allocation79_spill] sm:$0xff] }
 0x241   : > { %v9400_v57 = vpop.f32.mrf.mxu3  ;;  %v2985_v53 = vpack.c.bf16 %v2953_v30, %v2953_v30  ;;  %13345 = vst [vmem:[#allocation52_spill] sm:$0xff] %v9418_v50  ;;  %v2956_v52 = vmul.f32 %v8687_v3, %v9418_v50 }
 0x242   : > { %13338 = vst [vmem:[#allocation51_spill] sm:$0xff] %v9400_v57 }
 0x243   : > { %v1609_v21 = vpop.f32.mrf.mxu1  ;;  %v3108_v54 = vsel %vm3049_vm4, %v2985_v53, 0  ;;  %v13148_v53 = vperm.slane %v9444_v12, 0 }
 0x244   : > { %v2988_v21 = vpack.c.bf16 %v2956_v52, %v2956_v52 }
 0x246   : > { %2554 = vmatmul.bf16.vlgmr.msrb.gmra.mxu2 %v2178_v51  ;;  %v13348_v51 = vld [vmem:[#allocation55_spill] sm:$0xff] }
 0x247   : > { %3136 = vmatpush.bf16.msrb.mxu2 %v3127_v6  ;;  %v3165_v6 = vsel %vm3049_vm4, %v2988_v21, 0  ;;  %v9461_v21 = vsel %vm1073_vm6, 0.0, %v13150_v27 }
 0x248   : > { %2528 = vmatmul.bf16.vlgmr.msrb.gmra.mxu0 %v2176_v56  ;;  %v9436_v56 = vadd.f32 %v13348_v51, %v9347_v41  ;;  %v1084_v51 = vrot.slane %v9444_v12, 2 }
 0x249   : > { %3098 = vmatpush.bf16.msrb.mxu0 %v3089_v15  ;;  %v1440_v9 = vpop.f32.mrf.mxu3  ;;  %v9414_v46 = vpop.f32.mrf.mxu2  ;;  %v2180_v15 = vpack.c.bf16 %v2148_v22, %v2148_v22 }
 0x24a   : > { %13343 = vst [vmem:[#allocation49_spill] sm:$0xff] %v9414_v46  ;;  %v2131_v9 = vmul.f32 %v9198_v17, %v13351_v20  ;;  %v9467_v24 = vperm.slane %v1084_v51, 0  ;;  %v13357_v46 = vld [vmem:[#allocation48_spill] sm:$0xff] }
 0x24b   : > { %13349 = vst [vmem:[#allocation81_spill] sm:$0xff] %v9436_v56 }
 0x24e   : > { %2307 = vmatmul.bf16.vlgmr.msra.gmra.mxu3 %v2159_v19  ;;  %2541 = vmatmul.bf16.vlgmr.msrb.gmra.mxu1 %v2177_v0 }
 0x24f   : > { %2410 = vmatpush.bf16.xpose.msra.mxu3 %v9193_v8  ;;  %3117 = vmatpush.bf16.msrb.mxu1 %v3108_v54  ;;  %v2957_v8 = vmul.f32 %v8687_v3, %v9436_v56 }
 0x251   : > { %v9432_v5 = vpop.f32.mrf.mxu3  ;;  %v1622_v2 = vpop.f32.mrf.mxu2  ;;  %v2989_v0 = vpack.c.bf16 %v2957_v8, %v2957_v8  ;;  %v13149_v8 = vperm.slane %v9461_v21, 0 }
 0x252   : > { %13347 = vst [vmem:[#allocation71_spill] sm:$0xff] %v9432_v5  ;;  %v2163_v2 = vpack.c.bf16 %v2131_v9, %v2131_v9  ;;  %v1098_v5 = vrot.slane %v9461_v21, 2 }
 0x255   : > { %v9438_v30 = vpop.f32.mrf.mxu0 }
 0x256   : > { %13350 = vst [vmem:[#allocation50_spill] sm:$0xff] %v9438_v30 }
 0x258   : > { %2580 = vmatmul.bf16.vlgmr.msra.gmra.mxu0 %v2180_v15  ;;  %v3184_v15 = vsel %vm3049_vm4, %v2989_v0, 0  ;;  %v1085_v0 = vrot.slane %v9444_v12, 3 }
 0x259   : > { %3174 = vmatpush.bf16.msra.mxu0 %v3165_v6  ;;  %v1453_v36 = vpop.f32.mrf.mxu3  ;;  %v2191_v19 = vpop.f32.mrf.mxu2 }
 0x25a   : > { %v9454_v52 = vadd.f32 %v2191_v19, %v13148_v53  ;;  %v1086_v19 = vrot.slane %v9444_v12, 4 }
 0x25b   : > { %v9456_v22 = vpop.f32.mrf.mxu1 }
 0x25c   : > { %13352 = vst [vmem:[#allocation61_spill] sm:$0xff] %v9456_v22  ;;  %v2598_v1 = vsel %vm1663_vm7, %v9454_v52, -inf }
 0x25d   : > { %v1648_v54 = vpop.f32.mrf.mxu0  ;;  %2599 = vmax.xlane.f32.xlu0 %v2598_v1 }
 0x25e   : > { %2359 = vmatmul.bf16.vlgmr.msrb.gmra.mxu3 %v2163_v2  ;;  %2593 = vmatmul.bf16.vlgmr.msra.gmra.mxu1 %v2181_v61  ;;  %v2135_v61 = vmul.f32 %v9198_v17, %v9250_v42  ;;  %v9482_v2 = vperm.slane %v1086_v19, 0 }
 0x25f   : > { %2462 = vmatpush.bf16.xpose.msrb.mxu3 %v9236_v7  ;;  %3193 = vmatpush.bf16.msra.mxu1 %v3184_v15  ;;  %v9484_v15 = vperm.slane %v1085_v0, 0  ;;  %v1068_v0 = vld [vmem:[%s9425_s29 + $0x8] sm:$0xff] }
 0x260   : > { %vm1072_vm8 = vcmp.gt.f32.partialorder %v1068_v0, 0.0 }
 0x261   : > { %v1464_v6 = vpop.f32.mrf.mxu3  ;;  %v2193_v25 = vpop.f32.mrf.mxu2 }
 0x262   : > { %v9471_v20 = vadd.f32 %v1464_v6, %v13149_v8  ;;  %v9507_v8 = vsel %vm1072_vm8, 0.0, %v13150_v27 }
 0x263   : > { %v1661_v9 = vpop.f32.mrf.mxu1  ;;  %13355 = vst [vmem:[#allocation55_spill] sm:$0xff] %v9507_v8  ;;  %v1093_v63 = vrot.slane %v9507_v8, 4  ;;  %v1092_v34 = vrot.slane %v9507_v8, 3 }
 0x264   : > { %13353 = vst [vmem:[#allocation84_spill] sm:$0xff] %v9471_v20 }
 0x265   : > { %v2217_v36 = vpop.f32.mrf.mxu0 }
 0x266   : > { %v9475_v54 = vadd.f32 %v2217_v36, %v9467_v24  ;;  %v2167_v36 = vpack.c.bf16 %v2135_v61, %v2135_v61 }
 0x268   : > { %v2604_v7 = vsel %vm1663_vm7, %v9475_v54, -inf }
 0x269   : > { %2605 = vmax.xlane.f32.xlu1 %v2604_v7  ;;  %v1466_v1 = vpop.f32.mrf.mxu3  ;;  %v2243_v51 = vpop.f32.mrf.mxu2  ;;  %v1088_v7 = vrot.slane %v9444_v12, 6 }
 0x26a   : > { %v9487_v6 = vadd.f32 %v2243_v51, %v9482_v2 }
 0x26b   : > { %v2230_v9 = vpop.f32.mrf.mxu1  ;;  %v9501_v51 = vperm.slane %v1088_v7, 0 }
 0x26c   : > { %v9490_v53 = vadd.f32 %v2230_v9, %v9484_v15  ;;  %v2610_v42 = vsel %vm1663_vm7, %v9487_v6, -inf }
 0x26d   : > { %v2219_v25 = vpop.f32.mrf.mxu0 }
 0x26e   : > { %2411 = vmatmul.bf16.vlgmr.msra.gmra.mxu3 %v2167_v36  ;;  %v2607_v19 = vsel %vm1663_vm7, %v9490_v53, -inf }
 0x26f   : > { %2514 = vmatpush.bf16.xpose.msra.mxu3 %v9262_v62  ;;  %2608 = vmax.xlane.f32.xlu2 %v2607_v19  ;;  %v2139_v62 = vmul.f32 %v9198_v17, %v9276_v29 }
 0x271   : > { %2611 = vmax.xlane.f32.xlu1 %v2610_v42  ;;  %v9499_v1 = vpop.f32.mrf.mxu3  ;;  %v2245_v61 = vpop.f32.mrf.mxu2  ;;  %v13151_v42 = vperm.slane %v9507_v8, 0 }
 0x272   : > { %13354 = vst [vmem:[#allocation54_spill] sm:$0xff] %v9499_v1 }
 0x273   : > { %v2232_v25 = vpop.f32.mrf.mxu1 }
 0x275   : > { %v2269_v9 = vpop.f32.mrf.mxu0 }
 0x276   : > { %v9504_v36 = vadd.f32 %v2269_v9, %v9501_v51  ;;  %v2171_v9 = vpack.c.bf16 %v2139_v62, %v2139_v62 }
 0x278   : > { %v2616_v22 = vsel %vm1663_vm7, %v9504_v36, -inf }
 0x279   : > { %2617 = vmax.xlane.f32.xlu0 %v2616_v22  ;;  %v1479_v7 = vpop.f32.mrf.mxu3  ;;  %v2295_v19 = vpop.f32.mrf.mxu2  ;;  %v1091_v22 = vrot.slane %v9507_v8, 2 }
 0x27a   : > { %v9516_v0 = vadd.f32 %v2295_v19, %v13151_v42  ;;  %v9528_v19 = vadd.f32 %v13357_v46, %v9347_v41  ;;  %v2143_v46 = vmul.f32 %v9198_v17, %v9306_v32 }
 0x27b   : > { %v9518_v25 = vpop.f32.mrf.mxu1 }
 0x27c   : > { %v2622_v27 = vsel %vm1663_vm7, %v9516_v0, -inf  ;;  %13358 = vst [vmem:[#allocation48_spill] sm:$0xff] %v9528_v19  ;;  %v2175_v23 = vpack.c.bf16 %v2143_v46, %v2143_v46 }
 0x27d   : > { %v2271_v61 = vpop.f32.mrf.mxu0  ;;  %2623 = vmax.xlane.f32.xlu1 %v2622_v27 }
 0x27e   : > { %2463 = vmatmul.bf16.vlgmr.msrb.gmra.mxu3 %v2171_v9  ;;  %v9530_v61 = vperm.slane %v1091_v22, 0  ;;  %v2951_v9 = vmul.f32 %v8687_v3, %v9528_v19 }
 0x27f   : > { %2566 = vmatpush.bf16.xpose.msrb.mxu3 %v9292_v58 }
 0x280   : > { %v2983_v48 = vpack.c.bf16 %v2951_v9, %v2951_v9 }
 0x281   : > { %v9524_v29 = vpop.f32.mrf.mxu3  ;;  %v2297_v7 = vpop.f32.mrf.mxu2 }
 0x282   : > { %13356 = vst [vmem:[#allocation79_spill] sm:$0xff] %v9524_v29  ;;  %v9542_v7 = vperm.slane %v1093_v63, 0  ;;  %v3070_v32 = vsel %vm3049_vm4, %v2983_v48, 0  ;;  %v1096_v48 = vrot.slane %v9507_v8, 7 }
 0x283   : > { %v2284_v42 = vpop.f32.mrf.mxu1 }
 0x284   : > { %13359 = vst [vmem:[#allocation106_spill] sm:$0xff] %v9542_v7 }
 0x285   : > { %v2321_v62 = vpop.f32.mrf.mxu0 }
 0x286   : > { %v9534_v27 = vadd.f32 %v2321_v62, %v9530_v61 }
 0x288   : > { %v2628_v58 = vsel %vm1663_vm7, %v9534_v27, -inf }
 0x289   : > { %2629 = vmax.xlane.f32.xlu1 %v2628_v58  ;;  %v1531_v22 = vpop.f32.mrf.mxu3  ;;  %v2347_v42 = vpop.f32.mrf.mxu2  ;;  %v1095_v58 = vrot.slane %v9507_v8, 6 }
 0x28a   : > { %v9545_v44 = vadd.f32 %v2347_v42, %v9542_v7  ;;  %v13361_v22 = vld [vmem:[#allocation53_spill] sm:$0xff] }
 0x28b   : > { %v9547_v45 = vpop.f32.mrf.mxu1  ;;  %v9557_v42 = vadd.f32 %v13361_v22, %v9347_v41 }
 0x28c   : > { %v2634_v29 = vsel %vm1663_vm7, %v9545_v44, -inf }
 0x28d   : > { %v2323_v62 = vpop.f32.mrf.mxu0  ;;  %2635 = vmax.xlane.f32.xlu2 %v2634_v29  ;;  %13362 = vst [vmem:[#allocation53_spill] sm:$0xff] %v9557_v42 }
 0x28e   : > { %2515 = vmatmul.bf16.vlgmr.msra.gmra.mxu3 %v2175_v23  ;;  %v9559_v62 = vperm.slane %v1095_v58, 0  ;;  %v2955_v23 = vmul.f32 %v8687_v3, %v9557_v42 }
 0x28f   : > { %3079 = vmatpush.bf16.msra.mxu3 %v3070_v32  ;;  %v2147_v32 = vmul.f32 %v9198_v17, %v9328_v43 }
 0x290   : > { %13363 = vst [vmem:[#allocation108_spill] sm:$0xff] %v9559_v62  ;;  %v2987_v22 = vpack.c.bf16 %v2955_v23, %v2955_v23  ;;  %v9582_v23 = vperm.slane %v1098_v5, 0 }
 0x291   : > { %v9553_v63 = vpop.f32.mrf.mxu3  ;;  %v2349_v9 = vpop.f32.mrf.mxu2  ;;  %v2179_v30 = vpack.c.bf16 %v2147_v32, %v2147_v32 }
 0x292   : > { %13360 = vst [vmem:[#allocation107_spill] sm:$0xff] %v9553_v63  ;;  %v3146_v60 = vsel %vm3049_vm4, %v2987_v22, 0 }
 0x293   : > { %v2336_v46 = vpop.f32.mrf.mxu1  ;;  %13366 = vst [vmem:[#allocation111_spill] sm:$0xff] %v9582_v23 }
 0x294   : > { %v9571_v46 = vperm.slane %v1096_v48, 0 }
 0x295   : > { %v2373_v20 = vpop.f32.mrf.mxu0 }
 0x296   : > { %v9562_v1 = vadd.f32 %v2373_v20, %v9559_v62  ;;  %13364 = vst [vmem:[#allocation109_spill] sm:$0xff] %v9571_v46 }
 0x298   : > { %v2640_v29 = vsel %vm1663_vm7, %v9562_v1, -inf }
 0x299   : > { %2641 = vmax.xlane.f32.xlu1 %v2640_v29  ;;  %v1583_v9 = vpop.f32.mrf.mxu3  ;;  %v2399_v58 = vpop.f32.mrf.mxu2 }
 0x29b   : > { %v2386_v20 = vpop.f32.mrf.mxu1 }
 0x29c   : > { %v9574_v56 = vadd.f32 %v2386_v20, %v9571_v46 }
 0x29d   : > { %v2375_v63 = vpop.f32.mrf.mxu0 }
 0x29e   : > { %2567 = vmatmul.bf16.vlgmr.msrb.gmra.mxu3 %v2179_v30  ;;  %v2643_v29 = vsel %vm1663_vm7, %v9574_v56, -inf }
 0x29f   : > { %3155 = vmatpush.bf16.msrb.mxu3 %v3146_v60 }
 0x2a1   : > { %2644 = vmax.xlane.f32.xlu1 %v2643_v29  ;;  %v9580_v17 = vpop.f32.mrf.mxu3  ;;  %v2401_v43 = vpop.f32.mrf.mxu2  ;;  %v1083_v29 = vrot.slane %v9444_v12, 1 }
 0x2a2   : > { %13365 = vst [vmem:[#allocation110_spill] sm:$0xff] %v9580_v17  ;;  %v1089_v17 = vrot.slane %v9444_v12, 7 }
 0x2a3   : > { %v2388_v63 = vpop.f32.mrf.mxu1  ;;  %v9594_v43 = vperm.slane %v1083_v29, 0 }
 0x2a5   : > { %v2425_v48 = vpop.f32.mrf.mxu0 }
 0x2a6   : > { %v9585_v32 = vadd.f32 %v2425_v48, %v9582_v23 }
 0x2a8   : > { %v2652_v30 = vsel %vm1663_vm7, %v9585_v32, -inf }
 0x2a9   : > { %2653 = vmax.xlane.f32.xlu2 %v2652_v30  ;;  %v1635_v9 = vpop.f32.mrf.mxu3  ;;  %v9589_v22 = vpop.f32.mrf.mxu2 }
 0x2aa   : > { %v9604_v9 = vperm.slane %v1089_v17, 0  ;;  %v9618_v17 = vperm.slane %v1092_v34, 0 }
 0x2ab   : > { %v9591_v60 = vpop.f32.mrf.mxu1 }
 0x2ac   : > { %13367 = vst [vmem:[#allocation112_spill] sm:$0xff] %v9604_v9 }
 0x2ad   : > { %v2427_v20 = vpop.f32.mrf.mxu0  ;;  %13368 = vst [vmem:[#allocation113_spill] sm:$0xff] %v9618_v17 }
 0x2ae   : > { %v9608_v20 = vadd.f32 %v9518_v25, %v9604_v9  ;;  %v9624_v25 = vadd.f32 %v9547_v45, %v9618_v17 }
 0x2b0   : > { %v2619_v33 = vsel %vm1663_vm7, %v9608_v20, -inf  ;;  %v2631_v14 = vsel %vm1663_vm7, %v9624_v25, -inf }
 0x2b1   : > { %v2204_v5 = vpop.f32.mrf.mxu3  ;;  %v2453_v63 = vpop.f32.mrf.mxu2 }
 0x2b2   : > { %v9598_v48 = vadd.f32 %v2204_v5, %v9594_v43 }
 0x2b3   : > { %v2440_v46 = vpop.f32.mrf.mxu1 }
 0x2b4   : > { %v2601_v30 = vsel %vm1663_vm7, %v9598_v48, -inf  ;;  %v1087_v46 = vrot.slane %v9444_v12, 5 }
 0x2b5   : > { %v9600_v50 = vpop.f32.mrf.mxu0  ;;  %2602 = vmax.xlane.f32.xlu0 %v2601_v30 }
 0x2b6   : > { %v9620_v30 = vperm.slane %v1087_v46, 0 }
 0x2b9   : > { %v2206_v29 = vpop.f32.mrf.mxu3  ;;  %v9610_v63 = vpop.f32.mrf.mxu2 }
 0x2bb   : > { %v9613_v7 = vpop.f32.mrf.mxu1 }
 0x2bd   : > { %v2479_v5 = vpop.f32.mrf.mxu0  ;;  %2620 = vmax.xlane.f32.xlu0 %v2619_v33  ;;  %v13369_v33 = vperm.slane %v9461_v21, 0 }
 0x2bf   : > { %v9637_v45 = vadd.f32 %v2399_v58, %v13369_v33 }
 0x2c1   : > { %v2256_v29 = vpop.f32.mrf.mxu3  ;;  %v2505_v11 = vpop.f32.mrf.mxu2  ;;  %v2646_v17 = vsel %vm1663_vm7, %v9637_v45, -inf }
 0x2c2   : > { %v9627_v5 = vadd.f32 %v2256_v29, %v9620_v30 }
 0x2c3   : > { %v2492_v37 = vpop.f32.mrf.mxu1 }
 0x2c4   : > { %v2613_v34 = vsel %vm1663_vm7, %v9627_v5, -inf  ;;  %v1090_v37 = vrot.slane %v9507_v8, 1 }
 0x2c5   : > { %v9629_v42 = vpop.f32.mrf.mxu0  ;;  %2632 = vmax.xlane.f32.xlu0 %v2631_v14  ;;  %2614 = vmax.xlane.f32.xlu2 %v2613_v34 }
 0x2c6   : > { %v9646_v18 = vperm.slane %v1090_v37, 0 }
 0x2c8   : > { %13370 = vst [vmem:[#allocation114_spill] sm:$0xff] %v9646_v18 }
 0x2c9   : > { %v2258_v46 = vpop.f32.mrf.mxu3  ;;  %v9639_v11 = vpop.f32.mrf.mxu2 }
 0x2cb   : > { %v9641_v31 = vpop.f32.mrf.mxu1 }
 0x2cd   : > { %v2531_v29 = vpop.f32.mrf.mxu0  ;;  %2647 = vmax.xlane.f32.xlu0 %v2646_v17 }
 0x2d0   : > { %v2600_v14 = vpop.xlane.xlu0 %2599 }
 0x2d1   : > { %v2694_v34 = vsub.f32 %v9454_v52, %v2600_v14  ;;  %v2308_v10 = vpop.f32.mrf.mxu3  ;;  %v2557_v58 = vpop.f32.mrf.mxu2 }
 0x2d2   : > { %v9650_v33 = vadd.f32 %v2308_v10, %v9646_v18  ;;  %v1094_v10 = vrot.slane %v9507_v8, 5 }
 0x2d3   : > { %v2726_v46 = vmul.f32 1.442695, %v2694_v34  ;;  %v2544_v29 = vpop.f32.mrf.mxu1 }
 0x2d4   : > { %v2625_v23 = vsel %vm1663_vm7, %v9650_v33, -inf  ;;  %v9664_v13 = vperm.slane %v1094_v10, 0 }
 0x2d5   : > { %v9652_v38 = vpop.f32.mrf.mxu0  ;;  %7815 = vpow2.f32 %v2726_v46  ;;  %2626 = vmax.xlane.f32.xlu2 %v2625_v23 }
 0x2d6   : > { %13371 = vst [vmem:[#allocation115_spill] sm:$0xff] %v9664_v13 }
 0x2d9   : > { %v2310_v17 = vpop.f32.mrf.mxu3 }
 0x2db   : > { %v9656_v19 = vpop.eup %7815  ;;  %v9659_v58 = vpop.f32.mrf.mxu1 }
 0x2dc   : > { %v2606_v37 = vpop.xlane.xlu1 %2605  ;;  %v2790_v34 = vsel %vm1663_vm7, %v9656_v19, 0.0 }
 0x2dd   : > { %v2696_v52 = vsub.f32 %v9475_v54, %v2606_v37  ;;  %v2583_v14 = vpop.f32.mrf.mxu0  ;;  %2791 = vadd.xlane.f32.xlu1 %v2790_v34 }
 0x2df   : > { %v2730_v29 = vmul.f32 1.442695, %v2696_v52 }
 0x2e1   : > { %7817 = vpow2.f32 %v2730_v29  ;;  %v2360_v23 = vpop.f32.mrf.mxu3 }
 0x2e2   : > { %v9667_v46 = vadd.f32 %v2360_v23, %v9664_v13  ;;  %v2609_v37 = vpop.xlane.xlu2 %2608 }
 0x2e3   : > { %v2596_v14 = vpop.f32.mrf.mxu1  ;;  %v2697_v49 = vsub.f32 %v9490_v53, %v2609_v37  ;;  %v1097_v53 = vrot.slane %v9461_v21, 1 }
 0x2e4   : > { %v2612_v17 = vpop.xlane.xlu1 %2611  ;;  %v2637_v28 = vsel %vm1663_vm7, %v9667_v46, -inf }
 0x2e5   : > { %v2698_v54 = vsub.f32 %v9487_v6, %v2612_v17  ;;  %2638 = vmax.xlane.f32.xlu0 %v2637_v28  ;;  %v2732_v10 = vmul.f32 1.442695, %v2697_v49  ;;  %v9687_v14 = vperm.slane %v1097_v53, 0  ;;  %v1101_v53 = vrot.slane %v9461_v21, 5 }
 0x2e7   : > { %v9673_v18 = vpop.eup %7817  ;;  %v2734_v52 = vmul.f32 1.442695, %v2698_v54  ;;  %13372 = vst [vmem:[#allocation116_spill] sm:$0xff] %v9687_v14 }
 0x2e8   : > { %v2796_v34 = vsel %vm1663_vm7, %v9673_v18, 0.0 }
 0x2e9   : > { %7819 = vpow2.f32 %v2734_v52  ;;  %2797 = vadd.xlane.f32.xlu2 %v2796_v34  ;;  %v2362_v29 = vpop.f32.mrf.mxu3 }
 0x2ea   : > { %7821 = vpow2.f32 %v2732_v10 }
 0x2ec   : > { %v2618_v6 = vpop.xlane.xlu0 %2617 }
 0x2ed   : > { %v2700_v23 = vsub.f32 %v9504_v36, %v2618_v6 }
 0x2ef   : > { %v9679_v17 = vpop.eup %7819  ;;  %v2738_v49 = vmul.f32 1.442695, %v2700_v23 }
 0x2f0   : > { %v9681_v37 = vpop.eup %7821  ;;  %v2802_v28 = vsel %vm1663_vm7, %v9679_v17, 0.0  ;;  %v2624_v52 = vpop.xlane.xlu1 %2623 }
 0x2f1   : > { %2803 = vadd.xlane.f32.xlu2 %v2802_v28  ;;  %v2799_v54 = vsel %vm1663_vm7, %v9681_v37, 0.0  ;;  %v2412_v10 = vpop.f32.mrf.mxu3  ;;  %7823 = vpow2.f32 %v2738_v49  ;;  %v2702_v34 = vsub.f32 %v9516_v0, %v2624_v52  ;;  %v1099_v52 = vrot.slane %v9461_v21, 3 }
 0x2f2   : > { %2800 = vadd.xlane.f32.xlu0 %v2799_v54  ;;  %v9690_v36 = vadd.f32 %v2412_v10, %v9687_v14  ;;  %v9700_v10 = vperm.slane %v1101_v53, 0  ;;  %v1070_v14 = vld [vmem:[%s9425_s29 + $0x18] sm:$0xff] }
 0x2f3   : > { %v2742_v6 = vmul.f32 1.442695, %v2702_v34  ;;  %v1102_v34 = vrot.slane %v9461_v21, 6  ;;  %v9713_v53 = vperm.slane %v1099_v52, 0  ;;  %vm1074_vm9 = vcmp.gt.f32.partialorder %v1070_v14, 0.0 }
 0x2f4   : > { %v2649_v29 = vsel %vm1663_vm7, %v9690_v36, -inf  ;;  %13373 = vst [vmem:[#allocation117_spill] sm:$0xff] %v9700_v10 }
 0x2f5   : > { %2650 = vmax.xlane.f32.xlu1 %v2649_v29  ;;  %7825 = vpow2.f32 %v2742_v6  ;;  %13374 = vst [vmem:[#allocation118_spill] sm:$0xff] %v9713_v53  ;;  %v9720_v13 = vadd.f32 %v9591_v60, %v9713_v53 }
 0x2f7   : > { %v9695_v23 = vpop.eup %7823  ;;  %v2655_v52 = vsel %vm1663_vm7, %v9720_v13, -inf }
 0x2f8   : > { %v2808_v54 = vsel %vm1663_vm7, %v9695_v23, 0.0 }
 0x2f9   : > { %v2414_v28 = vpop.f32.mrf.mxu3 }
 0x2fb   : > { %v9702_v49 = vpop.eup %7825 }
 0x2fc   : > { %v2814_v6 = vsel %vm1663_vm7, %v9702_v49, 0.0  ;;  %v2630_v62 = vpop.xlane.xlu1 %2629 }
 0x2fd   : > { %2809 = vadd.xlane.f32.xlu1 %v2808_v54  ;;  %v9715_v54 = vperm.slane %v1102_v34, 0  ;;  %v2704_v9 = vsub.f32 %v9534_v27, %v2630_v62 }
 0x2ff   : > { %13375 = vst [vmem:[#allocation119_spill] sm:$0xff] %v9715_v54 }
 0x301   : > { %v2464_v0 = vpop.f32.mrf.mxu3 }
 0x302   : > { %v9707_v29 = vadd.f32 %v2464_v0, %v9700_v10  ;;  %v9724_v0 = vadd.f32 %v9600_v50, %v9715_v54  ;;  %v2636_v54 = vpop.xlane.xlu2 %2635 }
 0x304   : > { %v2661_v28 = vsel %vm1663_vm7, %v9707_v29, -inf  ;;  %v2664_v47 = vsel %vm1663_vm7, %v9724_v0, -inf }
 0x305   : > { %2815 = vadd.xlane.f32.xlu1 %v2814_v6  ;;  %2662 = vmax.xlane.f32.xlu0 %v2661_v28  ;;  %v13376_v6 = vmov -1e+30  }
 0x306   : > { %v9731_v34 = vsel %vm1074_vm9, 0.0, %v13376_v6 }
 0x307   : > { %13377 = vst [vmem:[#allocation120_spill] sm:$0xff] %v9731_v34  ;;  %v13172_v60 = vperm.slane %v9731_v34, 0 }
 0x309   : > { %v2466_v10 = vpop.f32.mrf.mxu3  ;;  %v9737_v50 = vadd.f32 %v9610_v63, %v13172_v60  ;;  %v1100_v63 = vrot.slane %v9461_v21, 4 }
 0x30b   : > { %v2670_v14 = vsel %vm1663_vm7, %v9737_v50, -inf }
 0x30d   : > { %2665 = vmax.xlane.f32.xlu1 %v2664_v47  ;;  %2656 = vmax.xlane.f32.xlu0 %v2655_v52 }
 0x311   : > { %v2516_v10 = vpop.f32.mrf.mxu3 }
 0x315   : > { %2671 = vmax.xlane.f32.xlu1 %v2670_v14 }
 0x319   : > { %v2518_v28 = vpop.f32.mrf.mxu3 }
 0x31a   : > { %v9750_v28 = vperm.slane %v1100_v63, 0 }
 0x31c   : > { %v9742_v35 = vpop.xlane.xlu2 %2653  ;;  %13378 = vst [vmem:[#allocation121_spill] sm:$0xff] %v9750_v28 }
 0x321   : > { %v2568_v53 = vpop.f32.mrf.mxu3 }
 0x328   : > { %v2603_v8 = vpop.xlane.xlu0 %2602 }
 0x329   : > { %v2695_v6 = vsub.f32 %v9598_v48, %v2603_v8  ;;  %v2570_v47 = vpop.f32.mrf.mxu3  ;;  %v9754_v48 = vadd.f32 %v9589_v22, %v9750_v28  ;;  %v2746_v22 = vmul.f32 1.442695, %v2704_v9  ;;  %v1104_v28 = vrot.slane %v9731_v34, 1 }
 0x32b   : > { %v2728_v52 = vmul.f32 1.442695, %v2695_v6  ;;  %v2658_v63 = vsel %vm1663_vm7, %v9754_v48, -inf }
 0x32d   : > { %7827 = vpow2.f32 %v2728_v52 }
 0x330   : > { %v2621_v39 = vpop.xlane.xlu0 %2620 }
 0x331   : > { %v2701_v57 = vsub.f32 %v9608_v20, %v2621_v39 }
 0x333   : > { %v9745_v60 = vpop.eup %7827  ;;  %v2740_v8 = vmul.f32 1.442695, %v2701_v57  ;;  %v2642_v57 = vpop.xlane.xlu1 %2641 }
 0x334   : > { %v2793_v14 = vsel %vm1663_vm7, %v9745_v60, 0.0 }
 0x335   : > { %2794 = vadd.xlane.f32.xlu2 %v2793_v14  ;;  %7829 = vpow2.f32 %v2740_v8 }
 0x338   : > { %v2633_v6 = vpop.xlane.xlu0 %2632  ;;  %v2615_v47 = vpop.xlane.xlu2 %2614 }
 0x339   : > { %v2705_v52 = vsub.f32 %v9624_v25, %v2633_v6  ;;  %v2699_v55 = vsub.f32 %v9627_v5, %v2615_v47  ;;  %v1108_v25 = vrot.slane %v9731_v34, 5  ;;  %v9776_v6 = vperm.slane %v1104_v28, 0 }
 0x33b   : > { %v2748_v39 = vmul.f32 1.442695, %v2705_v52  ;;  %v2736_v20 = vmul.f32 1.442695, %v2699_v55  ;;  %v9761_v14 = vpop.eup %7829  ;;  %v2706_v55 = vsub.f32 %v9545_v44, %v2636_v54  ;;  %13379 = vst [vmem:[#allocation122_spill] sm:$0xff] %v9776_v6  ;;  %v9778_v47 = vperm.slane %v1108_v25, 0  ;;  %v2645_v44 = vpop.xlane.xlu1 %2644 }
 0x33c   : > { %v2811_v62 = vsel %vm1663_vm7, %v9761_v14, 0.0 }
 0x33d   : > { %7831 = vpow2.f32 %v2748_v39  ;;  %2659 = vmax.xlane.f32.xlu2 %v2658_v63  ;;  %13380 = vst [vmem:[#allocation123_spill] sm:$0xff] %v9778_v47  ;;  %v2750_v52 = vmul.f32 1.442695, %v2706_v55  ;;  %v9781_v39 = vadd.f32 %v2516_v10, %v9776_v6  ;;  %v9784_v54 = vadd.f32 %v2568_v53, %v9778_v47  ;;  %v13381_v10 = vld [vmem:[#allocation56_spill] sm:$0xff] }
 0x33e   : > { %7833 = vpow2.f32 %v2736_v20 }
 0x33f   : > { %7835 = vpow2.f32 %v2746_v22  ;;  %v2685_v28 = vsel %vm1663_vm7, %v9784_v54, -inf  ;;  %v2673_v25 = vsel %vm1663_vm7, %v9781_v39, -inf }
 0x340   : > { %7837 = vpow2.f32 %v2750_v52  ;;  %v2648_v55 = vpop.xlane.xlu0 %2647  ;;  %v1103_v52 = vrot.slane %v9461_v21, 7 }
 0x343   : > { %v9765_v5 = vpop.eup %7831 }
 0x344   : > { %v9767_v8 = vpop.eup %7833  ;;  %v2823_v27 = vsel %vm1663_vm7, %v9765_v5, 0.0 }
 0x345   : > { %2824 = vadd.xlane.f32.xlu1 %v2823_v27  ;;  %2812 = vadd.xlane.f32.xlu2 %v2811_v62  ;;  %v2805_v9 = vsel %vm1663_vm7, %v9767_v8, 0.0  ;;  %v9787_v22 = vpop.eup %7835 }
 0x346   : > { %2806 = vadd.xlane.f32.xlu0 %v2805_v9  ;;  %v2820_v53 = vsel %vm1663_vm7, %v9787_v22, 0.0  ;;  %v9799_v9 = vpop.eup %7837 }
 0x348   : > { %v2627_v20 = vpop.xlane.xlu2 %2626 }
 0x349   : > { %v2703_v63 = vsub.f32 %v9650_v33, %v2627_v20  ;;  %v9797_v33 = vadd.f32 %v13381_v10, %v9347_v41  ;;  %v2708_v20 = vsub.f32 %v9562_v1, %v2642_v57  ;;  %v9812_v10 = vperm.slane %v1103_v52, 0 }
 0x34b   : > { %v2744_v27 = vmul.f32 1.442695, %v2703_v63  ;;  %13382 = vst [vmem:[#allocation56_spill] sm:$0xff] %v9797_v33  ;;  %v9818_v47 = vadd.f32 %v9613_v7, %v9812_v10 }
 0x34c   : > { %13383 = vst [vmem:[#allocation124_spill] sm:$0xff] %v9812_v10 }
 0x34d   : > { %7839 = vpow2.f32 %v2744_v27  ;;  %2686 = vmax.xlane.f32.xlu1 %v2685_v28  ;;  %2674 = vmax.xlane.f32.xlu2 %v2673_v25  ;;  %v1105_v27 = vrot.slane %v9731_v34, 2  ;;  %v2958_v28 = vmul.f32 %v8687_v3, %v9797_v33 }
 0x34e   : > { %2821 = vadd.xlane.f32.xlu0 %v2820_v53  ;;  %v2826_v53 = vsel %vm1663_vm7, %v9799_v9, 0.0 }
 0x34f   : > { %v9814_v1 = vperm.slane %v1105_v27, 0  ;;  %v2990_v57 = vpack.c.bf16 %v2958_v28, %v2958_v28  ;;  %v2710_v28 = vsub.f32 %v9637_v45, %v2648_v55 }
 0x350   : > { %v2792_v62 = vpop.xlane.xlu1 %2791 }
 0x351   : > { %7841 = vrcp.f32 %v2792_v62  ;;  %v2754_v62 = vmul.f32 1.442695, %v2708_v20  ;;  %v9827_v52 = vadd.f32 %v9629_v42, %v9814_v1  ;;  %v2709_v20 = vsub.f32 %v9574_v56, %v2645_v44 }
 0x352   : > { %v3203_v59 = vsel %vm3049_vm4, %v2990_v57, 0  ;;  %v2667_v42 = vsel %vm1663_vm7, %v9818_v47, -inf  ;;  %v2960_v56 = vmul.f32 %v8687_v3, %v9823_v4  ;;  %v13386_v57 = vld [vmem:[#allocation62_spill] sm:$0xff] }
 0x353   : > { %v9803_v63 = vpop.eup %7839  ;;  %7843 = vpow2.f32 %v2754_v62  ;;  %v2676_v45 = vsel %vm1663_vm7, %v9827_v52, -inf }
 0x354   : > { %v2817_v25 = vsel %vm1663_vm7, %v9803_v63, 0.0  ;;  %v2992_v62 = vpack.c.bf16 %v2960_v56, %v2960_v56 }
 0x355   : > { %2818 = vadd.xlane.f32.xlu2 %v2817_v25 }
 0x356   : > { %2827 = vadd.xlane.f32.xlu0 %v2826_v53 }
 0x357   : > { %v7842_v21 = vpop.eup %7841 }
 0x358   : > { %v2918_v6 = vmul.f32 %v7842_v21, %v9656_v19  ;;  %v2639_v33 = vpop.xlane.xlu0 %2638  ;;  %v1107_v19 = vrot.slane %v9731_v34, 4 }
 0x359   : > { %v2707_v27 = vsub.f32 %v9667_v46, %v2639_v33  ;;  %v2756_v46 = vmul.f32 1.442695, %v2709_v20  ;;  %v9843_v33 = vpop.eup %7843  ;;  %v9851_v20 = vadd.f32 %v13386_v57, %v9347_v41 }
 0x35a   : > { %v3014_v7 = vpack.c.bf16 %v2918_v6, %v2918_v6  ;;  %v2758_v6 = vmul.f32 1.442695, %v2710_v28  ;;  %v9841_v44 = vperm.slane %v1107_v19, 0  ;;  %v13387_v19 = vld [vmem:[#allocation60_spill] sm:$0xff] }
 0x35b   : > { %v2752_v53 = vmul.f32 1.442695, %v2707_v27  ;;  %v1106_v27 = vrot.slane %v9731_v34, 3 }
 0x35c   : > { %v2798_v25 = vpop.xlane.xlu2 %2797  ;;  %7444 = vmatmul.msk.bf16.vlgmr.msra.gmra.mxu2 %vm1663_vm7, %v3014_v7  ;;  %13385 = vst [vmem:[#allocation59_spill] sm:$0xff] %v9841_v44  ;;  %v9847_v21 = vadd.f32 %v9639_v11, %v9841_v44  ;;  %v2712_v11 = vsub.f32 %v9585_v32, %v9742_v35  ;;  %v3241_v35 = vsel %vm3049_vm4, %v2992_v62, 0  ;;  %v1109_v62 = vrot.slane %v9731_v34, 6 }
 0x35d   : > { %7845 = vrcp.f32 %v2798_v25  ;;  %3212 = vmatpush.bf16.msra.mxu2 %v3203_v59  ;;  %2668 = vmax.xlane.f32.xlu2 %v2667_v42 }
 0x35e   : > { %7847 = vpow2.f32 %v2752_v53  ;;  %2677 = vmax.xlane.f32.xlu0 %v2676_v45  ;;  %v9859_v53 = vadd.f32 %v13387_v19, %v9347_v41  ;;  %v2962_v45 = vmul.f32 %v8687_v3, %v9851_v20  ;;  %v2762_v57 = vmul.f32 1.442695, %v2712_v11 }
 0x35f   : > { %7849 = vpow2.f32 %v2756_v46  ;;  %v2682_v46 = vsel %vm1663_vm7, %v9847_v21, -inf }
 0x360   : > { %7851 = vpow2.f32 %v2758_v6  ;;  %v9871_v6 = vperm.slane %v1106_v27, 0 }
 0x362   : > { %13388 = vst [vmem:[#allocation62_spill] sm:$0xff] %v9871_v6 }
 0x363   : > { %v7846_v55 = vpop.eup %7845 }
 0x364   : > { %v2920_v28 = vmul.f32 %v7846_v55, %v9673_v18  ;;  %v2804_v7 = vpop.xlane.xlu2 %2803  ;;  %v9855_v25 = vpop.eup %7847  ;;  %v2832_v18 = vsel %vm1663_vm7, %v9843_v33, 0.0  ;;  %v2961_v55 = vmul.f32 %v8687_v3, %v9859_v53 }
 0x365   : > { %v2801_v59 = vpop.xlane.xlu0 %2800  ;;  %7853 = vrcp.f32 %v2804_v7  ;;  %v2829_v56 = vsel %vm1663_vm7, %v9855_v25, 0.0  ;;  %2833 = vadd.xlane.f32.xlu2 %v2832_v18  ;;  %v9875_v32 = vpop.eup %7849  ;;  %v9883_v7 = vadd.f32 %v9641_v31, %v9871_v6 }
 0x366   : > { %v3016_v42 = vpack.c.bf16 %v2920_v28, %v2920_v28  ;;  %7855 = vrcp.f32 %v2801_v59  ;;  %2830 = vadd.xlane.f32.xlu1 %v2829_v56  ;;  %2683 = vmax.xlane.f32.xlu0 %v2682_v46  ;;  %v9879_v28 = vpop.eup %7851  ;;  %v2994_v56 = vpack.c.bf16 %v2962_v45, %v2962_v45  ;;  %v2993_v46 = vpack.c.bf16 %v2961_v55, %v2961_v55  ;;  %v13389_v55 = vld [vmem:[#allocation66_spill] sm:$0xff] }
 0x367   : > { %7857 = vpow2.f32 %v2762_v57  ;;  %v2679_v31 = vsel %vm1663_vm7, %v9883_v7, -inf  ;;  %v2838_v6 = vsel %vm1663_vm7, %v9879_v28, 0.0  ;;  %v9903_v57 = vadd.f32 %v13389_v55, %v9347_v41 }
 0x368   : > { %7446 = vmatmul.msk.bf16.vlgmr.msrb.gmra.mxu0 %vm1663_vm7, %v3016_v42  ;;  %v2651_v27 = vpop.xlane.xlu1 %2650  ;;  %v3260_v45 = vsel %vm3049_vm4, %v2993_v46, 0 }
 0x369   : > { %3250 = vmatpush.bf16.msrb.mxu0 %v3241_v35  ;;  %v2711_v59 = vsub.f32 %v9690_v36, %v2651_v27  ;;  %v2835_v36 = vsel %vm1663_vm7, %v9875_v32, 0.0 }
 0x36b   : > { %v7854_v19 = vpop.eup %7853  ;;  %v2760_v35 = vmul.f32 1.442695, %v2711_v59 }
 0x36c   : > { %v7856_v42 = vpop.eup %7855  ;;  %v2922_v18 = vmul.f32 %v7854_v19, %v9679_v17  ;;  %v9895_v17 = vperm.slane %v1109_v62, 0 }
 0x36d   : > { %v2921_v11 = vmul.f32 %v7856_v42, %v9681_v37  ;;  %7859 = vpow2.f32 %v2760_v35  ;;  %2839 = vadd.xlane.f32.xlu2 %v2838_v6  ;;  %v3279_v37 = vsel %vm3049_vm4, %v2994_v56, 0  ;;  %v9909_v19 = vpop.eup %7857 }
 0x36e   : > { %v3018_v44 = vpack.c.bf16 %v2922_v18, %v2922_v18  ;;  %2680 = vmax.xlane.f32.xlu1 %v2679_v31  ;;  %2836 = vadd.xlane.f32.xlu0 %v2835_v36  ;;  %v9907_v27 = vadd.f32 %v9652_v38, %v9895_v17  ;;  %v2844_v59 = vsel %vm1663_vm7, %v9909_v19, 0.0  ;;  %v13390_v18 = vld [vmem:[#allocation69_spill] sm:$0xff] }
 0x36f   : > { %v3017_v10 = vpack.c.bf16 %v2921_v11, %v2921_v11  ;;  %v9923_v46 = vadd.f32 %v13390_v18, %v9347_v41  ;;  %v13392_v11 = vperm.slane %v9444_v12, 0 }
 0x370   : > { %7448 = vmatmul.msk.bf16.vlgmr.msrb.gmra.mxu2 %vm1663_vm7, %v3018_v44  ;;  %v2810_v6 = vpop.xlane.xlu1 %2809  ;;  %v2688_v38 = vsel %vm1663_vm7, %v9907_v27, -inf }
 0x371   : > { %7447 = vmatmul.msk.bf16.vlgmr.msrb.gmra.mxu1 %vm1663_vm7, %v3017_v10  ;;  %3288 = vmatpush.bf16.msrb.mxu2 %v3279_v37  ;;  %7861 = vrcp.f32 %v2810_v6  ;;  %v2964_v10 = vmul.f32 %v8687_v3, %v9903_v57  ;;  %13391 = vst [vmem:[#allocation60_spill] sm:$0xff] %v9923_v46  ;;  %v9928_v35 = vadd.f32 %v9234_v40, %v13392_v11 }
 0x372   : > { %3269 = vmatpush.bf16.msrb.mxu1 %v3260_v45  ;;  %v13393_v45 = vld [vmem:[#allocation63_spill] sm:$0xff]  ;;  %v2966_v12 = vmul.f32 %v8687_v3, %v9923_v46 }
 0x373   : > { %v9911_v44 = vpop.eup %7859  ;;  %v2996_v62 = vpack.c.bf16 %v2964_v10, %v2964_v10  ;;  %v9933_v55 = vadd.f32 %v13393_v45, %v9594_v43 }
 0x374   : > { %v2841_v42 = vsel %vm1663_vm7, %v9911_v44, 0.0 }
 0x375   : > { %2689 = vmax.xlane.f32.xlu2 %v2688_v38  ;;  %v3317_v40 = vsel %vm3049_vm4, %v2996_v62, 0  ;;  %v1667_v43 = vsel %vm1663_vm7, %v9933_v55, -inf }
 0x376   : > { %2845 = vadd.xlane.f32.xlu1 %v2844_v59  ;;  %2842 = vadd.xlane.f32.xlu0 %v2841_v42  ;;  %v1110_v59 = vrot.slane %v9731_v34, 7 }
 0x377   : > { %v7862_v56 = vpop.eup %7861 }
 0x378   : > { %v2924_v31 = vmul.f32 %v7862_v56, %v9695_v23  ;;  %v2816_v36 = vpop.xlane.xlu1 %2815  ;;  %v2663_v37 = vpop.xlane.xlu0 %2662  ;;  %v1664_v23 = vsel %vm1663_vm7, %v9928_v35, -inf  ;;  %v9945_v38 = vperm.slane %v1110_v59, 0  ;;  %v2998_v56 = vpack.c.bf16 %v2966_v12, %v2966_v12 }
 0x379   : > { %7863 = vrcp.f32 %v2816_v36  ;;  %v2715_v6 = vsub.f32 %v9707_v29, %v2663_v37 }
 0x37a   : > { %v3020_v10 = vpack.c.bf16 %v2924_v31, %v2924_v31  ;;  %13394 = vst [vmem:[#allocation66_spill] sm:$0xff] %v9945_v38  ;;  %v9950_v62 = vadd.f32 %v9659_v58, %v9945_v38  ;;  %v3355_v59 = vsel %vm3049_vm4, %v2998_v56, 0  ;;  %v13396_v56 = vld [vmem:[#allocation58_spill] sm:$0xff] }
 0x37b   : > { %v2768_v42 = vmul.f32 1.442695, %v2715_v6 }
 0x37c   : > { %7450 = vmatmul.msk.bf16.vlgmr.msra.gmra.mxu0 %vm1663_vm7, %v3020_v10  ;;  %v2691_v58 = vsel %vm1663_vm7, %v9950_v62, -inf }
 0x37d   : > { %7865 = vpow2.f32 %v2768_v42  ;;  %3326 = vmatpush.bf16.msra.mxu0 %v3317_v40  ;;  %1665 = vmax.xlane.f32.xlu2 %v1664_v23  ;;  %v13395_v23 = vld [vmem:[#allocation72_spill] sm:$0xff] }
 0x37e   : > { %1668 = vmax.xlane.f32.xlu0 %v1667_v43  ;;  %v9972_v43 = vadd.f32 %v13395_v23, %v9484_v15 }
 0x37f   : > { %v7864_v29 = vpop.eup %7863 }
 0x380   : > { %v2926_v18 = vmul.f32 %v7864_v29, %v9702_v49  ;;  %v2666_v11 = vpop.xlane.xlu1 %2665  ;;  %v2657_v31 = vpop.xlane.xlu0 %2656  ;;  %v1673_v29 = vsel %vm1663_vm7, %v9972_v43, -inf }
 0x381   : > { %v2716_v36 = vsub.f32 %v9724_v0, %v2666_v11  ;;  %v2713_v37 = vsub.f32 %v9720_v13, %v2657_v31 }
 0x382   : > { %v3022_v45 = vpack.c.bf16 %v2926_v18, %v2926_v18  ;;  %v9978_v18 = vadd.f32 %v13396_v56, %v9347_v41 }
 0x383   : > { %v9954_v6 = vpop.eup %7865  ;;  %v2770_v10 = vmul.f32 1.442695, %v2716_v36  ;;  %v2764_v42 = vmul.f32 1.442695, %v2713_v37 }
 0x384   : > { %7452 = vmatmul.msk.bf16.vlgmr.msra.gmra.mxu2 %vm1663_vm7, %v3022_v45  ;;  %v2853_v49 = vsel %vm1663_vm7, %v9954_v6, 0.0  ;;  %v2959_v31 = vmul.f32 %v8687_v3, %v9978_v18 }
 0x385   : > { %7867 = vpow2.f32 %v2770_v10  ;;  %3364 = vmatpush.bf16.msra.mxu2 %v3355_v59  ;;  %2854 = vadd.xlane.f32.xlu2 %v2853_v49 }
 0x386   : > { %7869 = vpow2.f32 %v2764_v42  ;;  %2692 = vmax.xlane.f32.xlu0 %v2691_v58  ;;  %v2991_v37 = vpack.c.bf16 %v2959_v31, %v2959_v31 }
 0x388   : > { %v3222_v49 = vsel %vm3049_vm4, %v2991_v37, 0  ;;  %v2672_v58 = vpop.xlane.xlu1 %2671 }
 0x38b   : > { %v9962_v13 = vpop.eup %7867 }
 0x38c   : > { %v9964_v0 = vpop.eup %7869  ;;  %v2856_v12 = vsel %vm1663_vm7, %v9962_v13, 0.0 }
 0x38d   : > { %v2847_v40 = vsel %vm1663_vm7, %v9964_v0, 0.0 }
 0x38e   : > { %2857 = vadd.xlane.f32.xlu0 %v2856_v12  ;;  %2848 = vadd.xlane.f32.xlu2 %v2847_v40  ;;  %v13397_v40 = vld [vmem:[#allocation64_spill] sm:$0xff] }
 0x38f   : > { %v9988_v23 = vadd.f32 %v13397_v40, %v9347_v41 }
 0x396   : > { %1674 = vmax.xlane.f32.xlu0 %v1673_v29 }
 0x3a8   : > { %v2795_v11 = vpop.xlane.xlu2 %2794 }
 0x3a9   : > { %7871 = vrcp.f32 %v2795_v11  ;;  %v2718_v11 = vsub.f32 %v9737_v50, %v2672_v58  ;;  %v13401_v58 = vld [vmem:[#allocation75_spill] sm:$0xff] }
 0x3af   : > { %v7872_v36 = vpop.eup %7871 }
 0x3b0   : > { %v2919_v45 = vmul.f32 %v7872_v36, %v9745_v60  ;;  %v2660_v10 = vpop.xlane.xlu2 %2659  ;;  %v13398_v60 = vld [vmem:[#allocation68_spill] sm:$0xff]  ;;  %v2963_v36 = vmul.f32 %v8687_v3, %v9988_v23 }
 0x3b1   : > { %v2714_v15 = vsub.f32 %v9754_v48, %v2660_v10  ;;  %v9992_v56 = vadd.f32 %v13398_v60, %v9347_v41 }
 0x3b2   : > { %v3015_v42 = vpack.c.bf16 %v2919_v45, %v2919_v45  ;;  %v2774_v45 = vmul.f32 1.442695, %v2718_v11  ;;  %v2995_v50 = vpack.c.bf16 %v2963_v36, %v2963_v36 }
 0x3b3   : > { %v2766_v59 = vmul.f32 1.442695, %v2714_v15  ;;  %13399 = vst [vmem:[#allocation69_spill] sm:$0xff] %v9992_v56  ;;  %v2965_v37 = vmul.f32 %v8687_v3, %v9992_v56  ;;  %v13400_v15 = vld [vmem:[#allocation67_spill] sm:$0xff] }
 0x3b4   : > { %7445 = vmatmul.msk.bf16.vlgmr.msra.gmra.mxu3 %vm1663_vm7, %v3015_v42  ;;  %v10005_v42 = vadd.f32 %v13400_v15, %v9467_v24 }
 0x3b5   : > { %7873 = vpow2.f32 %v2766_v59  ;;  %3231 = vmatpush.bf16.msra.mxu3 %v3222_v49 }
 0x3b6   : > { %v1670_v36 = vsel %vm1663_vm7, %v10005_v42, -inf }
 0x3b8   : > { %v2813_v12 = vpop.xlane.xlu2 %2812  ;;  %v2825_v15 = vpop.xlane.xlu1 %2824 }
 0x3b9   : > { %v2807_v29 = vpop.xlane.xlu0 %2806 }
 0x3ba   : > { %7875 = vrcp.f32 %v2807_v29 }
 0x3bb   : > { %v9994_v48 = vpop.eup %7873  ;;  %7877 = vrcp.f32 %v2813_v12  ;;  %v10009_v12 = vadd.f32 %v13401_v58, %v9347_v41 }
 0x3bc   : > { %v2850_v31 = vsel %vm1663_vm7, %v9994_v48, 0.0 }
 0x3bd   : > { %2851 = vadd.xlane.f32.xlu1 %v2850_v31  ;;  %v2997_v31 = vpack.c.bf16 %v2965_v37, %v2965_v37  ;;  %v2968_v58 = vmul.f32 %v8687_v3, %v10009_v12 }
 0x3c0   : > { %v7876_v10 = vpop.eup %7875  ;;  %v2675_v59 = vpop.xlane.xlu2 %2674 }
 0x3c1   : > { %v7878_v49 = vpop.eup %7877  ;;  %v2923_v40 = vmul.f32 %v7876_v10, %v9767_v8  ;;  %v2822_v29 = vpop.xlane.xlu0 %2821  ;;  %v2719_v60 = vsub.f32 %v9781_v39, %v2675_v59  ;;  %v3298_v8 = vsel %vm3049_vm4, %v2995_v50, 0  ;;  %v13402_v10 = vld [vmem:[#allocation73_spill] sm:$0xff] }
 0x3c2   : > { %v2925_v11 = vmul.f32 %v7878_v49, %v9761_v14  ;;  %7879 = vrcp.f32 %v2822_v29  ;;  %v3336_v14 = vsel %vm3049_vm4, %v2997_v31, 0  ;;  %v10026_v59 = vadd.f32 %v13402_v10, %v9347_v41  ;;  %v13406_v29 = vld [vmem:[#allocation80_spill] sm:$0xff] }
 0x3c3   : > { %7881 = vpow2.f32 %v2774_v45  ;;  %v3019_v38 = vpack.c.bf16 %v2923_v40, %v2923_v40  ;;  %v2776_v24 = vmul.f32 1.442695, %v2719_v60  ;;  %v10035_v60 = vadd.f32 %v13406_v29, %v9347_v41 }
 0x3c4   : > { %v3021_v34 = vpack.c.bf16 %v2925_v11, %v2925_v11  ;;  %13403 = vst [vmem:[#allocation63_spill] sm:$0xff] %v10026_v59 }
 0x3c5   : > { %7449 = vmatmul.msk.bf16.vlgmr.msrb.gmra.mxu3 %vm1663_vm7, %v3019_v38  ;;  %1671 = vmax.xlane.f32.xlu1 %v1670_v36  ;;  %7883 = vpow2.f32 %v2776_v24  ;;  %v3000_v38 = vpack.c.bf16 %v2968_v58, %v2968_v58  ;;  %13407 = vst [vmem:[#allocation58_spill] sm:$0xff] %v10035_v60 }
 0x3c6   : > { %7451 = vmatmul.msk.bf16.vlgmr.msra.gmra.mxu1 %vm1663_vm7, %v3021_v34  ;;  %3307 = vmatpush.bf16.msrb.mxu3 %v3298_v8  ;;  %7885 = vrcp.f32 %v2825_v15  ;;  %v13404_v34 = vld [vmem:[#allocation78_spill] sm:$0xff] }
 0x3c7   : > { %3345 = vmatpush.bf16.msra.mxu1 %v3336_v14  ;;  %v10031_v40 = vadd.f32 %v13404_v34, %v9347_v41  ;;  %v3393_v36 = vsel %vm3049_vm4, %v3000_v38, 0  ;;  %v2970_v14 = vmul.f32 %v8687_v3, %v10035_v60 }
 0x3c8   : > { %v7880_v39 = vpop.eup %7879  ;;  %v2819_v37 = vpop.xlane.xlu2 %2818 }
 0x3c9   : > { %v10022_v45 = vpop.eup %7881  ;;  %v2928_v49 = vmul.f32 %v7880_v39, %v9787_v22  ;;  %v2828_v50 = vpop.xlane.xlu0 %2827  ;;  %7887 = vrcp.f32 %v2819_v37  ;;  %13405 = vst [vmem:[#allocation72_spill] sm:$0xff] %v10031_v40  ;;  %v2967_v22 = vmul.f32 %v8687_v3, %v10026_v59  ;;  %v2969_v8 = vmul.f32 %v8687_v3, %v10031_v40 }
 0x3ca   : > { %7889 = vrcp.f32 %v2828_v50  ;;  %v2862_v24 = vsel %vm1663_vm7, %v10022_v45, 0.0  ;;  %v3002_v59 = vpack.c.bf16 %v2970_v14, %v2970_v14 }
 0x3cb   : > { %v3024_v31 = vpack.c.bf16 %v2928_v49, %v2928_v49  ;;  %v10037_v11 = vpop.eup %7883  ;;  %v2687_v49 = vpop.xlane.xlu1 %2686  ;;  %v2999_v34 = vpack.c.bf16 %v2967_v22, %v2967_v22  ;;  %v3001_v40 = vpack.c.bf16 %v2969_v8, %v2969_v8 }
 0x3cc   : > { %v7886_v15 = vpop.eup %7885  ;;  %v2865_v58 = vsel %vm1663_vm7, %v10037_v11, 0.0  ;;  %v2723_v22 = vsub.f32 %v9784_v54, %v2687_v49  ;;  %v13411_v49 = vld [vmem:[#allocation77_spill] sm:$0xff] }
 0x3cd   : > { %7454 = vmatmul.msk.bf16.vlgmr.msrb.gmra.mxu0 %vm1663_vm7, %v3024_v31  ;;  %2863 = vadd.xlane.f32.xlu1 %v2862_v24  ;;  %v2929_v10 = vmul.f32 %v7886_v15, %v9765_v5 }
 0x3ce   : > { %3402 = vmatpush.bf16.msrb.mxu0 %v3393_v36  ;;  %2866 = vadd.xlane.f32.xlu2 %v2865_v58  ;;  %v13408_v58 = vld [vmem:[#allocation87_spill] sm:$0xff] }
 0x3cf   : > { %v7888_v39 = vpop.eup %7887  ;;  %v10058_v60 = vadd.f32 %v13408_v58, %v9501_v51  ;;  %v3025_v56 = vpack.c.bf16 %v2929_v10, %v2929_v10  ;;  %v3412_v51 = vsel %vm3049_vm4, %v3001_v40, 0 }
 0x3d0   : > { %v7890_v37 = vpop.eup %7889  ;;  %v2927_v50 = vmul.f32 %v7888_v39, %v9803_v63  ;;  %v2669_v38 = vpop.xlane.xlu2 %2668  ;;  %v13410_v39 = vld [vmem:[#allocation86_spill] sm:$0xff] }
 0x3d1   : > { %v2930_v29 = vmul.f32 %v7890_v37, %v9799_v9  ;;  %v2678_v31 = vpop.xlane.xlu0 %2677  ;;  %v2717_v24 = vsub.f32 %v9818_v47, %v2669_v38  ;;  %v3374_v47 = vsel %vm3049_vm4, %v2999_v34, 0  ;;  %v3431_v9 = vsel %vm3049_vm4, %v3002_v59, 0 }
 0x3d2   : > { %v3023_v46 = vpack.c.bf16 %v2927_v50, %v2927_v50  ;;  %v2720_v36 = vsub.f32 %v9827_v52, %v2678_v31  ;;  %v1682_v54 = vsel %vm1663_vm7, %v10058_v60, -inf  ;;  %v13409_v52 = vld [vmem:[#allocation83_spill] sm:$0xff]  ;;  %v2784_v37 = vmul.f32 1.442695, %v2723_v22 }
 0x3d3   : > { %v3026_v5 = vpack.c.bf16 %v2930_v29, %v2930_v29  ;;  %v2772_v15 = vmul.f32 1.442695, %v2717_v24  ;;  %v10082_v50 = vadd.f32 %v13411_v49, %v9482_v2 }
 0x3d4   : > { %v2778_v63 = vmul.f32 1.442695, %v2720_v36 }
 0x3d5   : > { %7891 = vpow2.f32 %v2772_v15  ;;  %7453 = vmatmul.msk.bf16.vlgmr.msra.gmra.mxu3 %vm1663_vm7, %v3023_v46  ;;  %7456 = vmatmul.msk.bf16.vlgmr.msrb.gmra.mxu2 %vm1663_vm7, %v3026_v5  ;;  %v10071_v46 = vadd.f32 %v13409_v52, %v9347_v41  ;;  %v1676_v36 = vsel %vm1663_vm7, %v10082_v50, -inf }
 0x3d6   : > { %7893 = vpow2.f32 %v2778_v63  ;;  %7455 = vmatmul.msk.bf16.vlgmr.msrb.gmra.mxu1 %vm1663_vm7, %v3025_v56  ;;  %3383 = vmatpush.bf16.msra.mxu3 %v3374_v47  ;;  %v10075_v56 = vadd.f32 %v13410_v39, %v9347_v41  ;;  %v13412_v63 = vld [vmem:[#allocation88_spill] sm:$0xff]  ;;  %v13413_v47 = vld [vmem:[#allocation89_spill] sm:$0xff] }
 0x3d7   : > { %3421 = vmatpush.bf16.msrb.mxu1 %v3412_v51  ;;  %3440 = vmatpush.bf16.msrb.mxu2 %v3431_v9  ;;  %v2971_v34 = vmul.f32 %v8687_v3, %v10071_v46  ;;  %v10100_v22 = vadd.f32 %v13412_v63, %v9347_v41  ;;  %v10104_v51 = vadd.f32 %v13413_v47, %v9347_v41 }
 0x3d8   : > { %1683 = vmax.xlane.f32.xlu1 %v1682_v54  ;;  %v2834_v14 = vpop.xlane.xlu2 %2833  ;;  %v2972_v24 = vmul.f32 %v8687_v3, %v10075_v56 }
 0x3d9   : > { %v2831_v8 = vpop.xlane.xlu1 %2830  ;;  %v2684_v40 = vpop.xlane.xlu0 %2683  ;;  %v3003_v15 = vpack.c.bf16 %v2971_v34, %v2971_v34 }
 0x3da   : > { %7895 = vrcp.f32 %v2831_v8  ;;  %v2722_v59 = vsub.f32 %v9847_v21, %v2684_v40  ;;  %v3004_v8 = vpack.c.bf16 %v2972_v24, %v2972_v24  ;;  %v13414_v40 = vld [vmem:[#allocation82_spill] sm:$0xff] }
 0x3db   : > { %7897 = vrcp.f32 %v2834_v14  ;;  %v10078_v10 = vpop.eup %7891 }
 0x3dc   : > { %v10084_v38 = vpop.eup %7893  ;;  %v2782_v29 = vmul.f32 1.442695, %v2722_v59  ;;  %v2859_v31 = vsel %vm1663_vm7, %v10078_v10, 0.0  ;;  %7899 = vpow2.f32 %v2784_v37  ;;  %v10111_v59 = vadd.f32 %v13414_v40, %v9620_v30 }
 0x3dd   : > { %v2868_v21 = vsel %vm1663_vm7, %v10084_v38, 0.0  ;;  %2860 = vadd.xlane.f32.xlu2 %v2859_v31  ;;  %v3450_v30 = vsel %vm3049_vm4, %v3003_v15, 0  ;;  %v3469_v24 = vsel %vm3049_vm4, %v3004_v8, 0 }
 0x3de   : > { %7901 = vpow2.f32 %v2782_v29  ;;  %2869 = vadd.xlane.f32.xlu0 %v2868_v21 }
 0x3df   : > { %v10096_v58 = vpop.f32.mrf.mxu2 }
 0x3e0   : > { %v7896_v2 = vpop.eup %7895  ;;  %1677 = vmax.xlane.f32.xlu1 %v1676_v36  ;;  %v2840_v52 = vpop.xlane.xlu2 %2839  ;;  %v1679_v36 = vsel %vm1663_vm7, %v10111_v59, -inf }
 0x3e1   : > { %v7898_v5 = vpop.eup %7897  ;;  %v2931_v9 = vmul.f32 %v7896_v2, %v9855_v25  ;;  %v2681_v54 = vpop.xlane.xlu1 %2680  ;;  %7903 = vrcp.f32 %v2840_v52  ;;  %v10135_v52 = vadd.f32 %v9209_v16, %v9347_v41 }
 0x3e2   : > { %v2932_v14 = vmul.f32 %v7898_v5, %v9843_v33  ;;  %v2721_v39 = vsub.f32 %v9883_v7, %v2681_v54  ;;  %v2837_v37 = vpop.xlane.xlu0 %2836  ;;  %v10113_v34 = vpop.eup %7899  ;;  %v2973_v33 = vmul.f32 %v8687_v3, %v10100_v22  ;;  %v2974_v7 = vmul.f32 %v8687_v3, %v10104_v51 }
 0x3e3   : > { %v3027_v49 = vpack.c.bf16 %v2931_v9, %v2931_v9  ;;  %7905 = vrcp.f32 %v2837_v37  ;;  %v2877_v63 = vsel %vm1663_vm7, %v10113_v34, 0.0  ;;  %13415 = vst [vmem:[#allocation64_spill] sm:$0xff] %v10135_v52  ;;  %v10140_v37 = vadd.f32 %v9232_v26, %v9347_v41 }
 0x3e4   : > { %v3028_v29 = vpack.c.bf16 %v2932_v14, %v2932_v14  ;;  %v2780_v25 = vmul.f32 1.442695, %v2721_v39  ;;  %v10117_v21 = vpop.eup %7901  ;;  %v3005_v54 = vpack.c.bf16 %v2973_v33, %v2973_v33  ;;  %v3006_v15 = vpack.c.bf16 %v2974_v7, %v2974_v7 }
 0x3e5   : > { %v10115_v31 = vpop.f32.mrf.mxu0  ;;  %7457 = vmatmul.msk.bf16.vlgmr.msrb.gmra.mxu3 %vm1663_vm7, %v3027_v49  ;;  %v2874_v2 = vsel %vm1663_vm7, %v10117_v21, 0.0  ;;  %1680 = vmax.xlane.f32.xlu2 %v1679_v36 }
 0x3e6   : > { %7907 = vpow2.f32 %v2780_v25  ;;  %7458 = vmatmul.msk.bf16.vlgmr.msra.gmra.mxu0 %vm1663_vm7, %v3028_v29  ;;  %3459 = vmatpush.bf16.msrb.mxu3 %v3450_v30  ;;  %v13416_v25 = vld [vmem:[#allocation99_spill] sm:$0xff]  ;;  %v3507_v26 = vsel %vm3049_vm4, %v3006_v15, 0  ;;  %v3488_v36 = vsel %vm3049_vm4, %v3005_v54, 0 }
 0x3e7   : > { %3478 = vmatpush.bf16.msra.mxu0 %v3469_v24  ;;  %v7904_v5 = vpop.eup %7903  ;;  %2875 = vadd.xlane.f32.xlu0 %v2874_v2  ;;  %v3064_v47 = vpop.f32.mrf.mxu2  ;;  %v10146_v33 = vadd.f32 %v13416_v25, %v9530_v61  ;;  %v2975_v61 = vmul.f32 %v8687_v3, %v10135_v52 }
 0x3e8   : > { %v2934_v8 = vmul.f32 %v7904_v5, %v9879_v28  ;;  %2878 = vadd.xlane.f32.xlu1 %v2877_v63  ;;  %v2690_v39 = vpop.xlane.xlu2 %2689 }
 0x3e9   : > { %v7906_v9 = vpop.eup %7905  ;;  %v2846_v14 = vpop.xlane.xlu1 %2845  ;;  %v2724_v29 = vsub.f32 %v9907_v27, %v2690_v39  ;;  %v2976_v27 = vmul.f32 %v8687_v3, %v10140_v37  ;;  %v1694_v5 = vsel %vm1663_vm7, %v10146_v33, -inf }
 0x3ea   : > { %v2933_v40 = vmul.f32 %v7906_v9, %v9875_v32  ;;  %7909 = vrcp.f32 %v2846_v14  ;;  %v2843_v49 = vpop.xlane.xlu0 %2842  ;;  %v3030_v16 = vpack.c.bf16 %v2934_v8, %v2934_v8  ;;  %v3007_v8 = vpack.c.bf16 %v2975_v61, %v2975_v61 }
 0x3eb   : > { %7911 = vrcp.f32 %v2843_v49  ;;  %v2786_v30 = vmul.f32 1.442695, %v2724_v29  ;;  %v3008_v14 = vpack.c.bf16 %v2976_v27, %v2976_v27 }
 0x3ec   : > { %v10148_v28 = vpop.eup %7907  ;;  %v3029_v7 = vpack.c.bf16 %v2933_v40, %v2933_v40  ;;  %7460 = vmatmul.msk.bf16.vlgmr.msra.gmra.mxu2 %vm1663_vm7, %v3030_v16 }
 0x3ed   : > { %v3102_v24 = vpop.f32.mrf.mxu0  ;;  %v2871_v32 = vsel %vm1663_vm7, %v10148_v28, 0.0  ;;  %7913 = vpow2.f32 %v2786_v30  ;;  %3516 = vmatpush.bf16.msra.mxu2 %v3507_v26  ;;  %1695 = vmax.xlane.f32.xlu2 %v1694_v5  ;;  %v13419_v5 = vld [vmem:[#allocation112_spill] sm:$0xff] }
 0x3ee   : > { %v10150_v2 = vpop.f32.mrf.mxu1  ;;  %7459 = vmatmul.msk.bf16.vlgmr.msra.gmra.mxu1 %vm1663_vm7, %v3029_v7 }
 0x3ef   : > { %3497 = vmatpush.bf16.msra.mxu1 %v3488_v36  ;;  %2872 = vadd.xlane.f32.xlu0 %v2871_v32  ;;  %v13417_v32 = vld [vmem:[#allocation95_spill] sm:$0xff] }
 0x3f0   : > { %v7910_v63 = vpop.eup %7909  ;;  %v1666_v15 = vpop.xlane.xlu2 %1665  ;;  %v10180_v61 = vadd.f32 %v13417_v32, %v9347_v41 }
 0x3f1   : > { %v7912_v47 = vpop.eup %7911  ;;  %v2936_v9 = vmul.f32 %v7910_v63, %v9909_v19  ;;  %v1760_v49 = vsub.f32 %v9928_v35, %v1666_v15  ;;  %v3545_v35 = vsel %vm3049_vm4, %v3008_v14, 0  ;;  %v13420_v63 = vld [vmem:[#allocation90_spill] sm:$0xff] }
 0x3f2   : > { %v2935_v39 = vmul.f32 %v7912_v47, %v9911_v44  ;;  %v1669_v40 = vpop.xlane.xlu0 %1668  ;;  %v3526_v44 = vsel %vm3049_vm4, %v3007_v8, 0  ;;  %13418 = vst [vmem:[#allocation68_spill] sm:$0xff] %v10180_v61  ;;  %v10184_v47 = vadd.f32 %v13420_v63, %v13419_v5 }
 0x3f3   : > { %v10167_v54 = vpop.f32.mrf.mxu2  ;;  %v3032_v29 = vpack.c.bf16 %v2936_v9, %v2936_v9  ;;  %v1761_v25 = vsub.f32 %v9933_v55, %v1669_v40  ;;  %v10170_v16 = vpop.eup %7913  ;;  %v1792_v30 = vmul.f32 1.442695, %v1760_v49  ;;  %v2979_v49 = vmul.f32 %v8687_v3, %v10180_v61 }
 0x3f4   : > { %v3031_v7 = vpack.c.bf16 %v2935_v39, %v2935_v39  ;;  %v2880_v19 = vsel %vm1663_vm7, %v10170_v16, 0.0 }
 0x3f5   : > { %v1794_v24 = vmul.f32 1.442695, %v1761_v25  ;;  %7915 = vpow2.f32 %v1792_v30  ;;  %2881 = vadd.xlane.f32.xlu1 %v2880_v19  ;;  %v13422_v30 = vld [vmem:[#allocation51_spill] sm:$0xff]  ;;  %v3011_v19 = vpack.c.bf16 %v2979_v49, %v2979_v49 }
 0x3f6   : > { %v3121_v26 = vpop.f32.mrf.mxu1  ;;  %7461 = vmatmul.msk.bf16.vlgmr.msra.gmra.mxu3 %vm1663_vm7, %v3031_v7  ;;  %7462 = vmatmul.msk.bf16.vlgmr.msrb.gmra.mxu0 %vm1663_vm7, %v3032_v29  ;;  %v13421_v7 = vld [vmem:[#allocation108_spill] sm:$0xff] }
 0x3f7   : > { %7917 = vpow2.f32 %v1794_v24  ;;  %3535 = vmatpush.bf16.msra.mxu3 %v3526_v44  ;;  %3554 = vmatpush.bf16.msrb.mxu0 %v3545_v35  ;;  %v10203_v24 = vadd.f32 %v13422_v30, %v13421_v7  ;;  %v13423_v44 = vld [vmem:[#allocation96_spill] sm:$0xff]  ;;  %v13427_v7 = vld [vmem:[#allocation55_spill] sm:$0xff] }
 0x3f8   : > { %v2855_v55 = vpop.xlane.xlu2 %2854  ;;  %v10208_v35 = vadd.f32 %v13423_v44, %v9347_v41  ;;  %v13428_v30 = vperm.slane %v13427_v7, 0 }
 0x3f9   : > { %7919 = vrcp.f32 %v2855_v55  ;;  %v10187_v15 = vpop.f32.mrf.mxu0 }
 0x3fa   : > { %v2693_v27 = vpop.xlane.xlu0 %2692 }
 0x3fb   : > { %v3140_v36 = vpop.f32.mrf.mxu2  ;;  %v2725_v9 = vsub.f32 %v9950_v62, %v2693_v27  ;;  %v10189_v8 = vpop.eup %7915  ;;  %v1685_v62 = vsel %vm1663_vm7, %v10184_v47, -inf  ;;  %v13424_v27 = vld [vmem:[#allocation92_spill] sm:$0xff] }
 0x3fc   : > { %v1856_v40 = vsel %vm1663_vm7, %v10189_v8, 0.0  ;;  %v10212_v36 = vadd.f32 %v13424_v27, %v9347_v41 }
 0x3fd   : > { %v10191_v14 = vpop.eup %7917  ;;  %v2788_v39 = vmul.f32 1.442695, %v2725_v9  ;;  %1857 = vadd.xlane.f32.xlu2 %v1856_v40  ;;  %1686 = vmax.xlane.f32.xlu1 %v1685_v62  ;;  %v3602_v40 = vsel %vm3049_vm4, %v3011_v19, 0 }
 0x3fe   : > { %v1859_v29 = vsel %vm1663_vm7, %v10191_v14, 0.0  ;;  %13425 = vst [vmem:[#allocation67_spill] sm:$0xff] %v10212_v36 }
 0x3ff   : > { %7921 = vpow2.f32 %v2788_v39  ;;  %1860 = vadd.xlane.f32.xlu0 %v1859_v29  ;;  %v7920_v25 = vpop.eup %7919  ;;  %v2980_v39 = vmul.f32 %v8687_v3, %v10208_v35  ;;  %v2977_v29 = vmul.f32 %v8687_v3, %v10212_v36 }
 0x400   : > { %v2939_v26 = vmul.f32 %v7920_v25, %v9954_v6  ;;  %v1706_v6 = vsel %vm1663_vm7, %v10203_v24, -inf }
 0x401   : > { %v2849_v32 = vpop.xlane.xlu2 %2848  ;;  %v3178_v63 = vpop.f32.mrf.mxu0  ;;  %v3009_v36 = vpack.c.bf16 %v2977_v29, %v2977_v29 }
 0x402   : > { %v2858_v55 = vpop.xlane.xlu0 %2857  ;;  %v3035_v5 = vpack.c.bf16 %v2939_v26, %v2939_v26  ;;  %v13429_v26 = vld [vmem:[#allocation91_spill] sm:$0xff]  ;;  %v13431_v63 = vld [vmem:[#allocation94_spill] sm:$0xff] }
 0x403   : > { %7923 = vrcp.f32 %v2858_v55  ;;  %v10231_v44 = vadd.f32 %v13429_v26, %v13428_v30 }
 0x404   : > { %7925 = vrcp.f32 %v2849_v32  ;;  %v3012_v32 = vpack.c.bf16 %v2980_v39, %v2980_v39  ;;  %v3564_v39 = vsel %vm3049_vm4, %v3009_v36, 0 }
 0x405   : > { %v10214_v9 = vpop.eup %7921  ;;  %1707 = vmax.xlane.f32.xlu2 %v1706_v6  ;;  %v1688_v30 = vsel %vm1663_vm7, %v10231_v44, -inf }
 0x406   : > { %7465 = vmatmul.msk.bf16.vlgmr.msrb.gmra.mxu3 %vm1663_vm7, %v3035_v5  ;;  %v2883_v49 = vsel %vm1663_vm7, %v10214_v9, 0.0  ;;  %v13430_v5 = vld [vmem:[#allocation114_spill] sm:$0xff] }
 0x407   : > { %3611 = vmatpush.bf16.msrb.mxu3 %v3602_v40  ;;  %2884 = vadd.xlane.f32.xlu0 %v2883_v49  ;;  %v10226_v62 = vpop.f32.mrf.mxu2  ;;  %v10236_v6 = vadd.f32 %v13431_v63, %v13430_v5 }
 0x408   : > { %13426 = vst [vmem:[#allocation75_spill] sm:$0xff] %v10226_v62 }
 0x409   : > { %v7924_v25 = vpop.eup %7923 }
 0x40a   : > { %v7926_v55 = vpop.eup %7925  ;;  %v2940_v19 = vmul.f32 %v7924_v25, %v9962_v13  ;;  %v1675_v27 = vpop.xlane.xlu0 %1674  ;;  %v3621_v13 = vsel %vm3049_vm4, %v3012_v32, 0  ;;  %v13432_v25 = vld [vmem:[#allocation93_spill] sm:$0xff] }
 0x40b   : > { %v2937_v40 = vmul.f32 %v7926_v55, %v9964_v0  ;;  %v1763_v49 = vsub.f32 %v9972_v43, %v1675_v27  ;;  %v1691_v0 = vsel %vm1663_vm7, %v10236_v6, -inf  ;;  %v10254_v26 = vadd.f32 %v13432_v25, %v9347_v41 }
 0x40c   : > { %v3036_v61 = vpack.c.bf16 %v2940_v19, %v2940_v19 }
 0x40d   : > { %v3033_v62 = vpack.c.bf16 %v2937_v40, %v2937_v40  ;;  %v1798_v7 = vmul.f32 1.442695, %v1763_v49  ;;  %1689 = vmax.xlane.f32.xlu2 %v1688_v30  ;;  %13433 = vst [vmem:[#allocation73_spill] sm:$0xff] %v10254_v26  ;;  %v2978_v36 = vmul.f32 %v8687_v3, %v10254_v26 }
 0x40e   : > { %7466 = vmatmul.msk.bf16.vlgmr.msra.gmra.mxu0 %vm1663_vm7, %v3036_v61 }
 0x40f   : > { %7927 = vpow2.f32 %v1798_v7  ;;  %7463 = vmatmul.msk.bf16.vlgmr.msrb.gmra.mxu1 %vm1663_vm7, %v3033_v62  ;;  %3630 = vmatpush.bf16.msra.mxu0 %v3621_v13  ;;  %v3216_v43 = vpop.f32.mrf.mxu2  ;;  %v3010_v19 = vpack.c.bf16 %v2978_v36, %v2978_v36 }
 0x410   : > { %3573 = vmatpush.bf16.msrb.mxu1 %v3564_v39  ;;  %1692 = vmax.xlane.f32.xlu0 %v1691_v0 }
 0x411   : > { %v3583_v7 = vsel %vm3049_vm4, %v3010_v19, 0 }
 0x415   : > { %v10248_v29 = vpop.eup %7927 }
 0x416   : > { %v1865_v61 = vsel %vm1663_vm7, %v10248_v29, 0.0 }
 0x417   : > { %1866 = vadd.xlane.f32.xlu2 %v1865_v61  ;;  %v13435_v61 = vld [vmem:[#allocation39_spill] sm:$0xff] }
 0x430   : > { %v2852_v62 = vpop.xlane.xlu1 %2851 }
 0x431   : > { %7929 = vrcp.f32 %v2852_v62  ;;  %v13436_v62 = vld [vmem:[#allocation48_spill] sm:$0xff] }
 0x432   : > { %v2017_v36 = vmul.f32 %v13435_v61, %v13436_v62 }
 0x437   : > { %v7930_v55 = vpop.eup %7929  ;;  %v10258_v32 = vpop.f32.mrf.mxu3 }
 0x438   : > { %v2938_v27 = vmul.f32 %v7930_v55, %v9994_v48  ;;  %v1672_v5 = vpop.xlane.xlu1 %1671  ;;  %v13434_v48 = vld [vmem:[#allocation65_spill] sm:$0xff] }
 0x439   : > { %v1762_v63 = vsub.f32 %v10005_v42, %v1672_v5  ;;  %v2016_v42 = vmul.f32 %v13435_v61, %v13434_v48 }
 0x43a   : > { %v3034_v40 = vpack.c.bf16 %v2938_v27, %v2938_v27 }
 0x43b   : > { %v1796_v49 = vmul.f32 1.442695, %v1762_v63  ;;  %v2048_v27 = vpack.c.bf16 %v2016_v42, %v2016_v42 }
 0x43c   : > { %7464 = vmatmul.msk.bf16.vlgmr.msrb.gmra.mxu2 %vm1663_vm7, %v3034_v40  ;;  %v2049_v40 = vpack.c.bf16 %v2017_v36, %v2017_v36 }
 0x43d   : > { %7931 = vpow2.f32 %v1796_v49  ;;  %3592 = vmatpush.bf16.msrb.mxu2 %v3583_v7  ;;  %v13437_v49 = vld [vmem:[#allocation111_spill] sm:$0xff]  ;;  %v13438_v7 = vld [vmem:[#allocation97_spill] sm:$0xff] }
 0x43e   : > { %v3678_v42 = vsel %vm3049_vm4, %v2049_v40, 0 }
 0x43f   : > { %v3083_v30 = vpop.f32.mrf.mxu3 }
 0x440   : > { %v2864_v13 = vpop.xlane.xlu1 %2863  ;;  %v10279_v30 = vadd.f32 %v13438_v7, %v13437_v49 }
 0x441   : > { %7933 = vrcp.f32 %v2864_v13  ;;  %v2867_v39 = vpop.xlane.xlu2 %2866 }
 0x442   : > { %7935 = vrcp.f32 %v2867_v39 }
 0x443   : > { %v10264_v0 = vpop.eup %7931  ;;  %v10266_v43 = vpop.f32.mrf.mxu1 }
 0x444   : > { %v1862_v25 = vsel %vm1663_vm7, %v10264_v0, 0.0 }
 0x445   : > { %1863 = vadd.xlane.f32.xlu1 %v1862_v25 }
 0x447   : > { %v7934_v55 = vpop.eup %7933 }
 0x448   : > { %v7936_v19 = vpop.eup %7935  ;;  %v2942_v5 = vmul.f32 %v7934_v55, %v10022_v45  ;;  %v10275_v63 = vpop.f32.mrf.mxu3  ;;  %v3659_v45 = vsel %vm3049_vm4, %v2048_v27, 0  ;;  %v13439_v55 = vld [vmem:[#allocation100_spill] sm:$0xff] }
 0x449   : > { %v2943_v13 = vmul.f32 %v7936_v19, %v10037_v11  ;;  %v1718_v11 = vsel %vm1663_vm7, %v10279_v30, -inf  ;;  %v10293_v19 = vadd.f32 %v13439_v55, %v9347_v41 }
 0x44a   : > { %v3038_v39 = vpack.c.bf16 %v2942_v5, %v2942_v5  ;;  %v10282_v48 = vpop.f32.mrf.mxu0 }
 0x44b   : > { %v3039_v26 = vpack.c.bf16 %v2943_v13, %v2943_v13  ;;  %v1684_v62 = vpop.xlane.xlu1 %1683  ;;  %v3197_v25 = vpop.f32.mrf.mxu1  ;;  %13440 = vst [vmem:[#allocation78_spill] sm:$0xff] %v10293_v19  ;;  %v2981_v40 = vmul.f32 %v8687_v3, %v10293_v19  ;;  %v13441_v13 = vld [vmem:[#allocation85_spill] sm:$0xff] }
 0x44c   : > { %v1766_v52 = vsub.f32 %v10058_v60, %v1684_v62  ;;  %7468 = vmatmul.msk.bf16.vlgmr.msra.gmra.mxu2 %vm1663_vm7, %v3038_v39  ;;  %v2018_v39 = vmul.f32 %v13435_v61, %v13441_v13 }
 0x44d   : > { %7469 = vmatmul.msk.bf16.vlgmr.msra.gmra.mxu3 %vm1663_vm7, %v3039_v26  ;;  %3668 = vmatpush.bf16.msra.mxu2 %v3659_v45 }
 0x44e   : > { %v1804_v36 = vmul.f32 1.442695, %v1766_v52  ;;  %3687 = vmatpush.bf16.msra.mxu3 %v3678_v42  ;;  %1719 = vmax.xlane.f32.xlu1 %v1718_v11  ;;  %v3013_v11 = vpack.c.bf16 %v2981_v40, %v2981_v40 }
 0x450   : > { %7937 = vpow2.f32 %v1804_v36  ;;  %v3159_v60 = vpop.f32.mrf.mxu3  ;;  %v2861_v5 = vpop.xlane.xlu2 %2860 }
 0x451   : > { %v2870_v49 = vpop.xlane.xlu0 %2869  ;;  %7939 = vrcp.f32 %v2861_v5 }
 0x452   : > { %7941 = vrcp.f32 %v2870_v49  ;;  %v3254_v26 = vpop.f32.mrf.mxu0 }
 0x453   : > { %v1678_v27 = vpop.xlane.xlu1 %1677  ;;  %v10295_v7 = vpop.f32.mrf.mxu1 }
 0x454   : > { %v1764_v52 = vsub.f32 %v10082_v50, %v1678_v27  ;;  %v2050_v50 = vpack.c.bf16 %v2018_v39, %v2018_v39  ;;  %v13443_v27 = vld [vmem:[#allocation113_spill] sm:$0xff]  ;;  %v3640_v39 = vsel %vm3049_vm4, %v3013_v11, 0 }
 0x456   : > { %v10302_v41 = vpop.eup %7937  ;;  %v1800_v62 = vmul.f32 1.442695, %v1764_v52  ;;  %v13444_v52 = vld [vmem:[#allocation102_spill] sm:$0xff] }
 0x457   : > { %v7940_v25 = vpop.eup %7939  ;;  %v1874_v45 = vsel %vm1663_vm7, %v10302_v41, 0.0  ;;  %v10314_v13 = vadd.f32 %v13444_v52, %v13443_v27 }
 0x458   : > { %v7942_v42 = vpop.eup %7941  ;;  %7943 = vpow2.f32 %v1800_v62  ;;  %v2941_v36 = vmul.f32 %v7940_v25, %v10078_v10  ;;  %1875 = vadd.xlane.f32.xlu0 %v1874_v45  ;;  %v10307_v55 = vpop.f32.mrf.mxu3 }
 0x459   : > { %v10309_v3 = vpop.f32.mrf.mxu2  ;;  %v2944_v60 = vmul.f32 %v7942_v42, %v10084_v38  ;;  %v1681_v26 = vpop.xlane.xlu2 %1680  ;;  %v3697_v38 = vsel %vm3049_vm4, %v2050_v50, 0  ;;  %v13445_v42 = vld [vmem:[#allocation70_spill] sm:$0xff] }
 0x45a   : > { %13442 = vst [vmem:[#allocation80_spill] sm:$0xff] %v10309_v3  ;;  %v3037_v5 = vpack.c.bf16 %v2941_v36, %v2941_v36  ;;  %v2876_v49 = vpop.xlane.xlu0 %2875  ;;  %v1765_v10 = vsub.f32 %v10111_v59, %v1681_v26  ;;  %v2020_v36 = vmul.f32 %v13435_v61, %v13445_v42  ;;  %v13451_v3 = vld [vmem:[#allocation74_spill] sm:$0xff] }
 0x45b   : > { %v3040_v19 = vpack.c.bf16 %v2944_v60, %v2944_v60  ;;  %7945 = vrcp.f32 %v2876_v49  ;;  %v2879_v40 = vpop.xlane.xlu1 %2878  ;;  %v3273_v62 = vpop.f32.mrf.mxu1  ;;  %v13446_v60 = vld [vmem:[#allocation53_spill] sm:$0xff] }
 0x45c   : > { %7947 = vrcp.f32 %v2879_v40  ;;  %7467 = vmatmul.msk.bf16.vlgmr.msra.gmra.mxu1 %vm1663_vm7, %v3037_v5  ;;  %v1802_v25 = vmul.f32 1.442695, %v1765_v10  ;;  %v2021_v59 = vmul.f32 %v13435_v61, %v13446_v60  ;;  %v1697_v5 = vsel %vm1663_vm7, %v10314_v13, -inf }
 0x45d   : > { %7470 = vmatmul.msk.bf16.vlgmr.msrb.gmra.mxu0 %vm1663_vm7, %v3040_v19  ;;  %3649 = vmatpush.bf16.msra.mxu1 %v3640_v39  ;;  %v2052_v27 = vpack.c.bf16 %v2020_v36, %v2020_v36  ;;  %v13447_v39 = vld [vmem:[#allocation115_spill] sm:$0xff] }
 0x45e   : > { %v10321_v45 = vpop.eup %7943  ;;  %3706 = vmatpush.bf16.msrb.mxu0 %v3697_v38  ;;  %7949 = vpow2.f32 %v1802_v25  ;;  %v2053_v52 = vpack.c.bf16 %v2021_v59, %v2021_v59  ;;  %v13448_v25 = vld [vmem:[#allocation45_spill] sm:$0xff] }
 0x45f   : > { %v1868_v11 = vsel %vm1663_vm7, %v10321_v45, 0.0  ;;  %v10334_v38 = vadd.f32 %v13448_v25, %v13447_v39  ;;  %v2019_v39 = vmul.f32 %v13435_v61, %v13451_v3 }
 0x460   : > { %1698 = vmax.xlane.f32.xlu0 %v1697_v5  ;;  %1869 = vadd.xlane.f32.xlu1 %v1868_v11  ;;  %v3235_v19 = vpop.f32.mrf.mxu3  ;;  %v13449_v11 = vld [vmem:[#allocation119_spill] sm:$0xff] }
 0x461   : > { %v3292_v50 = vpop.f32.mrf.mxu2  ;;  %v7946_v49 = vpop.eup %7945  ;;  %v13450_v19 = vld [vmem:[#allocation103_spill] sm:$0xff] }
 0x462   : > { %v7948_v26 = vpop.eup %7947  ;;  %v2946_v40 = vmul.f32 %v7946_v49, %v10117_v21  ;;  %v2873_v10 = vpop.xlane.xlu0 %2872  ;;  %v10342_v50 = vadd.f32 %v13450_v19, %v13449_v11  ;;  %v13453_v11 = vld [vmem:[#allocation106_spill] sm:$0xff]  ;;  %v13454_v19 = vld [vmem:[#allocation105_spill] sm:$0xff] }
 0x463   : > { %v1696_v62 = vpop.xlane.xlu2 %1695  ;;  %v2947_v42 = vmul.f32 %v7948_v26, %v10113_v34  ;;  %7951 = vrcp.f32 %v2873_v10  ;;  %v10338_v5 = vpop.f32.mrf.mxu0  ;;  %v3735_v34 = vsel %vm3049_vm4, %v2052_v27, 0  ;;  %v3754_v26 = vsel %vm3049_vm4, %v2053_v52, 0 }
 0x464   : > { %v1770_v60 = vsub.f32 %v10146_v33, %v1696_v62  ;;  %v3042_v36 = vpack.c.bf16 %v2946_v40, %v2946_v40  ;;  %v10344_v59 = vpop.eup %7949  ;;  %v1703_v40 = vsel %vm1663_vm7, %v10334_v38, -inf  ;;  %v1730_v3 = vsel %vm1663_vm7, %v10342_v50, -inf }
 0x465   : > { %v3043_v21 = vpack.c.bf16 %v2947_v42, %v2947_v42  ;;  %v1871_v33 = vsel %vm1663_vm7, %v10344_v59, 0.0  ;;  %v2051_v62 = vpack.c.bf16 %v2019_v39, %v2019_v39 }
 0x466   : > { %v1812_v49 = vmul.f32 1.442695, %v1770_v60  ;;  %7472 = vmatmul.msk.bf16.vlgmr.msrb.gmra.mxu2 %vm1663_vm7, %v3042_v36  ;;  %1872 = vadd.xlane.f32.xlu2 %v1871_v33  ;;  %v10365_v36 = vadd.f32 %v13454_v19, %v13453_v11 }
 0x467   : > { %7473 = vmatmul.msk.bf16.vlgmr.msrb.gmra.mxu3 %vm1663_vm7, %v3043_v21  ;;  %3744 = vmatpush.bf16.msrb.mxu2 %v3735_v34  ;;  %v13455_v34 = vld [vmem:[#allocation52_spill] sm:$0xff]  ;;  %v3716_v39 = vsel %vm3049_vm4, %v2051_v62, 0 }
 0x468   : > { %7953 = vpow2.f32 %v1812_v49  ;;  %3763 = vmatpush.bf16.msrb.mxu3 %v3754_v26  ;;  %1704 = vmax.xlane.f32.xlu0 %v1703_v40  ;;  %v10358_v10 = vpop.f32.mrf.mxu3  ;;  %v2882_v42 = vpop.xlane.xlu1 %2881  ;;  %v2022_v26 = vmul.f32 %v13435_v61, %v13455_v34  ;;  %v1700_v40 = vsel %vm1663_vm7, %v10365_v36, -inf }
 0x469   : > { %v7952_v27 = vpop.eup %7951  ;;  %1731 = vmax.xlane.f32.xlu1 %v1730_v3  ;;  %7955 = vrcp.f32 %v2882_v42 }
 0x46a   : > { %v2945_v25 = vmul.f32 %v7952_v27, %v10148_v28 }
 0x46b   : > { %v10361_v60 = vpop.f32.mrf.mxu1  ;;  %v3330_v52 = vpop.f32.mrf.mxu0 }
 0x46c   : > { %13452 = vst [vmem:[#allocation87_spill] sm:$0xff] %v10361_v60  ;;  %v3041_v21 = vpack.c.bf16 %v2945_v25, %v2945_v25  ;;  %v2054_v52 = vpack.c.bf16 %v2022_v26, %v2022_v26  ;;  %v2025_v26 = vmul.f32 %v13435_v61, %v9978_v18 }
 0x46e   : > { %v10367_v49 = vpop.eup %7953  ;;  %7471 = vmatmul.msk.bf16.vlgmr.msrb.gmra.mxu1 %vm1663_vm7, %v3041_v21  ;;  %1701 = vmax.xlane.f32.xlu2 %v1700_v40  ;;  %v2057_v18 = vpack.c.bf16 %v2025_v26, %v2025_v26 }
 0x46f   : > { %v1886_v28 = vsel %vm1663_vm7, %v10367_v49, 0.0  ;;  %3725 = vmatpush.bf16.msrb.mxu1 %v3716_v39  ;;  %v10375_v33 = vpop.f32.mrf.mxu2  ;;  %v7956_v25 = vpop.eup %7955  ;;  %v13457_v39 = vld [vmem:[#allocation56_spill] sm:$0xff] }
 0x470   : > { %13456 = vst [vmem:[#allocation83_spill] sm:$0xff] %v10375_v33  ;;  %v3311_v3 = vpop.f32.mrf.mxu3  ;;  %v1858_v27 = vpop.xlane.xlu2 %1857  ;;  %v2948_v11 = vmul.f32 %v7956_v25, %v10170_v16  ;;  %v2024_v33 = vmul.f32 %v13435_v61, %v13457_v39  ;;  %v3773_v16 = vsel %vm3049_vm4, %v2054_v52, 0 }
 0x471   : > { %1887 = vadd.xlane.f32.xlu1 %v1886_v28  ;;  %7957 = vrcp.f32 %v1858_v27  ;;  %v1687_v62 = vpop.xlane.xlu1 %1686  ;;  %v13458_v3 = vld [vmem:[#allocation57_spill] sm:$0xff] }
 0x472   : > { %v1861_v42 = vpop.xlane.xlu0 %1860  ;;  %v1767_v21 = vsub.f32 %v10184_v47, %v1687_v62  ;;  %v10387_v60 = vadd.f32 %v13458_v3, %v9814_v1  ;;  %v3044_v28 = vpack.c.bf16 %v2948_v11, %v2948_v11 }
 0x473   : > { %7959 = vrcp.f32 %v1861_v42  ;;  %v3349_v19 = vpop.f32.mrf.mxu1  ;;  %v10381_v34 = vpop.f32.mrf.mxu0  ;;  %v2056_v42 = vpack.c.bf16 %v2024_v33, %v2024_v33 }
 0x474   : > { %v1806_v40 = vmul.f32 1.442695, %v1767_v21  ;;  %7474 = vmatmul.msk.bf16.vlgmr.msra.gmra.mxu0 %vm1663_vm7, %v3044_v28  ;;  %v1742_v1 = vsel %vm1663_vm7, %v10387_v60, -inf }
 0x475   : > { %3782 = vmatpush.bf16.msra.mxu0 %v3773_v16  ;;  %v13459_v16 = vld [vmem:[#allocation109_spill] sm:$0xff] }
 0x476   : > { %7961 = vpow2.f32 %v1806_v40  ;;  %1743 = vmax.xlane.f32.xlu2 %v1742_v1 }
 0x477   : > { %v7958_v27 = vpop.eup %7957  ;;  %v3368_v47 = vpop.f32.mrf.mxu2 }
 0x478   : > { %v1984_v62 = vmul.f32 %v7958_v27, %v10189_v8  ;;  %v1708_v19 = vpop.xlane.xlu2 %1707  ;;  %v13460_v8 = vld [vmem:[#allocation71_spill] sm:$0xff]  ;;  %v3811_v47 = vsel %vm3049_vm4, %v2056_v42, 0 }
 0x479   : > { %v7960_v25 = vpop.eup %7959  ;;  %v10396_v11 = vpop.f32.mrf.mxu3  ;;  %v1774_v52 = vsub.f32 %v10203_v24, %v1708_v19  ;;  %v10402_v27 = vadd.f32 %v13460_v8, %v13459_v16  ;;  %v3830_v24 = vsel %vm3049_vm4, %v2057_v18, 0  ;;  %v13462_v8 = vld [vmem:[#allocation50_spill] sm:$0xff] }
 0x47a   : > { %v1985_v21 = vmul.f32 %v7960_v25, %v10191_v14  ;;  %v2885_v39 = vpop.xlane.xlu0 %2884  ;;  %v2080_v3 = vpack.c.bf16 %v1984_v62, %v1984_v62  ;;  %v13461_v14 = vld [vmem:[#allocation81_spill] sm:$0xff] }
 0x47b   : > { %7963 = vrcp.f32 %v2885_v39  ;;  %v1820_v40 = vmul.f32 1.442695, %v1774_v52  ;;  %v3406_v33 = vpop.f32.mrf.mxu0  ;;  %v2023_v25 = vmul.f32 %v13435_v61, %v13461_v14  ;;  %v1709_v42 = vsel %vm1663_vm7, %v10402_v27, -inf }
 0x47c   : > { %v2081_v28 = vpack.c.bf16 %v1985_v21, %v1985_v21  ;;  %7476 = vmatmul.msk.bf16.vlgmr.msra.gmra.mxu2 %vm1663_vm7, %v2080_v3  ;;  %v10406_v26 = vpop.eup %7961 }
 0x47d   : > { %7965 = vpow2.f32 %v1820_v40  ;;  %3820 = vmatpush.bf16.msra.mxu2 %v3811_v47  ;;  %v1877_v62 = vsel %vm1663_vm7, %v10406_v26, 0.0  ;;  %v2055_v39 = vpack.c.bf16 %v2023_v25, %v2023_v25  ;;  %v10423_v47 = vadd.f32 %v13462_v8, %v9895_v17 }
 0x47e   : > { %7477 = vmatmul.msk.bf16.vlgmr.msra.gmra.mxu3 %vm1663_vm7, %v2081_v28  ;;  %1878 = vadd.xlane.f32.xlu0 %v1877_v62 }
 0x47f   : > { %3839 = vmatpush.bf16.msra.mxu3 %v3830_v24  ;;  %1710 = vmax.xlane.f32.xlu2 %v1709_v42 }
 0x480   : > { %v1690_v21 = vpop.xlane.xlu2 %1689 }
 0x481   : > { %v7964_v1 = vpop.eup %7963  ;;  %v3387_v19 = vpop.f32.mrf.mxu3  ;;  %v1768_v3 = vsub.f32 %v10231_v44, %v1690_v21  ;;  %v1754_v44 = vsel %vm1663_vm7, %v10423_v47, -inf  ;;  %v2027_v21 = vmul.f32 %v13435_v61, %v9859_v53 }
 0x482   : > { %v2949_v52 = vmul.f32 %v7964_v1, %v10214_v9  ;;  %v3792_v9 = vsel %vm3049_vm4, %v2055_v39, 0 }
 0x483   : > { %v1693_v28 = vpop.xlane.xlu0 %1692  ;;  %v10418_v40 = vpop.eup %7965  ;;  %v1808_v16 = vmul.f32 1.442695, %v1768_v3 }
 0x484   : > { %v3045_v18 = vpack.c.bf16 %v2949_v52, %v2949_v52  ;;  %v1769_v33 = vsub.f32 %v10236_v6, %v1693_v28  ;;  %v1898_v14 = vsel %vm1663_vm7, %v10418_v40, 0.0  ;;  %v2059_v28 = vpack.c.bf16 %v2027_v21, %v2027_v21 }
 0x485   : > { %7967 = vpow2.f32 %v1808_v16  ;;  %1899 = vadd.xlane.f32.xlu1 %v1898_v14  ;;  %v13464_v16 = vld [vmem:[#allocation54_spill] sm:$0xff]  ;;  %v2026_v21 = vmul.f32 %v13435_v61, %v9823_v4 }
 0x486   : > { %v1810_v25 = vmul.f32 1.442695, %v1769_v33  ;;  %7475 = vmatmul.msk.bf16.vlgmr.msra.gmra.mxu1 %vm1663_vm7, %v3045_v18  ;;  %v13463_v33 = vld [vmem:[#allocation116_spill] sm:$0xff] }
 0x487   : > { %3801 = vmatpush.bf16.msra.mxu1 %v3792_v9  ;;  %1755 = vmax.xlane.f32.xlu2 %v1754_v44  ;;  %v10450_v8 = vadd.f32 %v13464_v16, %v13463_v33  ;;  %v13465_v44 = vld [vmem:[#allocation84_spill] sm:$0xff] }
 0x488   : > { %7969 = vpow2.f32 %v1810_v25  ;;  %v1712_v53 = vsel %vm1663_vm7, %v13465_v44, -inf }
 0x489   : > { %v10431_v6 = vpop.f32.mrf.mxu3 }
 0x48a   : > { %v1867_v17 = vpop.xlane.xlu2 %1866 }
 0x48b   : > { %7971 = vrcp.f32 %v1867_v17  ;;  %v10433_v24 = vpop.f32.mrf.mxu0  ;;  %v10435_v62 = vpop.eup %7967  ;;  %v3868_v17 = vsel %vm3049_vm4, %v2059_v28, 0 }
 0x48c   : > { %v10437_v1 = vpop.f32.mrf.mxu1  ;;  %v1880_v42 = vsel %vm1663_vm7, %v10435_v62, 0.0 }
 0x48d   : > { %1881 = vadd.xlane.f32.xlu0 %v1880_v42  ;;  %v1715_v42 = vsel %vm1663_vm7, %v10450_v8, -inf }
 0x48e   : > { %v10441_v19 = vpop.eup %7969 }
 0x48f   : > { %v1883_v39 = vsel %vm1663_vm7, %v10441_v19, 0.0 }
 0x490   : > { %1884 = vadd.xlane.f32.xlu1 %v1883_v39 }
 0x491   : > { %v7972_v52 = vpop.eup %7971  ;;  %v3463_v3 = vpop.f32.mrf.mxu3 }
 0x492   : > { %v1987_v18 = vmul.f32 %v7972_v52, %v10248_v29  ;;  %v2058_v3 = vpack.c.bf16 %v2026_v21, %v2026_v21 }
 0x493   : > { %v3482_v14 = vpop.f32.mrf.mxu0 }
 0x494   : > { %v2083_v25 = vpack.c.bf16 %v1987_v18, %v1987_v18  ;;  %v3425_v9 = vpop.f32.mrf.mxu1 }
 0x495   : > { %1713 = vmax.xlane.f32.xlu0 %v1712_v53 }
 0x496   : > { %7479 = vmatmul.msk.bf16.vlgmr.msrb.gmra.mxu1 %vm1663_vm7, %v2083_v25  ;;  %v3849_v25 = vsel %vm3049_vm4, %v2058_v3, 0 }
 0x497   : > { %3877 = vmatpush.bf16.msrb.mxu1 %v3868_v17 }
 0x498   : > { %1716 = vmax.xlane.f32.xlu1 %v1715_v42 }
 0x4b8   : > { %v1864_v29 = vpop.xlane.xlu1 %1863 }
 0x4b9   : > { %7973 = vrcp.f32 %v1864_v29 }
 0x4bf   : > { %v7974_v39 = vpop.eup %7973  ;;  %v10460_v52 = vpop.f32.mrf.mxu2 }
 0x4c0   : > { %v1986_v18 = vmul.f32 %v7974_v39, %v10264_v0  ;;  %v2030_v0 = vmul.f32 %v13435_v61, %v9903_v57 }
 0x4c1   : > { %v1720_v33 = vpop.xlane.xlu1 %1719 }
 0x4c2   : > { %v2082_v16 = vpack.c.bf16 %v1986_v18, %v1986_v18  ;;  %v1778_v28 = vsub.f32 %v10279_v30, %v1720_v33  ;;  %v2062_v21 = vpack.c.bf16 %v2030_v0, %v2030_v0 }
 0x4c4   : > { %v1828_v14 = vmul.f32 1.442695, %v1778_v28  ;;  %7478 = vmatmul.msk.bf16.vlgmr.msrb.gmra.mxu0 %vm1663_vm7, %v2082_v16  ;;  %v3925_v57 = vsel %vm3049_vm4, %v2062_v21, 0 }
 0x4c5   : > { %3858 = vmatpush.bf16.msrb.mxu0 %v3849_v25 }
 0x4c6   : > { %7975 = vpow2.f32 %v1828_v14  ;;  %v2028_v14 = vmul.f32 %v13435_v61, %v9851_v20 }
 0x4c7   : > { %v3444_v9 = vpop.f32.mrf.mxu2 }
 0x4cb   : > { %v1876_v53 = vpop.xlane.xlu0 %1875 }
 0x4cc   : > { %v10466_v4 = vpop.eup %7975  ;;  %7977 = vrcp.f32 %v1876_v53 }
 0x4cd   : > { %v1910_v17 = vsel %vm1663_vm7, %v10466_v4, 0.0 }
 0x4ce   : > { %1911 = vadd.xlane.f32.xlu2 %v1910_v17 }
 0x4cf   : > { %v10472_v30 = vpop.f32.mrf.mxu2 }
 0x4d0   : > { %v10474_v42 = vpop.f32.mrf.mxu3 }
 0x4d2   : > { %v7978_v29 = vpop.eup %7977 }
 0x4d3   : > { %v1990_v39 = vmul.f32 %v7978_v29, %v10302_v41  ;;  %v1699_v3 = vpop.xlane.xlu0 %1698  ;;  %v1870_v18 = vpop.xlane.xlu1 %1869 }
 0x4d4   : > { %v1771_v33 = vsub.f32 %v10314_v13, %v1699_v3  ;;  %7979 = vrcp.f32 %v1870_v18  ;;  %v2060_v13 = vpack.c.bf16 %v2028_v14, %v2028_v14 }
 0x4d5   : > { %v2086_v16 = vpack.c.bf16 %v1990_v39, %v1990_v39 }
 0x4d6   : > { %v1814_v28 = vmul.f32 1.442695, %v1771_v33 }
 0x4d7   : > { %7482 = vmatmul.msk.bf16.vlgmr.msra.gmra.mxu0 %vm1663_vm7, %v2086_v16  ;;  %v3520_v25 = vpop.f32.mrf.mxu2 }
 0x4d8   : > { %7981 = vpow2.f32 %v1814_v28  ;;  %3934 = vmatpush.bf16.msra.mxu0 %v3925_v57  ;;  %v3539_v9 = vpop.f32.mrf.mxu3  ;;  %v3887_v57 = vsel %vm3049_vm4, %v2060_v13, 0 }
 0x4d9   : > { %v10482_v53 = vpop.f32.mrf.mxu1  ;;  %v1873_v3 = vpop.xlane.xlu2 %1872 }
 0x4da   : > { %v7980_v41 = vpop.eup %7979  ;;  %v10484_v17 = vpop.f32.mrf.mxu0  ;;  %7983 = vrcp.f32 %v1873_v3 }
 0x4db   : > { %v1988_v0 = vmul.f32 %v7980_v41, %v10321_v45  ;;  %v1705_v29 = vpop.xlane.xlu0 %1704 }
 0x4dc   : > { %v1773_v39 = vsub.f32 %v10334_v38, %v1705_v29  ;;  %v1732_v20 = vpop.xlane.xlu1 %1731  ;;  %v2029_v38 = vmul.f32 %v13435_v61, %v9988_v23 }
 0x4dd   : > { %v2084_v18 = vpack.c.bf16 %v1988_v0, %v1988_v0  ;;  %v1782_v21 = vsub.f32 %v10342_v50, %v1732_v20 }
 0x4de   : > { %v10489_v33 = vpop.eup %7981  ;;  %v1818_v16 = vmul.f32 1.442695, %v1773_v39  ;;  %v2061_v9 = vpack.c.bf16 %v2029_v38, %v2029_v38  ;;  %v13469_v38 = vld [vmem:[#allocation79_spill] sm:$0xff] }
 0x4df   : > { %v1836_v28 = vmul.f32 1.442695, %v1782_v21  ;;  %7480 = vmatmul.msk.bf16.vlgmr.msrb.gmra.mxu2 %vm1663_vm7, %v2084_v18  ;;  %v1889_v45 = vsel %vm1663_vm7, %v10489_v33, 0.0  ;;  %v2034_v21 = vmul.f32 %v13435_v61, %v10009_v12 }
 0x4e0   : > { %7985 = vpow2.f32 %v1818_v16  ;;  %3896 = vmatpush.bf16.msrb.mxu2 %v3887_v57  ;;  %1890 = vadd.xlane.f32.xlu0 %v1889_v45  ;;  %v7984_v25 = vpop.eup %7983  ;;  %v13468_v45 = vld [vmem:[#allocation117_spill] sm:$0xff] }
 0x4e1   : > { %7987 = vpow2.f32 %v1836_v28  ;;  %v3501_v50 = vpop.f32.mrf.mxu1  ;;  %v1989_v41 = vmul.f32 %v7984_v25, %v10344_v59  ;;  %v1702_v29 = vpop.xlane.xlu2 %1701  ;;  %v3906_v59 = vsel %vm3049_vm4, %v2061_v9, 0  ;;  %v13471_v25 = vld [vmem:[#allocation118_spill] sm:$0xff] }
 0x4e2   : > { %v3558_v14 = vpop.f32.mrf.mxu0  ;;  %v1772_v13 = vsub.f32 %v10365_v36, %v1702_v29  ;;  %v10517_v50 = vadd.f32 %v13469_v38, %v13468_v45  ;;  %v13472_v9 = vld [vmem:[#allocation98_spill] sm:$0xff] }
 0x4e3   : > { %v2085_v20 = vpack.c.bf16 %v1989_v41, %v1989_v41  ;;  %v2066_v14 = vpack.c.bf16 %v2034_v21, %v2034_v21  ;;  %v10523_v41 = vadd.f32 %v13472_v9, %v13471_v25 }
 0x4e4   : > { %v1888_v0 = vpop.xlane.xlu1 %1887  ;;  %v1816_v23 = vmul.f32 1.442695, %v1772_v13 }
 0x4e5   : > { %7989 = vrcp.f32 %v1888_v0  ;;  %7481 = vmatmul.msk.bf16.vlgmr.msrb.gmra.mxu3 %vm1663_vm7, %v2085_v20  ;;  %v4001_v21 = vsel %vm3049_vm4, %v2066_v14, 0  ;;  %v13474_v14 = vld [vmem:[#allocation121_spill] sm:$0xff] }
 0x4e6   : > { %v10499_v39 = vpop.eup %7985  ;;  %7991 = vpow2.f32 %v1816_v23  ;;  %3915 = vmatpush.bf16.msrb.mxu3 %v3906_v59  ;;  %v1727_v59 = vsel %vm1663_vm7, %v10517_v50, -inf }
 0x4e7   : > { %v10501_v3 = vpop.eup %7987  ;;  %v1895_v18 = vsel %vm1663_vm7, %v10499_v39, 0.0 }
 0x4e8   : > { %v1922_v16 = vsel %vm1663_vm7, %v10501_v3, 0.0  ;;  %1896 = vadd.xlane.f32.xlu0 %v1895_v18 }
 0x4e9   : > { %1923 = vadd.xlane.f32.xlu1 %v1922_v16  ;;  %v10511_v36 = vpop.f32.mrf.mxu2  ;;  %v1744_v29 = vpop.xlane.xlu2 %1743  ;;  %v1721_v16 = vsel %vm1663_vm7, %v10523_v41, -inf }
 0x4ea   : > { %13466 = vst [vmem:[#allocation86_spill] sm:$0xff] %v10511_v36  ;;  %v10513_v28 = vpop.f32.mrf.mxu3  ;;  %v1786_v13 = vsub.f32 %v10387_v60, %v1744_v29  ;;  %v13481_v36 = vld [vmem:[#allocation104_spill] sm:$0xff] }
 0x4eb   : > { %13467 = vst [vmem:[#allocation77_spill] sm:$0xff] %v10513_v28  ;;  %v7990_v57 = vpop.eup %7989  ;;  %v10519_v12 = vpop.f32.mrf.mxu1  ;;  %v13480_v28 = vld [vmem:[#allocation124_spill] sm:$0xff] }
 0x4ec   : > { %13470 = vst [vmem:[#allocation88_spill] sm:$0xff] %v10519_v12  ;;  %v1994_v0 = vmul.f32 %v7990_v57, %v10367_v49  ;;  %v10527_v23 = vpop.eup %7991  ;;  %v1844_v18 = vmul.f32 1.442695, %v1786_v13 }
 0x4ed   : > { %v1892_v49 = vsel %vm1663_vm7, %v10527_v23, 0.0 }
 0x4ee   : > { %v2090_v20 = vpack.c.bf16 %v1994_v0, %v1994_v0  ;;  %7993 = vpow2.f32 %v1844_v18  ;;  %1893 = vadd.xlane.f32.xlu2 %v1892_v49  ;;  %v13475_v0 = vld [vmem:[#allocation101_spill] sm:$0xff] }
 0x4ef   : > { %v10541_v29 = vadd.f32 %v13475_v0, %v13474_v14  ;;  %v2038_v0 = vmul.f32 %v13435_v61, %v10075_v56 }
 0x4f0   : > { %7486 = vmatmul.msk.bf16.vlgmr.msrb.gmra.mxu0 %vm1663_vm7, %v2090_v20  ;;  %1728 = vmax.xlane.f32.xlu0 %v1727_v59  ;;  %v13476_v20 = vld [vmem:[#allocation69_spill] sm:$0xff] }
 0x4f1   : > { %4010 = vmatpush.bf16.msrb.mxu0 %v4001_v21  ;;  %1722 = vmax.xlane.f32.xlu1 %v1721_v16  ;;  %v3596_v60 = vpop.f32.mrf.mxu2  ;;  %v1879_v45 = vpop.xlane.xlu0 %1878  ;;  %v2031_v18 = vmul.f32 %v13435_v61, %v13476_v20 }
 0x4f2   : > { %v3615_v57 = vpop.f32.mrf.mxu3  ;;  %7995 = vrcp.f32 %v1879_v45  ;;  %v10537_v25 = vpop.f32.mrf.mxu0 }
 0x4f3   : > { %v3577_v38 = vpop.f32.mrf.mxu1  ;;  %13473 = vst [vmem:[#allocation89_spill] sm:$0xff] %v10537_v25  ;;  %v1711_v9 = vpop.xlane.xlu2 %1710  ;;  %v1724_v57 = vsel %vm1663_vm7, %v10541_v29, -inf  ;;  %v2063_v45 = vpack.c.bf16 %v2031_v18, %v2031_v18 }
 0x4f4   : > { %v1775_v13 = vsub.f32 %v10402_v27, %v1711_v9  ;;  %v10546_v59 = vpop.eup %7993 }
 0x4f5   : > { %v1934_v16 = vsel %vm1663_vm7, %v10546_v59, 0.0  ;;  %v3944_v20 = vsel %vm3049_vm4, %v2063_v45, 0 }
 0x4f6   : > { %v1822_v21 = vmul.f32 1.442695, %v1775_v13  ;;  %1725 = vmax.xlane.f32.xlu2 %v1724_v57 }
 0x4f8   : > { %v1900_v49 = vpop.xlane.xlu1 %1899  ;;  %v7996_v60 = vpop.eup %7995  ;;  %7997 = vpow2.f32 %v1822_v21 }
 0x4f9   : > { %1935 = vadd.xlane.f32.xlu1 %v1934_v16  ;;  %v1991_v38 = vmul.f32 %v7996_v60, %v10406_v26  ;;  %7999 = vrcp.f32 %v1900_v49 }
 0x4fa   : > { %v3634_v27 = vpop.f32.mrf.mxu0 }
 0x4fb   : > { %v2087_v9 = vpack.c.bf16 %v1991_v38, %v1991_v38  ;;  %v1756_v14 = vpop.xlane.xlu2 %1755  ;;  %v2070_v38 = vpack.c.bf16 %v2038_v0, %v2038_v0  ;;  %v13479_v0 = vld [vmem:[#allocation63_spill] sm:$0xff] }
 0x4fc   : > { %v1790_v13 = vsub.f32 %v10423_v47, %v1756_v14 }
 0x4fd   : > { %7483 = vmatmul.msk.bf16.vlgmr.msra.gmra.mxu1 %vm1663_vm7, %v2087_v9 }
 0x4fe   : > { %v10558_v21 = vpop.eup %7997  ;;  %v1852_v16 = vmul.f32 1.442695, %v1790_v13  ;;  %3953 = vmatpush.bf16.msra.mxu1 %v3944_v20 }
 0x4ff   : > { %v3670_v18 = vpop.f32.mrf.mxu2  ;;  %v8000_v26 = vpop.eup %7999  ;;  %v1901_v49 = vsel %vm1663_vm7, %v10558_v21, 0.0 }
 0x500   : > { %v10563_v60 = vadd.f32 %v3670_v18, %v10096_v58  ;;  %v1882_v56 = vpop.xlane.xlu0 %1881  ;;  %v1998_v47 = vmul.f32 %v8000_v26, %v10418_v40  ;;  %8001 = vpow2.f32 %v1852_v16  ;;  %1902 = vadd.xlane.f32.xlu2 %v1901_v49  ;;  %v13478_v58 = vld [vmem:[#allocation60_spill] sm:$0xff]  ;;  %v4077_v40 = vsel %vm3049_vm4, %v2070_v38, 0 }
 0x501   : > { %v3689_v57 = vpop.f32.mrf.mxu3  ;;  %8003 = vrcp.f32 %v1882_v56  ;;  %v2032_v20 = vmul.f32 %v13435_v61, %v13478_v58 }
 0x502   : > { %v10567_v45 = vadd.f32 %v3689_v57, %v10258_v32  ;;  %v2094_v14 = vpack.c.bf16 %v1998_v47, %v1998_v47  ;;  %v2033_v32 = vmul.f32 %v13435_v61, %v13479_v0 }
 0x503   : > { %v1885_v27 = vpop.xlane.xlu1 %1884  ;;  %v10569_v9 = vpop.f32.mrf.mxu1 }
 0x504   : > { %13477 = vst [vmem:[#allocation82_spill] sm:$0xff] %v10569_v9  ;;  %8005 = vrcp.f32 %v1885_v27  ;;  %7490 = vmatmul.msk.bf16.vlgmr.msra.gmra.mxu0 %vm1663_vm7, %v2094_v14  ;;  %v2064_v27 = vpack.c.bf16 %v2032_v20, %v2032_v20  ;;  %v2065_v14 = vpack.c.bf16 %v2033_v32, %v2033_v32  ;;  %v13484_v32 = vld [vmem:[#allocation40_spill] sm:$0xff] }
 0x505   : > { %4086 = vmatpush.bf16.msra.mxu0 %v4077_v40 }
 0x506   : > { %v10579_v16 = vpop.eup %8001 }
 0x507   : > { %v3672_v18 = vpop.f32.mrf.mxu2  ;;  %v8004_v26 = vpop.eup %8003  ;;  %v1946_v49 = vsel %vm1663_vm7, %v10579_v16, 0.0 }
 0x508   : > { %v1714_v56 = vpop.xlane.xlu0 %1713  ;;  %v1992_v58 = vmul.f32 %v8004_v26, %v10435_v62  ;;  %1947 = vadd.xlane.f32.xlu0 %v1946_v49  ;;  %v3963_v62 = vsel %vm3049_vm4, %v2064_v27, 0  ;;  %v13485_v49 = vld [vmem:[#allocation122_spill] sm:$0xff] }
 0x509   : > { %v3691_v57 = vpop.f32.mrf.mxu3  ;;  %v1776_v38 = vsub.f32 %v13465_v44, %v1714_v56  ;;  %v13486_v56 = vld [vmem:[#allocation107_spill] sm:$0xff] }
 0x50a   : > { %v8006_v47 = vpop.eup %8005  ;;  %v2088_v9 = vpack.c.bf16 %v1992_v58, %v1992_v58  ;;  %v10589_v57 = vadd.f32 %v13481_v36, %v13480_v28 }
 0x50b   : > { %v1993_v0 = vmul.f32 %v8006_v47, %v10441_v19  ;;  %v1717_v40 = vpop.xlane.xlu1 %1716  ;;  %v3653_v13 = vpop.f32.mrf.mxu1  ;;  %v1824_v25 = vmul.f32 1.442695, %v1776_v38  ;;  %v3982_v19 = vsel %vm3049_vm4, %v2065_v14, 0  ;;  %v10612_v47 = vadd.f32 %v13486_v56, %v13485_v49 }
 0x50c   : > { %v1777_v18 = vsub.f32 %v10450_v8, %v1717_v40  ;;  %7484 = vmatmul.msk.bf16.vlgmr.msra.gmra.mxu2 %vm1663_vm7, %v2088_v9  ;;  %v1733_v8 = vsel %vm1663_vm7, %v10589_v57, -inf  ;;  %v13482_v9 = vld [vmem:[#allocation120_spill] sm:$0xff] }
 0x50d   : > { %v2089_v12 = vpack.c.bf16 %v1993_v0, %v1993_v0  ;;  %8007 = vpow2.f32 %v1824_v25  ;;  %3972 = vmatpush.bf16.msra.mxu2 %v3963_v62  ;;  %v13483_v13 = vperm.slane %v13482_v9, 0  ;;  %v1739_v38 = vsel %vm1663_vm7, %v10612_v47, -inf }
 0x50e   : > { %v1826_v20 = vmul.f32 1.442695, %v1777_v18  ;;  %v2042_v62 = vmul.f32 %v13435_v61, %v10140_v37 }
 0x50f   : > { %7485 = vmatmul.msk.bf16.vlgmr.msra.gmra.mxu3 %vm1663_vm7, %v2089_v12  ;;  %v10608_v26 = vadd.f32 %v13484_v32, %v13483_v13  ;;  %v13487_v13 = vld [vmem:[#allocation72_spill] sm:$0xff] }
 0x510   : > { %8009 = vpow2.f32 %v1826_v20  ;;  %3991 = vmatpush.bf16.msra.mxu3 %v3982_v19  ;;  %1734 = vmax.xlane.f32.xlu0 %v1733_v8  ;;  %v2074_v8 = vpack.c.bf16 %v2042_v62, %v2042_v62  ;;  %v2035_v32 = vmul.f32 %v13435_v61, %v13487_v13  ;;  %v2046_v62 = vmul.f32 %v13435_v61, %v10208_v35 }
 0x511   : > { %v1736_v58 = vsel %vm1663_vm7, %v10608_v26, -inf }
 0x512   : > { %v2067_v37 = vpack.c.bf16 %v2035_v32, %v2035_v32 }
 0x513   : > { %v3727_v44 = vpop.f32.mrf.mxu1  ;;  %v10597_v36 = vpop.eup %8007 }
 0x514   : > { %v1904_v28 = vsel %vm1663_vm7, %v10597_v36, 0.0  ;;  %v10619_v40 = vadd.f32 %v3727_v44, %v10150_v2  ;;  %v4153_v2 = vsel %vm3049_vm4, %v2074_v8, 0 }
 0x515   : > { %1905 = vadd.xlane.f32.xlu1 %v1904_v28 }
 0x516   : > { %v10601_v25 = vpop.eup %8009 }
 0x517   : > { %v1907_v12 = vsel %vm1663_vm7, %v10601_v25, 0.0 }
 0x518   : > { %1908 = vadd.xlane.f32.xlu2 %v1907_v12 }
 0x51b   : > { %v3729_v27 = vpop.f32.mrf.mxu1 }
 0x51d   : > { %1737 = vmax.xlane.f32.xlu1 %v1736_v58 }
 0x520   : > { %1740 = vmax.xlane.f32.xlu2 %v1739_v38 }
 0x541   : > { %v1912_v14 = vpop.xlane.xlu2 %1911  ;;  %v3708_v0 = vpop.f32.mrf.mxu0 }
 0x542   : > { %8011 = vrcp.f32 %v1912_v14  ;;  %v10622_v18 = vadd.f32 %v3708_v0, %v10115_v31  ;;  %v2037_v14 = vmul.f32 %v13435_v61, %v10071_v46  ;;  %v4020_v0 = vsel %vm3049_vm4, %v2067_v37, 0 }
 0x544   : > { %v4264_v20 = vpack.c.bf16 %v10619_v40, %v10622_v18 }
 0x548   : > { %v8012_v19 = vpop.eup %8011 }
 0x549   : > { %v2002_v28 = vmul.f32 %v8012_v19, %v10466_v4  ;;  %v3710_v12 = vpop.f32.mrf.mxu0 }
 0x54b   : > { %v2098_v9 = vpack.c.bf16 %v2002_v28, %v2002_v28  ;;  %v2069_v28 = vpack.c.bf16 %v2037_v14, %v2037_v14 }
 0x54d   : > { %7494 = vmatmul.msk.bf16.vlgmr.msrb.gmra.mxu0 %vm1663_vm7, %v2098_v9 }
 0x54e   : > { %4162 = vmatpush.bf16.msrb.mxu0 %v4153_v2  ;;  %v2078_v2 = vpack.c.bf16 %v2046_v62, %v2046_v62 }
 0x553   : > { %v1891_v44 = vpop.xlane.xlu0 %1890 }
 0x554   : > { %8013 = vrcp.f32 %v1891_v44  ;;  %v10631_v31 = vpop.f32.mrf.mxu0 }
 0x55a   : > { %v8014_v49 = vpop.eup %8013 }
 0x55b   : > { %v1995_v56 = vmul.f32 %v8014_v49, %v10489_v33  ;;  %v1897_v27 = vpop.xlane.xlu0 %1896 }
 0x55c   : > { %v1924_v4 = vpop.xlane.xlu1 %1923  ;;  %8015 = vrcp.f32 %v1897_v27  ;;  %v3786_v58 = vpop.f32.mrf.mxu0 }
 0x55d   : > { %v2091_v38 = vpack.c.bf16 %v1995_v56, %v1995_v56  ;;  %8017 = vrcp.f32 %v1924_v4  ;;  %v4058_v4 = vsel %vm3049_vm4, %v2069_v28, 0 }
 0x55f   : > { %7487 = vmatmul.msk.bf16.vlgmr.msrb.gmra.mxu1 %vm1663_vm7, %v2091_v38 }
 0x560   : > { %4029 = vmatpush.bf16.msrb.mxu1 %v4020_v0 }
 0x561   : > { %v1894_v37 = vpop.xlane.xlu2 %1893 }
 0x562   : > { %v8016_v19 = vpop.eup %8015  ;;  %v3746_v8 = vpop.f32.mrf.mxu2  ;;  %8019 = vrcp.f32 %v1894_v37 }
 0x563   : > { %v8018_v33 = vpop.eup %8017  ;;  %v1997_v12 = vmul.f32 %v8016_v19, %v10499_v39  ;;  %v1729_v9 = vpop.xlane.xlu0 %1728  ;;  %v4229_v39 = vsel %vm3049_vm4, %v2078_v2, 0  ;;  %v10653_v14 = vadd.f32 %v3746_v8, %v10167_v54 }
 0x564   : > { %v2006_v44 = vmul.f32 %v8018_v33, %v10501_v3  ;;  %v1723_v13 = vpop.xlane.xlu1 %1722  ;;  %v1781_v46 = vsub.f32 %v10517_v50, %v1729_v9  ;;  %v13488_v3 = vld [vmem:[#allocation58_spill] sm:$0xff] }
 0x565   : > { %v2093_v32 = vpack.c.bf16 %v1997_v12, %v1997_v12  ;;  %v1779_v49 = vsub.f32 %v10523_v41, %v1723_v13  ;;  %v2036_v50 = vmul.f32 %v13435_v61, %v13488_v3 }
 0x566   : > { %v2102_v56 = vpack.c.bf16 %v2006_v44, %v2006_v44  ;;  %v1834_v35 = vmul.f32 1.442695, %v1781_v46 }
 0x567   : > { %v1830_v27 = vmul.f32 1.442695, %v1779_v49  ;;  %7489 = vmatmul.msk.bf16.vlgmr.msrb.gmra.mxu3 %vm1663_vm7, %v2093_v32  ;;  %v2068_v19 = vpack.c.bf16 %v2036_v50, %v2036_v50  ;;  %v13490_v49 = vld [vmem:[#allocation110_spill] sm:$0xff] }
 0x568   : > { %8021 = vpow2.f32 %v1834_v35  ;;  %4067 = vmatpush.bf16.msrb.mxu3 %v4058_v4  ;;  %7498 = vmatmul.msk.bf16.vlgmr.msra.gmra.mxu0 %vm1663_vm7, %v2102_v56  ;;  %v3765_v58 = vpop.f32.mrf.mxu3  ;;  %v8020_v38 = vpop.eup %8019  ;;  %v13491_v35 = vld [vmem:[#allocation62_spill] sm:$0xff] }
 0x569   : > { %8023 = vpow2.f32 %v1830_v27  ;;  %4238 = vmatpush.bf16.msra.mxu0 %v4229_v39  ;;  %v10656_v0 = vadd.f32 %v3765_v58, %v10275_v63  ;;  %v1996_v33 = vmul.f32 %v8020_v38, %v10527_v23  ;;  %v1726_v28 = vpop.xlane.xlu2 %1725  ;;  %v4039_v46 = vsel %vm3049_vm4, %v2068_v19, 0  ;;  %v13492_v27 = vld [vmem:[#allocation76_spill] sm:$0xff] }
 0x56a   : > { %v3748_v41 = vpop.f32.mrf.mxu2  ;;  %v1780_v44 = vsub.f32 %v10541_v29, %v1726_v28  ;;  %v13489_v29 = vld [vmem:[#allocation123_spill] sm:$0xff]  ;;  %v10680_v4 = vadd.f32 %v13492_v27, %v13491_v35  ;;  %v2039_v19 = vmul.f32 %v13435_v61, %v10100_v22  ;;  %v10703_v28 = vld [vmem:[%s13080_s5 + $0x30] sm:$0xff]  ;;  %v10733_v35 = vld [vmem:[%s13080_s5 + $0x20] sm:$0xff] }
 0x56b   : > { %v2092_v8 = vpack.c.bf16 %v1996_v33, %v1996_v33  ;;  %v10676_v37 = vadd.f32 %v13490_v49, %v13489_v29  ;;  %v10686_v41 = vld [vmem:[%s13080_s5 + $0x38] sm:$0xff] }
 0x56c   : > { %v1936_v62 = vpop.xlane.xlu1 %1935  ;;  %v1832_v13 = vmul.f32 1.442695, %v1780_v44 }
 0x56d   : > { %8025 = vrcp.f32 %v1936_v62  ;;  %v10659_v12 = vpop.f32.mrf.mxu0  ;;  %7488 = vmatmul.msk.bf16.vlgmr.msrb.gmra.mxu2 %vm1663_vm7, %v2092_v8  ;;  %v1751_v38 = vsel %vm1663_vm7, %v10676_v37, -inf }
 0x56e   : > { %v10661_v9 = vpop.eup %8021  ;;  %8027 = vpow2.f32 %v1832_v13  ;;  %4048 = vmatpush.bf16.msrb.mxu2 %v4039_v46  ;;  %v13493_v46 = vld [vmem:[#allocation59_spill] sm:$0xff]  ;;  %v3861_v40 = vadd.f32 %v10659_v12, %v10282_v48 }
 0x56f   : > { %v10666_v54 = vpop.eup %8023  ;;  %v1919_v63 = vsel %vm1663_vm7, %v10661_v9, 0.0 }
 0x570   : > { %1920 = vadd.xlane.f32.xlu2 %v1919_v63  ;;  %v1913_v23 = vsel %vm1663_vm7, %v10666_v54, 0.0  ;;  %v3767_v56 = vpop.f32.mrf.mxu3  ;;  %v10707_v63 = vadd.f32 %v10631_v31, %v10187_v15  ;;  %v13497_v15 = vld [vmem:[#allocation66_spill] sm:$0xff] }
 0x571   : > { %1914 = vadd.xlane.f32.xlu0 %v1913_v23  ;;  %v2071_v23 = vpack.c.bf16 %v2039_v19, %v2039_v19  ;;  %v10721_v56 = vld [vmem:[%s13080_s5 + $0x28] sm:$0xff] }
 0x573   : > { %v8026_v32 = vpop.eup %8025  ;;  %v1903_v3 = vpop.xlane.xlu2 %1902  ;;  %v4096_v31 = vsel %vm3049_vm4, %v2071_v23, 0  ;;  %v10758_v23 = vld [vmem:[%s13080_s5 + $0x8] sm:$0xff] }
 0x574   : > { %v2010_v39 = vmul.f32 %v8026_v32, %v10546_v59  ;;  %8029 = vrcp.f32 %v1903_v3  ;;  %v10690_v62 = vpop.eup %8027  ;;  %v1745_v59 = vsel %vm1663_vm7, %v10680_v4, -inf  ;;  %v13494_v32 = vld [vmem:[#allocation49_spill] sm:$0xff] }
 0x575   : > { %v3862_v50 = vpop.f32.mrf.mxu0  ;;  %v1916_v33 = vsel %vm1663_vm7, %v10690_v62, 0.0  ;;  %v10714_v29 = vadd.f32 %v13494_v32, %v13493_v46  ;;  %v13495_v46 = vld [vmem:[#allocation64_spill] sm:$0xff] }
 0x576   : > { %v2106_v58 = vpack.c.bf16 %v2010_v39, %v2010_v39  ;;  %1917 = vadd.xlane.f32.xlu1 %v1916_v33  ;;  %v2041_v32 = vmul.f32 %v13435_v61, %v13495_v46 }
 0x578   : > { %7502 = vmatmul.msk.bf16.vlgmr.msrb.gmra.mxu0 %vm1663_vm7, %v2106_v58  ;;  %1752 = vmax.xlane.f32.xlu2 %v1751_v38 }
 0x579   : > { %1746 = vmax.xlane.f32.xlu0 %v1745_v59  ;;  %4347 = vmatpush.bf16.msrb.mxu0 %v10686_v41  ;;  %v10743_v59 = vld [vmem:[%s13080_s5 + $0x18] sm:$0xff] }
 0x57a   : > { %v3803_v44 = vpop.f32.mrf.mxu1  ;;  %v8030_v8 = vpop.eup %8029 }
 0x57b   : > { %v1948_v13 = vpop.xlane.xlu0 %1947  ;;  %v10710_v22 = vadd.f32 %v3803_v44, %v10266_v43  ;;  %v1999_v49 = vmul.f32 %v8030_v8, %v10558_v21  ;;  %v1748_v21 = vsel %vm1663_vm7, %v10714_v29, -inf }
 0x57c   : > { %8031 = vrcp.f32 %v1948_v13  ;;  %v2040_v13 = vmul.f32 %v13435_v61, %v10104_v51 }
 0x57d   : > { %4348 = vmatpush.bf16.msrb.mxu0 %v10703_v28  ;;  %v2095_v43 = vpack.c.bf16 %v1999_v49, %v1999_v49 }
 0x57e   : > { %1749 = vmax.xlane.f32.xlu1 %v1748_v21 }
 0x57f   : > { %7491 = vmatmul.msk.bf16.vlgmr.msra.gmra.mxu1 %vm1663_vm7, %v2095_v43 }
 0x580   : > { %4105 = vmatpush.bf16.msra.mxu1 %v4096_v31  ;;  %v2072_v31 = vpack.c.bf16 %v2040_v13, %v2040_v13 }
 0x581   : > { %4349 = vmatpush.bf16.msrb.mxu0 %v10721_v56  ;;  %v10735_v27 = vpop.f32.mrf.mxu0 }
 0x582   : > { %v8032_v39 = vpop.eup %8031  ;;  %v3805_v3 = vpop.f32.mrf.mxu1 }
 0x583   : > { %v2014_v50 = vmul.f32 %v8032_v39, %v10579_v16  ;;  %v1735_v58 = vpop.xlane.xlu0 %1734  ;;  %v10750_v16 = vld [vmem:[%s13080_s5 + $0x10] sm:$0xff] }
 0x584   : > { %v1783_v38 = vsub.f32 %v10589_v57, %v1735_v58  ;;  %v13496_v58 = vld [vmem:[#allocation75_spill] sm:$0xff] }
 0x585   : > { %4350 = vmatpush.bf16.msrb.mxu0 %v10733_v35  ;;  %v2110_v19 = vpack.c.bf16 %v2014_v50, %v2014_v50 }
 0x586   : > { %v1838_v33 = vmul.f32 1.442695, %v1783_v38 }
 0x588   : > { %7506 = vmatmul.msk.bf16.vlgmr.msra.gmra.mxu0 %vm1663_vm7, %v2110_v19  ;;  %v1906_v44 = vpop.xlane.xlu1 %1905  ;;  %8033 = vpow2.f32 %v1838_v33 }
 0x589   : > { %4351 = vmatpush.bf16.msrb.mxu0 %v10743_v59  ;;  %8035 = vrcp.f32 %v1906_v44  ;;  %v3938_v8 = vpop.f32.mrf.mxu0  ;;  %v10773_v44 = vld [vmem:[%s13080_s5] sm:$0xff] }
 0x58b   : > { %v1909_v57 = vpop.xlane.xlu2 %1908 }
 0x58c   : > { %8037 = vrcp.f32 %v1909_v57  ;;  %v2073_v57 = vpack.c.bf16 %v2041_v32, %v2041_v32 }
 0x58d   : > { %4352 = vmatpush.bf16.msrb.mxu0 %v10750_v16 }
 0x58e   : > { %v10762_v49 = vpop.eup %8033 }
 0x58f   : > { %v8036_v43 = vpop.eup %8035  ;;  %v1925_v21 = vsel %vm1663_vm7, %v10762_v49, 0.0  ;;  %v3822_v39 = vpop.f32.mrf.mxu2 }
 0x590   : > { %v1738_v3 = vpop.xlane.xlu1 %1737  ;;  %v2000_v50 = vmul.f32 %v8036_v43, %v10597_v36  ;;  %1926 = vadd.xlane.f32.xlu0 %v1925_v21  ;;  %v3823_v38 = vadd.f32 %v3822_v39, %v13496_v58  ;;  %v13498_v39 = vld [vmem:[#allocation61_spill] sm:$0xff] }
 0x591   : > { %4353 = vmatpush.bf16.msrb.mxu0 %v10758_v23  ;;  %v1784_v33 = vsub.f32 %v10608_v26, %v1738_v3  ;;  %v10780_v58 = vadd.f32 %v13498_v39, %v13497_v15 }
 0x592   : > { %v8038_v51 = vpop.eup %8037  ;;  %v3841_v19 = vpop.f32.mrf.mxu3  ;;  %v2096_v36 = vpack.c.bf16 %v2000_v50, %v2000_v50 }
 0x593   : > { %v2001_v8 = vmul.f32 %v8038_v51, %v10601_v25  ;;  %v3842_v13 = vadd.f32 %v3841_v19, %v10307_v55  ;;  %v1741_v46 = vpop.xlane.xlu2 %1740  ;;  %v1840_v43 = vmul.f32 1.442695, %v1784_v33  ;;  %v4115_v25 = vsel %vm3049_vm4, %v2072_v31, 0 }
 0x594   : > { %v1785_v21 = vsub.f32 %v10612_v47, %v1741_v46  ;;  %7492 = vmatmul.msk.bf16.vlgmr.msra.gmra.mxu2 %vm1663_vm7, %v2096_v36  ;;  %v4134_v55 = vsel %vm3049_vm4, %v2073_v57, 0  ;;  %v13499_v47 = vpack.c.bf16 %v10567_v45, %v10563_v60  ;;  %v1757_v15 = vsel %vm1663_vm7, %v10780_v58, -inf  ;;  %v13503_v46 = vld [vmem:[#allocation67_spill] sm:$0xff] }
 0x595   : > { %v2097_v26 = vpack.c.bf16 %v2001_v8, %v2001_v8  ;;  %v4267_v3 = vpack.c.bf16 %v3842_v13, %v3823_v38  ;;  %8039 = vpow2.f32 %v1840_v43  ;;  %4354 = vmatpush.bf16.msrb.mxu0 %v10773_v44  ;;  %4124 = vmatpush.bf16.msra.mxu2 %v4115_v25  ;;  %v13500_v60 = vpack.c.bf16 %v10656_v0, %v10653_v14 }
 0x596   : > { %v1842_v2 = vmul.f32 1.442695, %v1785_v21  ;;  %v13501_v45 = vpack.c.bf16 %v10710_v22, %v10707_v63  ;;  %v13502_v63 = vld [vmem:[#allocation68_spill] sm:$0xff]  ;;  %v2043_v36 = vmul.f32 %v13435_v61, %v13503_v46 }
 0x597   : > { %7493 = vmatmul.msk.bf16.vlgmr.msra.gmra.mxu3 %vm1663_vm7, %v2097_v26  ;;  %v3824_v32 = vpop.f32.mrf.mxu2  ;;  %v2045_v22 = vmul.f32 %v13435_v61, %v13502_v63 }
 0x598   : > { %8041 = vpow2.f32 %v1842_v2  ;;  %4143 = vmatpush.bf16.msra.mxu3 %v4134_v55  ;;  %4355 = vmatmul.bf16.vlgmr.msrb.gmra.mxu0 %v13499_v47  ;;  %v2075_v26 = vpack.c.bf16 %v2043_v36, %v2043_v36 }
 0x599   : > { %1758 = vmax.xlane.f32.xlu0 %v1757_v15  ;;  %v2077_v39 = vpack.c.bf16 %v2045_v22, %v2045_v22 }
 0x59a   : > { %v3843_v51 = vpop.f32.mrf.mxu3 }
 0x59b   : > { %v10792_v50 = vpop.eup %8039 }
 0x59c   : > { %v1928_v31 = vsel %vm1663_vm7, %v10792_v50, 0.0 }
 0x59d   : > { %1929 = vadd.xlane.f32.xlu1 %v1928_v31 }
 0x59e   : > { %v10796_v38 = vpop.eup %8041 }
 0x59f   : > { %v1931_v2 = vsel %vm1663_vm7, %v10796_v38, 0.0 }
 0x5a0   : > { %1932 = vadd.xlane.f32.xlu2 %v1931_v2 }
 0x5a8   : > { %4360 = vmatmul.bf16.gmra.mxu0 %v4264_v20 }
 0x5b8   : > { %4365 = vmatmul.bf16.gmra.mxu0 %v13500_v60 }
 0x5c8   : > { %4370 = vmatmul.bf16.gmra.mxu0 %v13501_v45 }
 0x5ca   : > { %v10809_v19 = vpop.f32.mrf.mxu0 }
 0x5d2   : > { %v4014_v33 = vpop.f32.mrf.mxu0 }
 0x5d8   : > { %4375 = vmatmul.bf16.gmra.mxu0 %v4267_v3 }
 0x5dc   : > { %v3879_v57 = vpop.f32.mrf.mxu1 }
 0x5dd   : > { %v3880_v8 = vadd.f32 %v3879_v57, %v10295_v7 }
 0x5df   : > { %v4268_v0 = vpack.c.bf16 %v3880_v8, %v3861_v40 }
 0x5e3   : > { %v1921_v13 = vpop.xlane.xlu2 %1920 }
 0x5e4   : > { %v1915_v18 = vpop.xlane.xlu0 %1914  ;;  %8043 = vrcp.f32 %v1921_v13  ;;  %v3881_v20 = vpop.f32.mrf.mxu1 }
 0x5e5   : > { %8045 = vrcp.f32 %v1915_v18  ;;  %v10814_v14 = vpop.f32.mrf.mxu0  ;;  %v13505_v18 = vld [vmem:[#allocation80_spill] sm:$0xff] }
 0x5e8   : > { %4380 = vmatmul.bf16.gmra.mxu0 %v4268_v0 }
 0x5e9   : > { %v1918_v32 = vpop.xlane.xlu1 %1917 }
 0x5ea   : > { %v8044_v43 = vpop.eup %8043  ;;  %v3917_v7 = vpop.f32.mrf.mxu3  ;;  %8047 = vrcp.f32 %v1918_v32 }
 0x5eb   : > { %v8046_v21 = vpop.eup %8045  ;;  %v2005_v48 = vmul.f32 %v8044_v43, %v10661_v9  ;;  %v1753_v12 = vpop.xlane.xlu2 %1752  ;;  %v4210_v9 = vsel %vm3049_vm4, %v2077_v39, 0  ;;  %v10831_v13 = vadd.f32 %v3917_v7, %v10358_v10 }
 0x5ec   : > { %v2003_v3 = vmul.f32 %v8046_v21, %v10666_v54  ;;  %v1747_v25 = vpop.xlane.xlu0 %1746  ;;  %v1789_v55 = vsub.f32 %v10676_v37, %v1753_v12  ;;  %v4172_v54 = vsel %vm3049_vm4, %v2075_v26, 0  ;;  %v13504_v37 = vld [vmem:[#allocation73_spill] sm:$0xff]  ;;  %v10854_v26 = vadd.f32 %v10735_v27, %v10338_v5 }
 0x5ed   : > { %v2101_v47 = vpack.c.bf16 %v2005_v48, %v2005_v48  ;;  %v1787_v15 = vsub.f32 %v10680_v4, %v1747_v25  ;;  %v4090_v51 = vpop.f32.mrf.mxu0  ;;  %v2044_v45 = vmul.f32 %v13435_v61, %v13504_v37 }
 0x5ee   : > { %v2099_v31 = vpack.c.bf16 %v2003_v3, %v2003_v3  ;;  %v1850_v2 = vmul.f32 1.442695, %v1789_v55  ;;  %v13506_v3 = vld [vmem:[#allocation87_spill] sm:$0xff] }
 0x5ef   : > { %v1846_v60 = vmul.f32 1.442695, %v1787_v15  ;;  %7497 = vmatmul.msk.bf16.vlgmr.msrb.gmra.mxu3 %vm1663_vm7, %v2101_v47  ;;  %v2076_v8 = vpack.c.bf16 %v2044_v45, %v2044_v45 }
 0x5f0   : > { %8049 = vpow2.f32 %v1850_v2  ;;  %7495 = vmatmul.msk.bf16.vlgmr.msrb.gmra.mxu1 %vm1663_vm7, %v2099_v31  ;;  %4219 = vmatpush.bf16.msrb.mxu3 %v4210_v9  ;;  %v8048_v33 = vpop.eup %8047  ;;  %v3898_v57 = vpop.f32.mrf.mxu2  ;;  %v13507_v2 = vld [vmem:[#allocation78_spill] sm:$0xff] }
 0x5f1   : > { %8051 = vpow2.f32 %v1846_v60  ;;  %4181 = vmatpush.bf16.msrb.mxu1 %v4172_v54  ;;  %v2004_v40 = vmul.f32 %v8048_v33, %v10690_v62  ;;  %v10835_v20 = vadd.f32 %v3898_v57, %v13505_v18  ;;  %v1750_v0 = vpop.xlane.xlu1 %1749  ;;  %v4191_v39 = vsel %vm3049_vm4, %v2076_v8, 0 }
 0x5f2   : > { %v3919_v4 = vpop.f32.mrf.mxu3  ;;  %v1788_v46 = vsub.f32 %v10714_v29, %v1750_v0  ;;  %v2047_v5 = vmul.f32 %v13435_v61, %v13507_v2  ;;  %v10876_v61 = vld [vmem:[%s13081_s6] ss:$0 sm:$0xff] }
 0x5f3   : > { %v2100_v43 = vpack.c.bf16 %v2004_v40, %v2004_v40  ;;  %v4269_v21 = vpack.c.bf16 %v10831_v13, %v10835_v20 }
 0x5f4   : > { %v1848_v62 = vmul.f32 1.442695, %v1788_v46  ;;  %v2079_v60 = vpack.c.bf16 %v2047_v5, %v2047_v5 }
 0x5f5   : > { %v10837_v63 = vpop.f32.mrf.mxu0  ;;  %7496 = vmatmul.msk.bf16.vlgmr.msrb.gmra.mxu2 %vm1663_vm7, %v2100_v43  ;;  %v13508_v43 = vld [vmem:[#allocation14_spill] sm:$0xff] }
 0x5f6   : > { %v10839_v22 = vpop.eup %8049  ;;  %8053 = vpow2.f32 %v1848_v62  ;;  %4200 = vmatpush.bf16.msrb.mxu2 %v4191_v39  ;;  %v4248_v57 = vsel %vm3049_vm4, %v2079_v60, 0 }
 0x5f7   : > { %v10842_v36 = vpop.eup %8051  ;;  %v1943_v10 = vsel %vm1663_vm7, %v10839_v22, 0.0 }
 0x5f8   : > { %v1937_v7 = vsel %vm1663_vm7, %v10842_v36, 0.0  ;;  %1944 = vadd.xlane.f32.xlu0 %v1943_v10  ;;  %v3900_v29 = vpop.f32.mrf.mxu2 }
 0x5f9   : > { %1938 = vadd.xlane.f32.xlu1 %v1937_v7  ;;  %v13509_v29 = vld [vmem:[#allocation83_spill] sm:$0xff] }
 0x5fc   : > { %v3955_v12 = vpop.f32.mrf.mxu1  ;;  %v10859_v55 = vpop.eup %8053 }
 0x5fd   : > { %v4166_v48 = vpop.f32.mrf.mxu0  ;;  %v10857_v25 = vadd.f32 %v3955_v12, %v13506_v3  ;;  %v1940_v15 = vsel %vm1663_vm7, %v10859_v55, 0.0 }
 0x5fe   : > { %1941 = vadd.xlane.f32.xlu2 %v1940_v15 }
 0x5ff   : > { %v4270_v47 = vpack.c.bf16 %v10857_v25, %v10854_v26 }
 0x603   : > { %v1927_v32 = vpop.xlane.xlu0 %1926 }
 0x604   : > { %8055 = vrcp.f32 %v1927_v32  ;;  %v3957_v31 = vpop.f32.mrf.mxu1 }
 0x605   : > { %v10865_v51 = vpop.f32.mrf.mxu0 }
 0x60a   : > { %v8056_v27 = vpop.eup %8055 }
 0x60b   : > { %v2007_v9 = vmul.f32 %v8056_v27, %v10762_v49 }
 0x60c   : > { %v1759_v54 = vpop.xlane.xlu0 %1758 }
 0x60d   : > { %v1791_v37 = vsub.f32 %v10780_v58, %v1759_v54  ;;  %v4242_v45 = vpop.f32.mrf.mxu0  ;;  %v2103_v4 = vpack.c.bf16 %v2007_v9, %v2007_v9 }
 0x60f   : > { %v1854_v33 = vmul.f32 1.442695, %v1791_v37  ;;  %7499 = vmatmul.msk.bf16.vlgmr.msra.gmra.mxu1 %vm1663_vm7, %v2103_v4  ;;  %v13511_v37 = vld [vmem:[#allocation18_spill] sm:$0xff] }
 0x610   : > { %v1930_v8 = vpop.xlane.xlu1 %1929  ;;  %4257 = vmatpush.bf16.msra.mxu1 %v4248_v57 }
 0x611   : > { %8057 = vpow2.f32 %v1854_v33 }
 0x612   : > { %8059 = vrcp.f32 %v1930_v8 }
 0x613   : > { %v1933_v40 = vpop.xlane.xlu2 %1932 }
 0x614   : > { %8061 = vrcp.f32 %v1933_v40 }
 0x615   : > { %v4356_v49 = vpop.f32.mrf.mxu0 }
 0x616   : > { %v4357_v58 = vadd.f32 %v10876_v61, %v4356_v49 }
 0x617   : > { %v10879_v18 = vpop.eup %8057  ;;  %v3974_v62 = vpop.f32.mrf.mxu2 }
 0x618   : > { %v8060_v0 = vpop.eup %8059  ;;  %v1949_v46 = vsel %vm1663_vm7, %v10879_v18, 0.0  ;;  %v10884_v10 = vadd.f32 %v4357_v58, %v13508_v43  ;;  %v10888_v48 = vadd.f32 %v3974_v62, %v13509_v29 }
 0x619   : > { %v2008_v39 = vmul.f32 %v8060_v0, %v10792_v50  ;;  %1950 = vadd.xlane.f32.xlu1 %v1949_v46  ;;  %v13515_v0 = vld [vmem:[#allocation22_spill] sm:$0xff] }
 0x61a   : > { %v8062_v7 = vpop.eup %8061  ;;  %v3993_v12 = vpop.f32.mrf.mxu3  ;;  %4470 = vadd.xlane.f32.xlu2 %v10884_v10 }
 0x61b   : > { %v2009_v3 = vmul.f32 %v8062_v7, %v10796_v38  ;;  %v10893_v15 = vadd.f32 %v3993_v12, %v10396_v11  ;;  %v2104_v32 = vpack.c.bf16 %v2008_v39, %v2008_v39  ;;  %v13510_v38 = vld [vmem:[#allocation15_spill] sm:$0xff]  ;;  %v13517_v12 = vld [vmem:[#allocation24_spill] sm:$0xff] }
 0x61d   : > { %v2105_v31 = vpack.c.bf16 %v2009_v3, %v2009_v3  ;;  %v4271_v2 = vpack.c.bf16 %v10893_v15, %v10888_v48  ;;  %v4358_v5 = vpop.f32.mrf.mxu0  ;;  %7500 = vmatmul.msk.bf16.vlgmr.msra.gmra.mxu2 %vm1663_vm7, %v2104_v32 }
 0x61e   : > { %v4359_v50 = vadd.f32 %v10876_v61, %v4358_v5  ;;  %7747 = vmatpush.bf16.msra.mxu2 %v10686_v41 }
 0x61f   : > { %7501 = vmatmul.msk.bf16.vlgmr.msra.gmra.mxu3 %vm1663_vm7, %v2105_v31  ;;  %v3976_v11 = vpop.f32.mrf.mxu2 }
 0x620   : > { %7748 = vmatpush.bf16.msra.mxu3 %v10686_v41  ;;  %v10903_v27 = vadd.f32 %v4359_v50, %v13510_v38  ;;  %v10957_v50 = vadd.f32 %v10809_v19, %v10381_v34 }
 0x622   : > { %v3995_v60 = vpop.f32.mrf.mxu3  ;;  %4472 = vadd.xlane.f32.xlu0 %v10903_v27  ;;  %7749 = vmatpush.bf16.msra.mxu2 %v10703_v28 }
 0x624   : > { %7750 = vmatpush.bf16.msra.mxu3 %v10703_v28  ;;  %v13512_v28 = vld [vmem:[#allocation19_spill] sm:$0xff] }
 0x625   : > { %v4361_v9 = vpop.f32.mrf.mxu0 }
 0x626   : > { %v4362_v54 = vadd.f32 %v10876_v61, %v4361_v9  ;;  %7751 = vmatpush.bf16.msra.mxu2 %v10721_v56 }
 0x628   : > { %7752 = vmatpush.bf16.msra.mxu3 %v10721_v56  ;;  %v10912_v41 = vadd.f32 %v4362_v54, %v13511_v37 }
 0x62a   : > { %4474 = vadd.xlane.f32.xlu1 %v10912_v41  ;;  %7753 = vmatpush.bf16.msra.mxu2 %v10733_v35 }
 0x62c   : > { %7754 = vmatpush.bf16.msra.mxu3 %v10733_v35  ;;  %v13513_v35 = vld [vmem:[#allocation20_spill] sm:$0xff] }
 0x62d   : > { %v4363_v45 = vpop.f32.mrf.mxu0 }
 0x62e   : > { %v4364_v4 = vadd.f32 %v10876_v61, %v4363_v45  ;;  %7755 = vmatpush.bf16.msra.mxu2 %v10743_v59 }
 0x630   : > { %7756 = vmatpush.bf16.msra.mxu3 %v10743_v59  ;;  %v10921_v33 = vadd.f32 %v4364_v4, %v13512_v28 }
 0x632   : > { %4476 = vadd.xlane.f32.xlu2 %v10921_v33  ;;  %7757 = vmatpush.bf16.msra.mxu2 %v10750_v16 }
 0x634   : > { %7758 = vmatpush.bf16.msra.mxu3 %v10750_v16  ;;  %v13514_v16 = vld [vmem:[#allocation21_spill] sm:$0xff] }
 0x635   : > { %v4366_v56 = vpop.f32.mrf.mxu0 }
 0x636   : > { %v4367_v57 = vadd.f32 %v10876_v61, %v4366_v56  ;;  %7759 = vmatpush.bf16.msra.mxu2 %v10758_v23 }
 0x638   : > { %7760 = vmatpush.bf16.msra.mxu3 %v10758_v23  ;;  %v10930_v8 = vadd.f32 %v4367_v57, %v13513_v35 }
 0x63a   : > { %4478 = vadd.xlane.f32.xlu0 %v10930_v8  ;;  %7761 = vmatpush.bf16.msra.mxu2 %v10773_v44 }
 0x63c   : > { %7762 = vmatpush.bf16.msra.mxu3 %v10773_v44  ;;  %v13516_v44 = vld [vmem:[#allocation23_spill] sm:$0xff] }
 0x63d   : > { %v4368_v59 = vpop.f32.mrf.mxu0 }
 0x63e   : > { %v4369_v40 = vadd.f32 %v10876_v61, %v4368_v59 }
 0x640   : > { %v10937_v49 = vadd.f32 %v4369_v40, %v13514_v16 }
 0x642   : > { %4480 = vadd.xlane.f32.xlu1 %v10937_v49 }
 0x645   : > { %v4371_v58 = vpop.f32.mrf.mxu0 }
 0x646   : > { %v4372_v23 = vadd.f32 %v10876_v61, %v4371_v58 }
 0x648   : > { %v10942_v46 = vadd.f32 %v4372_v23, %v13515_v0 }
 0x64a   : > { %4482 = vadd.xlane.f32.xlu2 %v10942_v46 }
 0x64d   : > { %v4373_v43 = vpop.f32.mrf.mxu0 }
 0x64e   : > { %v4374_v62 = vadd.f32 %v10876_v61, %v4373_v43 }
 0x650   : > { %v10947_v7 = vadd.f32 %v4374_v62, %v13516_v44 }
 0x652   : > { %4484 = vadd.xlane.f32.xlu0 %v10947_v7 }
 0x655   : > { %v4376_v39 = vpop.f32.mrf.mxu0 }
 0x656   : > { %v4377_v29 = vadd.f32 %v10876_v61, %v4376_v39  ;;  %v13518_v39 = vld [vmem:[#allocation36_spill] sm:$0xff] }
 0x658   : > { %v10952_v3 = vadd.f32 %v4377_v29, %v13517_v12 }
 0x65a   : > { %4486 = vadd.xlane.f32.xlu0 %v10952_v3 }
 0x65d   : > { %v4378_v44 = vpop.f32.mrf.mxu0 }
 0x66b   : > { %v1945_v32 = vpop.xlane.xlu0 %1944 }
 0x66c   : > { %v1939_v31 = vpop.xlane.xlu1 %1938  ;;  %8063 = vrcp.f32 %v1945_v32 }
 0x66d   : > { %8065 = vrcp.f32 %v1939_v31  ;;  %v4031_v5 = vpop.f32.mrf.mxu1 }
 0x66e   : > { %v10960_v38 = vadd.f32 %v4031_v5, %v10437_v1 }
 0x670   : > { %v4272_v11 = vpack.c.bf16 %v10960_v38, %v10957_v50  ;;  %v7720_v50 = vld [vmem:[%s13084_s9 + $0x74] sm:$0xf] }
 0x671   : > { %v1942_v28 = vpop.xlane.xlu2 %1941 }
 0x672   : > { %v8064_v60 = vpop.eup %8063  ;;  %v4069_v9 = vpop.f32.mrf.mxu3  ;;  %8067 = vrcp.f32 %v1942_v28 }
 0x673   : > { %v8066_v54 = vpop.eup %8065  ;;  %v2013_v37 = vmul.f32 %v8064_v60, %v10839_v22  ;;  %v10969_v35 = vadd.f32 %v4069_v9, %v10431_v6  ;;  %v4089_v6 = vadd.f32 %v10814_v14, %v10433_v24  ;;  %v13519_v60 = vld [vmem:[#allocation25_spill] sm:$0xff] }
 0x674   : > { %v2011_v45 = vmul.f32 %v8066_v54, %v10842_v36 }
 0x675   : > { %v2109_v4 = vpack.c.bf16 %v2013_v37, %v2013_v37  ;;  %v4033_v56 = vpop.f32.mrf.mxu1 }
 0x676   : > { %v2107_v57 = vpack.c.bf16 %v2011_v45, %v2011_v45 }
 0x677   : > { %7505 = vmatmul.msk.bf16.vlgmr.msrb.gmra.mxu3 %vm1663_vm7, %v2109_v4 }
 0x678   : > { %7503 = vmatmul.msk.bf16.vlgmr.msrb.gmra.mxu1 %vm1663_vm7, %v2107_v57  ;;  %v8068_v1 = vpop.eup %8067  ;;  %v4050_v19 = vpop.f32.mrf.mxu2 }
 0x679   : > { %v2012_v59 = vmul.f32 %v8068_v1, %v10859_v55  ;;  %v10973_v22 = vadd.f32 %v4050_v19, %v10460_v52 }
 0x67a   : > { %v4071_v34 = vpop.f32.mrf.mxu3 }
 0x67b   : > { %v2108_v36 = vpack.c.bf16 %v2012_v59, %v2012_v59  ;;  %v4273_v40 = vpack.c.bf16 %v10969_v35, %v10973_v22  ;;  %v13520_v59 = vld [vmem:[#allocation26_spill] sm:$0xff]  ;;  %v7591_v35 = vld [vmem:[%s13084_s9 + $0x60] sm:$0xf]  ;;  %v7719_v22 = vld [vmem:[%s13084_s9 + $0x64] sm:$0xf0] }
 0x67d   : > { %7504 = vmatmul.msk.bf16.vlgmr.msrb.gmra.mxu2 %vm1663_vm7, %v2108_v36 }
 0x680   : > { %v4052_v16 = vpop.f32.mrf.mxu2 }
 0x68c   : > { %v1951_v58 = vpop.xlane.xlu1 %1950  ;;  %v4107_v23 = vpop.f32.mrf.mxu1 }
 0x68d   : > { %8069 = vrcp.f32 %v1951_v58  ;;  %v4471_v0 = vpop.xlane.xlu2 %4470  ;;  %v4108_v43 = vadd.f32 %v4107_v23, %v10482_v53  ;;  %4385 = vmatmul.bf16.vlgmr.msra.gmra.mxu2 %v4269_v21  ;;  %v4381_v21 = vpop.f32.mrf.mxu0  ;;  %v13521_v23 = vld [vmem:[#allocation27_spill] sm:$0xff] }
 0x68e   : > { %v4534_v55 = vmul.f32 0.015625, %v4471_v0  ;;  %v4382_v45 = vadd.f32 %v10876_v61, %v4381_v21  ;;  %v4165_v21 = vadd.f32 %v10837_v63, %v10484_v17  ;;  %v7585_v17 = vld [vmem:[%s13084_s9 + $0x58] sm:$0xf0] }
 0x68f   : > { %v4274_v62 = vpack.c.bf16 %v4108_v43, %v4089_v6 }
 0x690   : > { %v4566_v52 = vsub.f32 %v10884_v10, %v4534_v55  ;;  %v4379_v10 = vadd.f32 %v10876_v61, %v4378_v44  ;;  %v11016_v36 = vadd.f32 %v4382_v45, %v13520_v59  ;;  %v7583_v45 = vld [vmem:[%s13084_s9 + $0x50] sm:$0xf] }
 0x691   : > { %4410 = vmatmul.bf16.vlgmr.msra.gmra.mxu3 %v4274_v62 }
 0x692   : > { %v10986_v29 = vmul.f32 %v13518_v39, %v4566_v52  ;;  %v11000_v9 = vadd.f32 %v4379_v10, %v13519_v60  ;;  %v7592_v10 = vor.u32 %v7719_v22, %v7591_v35  ;;  %v7553_v35 = vld [vmem:[%s13084_s9 + $0x18] sm:$0xf0] }
 0x693   : > { %v8070_v12 = vpop.eup %8069 }
 0x694   : > { %v2015_v32 = vmul.f32 %v8070_v12, %v10879_v18  ;;  %v4630_v24 = vmul.f32 %v10986_v29, %v10986_v29  ;;  %v4109_v53 = vpop.f32.mrf.mxu1 }
 0x695   : > { %v4473_v14 = vpop.xlane.xlu0 %4472 }
 0x696   : > { %v2111_v31 = vpack.c.bf16 %v2015_v32, %v2015_v32  ;;  %v4535_v5 = vmul.f32 0.015625, %v4473_v14  ;;  %4662 = vadd.xlane.f32.xlu1 %v4630_v24  ;;  %v7599_v14 = vld [vmem:[%s13084_s9 + $0x70] sm:$0xf] }
 0x698   : > { %v4567_v13 = vsub.f32 %v10903_v27, %v4535_v5  ;;  %7507 = vmatmul.msk.bf16.vlgmr.msra.gmra.mxu1 %vm1663_vm7, %v2111_v31 }
 0x69a   : > { %v10995_v20 = vmul.f32 %v13518_v39, %v4567_v13  ;;  %v7593_v13 = vld [vmem:[%s13084_s9 + $0x68] sm:$0xf0] }
 0x69c   : > { %v4631_v18 = vmul.f32 %v10995_v20, %v10995_v20 }
 0x69d   : > { %v4475_v54 = vpop.xlane.xlu1 %4474  ;;  %4390 = vmatmul.bf16.gmra.mxu2 %v4270_v47 }
 0x69e   : > { %v4536_v37 = vmul.f32 0.015625, %v4475_v54  ;;  %4664 = vadd.xlane.f32.xlu2 %v4631_v18  ;;  %4488 = vadd.xlane.f32.xlu1 %v11000_v9  ;;  %v13522_v18 = vld [vmem:[#allocation88_spill] sm:$0xff] }
 0x6a0   : > { %v4568_v27 = vsub.f32 %v10912_v41, %v4536_v37  ;;  %v4126_v4 = vpop.f32.mrf.mxu2  ;;  %v4383_v41 = vpop.f32.mrf.mxu0 }
 0x6a1   : > { %v4127_v28 = vadd.f32 %v4126_v4, %v10472_v30  ;;  %v4384_v30 = vadd.f32 %v10876_v61, %v4383_v41  ;;  %v7716_v4 = vld [vmem:[%s13084_s9 + $0x54] sm:$0xf] }
 0x6a2   : > { %v4145_v56 = vpop.f32.mrf.mxu3  ;;  %v11011_v34 = vmul.f32 %v13518_v39, %v4568_v27  ;;  %v7717_v27 = vld [vmem:[%s13084_s9 + $0x54] sm:$0xf0] }
 0x6a3   : > { %v4146_v57 = vadd.f32 %v4145_v56, %v10474_v42  ;;  %v11025_v0 = vadd.f32 %v4384_v30, %v13521_v23  ;;  %v7588_v56 = vor.u32 %v7716_v4, %v7585_v17  ;;  %v7567_v30 = vld [vmem:[%s13084_s9 + $0x30] sm:$0xf]  ;;  %v7569_v23 = vld [vmem:[%s13084_s9 + $0x38] sm:$0xf0] }
 0x6a4   : > { %v4632_v19 = vmul.f32 %v11011_v34, %v11011_v34 }
 0x6a5   : > { %v4275_v1 = vpack.c.bf16 %v4146_v57, %v4127_v28  ;;  %v4477_v16 = vpop.xlane.xlu2 %4476  ;;  %v7584_v28 = vor.u32 %v7717_v27, %v7583_v45  ;;  %v7575_v57 = vld [vmem:[%s13084_s9 + $0x40] sm:$0xf] }
 0x6a6   : > { %v4537_v58 = vmul.f32 0.015625, %v4477_v16  ;;  %4666 = vadd.xlane.f32.xlu2 %v4632_v19  ;;  %4490 = vadd.xlane.f32.xlu1 %v11016_v36  ;;  %v7714_v19 = vld [vmem:[%s13084_s9 + $0x44] sm:$0xf]  ;;  %v7577_v16 = vld [vmem:[%s13084_s9 + $0x48] sm:$0xf0] }
 0x6a7   : > { %4415 = vmatmul.bf16.gmra.mxu3 %v4275_v1  ;;  %v7715_v1 = vld [vmem:[%s13084_s9 + $0x44] sm:$0xf0] }
 0x6a8   : > { %v4569_v42 = vsub.f32 %v10921_v33, %v4537_v58  ;;  %v4128_v26 = vpop.f32.mrf.mxu2  ;;  %v7576_v41 = vor.u32 %v7715_v1, %v7575_v57  ;;  %v7580_v58 = vor.u32 %v7714_v19, %v7577_v16  ;;  %v13526_v16 = vld [vmem:[#allocation82_spill] sm:$0xff] }
 0x6a9   : > { %v7712_v26 = vld [vmem:[%s13084_s9 + $0x34] sm:$0xf] }
 0x6aa   : > { %v4147_v25 = vpop.f32.mrf.mxu3  ;;  %v11022_v47 = vmul.f32 %v13518_v39, %v4569_v42  ;;  %v7713_v42 = vld [vmem:[%s13084_s9 + $0x34] sm:$0xf0] }
 0x6ab   : > { %v7568_v25 = vor.u32 %v7713_v42, %v7567_v30 }
 0x6ac   : > { %v4633_v6 = vmul.f32 %v11022_v47, %v11022_v47 }
 0x6ad   : > { %v4479_v43 = vpop.xlane.xlu0 %4478  ;;  %4395 = vmatmul.bf16.gmra.mxu2 %v4271_v2 }
 0x6ae   : > { %v4538_v55 = vmul.f32 0.015625, %v4479_v43  ;;  %4492 = vadd.xlane.f32.xlu2 %v11025_v0  ;;  %4668 = vadd.xlane.f32.xlu0 %v4633_v6  ;;  %v7572_v43 = vor.u32 %v7712_v26, %v7569_v23 }
 0x6b0   : > { %v4570_v62 = vsub.f32 %v10930_v8, %v4538_v55 }
 0x6b2   : > { %v11035_v33 = vmul.f32 %v13518_v39, %v4570_v62  ;;  %v7559_v62 = vld [vmem:[%s13084_s9 + $0x20] sm:$0xf] }
 0x6b4   : > { %v4634_v52 = vmul.f32 %v11035_v33, %v11035_v33 }
 0x6b5   : > { %v4481_v44 = vpop.xlane.xlu1 %4480 }
 0x6b6   : > { %v4539_v12 = vmul.f32 0.015625, %v4481_v44  ;;  %4670 = vadd.xlane.f32.xlu0 %v4634_v52  ;;  %v7711_v52 = vld [vmem:[%s13084_s9 + $0x24] sm:$0xf0]  ;;  %v7710_v44 = vld [vmem:[%s13084_s9 + $0x24] sm:$0xf] }
 0x6b8   : > { %v4571_v32 = vsub.f32 %v10937_v49, %v4539_v12  ;;  %v13523_v12 = vld [vmem:[#allocation86_spill] sm:$0xff] }
 0x6ba   : > { %v11041_v24 = vmul.f32 %v13518_v39, %v4571_v32 }
 0x6bc   : > { %v4635_v8 = vmul.f32 %v11041_v24, %v11041_v24 }
 0x6bd   : > { %v4483_v53 = vpop.xlane.xlu2 %4482  ;;  %4400 = vmatmul.bf16.gmra.mxu2 %v4272_v11  ;;  %v7601_v11 = vld [vmem:[%s13084_s9 + $0x78] sm:$0xf0] }
 0x6be   : > { %v4540_v48 = vmul.f32 0.015625, %v4483_v53  ;;  %4672 = vadd.xlane.f32.xlu1 %v4635_v8  ;;  %v7604_v31 = vor.u32 %v7720_v50, %v7601_v11  ;;  %v7560_v8 = vor.u32 %v7711_v52, %v7559_v62  ;;  %v7561_v53 = vld [vmem:[%s13084_s9 + $0x28] sm:$0xf0]  ;;  %v7709_v50 = vld [vmem:[%s13084_s9 + $0x14] sm:$0xf0] }
 0x6c0   : > { %v4572_v15 = vsub.f32 %v10942_v46, %v4540_v48  ;;  %v7721_v46 = vld [vmem:[%s13084_s9 + $0x74] sm:$0xf0]  ;;  %5421 = vmatpush.bf16.msra.mxu0 %v7604_v31  ;;  %v13524_v48 = vld [vmem:[#allocation77_spill] sm:$0xff] }
 0x6c1   : > { %v7600_v38 = vor.u32 %v7721_v46, %v7599_v14  ;;  %v7551_v46 = vld [vmem:[%s13084_s9 + $0x10] sm:$0xf] }
 0x6c2   : > { %v11050_v2 = vmul.f32 %v13518_v39, %v4572_v15  ;;  %v7552_v31 = vor.u32 %v7709_v50, %v7551_v46  ;;  %v13528_v50 = vld [vmem:[#allocation29_spill] sm:$0xff] }
 0x6c3   : > { %5332 = vmatpush.bf16.msrb.mxu3 %v7600_v38  ;;  %v7708_v38 = vld [vmem:[%s13084_s9 + $0x14] sm:$0xf] }
 0x6c4   : > { %v4636_v49 = vmul.f32 %v11050_v2, %v11050_v2 }
 0x6c6   : > { %4674 = vadd.xlane.f32.xlu1 %v4636_v49  ;;  %v7564_v49 = vor.u32 %v7710_v44, %v7561_v53 }
 0x6c7   : > { %5333 = vmatpush.bf16.msrb.mxu3 %v7592_v10 }
 0x6cb   : > { %5334 = vmatpush.bf16.msrb.mxu3 %v7584_v28 }
 0x6cd   : > { %4405 = vmatmul.bf16.gmra.mxu2 %v4273_v40  ;;  %v7718_v40 = vld [vmem:[%s13084_s9 + $0x64] sm:$0xf] }
 0x6ce   : > { %v7596_v54 = vor.u32 %v7718_v40, %v7593_v13  ;;  %v7556_v40 = vor.u32 %v7708_v38, %v7553_v35  ;;  %v7543_v13 = vld [vmem:[%s13084_s9] sm:$0xf] }
 0x6cf   : > { %5335 = vmatpush.bf16.msrb.mxu3 %v7576_v41 }
 0x6d0   : > { %5422 = vmatpush.bf16.msra.mxu0 %v7596_v54  ;;  %v7706_v54 = vld [vmem:[%s13084_s9 + $0x4] sm:$0xf] }
 0x6d3   : > { %5336 = vmatpush.bf16.msrb.mxu3 %v7568_v25  ;;  %v13527_v25 = vld [vmem:[#allocation28_spill] sm:$0xff] }
 0x6d4   : > { %5423 = vmatpush.bf16.msra.mxu0 %v7588_v56 }
 0x6d7   : > { %5337 = vmatpush.bf16.msrb.mxu3 %v7560_v8 }
 0x6d8   : > { %5424 = vmatpush.bf16.msra.mxu0 %v7580_v58 }
 0x6db   : > { %5338 = vmatpush.bf16.msrb.mxu3 %v7552_v31 }
 0x6dc   : > { %5425 = vmatpush.bf16.msra.mxu0 %v7572_v43 }
 0x6e0   : > { %5426 = vmatpush.bf16.msra.mxu0 %v7564_v49 }
 0x6e4   : > { %5427 = vmatpush.bf16.msra.mxu0 %v7556_v40 }
 0x6f5   : > { %v4183_v5 = vpop.f32.mrf.mxu1 }
 0x6f6   : > { %v4184_v60 = vadd.f32 %v4183_v5, %v13522_v18  ;;  %v4485_v18 = vpop.xlane.xlu0 %4484 }
 0x6f7   : > { %v4541_v28 = vmul.f32 0.015625, %v4485_v18 }
 0x6f8   : > { %v4276_v37 = vpack.c.bf16 %v4184_v60, %v4165_v21  ;;  %v7707_v21 = vld [vmem:[%s13084_s9 + $0x4] sm:$0xf0] }
 0x6f9   : > { %v7544_v60 = vor.u32 %v7707_v21, %v7543_v13  ;;  %v4573_v30 = vsub.f32 %v10947_v7, %v4541_v28  ;;  %v11189_v21 = vld [vmem:[%s13082_s7] ss:$0 sm:$0xff] }
 0x6fa   : > { %4420 = vmatmul.bf16.gmra.mxu3 %v4276_v37  ;;  %v4221_v63 = vpop.f32.mrf.mxu3  ;;  %v7545_v37 = vld [vmem:[%s13084_s9 + $0x8] sm:$0xf0] }
 0x6fb   : > { %v4222_v15 = vadd.f32 %v4221_v63, %v13524_v48  ;;  %v7548_v45 = vor.u32 %v7706_v54, %v7545_v37  ;;  %5339 = vmatpush.bf16.msrb.mxu3 %v7544_v60 }
 0x6fd   : > { %v4185_v59 = vpop.f32.mrf.mxu1  ;;  %5428 = vmatpush.bf16.msra.mxu0 %v7548_v45 }
 0x6fe   : > { %v13525_v59 = vld [vmem:[#allocation89_spill] sm:$0xff]  ;;  %v4487_v42 = vpop.xlane.xlu0 %4486 }
 0x6ff   : > { %v4241_v41 = vadd.f32 %v10865_v51, %v13525_v59  ;;  %v4542_v62 = vmul.f32 0.015625, %v4487_v42  ;;  %v11168_v51 = vmul.f32 %v13518_v39, %v4573_v30  ;;  %v11210_v59 = vld [vmem:[%s13083_s8] ss:$0 sm:$0xff] }
 0x700   : > { %v4202_v55 = vpop.f32.mrf.mxu2 }
 0x701   : > { %v4203_v32 = vadd.f32 %v4202_v55, %v13523_v12 }
 0x702   : > { %v4223_v6 = vpop.f32.mrf.mxu3 }
 0x703   : > { %v4277_v14 = vpack.c.bf16 %v4222_v15, %v4203_v32 }
 0x708   : > { %v4204_v10 = vpop.f32.mrf.mxu2 }
 0x709   : > { %v4663_v11 = vpop.xlane.xlu1 %4662 }
 0x70a   : > { %v4726_v22 = vmul.f32 0.015625, %v4663_v11  ;;  %4425 = vmatmul.bf16.gmra.mxu3 %v4277_v14  ;;  %v4574_v14 = vsub.f32 %v10952_v3, %v4542_v62  ;;  %v4637_v11 = vmul.f32 %v11168_v51, %v11168_v51 }
 0x70c   : > { %v4758_v5 = vadd.f32 1e-05, %v4726_v22  ;;  %v11182_v40 = vmul.f32 %v13518_v39, %v4574_v14 }
 0x70e   : > { %8071 = vrsqrt.f32 %v4758_v5  ;;  %vm4796_vm11 = vweird.f32 %v4758_v5 }
 0x710   : > { %v4386_v56 = vpop.f32.mrf.mxu2 }
 0x711   : > { %v4665_v27 = vpop.xlane.xlu2 %4664  ;;  %v4387_v1 = vadd.f32 %v10876_v61, %v4386_v56  ;;  %v4489_v53 = vpop.xlane.xlu1 %4488 }
 0x712   : > { %v4727_v4 = vmul.f32 0.015625, %v4665_v27  ;;  %v4543_v10 = vmul.f32 0.015625, %v4489_v53  ;;  %v13530_v53 = vld [vmem:[#allocation31_spill] sm:$0xff] }
 0x713   : > { %v11164_v23 = vadd.f32 %v4387_v1, %v13527_v25 }
 0x714   : > { %v8072_v17 = vpop.eup %8071  ;;  %v4759_v63 = vadd.f32 1e-05, %v4727_v4  ;;  %v4638_v4 = vmul.f32 %v11182_v40, %v11182_v40  ;;  %v4575_v28 = vsub.f32 %v11000_v9, %v4543_v10 }
 0x715   : > { %v4791_v57 = vmul.f32 %v8072_v17, %v4758_v5  ;;  %v4259_v19 = vpop.f32.mrf.mxu1  ;;  %4494 = vadd.xlane.f32.xlu2 %v11164_v23  ;;  %vm4797_vm10 = vweird.f32 %v8072_v17 }
 0x716   : > { %8073 = vrsqrt.f32 %v4759_v63  ;;  %v4260_v58 = vadd.f32 %v4259_v19, %v13526_v16  ;;  %vm4798_vm12 = vmor %vm4796_vm11, %vm4797_vm10  ;;  %vm4806_vm14 = vweird.f32 %v4759_v63  ;;  %v11215_v42 = vmul.f32 %v13518_v39, %v4575_v28  ;;  %v13533_v28 = vld [vmem:[#allocation32_spill] sm:$0xff] }
 0x717   : > { %v4792_v26 = vmul.f32 %v8072_v17, %v4791_v57  ;;  %v13529_v57 = vld [vmem:[#allocation30_spill] sm:$0xff] }
 0x718   : > { %v4278_v6 = vpack.c.bf16 %v4260_v58, %v4241_v41  ;;  %v4388_v7 = vpop.f32.mrf.mxu2 }
 0x719   : > { %v4793_v43 = vmul.f32 0.5, %v4792_v26  ;;  %v4667_v55 = vpop.xlane.xlu2 %4666  ;;  %v4389_v15 = vadd.f32 %v10876_v61, %v4388_v7 }
 0x71a   : > { %v4728_v52 = vmul.f32 0.015625, %v4667_v55  ;;  %4430 = vmatmul.bf16.gmra.mxu3 %v4278_v6 }
 0x71b   : > { %v4794_v44 = vsub.f32 1.5, %v4793_v43  ;;  %v11176_v38 = vadd.f32 %v4389_v15, %v13528_v50  ;;  %v4639_v15 = vmul.f32 %v11215_v42, %v11215_v42 }
 0x71c   : > { %v8074_v12 = vpop.eup %8073  ;;  %v11170_v32 = vadd.f32 1e-05, %v4728_v52 }
 0x71d   : > { %v4795_v8 = vmul.f32 %v8072_v17, %v4794_v44  ;;  %v4801_v48 = vmul.f32 %v8074_v12, %v4759_v63  ;;  %v4261_v49 = vpop.f32.mrf.mxu1  ;;  %4676 = vadd.xlane.f32.xlu2 %v4637_v11  ;;  %4496 = vadd.xlane.f32.xlu0 %v11176_v38  ;;  %vm4807_vm13 = vweird.f32 %v8074_v12 }
 0x71e   : > { %8075 = vrsqrt.f32 %v11170_v32  ;;  %vm4808_vm15 = vmor %vm4806_vm14, %vm4807_vm13  ;;  %vm4816_vm1 = vweird.f32 %v11170_v32  ;;  %v13535_v49 = vld [vmem:[#allocation34_spill] sm:$0xff] }
 0x71f   : > { %v4802_v46 = vmul.f32 %v8074_v12, %v4801_v48  ;;  %v4799_v31 = vsel %vm4798_vm12, %v8072_v17, %v4795_v8 }
 0x720   : > { %v5110_v18 = vmul.f32 %v4799_v31, %v10986_v29  ;;  %v4391_v54 = vpop.f32.mrf.mxu2  ;;  %v4491_v29 = vpop.xlane.xlu1 %4490 }
 0x721   : > { %v4803_v35 = vmul.f32 0.5, %v4802_v46  ;;  %v4669_v22 = vpop.xlane.xlu0 %4668  ;;  %v4392_v27 = vadd.f32 %v10876_v61, %v4391_v54  ;;  %v4544_v58 = vmul.f32 0.015625, %v4491_v29  ;;  %v4493_v14 = vpop.xlane.xlu2 %4492 }
 0x722   : > { %v4729_v3 = vmul.f32 0.015625, %v4669_v22  ;;  %v5146_v63 = vmul.f32 %v11189_v21, %v5110_v18 }
 0x723   : > { %v4804_v5 = vsub.f32 1.5, %v4803_v35  ;;  %v11203_v1 = vadd.f32 %v4392_v27, %v13529_v57  ;;  %v4545_v35 = vmul.f32 0.015625, %v4493_v14 }
 0x724   : > { %v11184_v13 = vpop.eup %8075  ;;  %v11192_v60 = vadd.f32 1e-05, %v4729_v3  ;;  %v11220_v43 = vadd.f32 %v11210_v59, %v5146_v63 }
 0x725   : > { %v4805_v37 = vmul.f32 %v8074_v12, %v4804_v5  ;;  %v4811_v45 = vmul.f32 %v11184_v13, %v11170_v32  ;;  %4678 = vadd.xlane.f32.xlu2 %v4638_v4  ;;  %4498 = vadd.xlane.f32.xlu0 %v11203_v1  ;;  %vm4817_vm0 = vweird.f32 %v11184_v13  ;;  %v4577_v27 = vsub.f32 %v11025_v0, %v4545_v35 }
 0x726   : > { %8077 = vrsqrt.f32 %v11192_v60  ;;  %vm11239_vm2 = vmor %vm4816_vm1, %vm4817_vm0  ;;  %vm4826_vm4 = vweird.f32 %v11192_v60 }
 0x727   : > { %v4809_v17 = vsel %vm4808_vm15, %v8074_v12, %v4805_v37  ;;  %v4812_v56 = vmul.f32 %v11184_v13, %v4811_v45  ;;  %v4576_v12 = vsub.f32 %v11016_v36, %v4544_v58  ;;  %v11265_v57 = vmul.f32 %v13518_v39, %v4577_v27 }
 0x728   : > { %v5111_v19 = vmul.f32 %v4809_v17, %v10995_v20  ;;  %v4393_v6 = vpop.f32.mrf.mxu2 }
 0x729   : > { %v4813_v41 = vmul.f32 0.5, %v4812_v56  ;;  %v4671_v9 = vpop.xlane.xlu0 %4670  ;;  %v4394_v44 = vadd.f32 %v10876_v61, %v4393_v6  ;;  %v11248_v50 = vmul.f32 %v13518_v39, %v4576_v12 }
 0x72a   : > { %v5147_v16 = vmul.f32 %v11189_v21, %v5111_v19  ;;  %v4730_v30 = vmul.f32 0.015625, %v4671_v9 }
 0x72b   : > { %v4814_v26 = vsub.f32 1.5, %v4813_v41  ;;  %v11235_v48 = vadd.f32 %v4394_v44, %v13530_v53  ;;  %v4640_v37 = vmul.f32 %v11248_v50, %v11248_v50 }
 0x72c   : > { %v8078_v25 = vpop.eup %8077  ;;  %v11217_v20 = vadd.f32 1e-05, %v4730_v30  ;;  %v11223_v55 = vadd.f32 %v11210_v59, %v5147_v16 }
 0x72d   : > { %v4815_v62 = vmul.f32 %v11184_v13, %v4814_v26  ;;  %v4821_v52 = vmul.f32 %v8078_v25, %v11192_v60  ;;  %4680 = vadd.xlane.f32.xlu0 %v4639_v15  ;;  %4500 = vadd.xlane.f32.xlu1 %v11235_v48  ;;  %vm4827_vm3 = vweird.f32 %v8078_v25 }
 0x72e   : > { %8079 = vrsqrt.f32 %v11217_v20  ;;  %v5214_v7 = vpack.c.bf16 %v11223_v55, %v11220_v43  ;;  %vm4828_vm5 = vmor %vm4826_vm4, %vm4827_vm3  ;;  %vm4836_vm7 = vweird.f32 %v11217_v20 }
 0x72f   : > { %v4822_v8 = vmul.f32 %v8078_v25, %v4821_v52  ;;  %v4819_v36 = vsel %vm11239_vm2, %v11184_v13, %v4815_v62  ;;  %v4641_v62 = vmul.f32 %v11265_v57, %v11265_v57 }
 0x730   : > { %5340 = vmatmul.bf16.vlgmr.msrb.gmra.mxu3 %v5214_v7  ;;  %5429 = vmatmul.bf16.vlgmr.msra.gmra.mxu0 %v5214_v7  ;;  %v4396_v10 = vpop.f32.mrf.mxu2  ;;  %v5112_v5 = vmul.f32 %v4819_v36, %v11011_v34 }
 0x731   : > { %v4823_v46 = vmul.f32 0.5, %v4822_v8  ;;  %v4673_v32 = vpop.xlane.xlu1 %4672  ;;  %v4397_v54 = vadd.f32 %v10876_v61, %v4396_v10 }
 0x732   : > { %v4731_v11 = vmul.f32 0.015625, %v4673_v32  ;;  %v5148_v60 = vmul.f32 %v11189_v21, %v5112_v5 }
 0x733   : > { %v4824_v31 = vsub.f32 1.5, %v4823_v46  ;;  %v11258_v17 = vadd.f32 %v4397_v54, %v13533_v28  ;;  %v11309_v54 = vpop.f32.mrf.mxu3 }
 0x734   : > { %v8080_v22 = vpop.eup %8079  ;;  %v4763_v3 = vadd.f32 1e-05, %v4731_v11  ;;  %v11268_v41 = vadd.f32 %v11210_v59, %v5148_v60 }
 0x735   : > { %v4825_v18 = vmul.f32 %v8078_v25, %v4824_v31  ;;  %v4831_v13 = vmul.f32 %v8080_v22, %v11217_v20  ;;  %4682 = vadd.xlane.f32.xlu0 %v4640_v37  ;;  %4502 = vadd.xlane.f32.xlu1 %v11258_v17  ;;  %vm4837_vm6 = vweird.f32 %v8080_v22 }
 0x736   : > { %8081 = vrsqrt.f32 %v4763_v3  ;;  %vm4838_vm8 = vmor %vm4836_vm7, %vm4837_vm6  ;;  %vm4846_vm10 = vweird.f32 %v4763_v3 }
 0x737   : > { %v4829_v45 = vsel %vm4828_vm5, %v8078_v25, %v4825_v18  ;;  %v4832_v4 = vmul.f32 %v8080_v22, %v4831_v13  ;;  %v13534_v25 = vld [vmem:[#allocation33_spill] sm:$0xff] }
 0x738   : > { %v5113_v34 = vmul.f32 %v4829_v45, %v11022_v47  ;;  %v4398_v0 = vpop.f32.mrf.mxu2  ;;  %v13537_v18 = vld [vmem:[#allocation37_spill] sm:$0xff] }
 0x739   : > { %v4833_v29 = vmul.f32 0.5, %v4832_v4  ;;  %v4399_v58 = vadd.f32 %v10876_v61, %v4398_v0  ;;  %v4675_v4 = vpop.xlane.xlu1 %4674  ;;  %v7735_v0 = vld [vmem:[%s13086_s11 + $0x68] sm:$0xff] }
 0x73a   : > { %v5149_v56 = vmul.f32 %v11189_v21, %v5113_v34  ;;  %v7737_v34 = vld [vmem:[%s13086_s11 + $0x78] sm:$0xff]  ;;  %v4732_v60 = vmul.f32 0.015625, %v4675_v4 }
 0x73b   : > { %v4834_v63 = vsub.f32 1.5, %v4833_v29  ;;  %v11278_v6 = vadd.f32 %v4399_v58, %v13534_v25  ;;  %v11312_v37 = vpop.f32.mrf.mxu3  ;;  %5827 = vmatpush.bf16.msrb.mxu2 %v7737_v34  ;;  %v7736_v29 = vld [vmem:[%s13086_s11 + $0x70] sm:$0xff]  ;;  %v7727_v58 = vld [vmem:[%s13086_s11 + $0x28] sm:$0xff] }
 0x73c   : > { %v8082_v19 = vpop.eup %8081  ;;  %v11271_v9 = vadd.f32 %v11210_v59, %v5149_v56  ;;  %v11326_v56 = vadd.f32 1e-05, %v4732_v60  ;;  %v13538_v60 = vld [vmem:[#allocation38_spill] sm:$0xff] }
 0x73d   : > { %v4835_v47 = vmul.f32 %v8080_v22, %v4834_v63  ;;  %v4841_v16 = vmul.f32 %v8082_v19, %v4763_v3  ;;  %4504 = vadd.xlane.f32.xlu2 %v11278_v6  ;;  %4684 = vadd.xlane.f32.xlu1 %v4641_v62  ;;  %vm4847_vm9 = vweird.f32 %v8082_v19  ;;  %v13536_v3 = vld [vmem:[#allocation35_spill] sm:$0xff] }
 0x73e   : > { %v5215_v30 = vpack.c.bf16 %v11271_v9, %v11268_v41  ;;  %vm4848_vm11 = vmor %vm4846_vm10, %vm4847_vm9  ;;  %v7729_v63 = vld [vmem:[%s13086_s11 + $0x38] sm:$0xff]  ;;  %8083 = vrsqrt.f32 %v11326_v56  ;;  %vm4856_vm13 = vweird.f32 %v11326_v56 }
 0x73f   : > { %v4842_v26 = vmul.f32 %v8082_v19, %v4841_v16  ;;  %v4839_v52 = vsel %vm4838_vm8, %v8080_v22, %v4835_v47  ;;  %5828 = vmatpush.bf16.msrb.mxu2 %v7736_v29  ;;  %5738 = vmatpush.bf16.msrb.mxu1 %v7729_v63  ;;  %v7728_v47 = vld [vmem:[%s13086_s11 + $0x30] sm:$0xff]  ;;  %v7734_v16 = vld [vmem:[%s13086_s11 + $0x60] sm:$0xff]  ;;  %v7723_v63 = vld [vmem:[%s13086_s11 + $0x8] sm:$0xff] }
 0x740   : > { %5345 = vmatmul.bf16.gmra.mxu3 %v5215_v30  ;;  %5434 = vmatmul.bf16.gmra.mxu0 %v5215_v30  ;;  %v5114_v7 = vmul.f32 %v4839_v52, %v11035_v33  ;;  %v4401_v20 = vpop.f32.mrf.mxu2  ;;  %v7733_v52 = vld [vmem:[%s13086_s11 + $0x58] sm:$0xff] }
 0x741   : > { %v4843_v44 = vmul.f32 0.5, %v4842_v26  ;;  %v4402_v53 = vadd.f32 %v10876_v61, %v4401_v20 }
 0x742   : > { %v5150_v46 = vmul.f32 %v11189_v21, %v5114_v7 }
 0x743   : > { %v4844_v12 = vsub.f32 1.5, %v4843_v44  ;;  %v11286_v14 = vadd.f32 %v4402_v53, %v13535_v49  ;;  %v11314_v45 = vpop.f32.mrf.mxu3  ;;  %5829 = vmatpush.bf16.msrb.mxu2 %v7735_v0  ;;  %5739 = vmatpush.bf16.msrb.mxu1 %v7728_v47 }
 0x744   : > { %v11293_v33 = vadd.f32 %v11210_v59, %v5150_v46  ;;  %v11346_v26 = vpop.eup %8083 }
 0x745   : > { %v4845_v8 = vmul.f32 %v8082_v19, %v4844_v12  ;;  %4506 = vadd.xlane.f32.xlu2 %v11286_v14  ;;  %v7726_v12 = vld [vmem:[%s13086_s11 + $0x20] sm:$0xff]  ;;  %v4851_v7 = vmul.f32 %v11346_v26, %v11326_v56  ;;  %vm4857_vm12 = vweird.f32 %v11346_v26 }
 0x746   : > { %vm4858_vm14 = vmor %vm4856_vm13, %vm4857_vm12 }
 0x747   : > { %v4849_v15 = vsel %vm4848_vm11, %v8082_v19, %v4845_v8  ;;  %5830 = vmatpush.bf16.msrb.mxu2 %v7734_v16  ;;  %5740 = vmatpush.bf16.msrb.mxu1 %v7727_v58  ;;  %v7732_v8 = vld [vmem:[%s13086_s11 + $0x50] sm:$0xff]  ;;  %v4852_v49 = vmul.f32 %v11346_v26, %v4851_v7 }
 0x748   : > { %v5115_v36 = vmul.f32 %v4849_v15, %v11041_v24  ;;  %v4403_v11 = vpop.f32.mrf.mxu2  ;;  %v7725_v15 = vld [vmem:[%s13086_s11 + $0x18] sm:$0xff] }
 0x749   : > { %v4404_v35 = vadd.f32 %v10876_v61, %v4403_v11  ;;  %v4853_v4 = vmul.f32 0.5, %v4852_v49 }
 0x74a   : > { %v5151_v32 = vmul.f32 %v11189_v21, %v5115_v36 }
 0x74b   : > { %v11302_v24 = vadd.f32 %v4404_v35, %v13536_v3  ;;  %v11316_v27 = vpop.f32.mrf.mxu3  ;;  %5831 = vmatpush.bf16.msrb.mxu2 %v7733_v52  ;;  %5741 = vmatpush.bf16.msrb.mxu1 %v7726_v12  ;;  %v7731_v35 = vld [vmem:[%s13086_s11 + $0x48] sm:$0xff]  ;;  %v4854_v0 = vsub.f32 1.5, %v4853_v4  ;;  %v11399_v52 = vld [vmem:[%s13081_s6] ss:$0 sm:$0xff] }
 0x74c   : > { %v11296_v31 = vadd.f32 %v11210_v59, %v5151_v32 }
 0x74d   : > { %4508 = vadd.xlane.f32.xlu0 %v11302_v24 }
 0x74e   : > { %v5216_v22 = vpack.c.bf16 %v11296_v31, %v11293_v33 }
 0x74f   : > { %5832 = vmatpush.bf16.msrb.mxu2 %v7732_v8  ;;  %5742 = vmatpush.bf16.msrb.mxu1 %v7725_v15  ;;  %v7722_v8 = vld [vmem:[%s13086_s11] sm:$0xff] }
 0x750   : > { %5350 = vmatmul.bf16.gmra.mxu3 %v5216_v22  ;;  %5439 = vmatmul.bf16.gmra.mxu0 %v5216_v22  ;;  %v4406_v10 = vpop.f32.mrf.mxu2 }
 0x751   : > { %v4407_v5 = vadd.f32 %v10876_v61, %v4406_v10 }
 0x753   : > { %v11307_v13 = vadd.f32 %v4407_v5, %v13537_v18  ;;  %5833 = vmatpush.bf16.msrb.mxu2 %v7731_v35  ;;  %v7724_v18 = vld [vmem:[%s13086_s11 + $0x10] sm:$0xff] }
 0x754   : > { %5743 = vmatpush.bf16.msrb.mxu1 %v7724_v18 }
 0x755   : > { %4510 = vadd.xlane.f32.xlu0 %v11307_v13 }
 0x758   : > { %v4408_v53 = vpop.f32.mrf.mxu2  ;;  %5744 = vmatpush.bf16.msrb.mxu1 %v7723_v63 }
 0x759   : > { %v4409_v22 = vadd.f32 %v10876_v61, %v4408_v53  ;;  %v7730_v61 = vld [vmem:[%s13086_s11 + $0x40] sm:$0xff]  ;;  %v4855_v53 = vmul.f32 %v11346_v26, %v4854_v0 }
 0x75a   : > { %5834 = vmatpush.bf16.msrb.mxu2 %v7730_v61  ;;  %v4414_v61 = vadd.f32 %v11399_v52, %v11312_v37 }
 0x75c   : > { %5745 = vmatpush.bf16.msrb.mxu1 %v7722_v8 }
 0x77d   : > { %v11318_v28 = vpop.f32.mrf.mxu3 }
 0x785   : > { %v11331_v19 = vpop.f32.mrf.mxu3 }
 0x788   : > { %v4495_v30 = vpop.xlane.xlu2 %4494 }
 0x789   : > { %v4546_v25 = vmul.f32 0.015625, %v4495_v30 }
 0x78b   : > { %v4578_v44 = vsub.f32 %v11164_v23, %v4546_v25 }
 0x78d   : > { %v11348_v62 = vpop.f32.mrf.mxu3  ;;  %v11360_v20 = vmul.f32 %v13518_v39, %v4578_v44  ;;  %v4412_v44 = vadd.f32 %v11399_v52, %v11309_v54  ;;  %v13539_v54 = vld [vmem:[#allocation41_spill] sm:$0xff] }
 0x78f   : > { %v4642_v23 = vmul.f32 %v11360_v20, %v11360_v20 }
 0x790   : > { %v4497_v36 = vpop.xlane.xlu0 %4496  ;;  %v4677_v46 = vpop.xlane.xlu2 %4676 }
 0x791   : > { %v4547_v32 = vmul.f32 0.015625, %v4497_v36  ;;  %v4733_v11 = vmul.f32 0.015625, %v4677_v46  ;;  %4686 = vadd.xlane.f32.xlu1 %v4642_v23  ;;  %v11419_v36 = vadd.f32 %v4412_v44, %v13539_v54 }
 0x793   : > { %v4579_v3 = vsub.f32 %v11176_v38, %v4547_v32  ;;  %v4765_v10 = vadd.f32 1e-05, %v4733_v11  ;;  %v11388_v38 = vadd.f32 %v4409_v22, %v13538_v60  ;;  %v4859_v32 = vsel %vm4858_vm14, %v11346_v26, %v4855_v53 }
 0x794   : > { %v5116_v60 = vmul.f32 %v4859_v32, %v11050_v2 }
 0x795   : > { %v11376_v5 = vpop.f32.mrf.mxu3  ;;  %v11382_v34 = vmul.f32 %v13518_v39, %v4579_v3  ;;  %8085 = vrsqrt.f32 %v4765_v10  ;;  %vm4866_vm0 = vweird.f32 %v4765_v10 }
 0x796   : > { %v5152_v44 = vmul.f32 %v11189_v21, %v5116_v60 }
 0x797   : > { %v4643_v29 = vmul.f32 %v11382_v34, %v11382_v34 }
 0x798   : > { %v4499_v47 = vpop.xlane.xlu0 %4498  ;;  %v4679_v16 = vpop.xlane.xlu2 %4678 }
 0x799   : > { %v4548_v58 = vmul.f32 0.015625, %v4499_v47  ;;  %v4734_v30 = vmul.f32 0.015625, %v4679_v16  ;;  %4688 = vadd.xlane.f32.xlu2 %v4643_v29  ;;  %4512 = vadd.xlane.f32.xlu1 %v11388_v38 }
 0x79b   : > { %v8086_v25 = vpop.eup %8085  ;;  %v4580_v12 = vsub.f32 %v11203_v1, %v4548_v58  ;;  %v11404_v7 = vadd.f32 1e-05, %v4734_v30  ;;  %v13540_v58 = vld [vmem:[#allocation42_spill] sm:$0xff] }
 0x79c   : > { %v4861_v23 = vmul.f32 %v8086_v25, %v4765_v10  ;;  %vm4867_vm15 = vweird.f32 %v8086_v25  ;;  %v11441_v2 = vadd.f32 %v4414_v61, %v13540_v58 }
 0x79d   : > { %v11412_v15 = vmul.f32 %v13518_v39, %v4580_v12  ;;  %8087 = vrsqrt.f32 %v11404_v7  ;;  %v11415_v49 = vpop.f32.mrf.mxu3  ;;  %vm4868_vm1 = vmor %vm4866_vm0, %vm4867_vm15  ;;  %vm4876_vm3 = vweird.f32 %v11404_v7 }
 0x79e   : > { %v4862_v1 = vmul.f32 %v8086_v25, %v4861_v23 }
 0x79f   : > { %v4644_v46 = vmul.f32 %v11412_v15, %v11412_v15 }
 0x7a0   : > { %v4863_v11 = vmul.f32 0.5, %v4862_v1  ;;  %v4681_v35 = vpop.xlane.xlu0 %4680  ;;  %v4501_v22 = vpop.xlane.xlu1 %4500 }
 0x7a1   : > { %v4735_v3 = vmul.f32 0.015625, %v4681_v35  ;;  %v4549_v18 = vmul.f32 0.015625, %v4501_v22  ;;  %4690 = vadd.xlane.f32.xlu2 %v4644_v46  ;;  %4514 = vadd.xlane.f32.xlu1 %v11419_v36  ;;  %v4417_v46 = vadd.f32 %v11399_v52, %v11314_v45 }
 0x7a2   : > { %v4864_v56 = vsub.f32 1.5, %v4863_v11 }
 0x7a3   : > { %v11425_v4 = vpop.eup %8087  ;;  %v11430_v29 = vadd.f32 1e-05, %v4735_v3  ;;  %v4581_v26 = vsub.f32 %v11235_v48, %v4549_v18  ;;  %v11460_v3 = vadd.f32 %v11210_v59, %v5152_v44 }
 0x7a4   : > { %v4865_v63 = vmul.f32 %v8086_v25, %v4864_v56  ;;  %v4871_v0 = vmul.f32 %v11425_v4, %v11404_v7  ;;  %vm4877_vm2 = vweird.f32 %v11425_v4 }
 0x7a5   : > { %8089 = vrsqrt.f32 %v11430_v29  ;;  %v11437_v47 = vmul.f32 %v13518_v39, %v4581_v26  ;;  %v11444_v48 = vpop.f32.mrf.mxu3  ;;  %vm11480_vm4 = vmor %vm4876_vm3, %vm4877_vm2  ;;  %vm4886_vm6 = vweird.f32 %v11430_v29 }
 0x7a6   : > { %v4869_v16 = vsel %vm4868_vm1, %v8086_v25, %v4865_v63  ;;  %v4872_v37 = vmul.f32 %v11425_v4, %v4871_v0  ;;  %v5246_v25 = vld [vmem:[%s13085_s10] sm:$0x3]  ;;  %v13541_v63 = vld [vmem:[#allocation43_spill] sm:$0xff] }
 0x7a7   : > { %v5117_v30 = vmul.f32 %v4869_v16, %v11168_v51  ;;  %v4645_v10 = vmul.f32 %v11437_v47, %v11437_v47  ;;  %v11468_v60 = vperm.slane %v5246_v25, 1  ;;  %v11478_v0 = vadd.f32 %v4417_v46, %v13541_v63 }
 0x7a8   : > { %v4873_v12 = vmul.f32 0.5, %v4872_v37  ;;  %v4683_v8 = vpop.xlane.xlu0 %4682  ;;  %v4503_v53 = vpop.xlane.xlu1 %4502  ;;  %v11493_v46 = vperm.slane %v5246_v25, 0 }
 0x7a9   : > { %v4736_v23 = vmul.f32 0.015625, %v4683_v8  ;;  %v4550_v1 = vmul.f32 0.015625, %v4503_v53  ;;  %4516 = vadd.xlane.f32.xlu2 %v11441_v2  ;;  %4692 = vadd.xlane.f32.xlu0 %v4645_v10  ;;  %v5153_v54 = vmul.f32 %v11189_v21, %v5117_v30  ;;  %v4419_v8 = vadd.f32 %v11399_v52, %v11316_v27 }
 0x7aa   : > { %v4874_v32 = vsub.f32 1.5, %v4873_v12 }
 0x7ab   : > { %v8090_v11 = vpop.eup %8089  ;;  %v11456_v35 = vadd.f32 1e-05, %v4736_v23  ;;  %v4582_v22 = vsub.f32 %v11258_v17, %v4550_v1  ;;  %v11463_v18 = vadd.f32 %v11210_v59, %v5153_v54 }
 0x7ac   : > { %v4875_v56 = vmul.f32 %v11425_v4, %v4874_v32  ;;  %v4881_v61 = vmul.f32 %v8090_v11, %v11430_v29  ;;  %vm4887_vm5 = vweird.f32 %v8090_v11 }
 0x7ad   : > { %v5430_v51 = vpop.f32.mrf.mxu0  ;;  %8091 = vrsqrt.f32 %v11456_v35  ;;  %v11472_v45 = vmul.f32 %v13518_v39, %v4582_v22  ;;  %v5217_v17 = vpack.c.bf16 %v11463_v18, %v11460_v3  ;;  %vm4888_vm7 = vmor %vm4886_vm6, %vm4887_vm5  ;;  %vm4896_vm9 = vweird.f32 %v11456_v35 }
 0x7ae   : > { %v4882_v26 = vmul.f32 %v8090_v11, %v4881_v61  ;;  %v4879_v30 = vsel %vm11480_vm4, %v11425_v4, %v4875_v56  ;;  %v5431_v7 = vadd.f32 %v5430_v51, %v11468_v60 }
 0x7af   : > { %5355 = vmatmul.bf16.gmra.mxu3 %v5217_v17  ;;  %5444 = vmatmul.bf16.gmra.mxu0 %v5217_v17  ;;  %v4646_v58 = vmul.f32 %v11472_v45, %v11472_v45  ;;  %v5118_v51 = vmul.f32 %v4879_v30, %v11182_v40 }
 0x7b0   : > { %v4883_v10 = vmul.f32 0.5, %v4882_v26  ;;  %v4685_v44 = vpop.xlane.xlu1 %4684  ;;  %v4505_v12 = vpop.xlane.xlu2 %4504  ;;  %v5511_v17 = vmax.f32 %v5431_v7, 0.0 }
 0x7b1   : > { %v4737_v53 = vmul.f32 0.015625, %v4685_v44  ;;  %v4551_v23 = vmul.f32 0.015625, %v4505_v12  ;;  %4518 = vadd.xlane.f32.xlu2 %v11478_v0  ;;  %4694 = vadd.xlane.f32.xlu0 %v4646_v58  ;;  %v13544_v58 = vld [vmem:[#allocation44_spill] sm:$0xff]  ;;  %v5154_v44 = vmul.f32 %v11189_v21, %v5118_v51 }
 0x7b2   : > { %v4884_v54 = vsub.f32 1.5, %v4883_v10 }
 0x7b3   : > { %v5341_v37 = vpop.f32.mrf.mxu3  ;;  %v11496_v32 = vpop.eup %8091  ;;  %v11500_v22 = vadd.f32 1e-05, %v4737_v53  ;;  %v4583_v27 = vsub.f32 %v11278_v6, %v4551_v23  ;;  %v11512_v6 = vadd.f32 %v4419_v8, %v13544_v58 }
 0x7b4   : > { %v4885_v56 = vmul.f32 %v8090_v11, %v4884_v54  ;;  %v4891_v61 = vmul.f32 %v11496_v32, %v11456_v35  ;;  %v5342_v29 = vadd.f32 %v5341_v37, %v11493_v46  ;;  %vm4897_vm8 = vweird.f32 %v11496_v32 }
 0x7b5   : > { %v5432_v1 = vpop.f32.mrf.mxu0  ;;  %8093 = vrsqrt.f32 %v11500_v22  ;;  %v11507_v25 = vmul.f32 %v13518_v39, %v4583_v27  ;;  %v4422_v27 = vadd.f32 %v11399_v52, %v11318_v28  ;;  %vm11542_vm10 = vmor %vm4896_vm9, %vm4897_vm8  ;;  %vm4906_vm12 = vweird.f32 %v11500_v22 }
 0x7b6   : > { %v5433_v4 = vadd.f32 %v5432_v1, %v11468_v60  ;;  %v4889_v63 = vsel %vm4888_vm7, %v8090_v11, %v4885_v56  ;;  %v4892_v40 = vmul.f32 %v11496_v32, %v4891_v61  ;;  %v11525_v56 = vadd.f32 %v11210_v59, %v5154_v44 }
 0x7b7   : > { %v5119_v30 = vmul.f32 %v4889_v63, %v11215_v42  ;;  %v4647_v7 = vmul.f32 %v11507_v25, %v11507_v25  ;;  %v5510_v42 = vmax.f32 %v5342_v29, 0.0  ;;  %v13545_v29 = vld [vmem:[#allocation46_spill] sm:$0xff] }
 0x7b8   : > { %v5513_v26 = vmax.f32 %v5433_v4, 0.0  ;;  %v4893_v12 = vmul.f32 0.5, %v4892_v40  ;;  %v4507_v11 = vpop.xlane.xlu2 %4506 }
 0x7b9   : > { %v4552_v23 = vmul.f32 0.015625, %v4507_v11  ;;  %4520 = vadd.xlane.f32.xlu0 %v11512_v6  ;;  %4696 = vadd.xlane.f32.xlu1 %v4647_v7  ;;  %v5155_v8 = vmul.f32 %v11189_v21, %v5119_v30 }
 0x7ba   : > { %v5575_v16 = vpack.c.bf16 %v5513_v26, %v5511_v17  ;;  %v4894_v1 = vsub.f32 1.5, %v4893_v12 }
 0x7bb   : > { %v5343_v10 = vpop.f32.mrf.mxu3  ;;  %v8094_v4 = vpop.eup %8093  ;;  %v4584_v51 = vsub.f32 %v11286_v14, %v4552_v23  ;;  %v11528_v61 = vadd.f32 %v11210_v59, %v5155_v8 }
 0x7bc   : > { %v5344_v53 = vadd.f32 %v5343_v10, %v11493_v46  ;;  %5835 = vmatmul.bf16.vlgmr.msrb.gmra.mxu2 %v5575_v16  ;;  %v4895_v17 = vmul.f32 %v11496_v32, %v4894_v1  ;;  %v4901_v26 = vmul.f32 %v8094_v4, %v11500_v22  ;;  %v11540_v16 = vadd.f32 %v4422_v27, %v13545_v29 }
 0x7bd   : > { %v5435_v37 = vpop.f32.mrf.mxu0  ;;  %v11534_v40 = vmul.f32 %v13518_v39, %v4584_v51  ;;  %v5218_v28 = vpack.c.bf16 %v11528_v61, %v11525_v56  ;;  %vm4907_vm11 = vweird.f32 %v8094_v4  ;;  %v4424_v1 = vadd.f32 %v11399_v52, %v11331_v19 }
 0x7be   : > { %v5512_v54 = vmax.f32 %v5344_v53, 0.0  ;;  %v4902_v14 = vmul.f32 %v8094_v4, %v4901_v26  ;;  %v4899_v7 = vsel %vm11542_vm10, %v11496_v32, %v4895_v17  ;;  %v5436_v44 = vadd.f32 %v5435_v37, %v11468_v60  ;;  %vm4908_vm13 = vmor %vm4906_vm12, %vm4907_vm11 }
 0x7bf   : > { %5360 = vmatmul.bf16.gmra.mxu3 %v5218_v28  ;;  %5449 = vmatmul.bf16.gmra.mxu0 %v5218_v28  ;;  %v4648_v10 = vmul.f32 %v11534_v40, %v11534_v40  ;;  %v13548_v28 = vld [vmem:[#allocation47_spill] sm:$0xff] }
 0x7c0   : > { %v5574_v63 = vpack.c.bf16 %v5512_v54, %v5510_v42  ;;  %v4903_v35 = vmul.f32 0.5, %v4902_v14  ;;  %v4509_v12 = vpop.xlane.xlu0 %4508  ;;  %v5120_v42 = vmul.f32 %v4899_v7, %v11248_v50  ;;  %v5515_v37 = vmax.f32 %v5436_v44, 0.0 }
 0x7c1   : > { %v4553_v53 = vmul.f32 0.015625, %v4509_v12  ;;  %4522 = vadd.xlane.f32.xlu0 %v11540_v16  ;;  %4698 = vadd.xlane.f32.xlu1 %v4648_v10  ;;  %v11564_v14 = vadd.f32 %v4424_v1, %v13548_v28  ;;  %v13550_v1 = vld [vmem:[#allocation12_spill] sm:$0xff] }
 0x7c2   : > { %5746 = vmatmul.bf16.vlgmr.msrb.gmra.mxu1 %v5574_v63  ;;  %v4904_v23 = vsub.f32 1.5, %v4903_v35  ;;  %v5156_v22 = vmul.f32 %v11189_v21, %v5120_v42 }
 0x7c3   : > { %v5346_v30 = vpop.f32.mrf.mxu3  ;;  %v4585_v32 = vsub.f32 %v11302_v24, %v4553_v53 }
 0x7c4   : > { %v4905_v54 = vmul.f32 %v8094_v4, %v4904_v23  ;;  %v5347_v26 = vadd.f32 %v5346_v30, %v11493_v46  ;;  %v11577_v12 = vadd.f32 %v11210_v59, %v5156_v22 }
 0x7c5   : > { %v5437_v11 = vpop.f32.mrf.mxu0  ;;  %v11560_v51 = vmul.f32 %v13518_v39, %v4585_v32 }
 0x7c6   : > { %v5438_v8 = vadd.f32 %v5437_v11, %v11468_v60  ;;  %v4909_v17 = vsel %vm4908_vm13, %v8094_v4, %v4905_v54  ;;  %v5514_v7 = vmax.f32 %v5347_v26, 0.0 }
 0x7c7   : > { %v5121_v50 = vmul.f32 %v4909_v17, %v11265_v57  ;;  %v4649_v24 = vmul.f32 %v11560_v51, %v11560_v51  ;;  %v4427_v57 = vadd.f32 %v11399_v52, %v11348_v62 }
 0x7c8   : > { %v5517_v27 = vmax.f32 %v5438_v8, 0.0  ;;  %v4511_v29 = vpop.xlane.xlu0 %4510 }
 0x7c9   : > { %v4554_v10 = vmul.f32 0.015625, %v4511_v29  ;;  %4700 = vadd.xlane.f32.xlu2 %v4649_v24  ;;  %4524 = vadd.xlane.f32.xlu1 %v11564_v14  ;;  %v5157_v30 = vmul.f32 %v11189_v21, %v5121_v50  ;;  %v11588_v42 = vadd.f32 %v4427_v57, %v13550_v1  ;;  %v13551_v50 = vld [vmem:[#allocation13_spill] sm:$0xff] }
 0x7ca   : > { %v5577_v63 = vpack.c.bf16 %v5517_v27, %v5515_v37  ;;  %v4429_v27 = vadd.f32 %v11399_v52, %v11376_v5 }
 0x7cb   : > { %v5348_v19 = vpop.f32.mrf.mxu3  ;;  %v4586_v44 = vsub.f32 %v11307_v13, %v4554_v10  ;;  %v11580_v53 = vadd.f32 %v11210_v59, %v5157_v30  ;;  %v4432_v10 = vadd.f32 %v11399_v52, %v11415_v49 }
 0x7cc   : > { %v5349_v58 = vadd.f32 %v5348_v19, %v11493_v46  ;;  %5840 = vmatmul.bf16.gmra.mxu2 %v5577_v63  ;;  %v11599_v19 = vadd.f32 %v4429_v27, %v13551_v50 }
 0x7cd   : > { %v5440_v4 = vpop.f32.mrf.mxu0  ;;  %13549 = vst [vmem:[#allocation99_spill] sm:$0xff] %v11580_v53  ;;  %v11583_v23 = vmul.f32 %v13518_v39, %v4586_v44  ;;  %v5219_v8 = vpack.c.bf16 %v11580_v53, %v11577_v12 }
 0x7ce   : > { %v5516_v35 = vmax.f32 %v5349_v58, 0.0  ;;  %v5441_v32 = vadd.f32 %v5440_v4, %v11468_v60  ;;  %v13552_v4 = vld [vmem:[#allocation16_spill] sm:$0xff] }
 0x7cf   : > { %5365 = vmatmul.bf16.gmra.mxu3 %v5219_v8  ;;  %5454 = vmatmul.bf16.gmra.mxu0 %v5219_v8  ;;  %v4650_v62 = vmul.f32 %v11583_v23, %v11583_v23  ;;  %v11606_v30 = vadd.f32 %v4432_v10, %v13552_v4 }
 0x7d0   : > { %v5576_v11 = vpack.c.bf16 %v5516_v35, %v5514_v7  ;;  %v5519_v17 = vmax.f32 %v5441_v32, 0.0 }
 0x7d1   : > { %4702 = vadd.xlane.f32.xlu2 %v4650_v62  ;;  %4526 = vadd.xlane.f32.xlu1 %v11588_v42 }
 0x7d2   : > { %5751 = vmatmul.bf16.gmra.mxu1 %v5576_v11 }
 0x7d3   : > { %v5351_v13 = vpop.f32.mrf.mxu3 }
 0x7d4   : > { %v5352_v63 = vadd.f32 %v5351_v13, %v11493_v46 }
 0x7d5   : > { %v5442_v54 = vpop.f32.mrf.mxu0 }
 0x7d6   : > { %v5443_v37 = vadd.f32 %v5442_v54, %v11468_v60  ;;  %v5518_v29 = vmax.f32 %v5352_v63, 0.0 }
 0x7d8   : > { %v5521_v26 = vmax.f32 %v5443_v37, 0.0 }
 0x7d9   : > { %4528 = vadd.xlane.f32.xlu2 %v11599_v19 }
 0x7da   : > { %v5579_v28 = vpack.c.bf16 %v5521_v26, %v5519_v17 }
 0x7db   : > { %v5353_v24 = vpop.f32.mrf.mxu3 }
 0x7dc   : > { %v5354_v22 = vadd.f32 %v5353_v24, %v11493_v46  ;;  %5845 = vmatmul.bf16.gmra.mxu2 %v5579_v28 }
 0x7de   : > { %v5520_v58 = vmax.f32 %v5354_v22, 0.0 }
 0x7e0   : > { %v5578_v5 = vpack.c.bf16 %v5520_v58, %v5518_v29 }
 0x7e1   : > { %4530 = vadd.xlane.f32.xlu2 %v11606_v30 }
 0x7e2   : > { %5756 = vmatmul.bf16.gmra.mxu1 %v5578_v5 }
 0x804   : > { %v4687_v7 = vpop.xlane.xlu1 %4686 }
 0x805   : > { %v4738_v35 = vmul.f32 0.015625, %v4687_v7 }
 0x807   : > { %v4770_v57 = vadd.f32 1e-05, %v4738_v35 }
 0x809   : > { %8095 = vrsqrt.f32 %v4770_v57  ;;  %vm4916_vm15 = vweird.f32 %v4770_v57 }
 0x80c   : > { %v4513_v44 = vpop.xlane.xlu1 %4512  ;;  %v4689_v11 = vpop.xlane.xlu2 %4688 }
 0x80d   : > { %v4555_v8 = vmul.f32 0.015625, %v4513_v44  ;;  %v4739_v1 = vmul.f32 0.015625, %v4689_v11 }
 0x80f   : > { %v8096_v13 = vpop.eup %8095  ;;  %v4587_v62 = vsub.f32 %v11388_v38, %v4555_v8  ;;  %v4771_v32 = vadd.f32 1e-05, %v4739_v1 }
 0x810   : > { %v4911_v49 = vmul.f32 %v8096_v13, %v4770_v57  ;;  %vm4917_vm14 = vweird.f32 %v8096_v13 }
 0x811   : > { %v11611_v54 = vmul.f32 %v13518_v39, %v4587_v62  ;;  %8097 = vrsqrt.f32 %v4771_v32  ;;  %vm4918_vm0 = vmor %vm4916_vm15, %vm4917_vm14  ;;  %vm4926_vm2 = vweird.f32 %v4771_v32 }
 0x812   : > { %v4912_v37 = vmul.f32 %v8096_v13, %v4911_v49 }
 0x813   : > { %v4651_v27 = vmul.f32 %v11611_v54, %v11611_v54 }
 0x814   : > { %v4913_v17 = vmul.f32 0.5, %v4912_v37  ;;  %v4515_v26 = vpop.xlane.xlu1 %4514  ;;  %v4691_v63 = vpop.xlane.xlu2 %4690  ;;  %v4434_v37 = vadd.f32 %v11399_v52, %v11444_v48 }
 0x815   : > { %v4556_v28 = vmul.f32 0.015625, %v4515_v26  ;;  %v4740_v50 = vmul.f32 0.015625, %v4691_v63  ;;  %4704 = vadd.xlane.f32.xlu0 %v4651_v27 }
 0x816   : > { %v4914_v24 = vsub.f32 1.5, %v4913_v17 }
 0x817   : > { %v8098_v22 = vpop.eup %8097  ;;  %v4588_v38 = vsub.f32 %v11419_v36, %v4556_v28  ;;  %v4772_v29 = vadd.f32 1e-05, %v4740_v50 }
 0x818   : > { %v4915_v58 = vmul.f32 %v8096_v13, %v4914_v24  ;;  %v4921_v10 = vmul.f32 %v8098_v22, %v4771_v32  ;;  %vm4927_vm1 = vweird.f32 %v8098_v22  ;;  %v13553_v24 = vld [vmem:[#allocation17_spill] sm:$0xff] }
 0x819   : > { %v11617_v5 = vmul.f32 %v13518_v39, %v4588_v38  ;;  %8099 = vrsqrt.f32 %v4772_v29  ;;  %vm4928_vm3 = vmor %vm4926_vm2, %vm4927_vm1  ;;  %v11630_v38 = vadd.f32 %v4434_v37, %v13553_v24  ;;  %vm4936_vm5 = vweird.f32 %v4772_v29 }
 0x81a   : > { %v4922_v4 = vmul.f32 %v8098_v22, %v4921_v10  ;;  %v4919_v7 = vsel %vm4918_vm0, %v8096_v13, %v4915_v58 }
 0x81b   : > { %v4652_v35 = vmul.f32 %v11617_v5, %v11617_v5  ;;  %v5122_v36 = vmul.f32 %v4919_v7, %v11360_v20 }
 0x81c   : > { %v4923_v44 = vmul.f32 0.5, %v4922_v4  ;;  %v4693_v11 = vpop.xlane.xlu0 %4692  ;;  %v4517_v8 = vpop.xlane.xlu2 %4516 }
 0x81d   : > { %v4741_v1 = vmul.f32 0.015625, %v4693_v11  ;;  %v4557_v62 = vmul.f32 0.015625, %v4517_v8  ;;  %4706 = vadd.xlane.f32.xlu0 %v4652_v35  ;;  %v5158_v20 = vmul.f32 %v11189_v21, %v5122_v36 }
 0x81e   : > { %v4924_v49 = vsub.f32 1.5, %v4923_v44 }
 0x81f   : > { %v8100_v57 = vpop.eup %8099  ;;  %v4773_v27 = vadd.f32 1e-05, %v4741_v1  ;;  %v4589_v13 = vsub.f32 %v11441_v2, %v4557_v62  ;;  %v11638_v35 = vadd.f32 %v11210_v59, %v5158_v20 }
 0x820   : > { %v4925_v17 = vmul.f32 %v8098_v22, %v4924_v49  ;;  %v4931_v26 = vmul.f32 %v8100_v57, %v4772_v29  ;;  %vm4937_vm4 = vweird.f32 %v8100_v57 }
 0x821   : > { %8101 = vrsqrt.f32 %v4773_v27  ;;  %v11626_v63 = vmul.f32 %v13518_v39, %v4589_v13  ;;  %vm4938_vm6 = vmor %vm4936_vm5, %vm4937_vm4  ;;  %vm4946_vm8 = vweird.f32 %v4773_v27 }
 0x822   : > { %v4929_v28 = vsel %vm4928_vm3, %v8098_v22, %v4925_v17  ;;  %v4932_v50 = vmul.f32 %v8100_v57, %v4931_v26 }
 0x823   : > { %v5123_v52 = vmul.f32 %v4929_v28, %v11382_v34  ;;  %v4653_v2 = vmul.f32 %v11626_v63, %v11626_v63 }
 0x824   : > { %v4933_v48 = vmul.f32 0.5, %v4932_v50  ;;  %v4695_v32 = vpop.xlane.xlu0 %4694  ;;  %v4519_v58 = vpop.xlane.xlu2 %4518 }
 0x825   : > { %v4742_v10 = vmul.f32 0.015625, %v4695_v32  ;;  %v4558_v4 = vmul.f32 0.015625, %v4519_v58  ;;  %4532 = vadd.xlane.f32.xlu0 %v11630_v38  ;;  %4708 = vadd.xlane.f32.xlu1 %v4653_v2  ;;  %v5159_v22 = vmul.f32 %v11189_v21, %v5123_v52 }
 0x826   : > { %v4934_v7 = vsub.f32 1.5, %v4933_v48 }
 0x827   : > { %v8102_v44 = vpop.eup %8101  ;;  %v11640_v34 = vadd.f32 1e-05, %v4742_v10  ;;  %v4590_v11 = vsub.f32 %v11478_v0, %v4558_v4  ;;  %v11644_v8 = vadd.f32 %v11210_v59, %v5159_v22 }
 0x828   : > { %v4935_v1 = vmul.f32 %v8100_v57, %v4934_v7  ;;  %v4941_v62 = vmul.f32 %v8102_v44, %v4773_v27  ;;  %vm4947_vm7 = vweird.f32 %v8102_v44 }
 0x829   : > { %8103 = vrsqrt.f32 %v11640_v34  ;;  %v11648_v21 = vmul.f32 %v13518_v39, %v4590_v11  ;;  %v5220_v36 = vpack.c.bf16 %v11644_v8, %v11638_v35  ;;  %vm4948_vm9 = vmor %vm4946_vm8, %vm4947_vm7  ;;  %vm4956_vm11 = vweird.f32 %v11640_v34 }
 0x82a   : > { %v4942_v49 = vmul.f32 %v8102_v44, %v4941_v62  ;;  %v4939_v37 = vsel %vm4938_vm6, %v8100_v57, %v4935_v1 }
 0x82b   : > { %5370 = vmatmul.bf16.gmra.mxu3 %v5220_v36  ;;  %5459 = vmatmul.bf16.gmra.mxu0 %v5220_v36  ;;  %v4654_v59 = vmul.f32 %v11648_v21, %v11648_v21  ;;  %v5124_v28 = vmul.f32 %v4939_v37, %v11412_v15 }
 0x82c   : > { %v4943_v0 = vmul.f32 0.5, %v4942_v49  ;;  %v4521_v13 = vpop.xlane.xlu0 %4520  ;;  %v5445_v17 = vpop.f32.mrf.mxu0 }
 0x82d   : > { %v4559_v29 = vmul.f32 0.015625, %v4521_v13  ;;  %v4697_v26 = vpop.xlane.xlu1 %4696  ;;  %4710 = vadd.xlane.f32.xlu1 %v4654_v59 }
 0x82e   : > { %v4944_v50 = vsub.f32 1.5, %v4943_v0  ;;  %v4743_v20 = vmul.f32 0.015625, %v4697_v26 }
 0x82f   : > { %v11655_v24 = vpop.eup %8103  ;;  %v4591_v57 = vsub.f32 %v11512_v6, %v4559_v29  ;;  %v11670_v6 = vld [vmem:[%s13082_s7] ss:$0 sm:$0xff] }
 0x830   : > { %v4945_v52 = vmul.f32 %v8102_v44, %v4944_v50  ;;  %v4951_v2 = vmul.f32 %v11655_v24, %v11640_v34  ;;  %v11660_v48 = vadd.f32 1e-05, %v4743_v20  ;;  %v5160_v27 = vmul.f32 %v11670_v6, %v5124_v28 }
 0x831   : > { %v11663_v32 = vmul.f32 %v13518_v39, %v4591_v57  ;;  %vm4957_vm10 = vweird.f32 %v11655_v24 }
 0x832   : > { %v4949_v58 = vsel %vm4948_vm9, %v8102_v44, %v4945_v52  ;;  %v4952_v15 = vmul.f32 %v11655_v24, %v4951_v2  ;;  %8105 = vrsqrt.f32 %v11660_v48  ;;  %v5356_v10 = vpop.f32.mrf.mxu3  ;;  %v5446_v44 = vadd.f32 %v5445_v17, %v11468_v60  ;;  %vm11713_vm12 = vmor %vm4956_vm11, %vm4957_vm10 }
 0x833   : > { %v5125_v4 = vmul.f32 %v4949_v58, %v11437_v47  ;;  %v4655_v22 = vmul.f32 %v11663_v32, %v11663_v32  ;;  %v11682_v47 = vld [vmem:[%s13083_s8] ss:$0 sm:$0xff]  ;;  %v5357_v52 = vadd.f32 %v5356_v10, %v11493_v46  ;;  %vm4966_vm14 = vweird.f32 %v11660_v48 }
 0x834   : > { %v4953_v7 = vmul.f32 0.5, %v4952_v15  ;;  %v4523_v11 = vpop.xlane.xlu0 %4522  ;;  %v5447_v1 = vpop.f32.mrf.mxu0  ;;  %v11685_v0 = vadd.f32 %v11682_v47, %v5160_v27  ;;  %v5523_v50 = vmax.f32 %v5446_v44, 0.0 }
 0x835   : > { %v4560_v62 = vmul.f32 0.015625, %v4523_v11  ;;  %v5448_v36 = vadd.f32 %v5447_v1, %v11468_v60  ;;  %v4699_v49 = vpop.xlane.xlu1 %4698  ;;  %4712 = vadd.xlane.f32.xlu2 %v4655_v22  ;;  %v5161_v37 = vmul.f32 %v11670_v6, %v5125_v4 }
 0x836   : > { %v4744_v59 = vmul.f32 0.015625, %v4699_v49  ;;  %13554 = vst [vmem:[#allocation95_spill] sm:$0xff] %v11685_v0  ;;  %v4954_v13 = vsub.f32 1.5, %v4953_v7 }
 0x837   : > { %v4592_v17 = vsub.f32 %v11540_v16, %v4560_v62  ;;  %v5525_v29 = vmax.f32 %v5448_v36, 0.0  ;;  %v11689_v26 = vadd.f32 %v11682_v47, %v5161_v37  ;;  %v5522_v36 = vmax.f32 %v5357_v52, 0.0 }
 0x838   : > { %v8106_v28 = vpop.eup %8105  ;;  %v11691_v20 = vadd.f32 1e-05, %v4744_v59  ;;  %v4955_v27 = vmul.f32 %v11655_v24, %v4954_v13 }
 0x839   : > { %13555 = vst [vmem:[#allocation112_spill] sm:$0xff] %v11689_v26  ;;  %v4961_v57 = vmul.f32 %v8106_v28, %v11660_v48  ;;  %v11696_v2 = vmul.f32 %v13518_v39, %v4592_v17  ;;  %v5221_v58 = vpack.c.bf16 %v11689_v26, %v11685_v0  ;;  %v5581_v15 = vpack.c.bf16 %v5525_v29, %v5523_v50 }
 0x83a   : > { %8107 = vrsqrt.f32 %v11691_v20  ;;  %v5358_v16 = vpop.f32.mrf.mxu3  ;;  %vm4967_vm13 = vweird.f32 %v8106_v28  ;;  %v4959_v34 = vsel %vm11713_vm12, %v11655_v24, %v4955_v27  ;;  %vm4976_vm1 = vweird.f32 %v11691_v20 }
 0x83b   : > { %v4962_v4 = vmul.f32 %v8106_v28, %v4961_v57  ;;  %v5359_v22 = vadd.f32 %v5358_v16, %v11493_v46  ;;  %5375 = vmatmul.bf16.gmra.mxu3 %v5221_v58  ;;  %5464 = vmatmul.bf16.gmra.mxu0 %v5221_v58  ;;  %v4656_v1 = vmul.f32 %v11696_v2, %v11696_v2  ;;  %v13558_v16 = vlaneseq  ;;  %vm4968_vm15 = vmor %vm4966_vm14, %vm4967_vm13 }
 0x83c   : > { %5850 = vmatmul.bf16.gmra.mxu2 %v5581_v15  ;;  %v5450_v44 = vpop.f32.mrf.mxu0  ;;  %v4701_v11 = vpop.xlane.xlu2 %4700  ;;  %v5126_v24 = vmul.f32 %v4959_v34, %v11472_v45 }
 0x83d   : > { %v4963_v62 = vmul.f32 0.5, %v4962_v4  ;;  %v5524_v49 = vmax.f32 %v5359_v22, 0.0  ;;  %v4525_v37 = vpop.xlane.xlu1 %4524  ;;  %v4745_v59 = vmul.f32 0.015625, %v4701_v11  ;;  %4714 = vadd.xlane.f32.xlu0 %v4656_v1  ;;  %v6694_v15 = vshrl.u32 %v13558_v16, 7 }
 0x83e   : > { %v4561_v17 = vmul.f32 0.015625, %v4525_v37  ;;  %v5451_v48 = vadd.f32 %v5450_v44, %v11468_v60  ;;  %v5162_v44 = vmul.f32 %v11670_v6, %v5126_v24  ;;  %v11757_v24 = vld [vmem:[%s13087_s12] ss:$0 sm:$0xff] }
 0x83f   : > { %v11704_v10 = vpop.f32.mrf.mxu1  ;;  %v11706_v7 = vpop.f32.mrf.mxu2  ;;  %v4964_v29 = vsub.f32 1.5, %v4963_v62  ;;  %v11720_v50 = vadd.f32 1e-05, %v4745_v59  ;;  %v5580_v57 = vpack.c.bf16 %v5524_v49, %v5522_v36  ;;  %7808 = vset.pattern.permute.xlu0 %v6694_v15  ;;  %7806 = vset.pattern.permute.xlu1 %v6694_v15 }
 0x840   : > { %v11722_v52 = vpop.eup %8107  ;;  %v4593_v58 = vsub.f32 %v11564_v14, %v4561_v17  ;;  %7807 = vset.pattern.permute.xlu2 %v6694_v15  ;;  %v5527_v16 = vmax.f32 %v5451_v48, 0.0 }
 0x841   : > { %v4965_v4 = vmul.f32 %v8106_v28, %v4964_v29  ;;  %v4971_v22 = vmul.f32 %v11722_v52, %v11691_v20  ;;  %8109 = vrsqrt.f32 %v11720_v50  ;;  %5761 = vmatmul.bf16.gmra.mxu1 %v5580_v57  ;;  %vm4977_vm0 = vweird.f32 %v11722_v52 }
 0x842   : > { %v11733_v27 = vmul.f32 %v13518_v39, %v4593_v58  ;;  %v5361_v11 = vpop.f32.mrf.mxu3  ;;  %vm11770_vm2 = vmor %vm4976_vm1, %vm4977_vm0  ;;  %vm4986_vm4 = vweird.f32 %v11720_v50 }
 0x843   : > { %v4969_v14 = vsel %vm4968_vm15, %v8106_v28, %v4965_v4  ;;  %v4972_v1 = vmul.f32 %v11722_v52, %v4971_v22  ;;  %v5362_v4 = vadd.f32 %v5361_v11, %v11493_v46 }
 0x844   : > { %v5127_v45 = vmul.f32 %v4969_v14, %v11507_v25  ;;  %v5452_v49 = vpop.f32.mrf.mxu0  ;;  %v11742_v37 = vpop.xlane.xlu2 %4702  ;;  %v4657_v59 = vmul.f32 %v11733_v27, %v11733_v27 }
 0x845   : > { %v4973_v13 = vmul.f32 0.5, %v4972_v1  ;;  %v5453_v28 = vadd.f32 %v5452_v49, %v11468_v60  ;;  %v4527_v17 = vpop.xlane.xlu1 %4526 }
 0x846   : > { %v4562_v34 = vmul.f32 0.015625, %v4527_v17  ;;  %4716 = vadd.xlane.f32.xlu1 %v4657_v59  ;;  %v5163_v29 = vmul.f32 %v11670_v6, %v5127_v45  ;;  %v11763_v59 = vadd.f32 %v11682_v47, %v5162_v44 }
 0x847   : > { %v11737_v62 = vpop.f32.mrf.mxu1  ;;  %v11739_v36 = vpop.f32.mrf.mxu2  ;;  %v4974_v58 = vsub.f32 1.5, %v4973_v13  ;;  %v5529_v25 = vmax.f32 %v5453_v28, 0.0 }
 0x848   : > { %v8110_v57 = vpop.eup %8109  ;;  %v4594_v22 = vsub.f32 %v11588_v42, %v4562_v34  ;;  %13559 = vst [vmem:[#allocation90_spill] sm:$0xff] %v11763_v59  ;;  %v11766_v42 = vadd.f32 %v11682_v47, %v5163_v29  ;;  %v5526_v34 = vmax.f32 %v5362_v4, 0.0 }
 0x849   : > { %v4981_v15 = vmul.f32 %v8110_v57, %v11720_v50  ;;  %v4975_v14 = vmul.f32 %v11722_v52, %v4974_v58  ;;  %v5583_v1 = vpack.c.bf16 %v5529_v25, %v5527_v16  ;;  %vm4987_vm3 = vweird.f32 %v8110_v57 }
 0x84a   : > { %v11760_v48 = vmul.f32 %v13518_v39, %v4594_v22  ;;  %v5363_v49 = vpop.f32.mrf.mxu3  ;;  %13560 = vst [vmem:[#allocation108_spill] sm:$0xff] %v11766_v42  ;;  %v5222_v58 = vpack.c.bf16 %v11766_v42, %v11763_v59  ;;  %vm4988_vm5 = vmor %vm4986_vm4, %vm4987_vm3 }
 0x84b   : > { %v4982_v45 = vmul.f32 %v8110_v57, %v4981_v15  ;;  %v5364_v11 = vadd.f32 %v5363_v49, %v11493_v46  ;;  %v4979_v20 = vsel %vm11770_vm2, %v11722_v52, %v4975_v14 }
 0x84c   : > { %5855 = vmatmul.bf16.gmra.mxu2 %v5583_v1  ;;  %v5455_v44 = vpop.f32.mrf.mxu0  ;;  %v4529_v29 = vpop.xlane.xlu2 %4528  ;;  %v4658_v49 = vmul.f32 %v11760_v48, %v11760_v48  ;;  %5380 = vmatmul.bf16.gmra.mxu3 %v5222_v58  ;;  %v5128_v42 = vmul.f32 %v4979_v20, %v11534_v40 }
 0x84d   : > { %v4983_v17 = vmul.f32 0.5, %v4982_v45  ;;  %v5528_v25 = vmax.f32 %v5364_v11, 0.0  ;;  %v4563_v22 = vmul.f32 0.015625, %v4529_v29  ;;  %5469 = vmatmul.bf16.gmra.mxu0 %v5222_v58  ;;  %v5456_v58 = vadd.f32 %v5455_v44, %v11468_v60 }
 0x84e   : > { %4718 = vadd.xlane.f32.xlu2 %v4658_v49  ;;  %v5164_v40 = vmul.f32 %v11670_v6, %v5128_v42 }
 0x84f   : > { %v5752_v13 = vpop.f32.mrf.mxu1  ;;  %v5841_v15 = vpop.f32.mrf.mxu2  ;;  %v4984_v45 = vsub.f32 1.5, %v4983_v17  ;;  %v5582_v1 = vpack.c.bf16 %v5528_v25, %v5526_v34  ;;  %v5531_v25 = vmax.f32 %v5456_v58, 0.0 }
 0x850   : > { %v5753_v16 = vadd.f32 %v11757_v24, %v5752_v13  ;;  %v4595_v13 = vsub.f32 %v11599_v19, %v4563_v22  ;;  %v11802_v44 = vadd.f32 %v11682_v47, %v5164_v40  ;;  %v4746_v40 = vmul.f32 0.015625, %v11742_v37 }
 0x851   : > { %v4985_v28 = vmul.f32 %v8110_v57, %v4984_v45  ;;  %5766 = vmatmul.bf16.gmra.mxu1 %v5582_v1 }
 0x852   : > { %v11782_v4 = vadd.f32 %v5841_v15, %v5753_v16  ;;  %v11788_v52 = vmul.f32 %v13518_v39, %v4595_v13  ;;  %v5366_v11 = vpop.f32.mrf.mxu3  ;;  %13564 = vst [vmem:[#allocation96_spill] sm:$0xff] %v11802_v44 }
 0x853   : > { %v4989_v14 = vsel %vm4988_vm5, %v8110_v57, %v4985_v28  ;;  %v5367_v22 = vadd.f32 %v5366_v11, %v11493_v46 }
 0x854   : > { %v5129_v17 = vmul.f32 %v4989_v14, %v11560_v51  ;;  %v4659_v19 = vmul.f32 %v11788_v52, %v11788_v52  ;;  %v5457_v34 = vpop.f32.mrf.mxu0  ;;  %v4531_v16 = vpop.xlane.xlu2 %4530 }
 0x855   : > { %v5458_v50 = vadd.f32 %v5457_v34, %v11468_v60  ;;  %v4564_v29 = vmul.f32 0.015625, %v4531_v16  ;;  %v5530_v28 = vmax.f32 %v5367_v22, 0.0 }
 0x856   : > { %4720 = vadd.xlane.f32.xlu0 %v4659_v19  ;;  %v5165_v20 = vmul.f32 %v11670_v6, %v5129_v17  ;;  %v11814_v17 = vld [vmem:[%s9425_s29] sm:$0xff]  ;;  %v11818_v19 = vld [vmem:[%s9425_s29 + $0x8] sm:$0xff] }
 0x857   : > { %v5533_v57 = vmax.f32 %v5458_v50, 0.0  ;;  %v4596_v15 = vsub.f32 %v11606_v30, %v4564_v29  ;;  %v6706_v58 = vperm.slane %v11814_v17, 2  ;;  %v6755_v34 = vperm.slane %v11818_v19, 1 }
 0x858   : > { %v11799_v51 = vadd.f32 %v11682_v47, %v5165_v20  ;;  %v6692_v16 = vperm.slane %v11814_v17, 0  ;;  %v6776_v50 = vperm.slane %v11818_v19, 4  ;;  %v4778_v29 = vadd.f32 1e-05, %v4746_v40 }
 0x859   : > { %v5585_v42 = vpack.c.bf16 %v5533_v57, %v5531_v25  ;;  %v11806_v49 = vmul.f32 %v13518_v39, %v4596_v15  ;;  %v6720_v20 = vperm.slane %v11814_v17, 4  ;;  %v6797_v25 = vperm.slane %v11818_v19, 7 }
 0x85a   : > { %13563 = vst [vmem:[#allocation51_spill] sm:$0xff] %v11799_v51  ;;  %v5368_v45 = vpop.f32.mrf.mxu3  ;;  %v5223_v1 = vpack.c.bf16 %v11799_v51, %v11802_v44  ;;  %8111 = vrsqrt.f32 %v4778_v29  ;;  %v6734_v15 = vperm.slane %v11814_v17, 6  ;;  %v6769_v40 = vperm.slane %v11818_v19, 3 }
 0x85b   : > { %v5369_v30 = vadd.f32 %v5368_v45, %v11493_v46  ;;  %v4660_v13 = vmul.f32 %v11806_v49, %v11806_v49  ;;  %vm4996_vm7 = vweird.f32 %v4778_v29 }
 0x85c   : > { %5860 = vmatmul.bf16.gmra.mxu2 %v5585_v42  ;;  %5385 = vmatmul.bf16.gmra.mxu3 %v5223_v1  ;;  %v11828_v42 = vld [vmem:[%s9425_s29 + $0x10] sm:$0xff] }
 0x85d   : > { %v5532_v14 = vmax.f32 %v5369_v30, 0.0  ;;  %4722 = vadd.xlane.f32.xlu1 %v4660_v13  ;;  %5474 = vmatmul.bf16.gmra.mxu0 %v5223_v1  ;;  %v6818_v37 = vperm.slane %v11828_v42, 2  ;;  %v6748_v13 = vperm.slane %v11818_v19, 0 }
 0x85f   : > { %v5584_v11 = vpack.c.bf16 %v5532_v14, %v5530_v28 }
 0x860   : > { %v8112_v57 = vpop.eup %8111 }
 0x861   : > { %5771 = vmatmul.bf16.gmra.mxu1 %v5584_v11  ;;  %v4991_v22 = vmul.f32 %v8112_v57, %v4778_v29  ;;  %v6839_v11 = vperm.slane %v11828_v42, 5  ;;  %vm4997_vm6 = vweird.f32 %v8112_v57 }
 0x862   : > { %vm4998_vm8 = vmor %vm4996_vm7, %vm4997_vm6 }
 0x863   : > { %v4992_v45 = vmul.f32 %v8112_v57, %v4991_v22  ;;  %v11835_v22 = vld [vmem:[%s9425_s29 + $0x18] sm:$0xff] }
 0x865   : > { %v4993_v14 = vmul.f32 0.5, %v4992_v45 }
 0x86a   : > { %6711 = vperm.xlu0 %7808, %v6706_v58   ;;  %v4994_v58 = vsub.f32 1.5, %v4993_v14 }
 0x872   : > { %6760 = vperm.xlu0 %7808, %v6755_v34  }
 0x876   : > { %6697 = vperm.xlu1 %7806, %v6692_v16  }
 0x87a   : > { %6781 = vperm.xlu0 %7808, %v6776_v50  }
 0x87e   : > { %6725 = vperm.xlu1 %7806, %v6720_v20  }
 0x882   : > { %6802 = vperm.xlu0 %7808, %v6797_v25   ;;  %v4995_v25 = vmul.f32 %v8112_v57, %v4994_v58  ;;  %v6790_v58 = vperm.slane %v11818_v19, 6 }
 0x886   : > { %6739 = vperm.xlu1 %7806, %v6734_v15  }
 0x888   : > { %v4705_v1 = vpop.xlane.xlu0 %4704 }
 0x889   : > { %v4747_v30 = vmul.f32 0.015625, %v4705_v1  ;;  %v4999_v1 = vsel %vm4998_vm8, %v8112_v57, %v4995_v25  ;;  %v6895_v25 = vperm.slane %v11835_v22, 5 }
 0x88a   : > { %6823 = vperm.xlu0 %7808, %v6818_v37   ;;  %v6874_v37 = vperm.slane %v11835_v22, 2  ;;  %v5130_v44 = vmul.f32 %v4999_v1, %v11583_v23 }
 0x88b   : > { %v4779_v28 = vadd.f32 1e-05, %v4747_v30 }
 0x88d   : > { %8113 = vrsqrt.f32 %v4779_v28  ;;  %vm5006_vm10 = vweird.f32 %v4779_v28 }
 0x88e   : > { %6753 = vperm.xlu1 %7806, %v6748_v13  }
 0x890   : > { %v4707_v34 = vpop.xlane.xlu0 %4706 }
 0x891   : > { %v4748_v16 = vmul.f32 0.015625, %v4707_v34 }
 0x892   : > { %6844 = vperm.xlu0 %7808, %v6839_v11  }
 0x893   : > { %v8114_v50 = vpop.eup %8113  ;;  %v4780_v20 = vadd.f32 1e-05, %v4748_v16 }
 0x894   : > { %v5001_v15 = vmul.f32 %v8114_v50, %v4779_v28  ;;  %vm5007_vm9 = vweird.f32 %v8114_v50 }
 0x895   : > { %8115 = vrsqrt.f32 %v4780_v20  ;;  %vm5008_vm11 = vmor %vm5006_vm10, %vm5007_vm9  ;;  %vm5016_vm13 = vweird.f32 %v4780_v20 }
 0x896   : > { %v5002_v45 = vmul.f32 %v8114_v50, %v5001_v15  ;;  %6774 = vperm.xlu1 %7806, %v6769_v40  }
 0x898   : > { %v5003_v30 = vmul.f32 0.5, %v5002_v45  ;;  %v4533_v13 = vpop.xlane.xlu0 %4532  ;;  %v4709_v14 = vpop.xlane.xlu1 %4708 }
 0x899   : > { %v4565_v11 = vmul.f32 0.015625, %v4533_v13  ;;  %v4749_v34 = vmul.f32 0.015625, %v4709_v14  ;;  %v11850_v14 = vpop.f32.mrf.mxu1 }
 0x89a   : > { %6879 = vperm.xlu0 %7808, %v6874_v37   ;;  %v5004_v16 = vsub.f32 1.5, %v5003_v30 }
 0x89b   : > { %v8116_v51 = vpop.eup %8115  ;;  %v4597_v59 = vsub.f32 %v11630_v38, %v4565_v11  ;;  %v4781_v29 = vadd.f32 1e-05, %v4749_v34  ;;  %v5166_v38 = vmul.f32 %v11670_v6, %v5130_v44 }
 0x89c   : > { %v5005_v15 = vmul.f32 %v8114_v50, %v5004_v16  ;;  %v5011_v40 = vmul.f32 %v8116_v51, %v4780_v20  ;;  %v11853_v16 = vpop.f32.mrf.mxu2  ;;  %vm5017_vm12 = vweird.f32 %v8116_v51 }
 0x89d   : > { %v11842_v57 = vmul.f32 %v13518_v39, %v4597_v59  ;;  %8117 = vrsqrt.f32 %v4781_v29  ;;  %vm5018_vm14 = vmor %vm5016_vm13, %vm5017_vm12  ;;  %vm5026_vm0 = vweird.f32 %v4781_v29 }
 0x89e   : > { %v5009_v37 = vsel %vm5008_vm11, %v8114_v50, %v5005_v15  ;;  %v5012_v45 = vmul.f32 %v8116_v51, %v5011_v40  ;;  %6795 = vperm.xlu1 %7806, %v6790_v58   ;;  %v6811_v50 = vperm.slane %v11828_v42, 1  ;;  %v11858_v58 = vadd.f32 %v11682_v47, %v5166_v38 }
 0x89f   : > { %v5131_v30 = vmul.f32 %v5009_v37, %v11611_v54  ;;  %v4661_v23 = vmul.f32 %v11842_v57, %v11842_v57 }
 0x8a0   : > { %v5013_v1 = vmul.f32 0.5, %v5012_v45  ;;  %v4711_v28 = vpop.xlane.xlu1 %4710  ;;  %13565 = vst [vmem:[#allocation92_spill] sm:$0xff] %v11858_v58 }
 0x8a1   : > { %v4750_v13 = vmul.f32 0.015625, %v4711_v28  ;;  %4724 = vadd.xlane.f32.xlu2 %v4661_v23  ;;  %v5167_v59 = vmul.f32 %v11670_v6, %v5131_v30  ;;  %v11872_v20 = vpop.f32.mrf.mxu1 }
 0x8a2   : > { %6900 = vperm.xlu0 %7808, %v6895_v25   ;;  %v5014_v11 = vsub.f32 1.5, %v5013_v1 }
 0x8a3   : > { %v8118_v34 = vpop.eup %8117  ;;  %v11855_v54 = vadd.f32 1e-05, %v4750_v13  ;;  %v11861_v44 = vadd.f32 %v11682_v47, %v5167_v59  ;;  %v6832_v13 = vperm.slane %v11828_v42, 4 }
 0x8a4   : > { %v5015_v15 = vmul.f32 %v8116_v51, %v5014_v11  ;;  %v5021_v40 = vmul.f32 %v8118_v34, %v4781_v29  ;;  %vm5027_vm15 = vweird.f32 %v8118_v34 }
 0x8a5   : > { %13566 = vst [vmem:[#allocation55_spill] sm:$0xff] %v11861_v44  ;;  %8119 = vrsqrt.f32 %v11855_v54  ;;  %v5224_v25 = vpack.c.bf16 %v11861_v44, %v11858_v58  ;;  %vm5028_vm1 = vmor %vm5026_vm0, %vm5027_vm15  ;;  %vm5036_vm3 = vweird.f32 %v11855_v54 }
 0x8a6   : > { %v5022_v37 = vmul.f32 %v8118_v34, %v5021_v40  ;;  %6816 = vperm.xlu1 %7806, %v6811_v50   ;;  %v5019_v45 = vsel %vm5018_vm14, %v8116_v51, %v5015_v15  ;;  %v11876_v15 = vpop.f32.mrf.mxu2 }
 0x8a7   : > { %5390 = vmatmul.bf16.gmra.mxu3 %v5224_v25  ;;  %5479 = vmatmul.bf16.gmra.mxu0 %v5224_v25  ;;  %v5132_v11 = vmul.f32 %v5019_v45, %v11617_v5 }
 0x8a8   : > { %v5023_v30 = vmul.f32 0.5, %v5022_v37  ;;  %v5460_v23 = vpop.f32.mrf.mxu0  ;;  %v4713_v38 = vpop.xlane.xlu2 %4712 }
 0x8a9   : > { %v4751_v1 = vmul.f32 0.015625, %v4713_v38  ;;  %v5461_v45 = vadd.f32 %v5460_v23, %v11468_v60 }
 0x8aa   : > { %v5024_v28 = vsub.f32 1.5, %v5023_v30  ;;  %v5168_v30 = vmul.f32 %v11670_v6, %v5132_v11 }
 0x8ab   : > { %v11867_v59 = vpop.eup %8119  ;;  %v11870_v44 = vadd.f32 1e-05, %v4751_v1 }
 0x8ac   : > { %v5025_v50 = vmul.f32 %v8118_v34, %v5024_v28  ;;  %v5031_v51 = vmul.f32 %v11867_v59, %v11855_v54  ;;  %vm5037_vm2 = vweird.f32 %v11867_v59  ;;  %v6888_v54 = vperm.slane %v11835_v22, 4 }
 0x8ad   : > { %8121 = vrsqrt.f32 %v11870_v44  ;;  %vm5038_vm4 = vmor %vm5036_vm3, %vm5037_vm2  ;;  %vm5046_vm6 = vweird.f32 %v11870_v44 }
 0x8ae   : > { %v5029_v40 = vsel %vm5028_vm1, %v8118_v34, %v5025_v50  ;;  %v5032_v25 = vmul.f32 %v11867_v59, %v5031_v51  ;;  %v5371_v37 = vpop.f32.mrf.mxu3  ;;  %6837 = vperm.xlu1 %7806, %v6832_v13   ;;  %v6867_v34 = vperm.slane %v11835_v22, 1  ;;  %v5535_v51 = vmax.f32 %v5461_v45, 0.0 }
 0x8af   : > { %v5133_v5 = vmul.f32 %v5029_v40, %v11626_v63  ;;  %v11887_v63 = vadd.f32 %v11682_v47, %v5168_v30 }
 0x8b0   : > { %v5033_v29 = vmul.f32 0.5, %v5032_v25  ;;  %v5462_v38 = vpop.f32.mrf.mxu0  ;;  %v4715_v1 = vpop.xlane.xlu0 %4714  ;;  %v6699_v25 = vperm.slane %v11814_v17, 1 }
 0x8b1   : > { %v5463_v28 = vadd.f32 %v5462_v38, %v11468_v60  ;;  %v5169_v58 = vmul.f32 %v11670_v6, %v5133_v5  ;;  %v4752_v39 = vmul.f32 0.015625, %v4715_v1  ;;  %13567 = vst [vmem:[#allocation91_spill] sm:$0xff] %v11887_v63  ;;  %v11901_v38 = vpop.f32.mrf.mxu1 }
 0x8b2   : > { %v5034_v26 = vsub.f32 1.5, %v5033_v29  ;;  %v5372_v29 = vadd.f32 %v5371_v37, %v11493_v46 }
 0x8b3   : > { %v8122_v50 = vpop.eup %8121  ;;  %v5537_v13 = vmax.f32 %v5463_v28, 0.0  ;;  %v11890_v23 = vadd.f32 %v11682_v47, %v5169_v58  ;;  %v11894_v40 = vadd.f32 1e-05, %v4752_v39  ;;  %v11904_v28 = vpop.f32.mrf.mxu2 }
 0x8b4   : > { %v5041_v11 = vmul.f32 %v8122_v50, %v11870_v44  ;;  %v5035_v5 = vmul.f32 %v11867_v59, %v5034_v26  ;;  %vm5047_vm5 = vweird.f32 %v8122_v50 }
 0x8b5   : > { %13568 = vst [vmem:[#allocation114_spill] sm:$0xff] %v11890_v23  ;;  %v5587_v45 = vpack.c.bf16 %v5537_v13, %v5535_v51  ;;  %v5225_v30 = vpack.c.bf16 %v11890_v23, %v11887_v63  ;;  %8123 = vrsqrt.f32 %v11894_v40  ;;  %v5534_v13 = vmax.f32 %v5372_v29, 0.0  ;;  %vm5048_vm7 = vmor %vm5046_vm6, %vm5047_vm5 }
 0x8b6   : > { %v5042_v58 = vmul.f32 %v8122_v50, %v5041_v11  ;;  %v5373_v1 = vpop.f32.mrf.mxu3  ;;  %6872 = vperm.xlu1 %7806, %v6867_v34   ;;  %v5039_v51 = vsel %vm5038_vm4, %v11867_v59, %v5035_v5  ;;  %vm5056_vm9 = vweird.f32 %v11894_v40 }
 0x8b7   : > { %v5374_v39 = vadd.f32 %v5373_v1, %v11493_v46  ;;  %5395 = vmatmul.bf16.gmra.mxu3 %v5225_v30  ;;  %5484 = vmatmul.bf16.gmra.mxu0 %v5225_v30  ;;  %v5134_v30 = vmul.f32 %v5039_v51, %v11648_v21 }
 0x8b8   : > { %v5043_v26 = vmul.f32 0.5, %v5042_v58  ;;  %5865 = vmatmul.bf16.gmra.mxu2 %v5587_v45  ;;  %v5465_v37 = vpop.f32.mrf.mxu0 }
 0x8b9   : > { %v5536_v11 = vmax.f32 %v5374_v39, 0.0  ;;  %v4717_v23 = vpop.xlane.xlu1 %4716  ;;  %6704 = vperm.xlu2 %7807, %v6699_v25   ;;  %v6713_v25 = vperm.slane %v11814_v17, 3  ;;  %v5748_v39 = vadd.f32 %v11757_v24, %v11704_v10 }
 0x8ba   : > { %v5044_v34 = vsub.f32 1.5, %v5043_v26  ;;  %v4753_v63 = vmul.f32 0.015625, %v4717_v23 }
 0x8bb   : > { %v5586_v1 = vpack.c.bf16 %v5536_v11, %v5534_v13  ;;  %v11912_v0 = vpop.eup %8123 }
 0x8bc   : > { %v5045_v53 = vmul.f32 %v8122_v50, %v5044_v34  ;;  %v11916_v45 = vadd.f32 1e-05, %v4753_v63  ;;  %v5051_v59 = vmul.f32 %v11912_v0, %v11894_v40  ;;  %v5466_v63 = vadd.f32 %v5465_v37, %v11468_v60 }
 0x8bd   : > { %5776 = vmatmul.bf16.gmra.mxu1 %v5586_v1  ;;  %vm5057_vm8 = vweird.f32 %v11912_v0 }
 0x8be   : > { %v5049_v23 = vsel %vm5048_vm7, %v8122_v50, %v5045_v53  ;;  %8125 = vrsqrt.f32 %v11916_v45  ;;  %v5376_v5 = vpop.f32.mrf.mxu3  ;;  %v11922_v29 = vpop.f32.mrf.mxu1  ;;  %6893 = vperm.xlu1 %7806, %v6888_v54   ;;  %v5052_v44 = vmul.f32 %v11912_v0, %v5051_v59  ;;  %v5170_v53 = vmul.f32 %v11670_v6, %v5134_v30  ;;  %vm11964_vm10 = vmor %vm5056_vm9, %vm5057_vm8 }
 0x8bf   : > { %v5135_v21 = vmul.f32 %v5049_v23, %v11663_v32  ;;  %v11927_v58 = vpop.f32.mrf.mxu2  ;;  %v5539_v34 = vmax.f32 %v5466_v63, 0.0  ;;  %v5837_v59 = vadd.f32 %v11706_v7, %v5748_v39  ;;  %vm5066_vm12 = vweird.f32 %v11916_v45 }
 0x8c0   : > { %v5467_v26 = vpop.f32.mrf.mxu0  ;;  %v5053_v50 = vmul.f32 0.5, %v5052_v44  ;;  %v11936_v23 = vadd.f32 %v11682_v47, %v5170_v53 }
 0x8c1   : > { %v5468_v51 = vadd.f32 %v5467_v26, %v11468_v60  ;;  %6718 = vperm.xlu2 %7807, %v6713_v25   ;;  %v4719_v13 = vpop.xlane.xlu2 %4718  ;;  %v5171_v11 = vmul.f32 %v11670_v6, %v5135_v21  ;;  %v5377_v25 = vadd.f32 %v5376_v5, %v11493_v46  ;;  %v6727_v21 = vperm.slane %v11814_v17, 5 }
 0x8c2   : > { %v5054_v32 = vsub.f32 1.5, %v5053_v50  ;;  %v4754_v1 = vmul.f32 0.015625, %v4719_v13  ;;  %v11956_v5 = vadd.f32 %v5837_v59, %v11220_v43 }
 0x8c3   : > { %v5541_v54 = vmax.f32 %v5468_v51, 0.0  ;;  %v11939_v10 = vadd.f32 %v11682_v47, %v5171_v11  ;;  %v5755_v11 = vadd.f32 %v11757_v24, %v11850_v14 }
 0x8c4   : > { %v8126_v37 = vpop.eup %8125  ;;  %v5055_v63 = vmul.f32 %v11912_v0, %v5054_v32  ;;  %v11946_v26 = vadd.f32 1e-05, %v4754_v1  ;;  %v5538_v1 = vmax.f32 %v5377_v25, 0.0  ;;  %v6741_v25 = vperm.slane %v11814_v17, 7 }
 0x8c5   : > { %13569 = vst [vmem:[#allocation94_spill] sm:$0xff] %v11939_v10  ;;  %v5061_v30 = vmul.f32 %v8126_v37, %v11916_v45  ;;  %v5589_v44 = vpack.c.bf16 %v5541_v54, %v5539_v34  ;;  %v5226_v53 = vpack.c.bf16 %v11939_v10, %v11936_v23  ;;  %vm5067_vm11 = vweird.f32 %v8126_v37 }
 0x8c6   : > { %v5378_v7 = vpop.f32.mrf.mxu3  ;;  %v11948_v39 = vpop.f32.mrf.mxu1  ;;  %8127 = vrsqrt.f32 %v11946_v26  ;;  %v5059_v14 = vsel %vm11964_vm10, %v11912_v0, %v5055_v63  ;;  %v5844_v10 = vadd.f32 %v11853_v16, %v5755_v11  ;;  %vm5068_vm13 = vmor %vm5066_vm12, %vm5067_vm11  ;;  %v5763_v17 = vadd.f32 %v11757_v24, %v11922_v29 }
 0x8c7   : > { %v5062_v50 = vmul.f32 %v8126_v37, %v5061_v30  ;;  %v5379_v51 = vadd.f32 %v5378_v7, %v11493_v46  ;;  %v11953_v13 = vpop.f32.mrf.mxu2  ;;  %5400 = vmatmul.bf16.gmra.mxu3 %v5226_v53  ;;  %5489 = vmatmul.bf16.gmra.mxu0 %v5226_v53  ;;  %vm5076_vm15 = vweird.f32 %v11946_v26 }
 0x8c8   : > { %5870 = vmatmul.bf16.gmra.mxu2 %v5589_v44  ;;  %v5136_v44 = vmul.f32 %v5059_v14, %v11696_v2  ;;  %v11985_v11 = vadd.f32 %v5844_v10, %v11271_v9  ;;  %v5852_v29 = vadd.f32 %v11927_v58, %v5763_v17 }
 0x8c9   : > { %v4721_v32 = vpop.xlane.xlu0 %4720  ;;  %v5063_v54 = vmul.f32 0.5, %v5062_v50  ;;  %v5540_v43 = vmax.f32 %v5379_v51, 0.0  ;;  %6732 = vperm.xlu2 %7807, %v6727_v21  }
 0x8ca   : > { %v4755_v59 = vmul.f32 0.015625, %v4721_v32  ;;  %v5470_v7 = vpop.f32.mrf.mxu0 }
 0x8cb   : > { %v5064_v40 = vsub.f32 1.5, %v5063_v54  ;;  %v5588_v30 = vpack.c.bf16 %v5540_v43, %v5538_v1  ;;  %v5471_v1 = vadd.f32 %v5470_v7, %v11468_v60 }
 0x8cc   : > { %v11971_v53 = vadd.f32 1e-05, %v4755_v59  ;;  %5948 = vadd.xlane.f32.xlu0 %v11956_v5  ;;  %v8128_v0 = vpop.eup %8127 }
 0x8cd   : > { %v5065_v50 = vmul.f32 %v8126_v37, %v5064_v40  ;;  %5781 = vmatmul.bf16.gmra.mxu1 %v5588_v30  ;;  %v5071_v51 = vmul.f32 %v8128_v0, %v11946_v26  ;;  %vm5077_vm14 = vweird.f32 %v8128_v0 }
 0x8ce   : > { %8129 = vrsqrt.f32 %v11971_v53  ;;  %v5767_v21 = vpop.f32.mrf.mxu1  ;;  %vm5078_vm0 = vmor %vm5076_vm15, %vm5077_vm14  ;;  %vm5086_vm2 = vweird.f32 %v11971_v53 }
 0x8cf   : > { %v5069_v63 = vsel %vm5068_vm13, %v8126_v37, %v5065_v50  ;;  %v5768_v32 = vadd.f32 %v11757_v24, %v5767_v21  ;;  %v5856_v2 = vpop.f32.mrf.mxu2  ;;  %v5072_v45 = vmul.f32 %v8128_v0, %v5071_v51  ;;  %v5381_v34 = vpop.f32.mrf.mxu3  ;;  %v5172_v37 = vmul.f32 %v11670_v6, %v5136_v44 }
 0x8d0   : > { %v5137_v16 = vmul.f32 %v5069_v63, %v11733_v27  ;;  %v6762_v63 = vperm.slane %v11818_v19, 2 }
 0x8d1   : > { %v11987_v54 = vadd.f32 %v5856_v2, %v5768_v32  ;;  %6746 = vperm.xlu2 %7807, %v6741_v25   ;;  %v5073_v27 = vmul.f32 0.5, %v5072_v45  ;;  %v11997_v30 = vadd.f32 %v11682_v47, %v5172_v37  ;;  %v5543_v25 = vmax.f32 %v5471_v1, 0.0 }
 0x8d2   : > { %v5173_v43 = vmul.f32 %v11670_v6, %v5137_v16  ;;  %v5472_v14 = vpop.f32.mrf.mxu0  ;;  %v5382_v16 = vadd.f32 %v5381_v34, %v11493_v46  ;;  %v12008_v2 = vadd.f32 %v5852_v29, %v11460_v3 }
 0x8d3   : > { %v5473_v10 = vadd.f32 %v5472_v14, %v11468_v60  ;;  %v5074_v40 = vsub.f32 1.5, %v5073_v27 }
 0x8d4   : > { %v8130_v59 = vpop.eup %8129  ;;  %5954 = vadd.xlane.f32.xlu0 %v11985_v11  ;;  %v12000_v7 = vadd.f32 %v11682_v47, %v5173_v43  ;;  %v5542_v3 = vmax.f32 %v5382_v16, 0.0 }
 0x8d5   : > { %v5081_v9 = vmul.f32 %v8130_v59, %v11971_v53  ;;  %v5545_v50 = vmax.f32 %v5473_v10, 0.0  ;;  %v5075_v51 = vmul.f32 %v8128_v0, %v5074_v40  ;;  %vm5087_vm1 = vweird.f32 %v8130_v59 }
 0x8d6   : > { %v5769_v21 = vpop.f32.mrf.mxu1  ;;  %v5227_v58 = vpack.c.bf16 %v12000_v7, %v11997_v30  ;;  %vm5088_vm3 = vmor %vm5086_vm2, %vm5087_vm1 }
 0x8d7   : > { %v5082_v44 = vmul.f32 %v8130_v59, %v5081_v9  ;;  %v5591_v17 = vpack.c.bf16 %v5545_v50, %v5543_v25  ;;  %v5079_v45 = vsel %vm5078_vm0, %v8128_v0, %v5075_v51  ;;  %v5383_v37 = vpop.f32.mrf.mxu3  ;;  %v5770_v1 = vadd.f32 %v11757_v24, %v5769_v21  ;;  %v5858_v29 = vpop.f32.mrf.mxu2 }
 0x8d8   : > { %5405 = vmatmul.bf16.gmra.mxu3 %v5227_v58  ;;  %5494 = vmatmul.bf16.gmra.mxu0 %v5227_v58  ;;  %v5384_v26 = vadd.f32 %v5383_v37, %v11493_v46  ;;  %v5138_v27 = vmul.f32 %v5079_v45, %v11760_v48  ;;  %v5750_v9 = vadd.f32 %v11757_v24, %v11737_v62 }
 0x8d9   : > { %v5083_v32 = vmul.f32 0.5, %v5082_v44  ;;  %5875 = vmatmul.bf16.gmra.mxu2 %v5591_v17  ;;  %6767 = vperm.xlu2 %7807, %v6762_v63   ;;  %v5859_v10 = vadd.f32 %v5858_v29, %v5770_v1  ;;  %v6783_v44 = vperm.slane %v11818_v19, 5  ;;  %v5758_v58 = vadd.f32 %v11757_v24, %v11872_v20 }
 0x8da   : > { %v5475_v14 = vpop.f32.mrf.mxu0  ;;  %v5544_v0 = vmax.f32 %v5384_v26, 0.0  ;;  %v5174_v50 = vmul.f32 %v11670_v6, %v5138_v27  ;;  %v5839_v21 = vadd.f32 %v11739_v36, %v5750_v9  ;;  %v6804_v17 = vperm.slane %v11828_v42, 0 }
 0x8db   : > { %v5084_v43 = vsub.f32 1.5, %v5083_v32  ;;  %v12022_v53 = vadd.f32 %v5859_v10, %v11528_v61  ;;  %v5476_v62 = vadd.f32 %v5475_v14, %v11468_v60  ;;  %v5765_v27 = vadd.f32 %v11757_v24, %v11948_v39 }
 0x8dc   : > { %5960 = vadd.xlane.f32.xlu0 %v12008_v2  ;;  %v5590_v25 = vpack.c.bf16 %v5544_v0, %v5542_v3  ;;  %v12028_v19 = vadd.f32 %v11682_v47, %v5174_v50  ;;  %v12035_v61 = vadd.f32 %v5839_v21, %v11223_v55  ;;  %v5847_v55 = vadd.f32 %v11876_v15, %v5758_v58  ;;  %v4723_v3 = vpop.xlane.xlu1 %4722 }
 0x8dd   : > { %v5085_v34 = vmul.f32 %v8130_v59, %v5084_v43  ;;  %v5547_v32 = vmax.f32 %v5476_v62, 0.0  ;;  %v5854_v15 = vadd.f32 %v11953_v13, %v5765_v27  ;;  %v6860_v9 = vperm.slane %v11835_v22, 0 }
 0x8de   : > { %5786 = vmatmul.bf16.gmra.mxu1 %v5590_v25  ;;  %v12047_v26 = vadd.f32 %v5847_v55, %v11293_v33  ;;  %v5772_v0 = vpop.f32.mrf.mxu1  ;;  %v12062_v25 = vpop.permute.xlu0 %6711 }
 0x8df   : > { %v5089_v40 = vsel %vm5088_vm3, %v8130_v59, %v5085_v34  ;;  %v5386_v63 = vpop.f32.mrf.mxu3  ;;  %v6825_v34 = vperm.slane %v11828_v42, 3  ;;  %v12055_v29 = vadd.f32 %v5854_v15, %v11463_v18  ;;  %v5773_v33 = vadd.f32 %v11757_v24, %v5772_v0  ;;  %v5861_v39 = vpop.f32.mrf.mxu2 }
 0x8e0   : > { %v5139_v48 = vmul.f32 %v5089_v40, %v11788_v52  ;;  %v5387_v45 = vadd.f32 %v5386_v63, %v11493_v46  ;;  %v4756_v18 = vmul.f32 0.015625, %v4723_v3  ;;  %v6846_v63 = vperm.slane %v11828_v42, 6 }
 0x8e1   : > { %6788 = vperm.xlu2 %7807, %v6783_v44   ;;  %v5862_v40 = vadd.f32 %v5861_v39, %v5773_v33  ;;  %v6881_v44 = vperm.slane %v11835_v22, 3 }
 0x8e2   : > { %v5175_v51 = vmul.f32 %v11670_v6, %v5139_v48  ;;  %v5477_v59 = vpop.f32.mrf.mxu0  ;;  %v5546_v43 = vmax.f32 %v5387_v45, 0.0  ;;  %v4788_v50 = vadd.f32 1e-05, %v4756_v18 }
 0x8e3   : > { %v5478_v36 = vadd.f32 %v5477_v59, %v11468_v60  ;;  %v12065_v13 = vadd.f32 %v5862_v40, %v11577_v12 }
 0x8e4   : > { %5966 = vadd.xlane.f32.xlu0 %v12022_v53  ;;  %v12031_v52 = vadd.f32 %v11682_v47, %v5175_v51  ;;  %8131 = vrsqrt.f32 %v4788_v50  ;;  %vm5096_vm5 = vweird.f32 %v4788_v50 }
 0x8e5   : > { %v5549_v16 = vmax.f32 %v5478_v36, 0.0 }
 0x8e6   : > { %v5228_v6 = vpack.c.bf16 %v12031_v52, %v12028_v19  ;;  %v12071_v21 = vpop.permute.xlu0 %6760 }
 0x8e7   : > { %v5593_v37 = vpack.c.bf16 %v5549_v16, %v5547_v32  ;;  %v5388_v47 = vpop.f32.mrf.mxu3  ;;  %13572 = vst [vmem:[#allocation93_spill] sm:$0xff] %v12071_v21 }
 0x8e8   : > { %5950 = vadd.xlane.f32.xlu1 %v12035_v61  ;;  %5410 = vmatmul.bf16.gmra.mxu3 %v5228_v6  ;;  %v5389_v1 = vadd.f32 %v5388_v47, %v11493_v46  ;;  %v12059_v10 = vpop.permute.xlu1 %6697 }
 0x8e9   : > { %5499 = vmatmul.bf16.gmra.mxu0 %v5228_v6  ;;  %5880 = vmatmul.bf16.gmra.mxu2 %v5593_v37 }
 0x8ea   : > { %6809 = vperm.xlu2 %7807, %v6804_v17   ;;  %v5548_v20 = vmax.f32 %v5389_v1, 0.0  ;;  %v8132_v62 = vpop.eup %8131 }
 0x8eb   : > { %v5091_v59 = vmul.f32 %v8132_v62, %v4788_v50  ;;  %vm5097_vm4 = vweird.f32 %v8132_v62 }
 0x8ec   : > { %v5592_v14 = vpack.c.bf16 %v5548_v20, %v5546_v43  ;;  %vm5098_vm6 = vmor %vm5096_vm5, %vm5097_vm4 }
 0x8ed   : > { %v5092_v22 = vmul.f32 %v8132_v62, %v5091_v59 }
 0x8ee   : > { %5791 = vmatmul.bf16.gmra.mxu1 %v5592_v14  ;;  %v12076_v12 = vpop.permute.xlu0 %6781 }
 0x8ef   : > { %13573 = vst [vmem:[#allocation65_spill] sm:$0xff] %v12076_v12  ;;  %v5093_v16 = vmul.f32 0.5, %v5092_v22 }
 0x8f0   : > { %5956 = vadd.xlane.f32.xlu1 %v12047_v26  ;;  %v12069_v48 = vpop.permute.xlu1 %6725 }
 0x8f1   : > { %v5094_v45 = vsub.f32 1.5, %v5093_v16  ;;  %v5760_v16 = vadd.f32 %v11757_v24, %v11901_v38 }
 0x8f2   : > { %6830 = vperm.xlu2 %7807, %v6825_v34  }
 0x8f3   : > { %v5095_v47 = vmul.f32 %v8132_v62, %v5094_v45 }
 0x8f5   : > { %v5099_v20 = vsel %vm5098_vm6, %v8132_v62, %v5095_v47 }
 0x8f6   : > { %v12080_v17 = vpop.permute.xlu0 %6802  ;;  %v5140_v3 = vmul.f32 %v5099_v20, %v11806_v49  ;;  %v5863_v20 = vpop.f32.mrf.mxu2 }
 0x8f7   : > { %13575 = vst [vmem:[#allocation48_spill] sm:$0xff] %v12080_v17 }
 0x8f8   : > { %5962 = vadd.xlane.f32.xlu1 %v12055_v29  ;;  %v12074_v51 = vpop.permute.xlu1 %6739 }
 0x8fa   : > { %6865 = vperm.xlu2 %7807, %v6860_v9  }
 0x8fe   : > { %v12084_v43 = vpop.permute.xlu0 %6823 }
 0x8ff   : > { %13577 = vst [vmem:[#allocation97_spill] sm:$0xff] %v12084_v43 }
 0x900   : > { %5968 = vadd.xlane.f32.xlu1 %v12065_v13  ;;  %v12078_v58 = vpop.permute.xlu1 %6753 }
 0x901   : > { %13574 = vst [vmem:[#allocation39_spill] sm:$0xff] %v12078_v58 }
 0x902   : > { %6886 = vperm.xlu2 %7807, %v6881_v44   ;;  %v8206_v44 = vld [vmem:[%s13082_s7] ss:$0 sm:$0xff] }
 0x903   : > { %v5176_v18 = vmul.f32 %v8206_v44, %v5140_v3 }
 0x906   : > { %v12094_v50 = vpop.permute.xlu0 %6844 }
 0x907   : > { %13579 = vst [vmem:[#allocation85_spill] sm:$0xff] %v12094_v50 }
 0x908   : > { %v12082_v37 = vpop.permute.xlu1 %6774 }
 0x909   : > { %13576 = vst [vmem:[#allocation111_spill] sm:$0xff] %v12082_v37 }
 0x90a   : > { %6851 = vperm.xlu2 %7807, %v6846_v63  }
 0x90e   : > { %v12118_v3 = vpop.permute.xlu0 %6879 }
 0x90f   : > { %13581 = vst [vmem:[#allocation102_spill] sm:$0xff] %v12118_v3 }
 0x910   : > { %v12087_v0 = vpop.permute.xlu1 %6795 }
 0x911   : > { %13578 = vst [vmem:[#allocation100_spill] sm:$0xff] %v12087_v0 }
 0x914   : > { %v4725_v36 = vpop.xlane.xlu2 %4724 }
 0x915   : > { %v4757_v6 = vmul.f32 0.015625, %v4725_v36  ;;  %v8207_v36 = vld [vmem:[%s13083_s8] ss:$0 sm:$0xff] }
 0x917   : > { %v4789_v32 = vadd.f32 1e-05, %v4757_v6 }
 0x919   : > { %8133 = vrsqrt.f32 %v4789_v32  ;;  %vm5106_vm8 = vweird.f32 %v4789_v32 }
 0x91f   : > { %v8134_v42 = vpop.eup %8133 }
 0x920   : > { %v5101_v55 = vmul.f32 %v8134_v42, %v4789_v32  ;;  %vm5107_vm7 = vweird.f32 %v8134_v42  ;;  %v12106_v32 = vadd.f32 %v11782_v4, %v11268_v41  ;;  %v5849_v4 = vadd.f32 %v11904_v28, %v5760_v16  ;;  %v12134_v16 = vpop.permute.xlu0 %6900 }
 0x921   : > { %vm5108_vm9 = vmor %vm5106_vm8, %vm5107_vm7  ;;  %13583 = vst [vmem:[#allocation53_spill] sm:$0xff] %v12134_v16  ;;  %v13590_v16 = vld [vmem:[#allocation90_spill] sm:$0xff] }
 0x922   : > { %v5102_v1 = vmul.f32 %v8134_v42, %v5101_v55  ;;  %v5774_v55 = vpop.f32.mrf.mxu1 }
 0x924   : > { %v5103_v27 = vmul.f32 0.5, %v5102_v1  ;;  %v5480_v14 = vpop.f32.mrf.mxu0 }
 0x925   : > { %v5481_v40 = vadd.f32 %v5480_v14, %v11468_v60  ;;  %v12115_v14 = vpop.permute.xlu1 %6816 }
 0x926   : > { %v5104_v34 = vsub.f32 1.5, %v5103_v27  ;;  %13580 = vst [vmem:[#allocation113_spill] sm:$0xff] %v12115_v14 }
 0x927   : > { %v5551_v59 = vmax.f32 %v5481_v40, 0.0 }
 0x928   : > { %v5105_v15 = vmul.f32 %v8134_v42, %v5104_v34 }
 0x92a   : > { %v5109_v33 = vsel %vm5108_vm9, %v8134_v42, %v5105_v15  ;;  %v5391_v9 = vpop.f32.mrf.mxu3 }
 0x92b   : > { %v5141_v39 = vmul.f32 %v5109_v33, %v11842_v57  ;;  %v12100_v57 = vadd.f32 %v8207_v36, %v5176_v18  ;;  %v5392_v45 = vadd.f32 %v5391_v9, %v11493_v46  ;;  %v12121_v33 = vadd.f32 %v5849_v4, %v11296_v31  ;;  %v12123_v9 = vpop.permute.xlu2 %6704 }
 0x92c   : > { %v5482_v63 = vpop.f32.mrf.mxu0 }
 0x92d   : > { %v5483_v49 = vadd.f32 %v5482_v63, %v11468_v60  ;;  %v5177_v62 = vmul.f32 %v8206_v44, %v5141_v39  ;;  %v5550_v38 = vmax.f32 %v5392_v45, 0.0  ;;  %v12138_v45 = vadd.f32 %v11987_v54, %v11525_v56 }
 0x92f   : > { %v5553_v22 = vmax.f32 %v5483_v49, 0.0  ;;  %v12102_v6 = vadd.f32 %v8207_v36, %v5177_v62 }
 0x931   : > { %v5595_v42 = vpack.c.bf16 %v5553_v22, %v5551_v59  ;;  %v5229_v47 = vpack.c.bf16 %v12102_v6, %v12100_v57  ;;  %v12129_v59 = vpop.permute.xlu1 %6837 }
 0x932   : > { %v5393_v1 = vpop.f32.mrf.mxu3  ;;  %13582 = vst [vmem:[#allocation70_spill] sm:$0xff] %v12129_v59 }
 0x933   : > { %5952 = vadd.xlane.f32.xlu2 %v12106_v32  ;;  %v5394_v27 = vadd.f32 %v5393_v1, %v11493_v46  ;;  %5885 = vmatmul.bf16.gmra.mxu2 %v5595_v42  ;;  %v12151_v4 = vpop.permute.xlu2 %6718 }
 0x934   : > { %5415 = vmatmul.bf16.gmra.mxu3 %v5229_v47  ;;  %5504 = vmatmul.bf16.gmra.mxu0 %v5229_v47  ;;  %v5485_v41 = vpop.f32.mrf.mxu0 }
 0x935   : > { %v5552_v34 = vmax.f32 %v5394_v27, 0.0  ;;  %v5486_v44 = vadd.f32 %v5485_v41, %v11468_v60 }
 0x937   : > { %v5594_v15 = vpack.c.bf16 %v5552_v34, %v5550_v38  ;;  %v5555_v31 = vmax.f32 %v5486_v44, 0.0 }
 0x939   : > { %5796 = vmatmul.bf16.gmra.mxu1 %v5594_v15 }
 0x93a   : > { %v5396_v39 = vpop.f32.mrf.mxu3  ;;  %v5777_v40 = vpop.f32.mrf.mxu1 }
 0x93b   : > { %5958 = vadd.xlane.f32.xlu2 %v12121_v33  ;;  %v5778_v18 = vadd.f32 %v11757_v24, %v5777_v40  ;;  %v5866_v28 = vpop.f32.mrf.mxu2  ;;  %v12143_v24 = vld [vmem:[%s13087_s12] ss:$0 sm:$0xff]  ;;  %v5397_v47 = vadd.f32 %v5396_v39, %v11493_v46 }
 0x93c   : > { %v5487_v63 = vpop.f32.mrf.mxu0  ;;  %v5775_v42 = vadd.f32 %v12143_v24, %v5774_v55 }
 0x93d   : > { %v5867_v49 = vadd.f32 %v5866_v28, %v5778_v18  ;;  %v5488_v62 = vadd.f32 %v5487_v63, %v11468_v60  ;;  %v5554_v34 = vmax.f32 %v5397_v47, 0.0  ;;  %v12156_v18 = vpop.permute.xlu1 %6872  ;;  %v13585_v28 = vld [vmem:[#allocation99_spill] sm:$0xff] }
 0x93e   : > { %v5864_v38 = vadd.f32 %v5863_v20, %v5775_v42  ;;  %13584 = vst [vmem:[#allocation115_spill] sm:$0xff] %v12156_v18 }
 0x93f   : > { %v12132_v22 = vadd.f32 %v5867_v49, %v11638_v35  ;;  %v5557_v36 = vmax.f32 %v5488_v62, 0.0  ;;  %v5949_v49 = vpop.xlane.xlu0 %5948 }
 0x940   : > { %v12159_v63 = vadd.f32 %v5864_v38, %v13585_v28 }
 0x941   : > { %v5597_v1 = vpack.c.bf16 %v5557_v36, %v5555_v31  ;;  %5972 = vadd.xlane.f32.xlu0 %v12132_v22 }
 0x942   : > { %v5398_v35 = vpop.f32.mrf.mxu3  ;;  %v5779_v27 = vpop.f32.mrf.mxu1 }
 0x943   : > { %5964 = vadd.xlane.f32.xlu2 %v12138_v45  ;;  %v5399_v41 = vadd.f32 %v5398_v35, %v11493_v46  ;;  %v5780_v56 = vadd.f32 %v12143_v24, %v5779_v27  ;;  %v5868_v54 = vpop.f32.mrf.mxu2  ;;  %5890 = vmatmul.bf16.gmra.mxu2 %v5597_v1  ;;  %v12166_v27 = vpop.permute.xlu2 %6732 }
 0x944   : > { %v5490_v39 = vpop.f32.mrf.mxu0 }
 0x945   : > { %v5556_v55 = vmax.f32 %v5399_v41, 0.0  ;;  %v5869_v15 = vadd.f32 %v5868_v54, %v5780_v56  ;;  %v5491_v36 = vadd.f32 %v5490_v39, %v11468_v60  ;;  %v13586_v41 = vld [vmem:[#allocation95_spill] sm:$0xff] }
 0x947   : > { %v5596_v40 = vpack.c.bf16 %v5556_v55, %v5554_v34  ;;  %v12154_v44 = vadd.f32 %v5869_v15, %v11644_v8  ;;  %v6012_v8 = vmul.f32 0.015625, %v5949_v49  ;;  %v5559_v54 = vmax.f32 %v5491_v36, 0.0  ;;  %v12172_v55 = vpop.permute.xlu1 %6893 }
 0x948   : > { %13587 = vst [vmem:[#allocation45_spill] sm:$0xff] %v12172_v55 }
 0x949   : > { %5801 = vmatmul.bf16.gmra.mxu1 %v5596_v40  ;;  %5974 = vadd.xlane.f32.xlu1 %v12154_v44  ;;  %v6044_v34 = vsub.f32 %v11956_v5, %v6012_v8 }
 0x94a   : > { %v5782_v62 = vpop.f32.mrf.mxu1  ;;  %v5401_v20 = vpop.f32.mrf.mxu3 }
 0x94b   : > { %5970 = vadd.xlane.f32.xlu2 %v12159_v63  ;;  %v5783_v31 = vadd.f32 %v12143_v24, %v5782_v62  ;;  %v5871_v42 = vpop.f32.mrf.mxu2  ;;  %v5402_v15 = vadd.f32 %v5401_v20, %v11493_v46 }
 0x94c   : > { %v5492_v1 = vpop.f32.mrf.mxu0 }
 0x94d   : > { %v5872_v47 = vadd.f32 %v5871_v42, %v5783_v31  ;;  %v5493_v35 = vadd.f32 %v5492_v1, %v11468_v60  ;;  %v13588_v42 = vld [vmem:[#allocation36_spill] sm:$0xff]  ;;  %v5558_v5 = vmax.f32 %v5402_v15, 0.0 }
 0x94e   : > { %v12179_v36 = vmul.f32 %v13588_v42, %v6044_v34 }
 0x94f   : > { %v12169_v56 = vadd.f32 %v5872_v47, %v13586_v41  ;;  %v5561_v38 = vmax.f32 %v5493_v35, 0.0  ;;  %v13589_v35 = vld [vmem:[#allocation112_spill] sm:$0xff] }
 0x951   : > { %v5599_v39 = vpack.c.bf16 %v5561_v38, %v5559_v54  ;;  %v12184_v54 = vpop.permute.xlu2 %6746  ;;  %v6108_v38 = vmul.f32 %v12179_v36, %v12179_v36 }
 0x952   : > { %v5784_v40 = vpop.f32.mrf.mxu1  ;;  %v5403_v49 = vpop.f32.mrf.mxu3 }
 0x953   : > { %v5785_v28 = vadd.f32 %v12143_v24, %v5784_v40  ;;  %5976 = vadd.xlane.f32.xlu2 %v12169_v56  ;;  %v5873_v62 = vpop.f32.mrf.mxu2  ;;  %v5404_v31 = vadd.f32 %v5403_v49, %v11493_v46  ;;  %5895 = vmatmul.bf16.gmra.mxu2 %v5599_v39 }
 0x955   : > { %v5874_v47 = vadd.f32 %v5873_v62, %v5785_v28  ;;  %v5560_v8 = vmax.f32 %v5404_v31, 0.0  ;;  %v5495_v1 = vpop.f32.mrf.mxu0 }
 0x956   : > { %v5496_v15 = vadd.f32 %v5495_v1, %v11468_v60 }
 0x957   : > { %v12182_v20 = vadd.f32 %v5874_v47, %v13589_v35  ;;  %v5598_v41 = vpack.c.bf16 %v5560_v8, %v5558_v5 }
 0x959   : > { %5978 = vadd.xlane.f32.xlu0 %v12182_v20  ;;  %5806 = vmatmul.bf16.gmra.mxu1 %v5598_v41  ;;  %v5563_v41 = vmax.f32 %v5496_v15, 0.0 }
 0x95b   : > { %6140 = vadd.xlane.f32.xlu2 %v6108_v38  ;;  %v5951_v39 = vpop.xlane.xlu1 %5950  ;;  %v5406_v34 = vpop.f32.mrf.mxu3 }
 0x95c   : > { %v6013_v40 = vmul.f32 0.015625, %v5951_v39  ;;  %v5787_v28 = vpop.f32.mrf.mxu1  ;;  %v5876_v49 = vpop.f32.mrf.mxu2 }
 0x95d   : > { %v5788_v62 = vadd.f32 %v12143_v24, %v5787_v28  ;;  %v5497_v47 = vpop.f32.mrf.mxu0  ;;  %v12201_v39 = vpop.permute.xlu2 %6767 }
 0x95e   : > { %v6045_v31 = vsub.f32 %v12035_v61, %v6013_v40  ;;  %v5498_v5 = vadd.f32 %v5497_v47, %v11468_v60  ;;  %13591 = vst [vmem:[#allocation119_spill] sm:$0xff] %v12201_v39  ;;  %v5955_v28 = vpop.xlane.xlu0 %5954  ;;  %v5407_v61 = vadd.f32 %v5406_v34, %v11493_v46 }
 0x95f   : > { %v5877_v8 = vadd.f32 %v5876_v49, %v5788_v62 }
 0x960   : > { %v12194_v35 = vmul.f32 %v13588_v42, %v6045_v31  ;;  %v5565_v38 = vmax.f32 %v5498_v5, 0.0 }
 0x961   : > { %v12197_v55 = vadd.f32 %v5877_v8, %v13590_v16  ;;  %v6015_v16 = vmul.f32 0.015625, %v5955_v28  ;;  %v5562_v8 = vmax.f32 %v5407_v61, 0.0 }
 0x962   : > { %v6109_v1 = vmul.f32 %v12194_v35, %v12194_v35  ;;  %v5601_v40 = vpack.c.bf16 %v5565_v38, %v5563_v41  ;;  %v13592_v41 = vld [vmem:[#allocation108_spill] sm:$0xff] }
 0x963   : > { %5980 = vadd.xlane.f32.xlu1 %v12197_v55  ;;  %v5408_v49 = vpop.f32.mrf.mxu3  ;;  %v6047_v34 = vsub.f32 %v11985_v11, %v6015_v16  ;;  %v5957_v14 = vpop.xlane.xlu1 %5956 }
 0x964   : > { %6142 = vadd.xlane.f32.xlu0 %v6109_v1  ;;  %v5409_v62 = vadd.f32 %v5408_v49, %v11493_v46  ;;  %v5789_v15 = vpop.f32.mrf.mxu1  ;;  %v5878_v31 = vpop.f32.mrf.mxu2  ;;  %5900 = vmatmul.bf16.gmra.mxu2 %v5601_v40 }
 0x965   : > { %v5790_v47 = vadd.f32 %v12143_v24, %v5789_v15  ;;  %v12212_v49 = vpop.permute.xlu2 %6788  ;;  %v12216_v61 = vmul.f32 %v13588_v42, %v6047_v34 }
 0x966   : > { %v5500_v5 = vpop.f32.mrf.mxu0  ;;  %v5564_v3 = vmax.f32 %v5409_v62, 0.0  ;;  %13593 = vst [vmem:[#allocation103_spill] sm:$0xff] %v12212_v49  ;;  %v6016_v62 = vmul.f32 0.015625, %v5957_v14 }
 0x967   : > { %v5879_v18 = vadd.f32 %v5878_v31, %v5790_v47  ;;  %v5501_v28 = vadd.f32 %v5500_v5, %v11468_v60  ;;  %v6111_v5 = vmul.f32 %v12216_v61, %v12216_v61 }
 0x968   : > { %v5600_v59 = vpack.c.bf16 %v5564_v3, %v5562_v8  ;;  %v6048_v47 = vsub.f32 %v12047_v26, %v6016_v62  ;;  %v13594_v8 = vld [vmem:[#allocation96_spill] sm:$0xff] }
 0x969   : > { %v12209_v38 = vadd.f32 %v5879_v18, %v13592_v41 }
 0x96a   : > { %5811 = vmatmul.bf16.gmra.mxu1 %v5600_v59  ;;  %v5567_v59 = vmax.f32 %v5501_v28, 0.0  ;;  %v12230_v28 = vmul.f32 %v13588_v42, %v6048_v47 }
 0x96b   : > { %5982 = vadd.xlane.f32.xlu2 %v12209_v38  ;;  %v5411_v1 = vpop.f32.mrf.mxu3 }
 0x96c   : > { %v5792_v40 = vpop.f32.mrf.mxu1  ;;  %v5881_v15 = vpop.f32.mrf.mxu2  ;;  %v5412_v34 = vadd.f32 %v5411_v1, %v11493_v46 }
 0x96d   : > { %v5793_v3 = vadd.f32 %v12143_v24, %v5792_v40  ;;  %v12232_v26 = vpop.permute.xlu2 %6809 }
 0x96e   : > { %v5502_v11 = vpop.f32.mrf.mxu0  ;;  %13595 = vst [vmem:[#allocation74_spill] sm:$0xff] %v12232_v26  ;;  %v5566_v62 = vmax.f32 %v5412_v34, 0.0 }
 0x96f   : > { %v5503_v18 = vadd.f32 %v5502_v11, %v11468_v60  ;;  %v5882_v31 = vadd.f32 %v5881_v15, %v5793_v3 }
 0x971   : > { %v5569_v16 = vmax.f32 %v5503_v18, 0.0  ;;  %v12222_v41 = vadd.f32 %v5882_v31, %v13594_v8  ;;  %v6112_v18 = vmul.f32 %v12230_v28, %v12230_v28 }
 0x973   : > { %v5603_v14 = vpack.c.bf16 %v5569_v16, %v5567_v59  ;;  %6146 = vadd.xlane.f32.xlu2 %v6111_v5  ;;  %5984 = vadd.xlane.f32.xlu0 %v12222_v41  ;;  %v5413_v40 = vpop.f32.mrf.mxu3 }
 0x974   : > { %v5414_v11 = vadd.f32 %v5413_v40, %v11493_v46  ;;  %v5794_v34 = vpop.f32.mrf.mxu1 }
 0x975   : > { %5905 = vmatmul.bf16.gmra.mxu2 %v5603_v14  ;;  %v12236_v1 = vpop.permute.xlu2 %6830  ;;  %v5795_v40 = vadd.f32 %v12143_v24, %v5794_v34 }
 0x976   : > { %v5568_v3 = vmax.f32 %v5414_v11, 0.0  ;;  %13596 = vst [vmem:[#allocation106_spill] sm:$0xff] %v12236_v1 }
 0x978   : > { %v5602_v15 = vpack.c.bf16 %v5568_v3, %v5566_v62  ;;  %v5883_v3 = vpop.f32.mrf.mxu2 }
 0x97a   : > { %5816 = vmatmul.bf16.gmra.mxu1 %v5602_v15  ;;  %v5884_v15 = vadd.f32 %v5883_v3, %v5795_v40 }
 0x97b   : > { %6148 = vadd.xlane.f32.xlu0 %v6112_v18 }
 0x97d   : > { %v12238_v31 = vpop.permute.xlu2 %6865 }
 0x97e   : > { %13597 = vst [vmem:[#allocation105_spill] sm:$0xff] %v12238_v31  ;;  %v13600_v31 = vld [vmem:[#allocation51_spill] sm:$0xff] }
 0x985   : > { %v12240_v59 = vpop.permute.xlu2 %6886 }
 0x986   : > { %13598 = vst [vmem:[#allocation52_spill] sm:$0xff] %v12240_v59 }
 0x98d   : > { %v12242_v16 = vpop.permute.xlu2 %6851 }
 0x98e   : > { %13599 = vst [vmem:[#allocation56_spill] sm:$0xff] %v12242_v16  ;;  %v5961_v16 = vpop.xlane.xlu0 %5960 }
 0x9a6   : > { %v5953_v47 = vpop.xlane.xlu2 %5952 }
 0x9a7   : > { %v6014_v8 = vmul.f32 0.015625, %v5953_v47  ;;  %v12252_v47 = vadd.f32 %v5884_v15, %v13600_v31 }
 0x9a9   : > { %v6046_v5 = vsub.f32 %v12106_v32, %v6014_v8 }
 0x9ab   : > { %v12246_v14 = vmul.f32 %v13588_v42, %v6046_v5  ;;  %v6018_v5 = vmul.f32 0.015625, %v5961_v16  ;;  %v5963_v16 = vpop.xlane.xlu1 %5962 }
 0x9ad   : > { %v6110_v11 = vmul.f32 %v12246_v14, %v12246_v14  ;;  %v6050_v3 = vsub.f32 %v12008_v2, %v6018_v5 }
 0x9ae   : > { %v5959_v62 = vpop.xlane.xlu2 %5958 }
 0x9af   : > { %6144 = vadd.xlane.f32.xlu1 %v6110_v11  ;;  %v6017_v18 = vmul.f32 0.015625, %v5959_v62 }
 0x9b1   : > { %v5505_v59 = vpop.f32.mrf.mxu0  ;;  %v6049_v32 = vsub.f32 %v12121_v33, %v6017_v18  ;;  %v13601_v33 = vld [vmem:[#allocation92_spill] sm:$0xff] }
 0x9b2   : > { %v5506_v50 = vadd.f32 %v5505_v59, %v11468_v60 }
 0x9b3   : > { %v12259_v40 = vmul.f32 %v13588_v42, %v6049_v32 }
 0x9b4   : > { %v5571_v18 = vmax.f32 %v5506_v50, 0.0 }
 0x9b5   : > { %v6113_v59 = vmul.f32 %v12259_v40, %v12259_v40 }
 0x9b6   : > { %v5797_v8 = vpop.f32.mrf.mxu1  ;;  %v5886_v26 = vpop.f32.mrf.mxu2 }
 0x9b7   : > { %v5416_v1 = vpop.f32.mrf.mxu3  ;;  %v5798_v34 = vadd.f32 %v12143_v24, %v5797_v8  ;;  %5986 = vadd.xlane.f32.xlu1 %v12252_v47 }
 0x9b8   : > { %v5417_v32 = vadd.f32 %v5416_v1, %v11493_v46  ;;  %v13602_v1 = vld [vmem:[#allocation55_spill] sm:$0xff] }
 0x9b9   : > { %v5887_v11 = vadd.f32 %v5886_v26, %v5798_v34  ;;  %v5507_v62 = vpop.f32.mrf.mxu0  ;;  %v12271_v34 = vmul.f32 %v13588_v42, %v6050_v3 }
 0x9ba   : > { %v5508_v31 = vadd.f32 %v5507_v62, %v11468_v60  ;;  %v6019_v60 = vmul.f32 0.015625, %v5963_v16  ;;  %v5965_v16 = vpop.xlane.xlu2 %5964 }
 0x9bb   : > { %v12264_v15 = vadd.f32 %v5887_v11, %v13601_v33  ;;  %v6114_v3 = vmul.f32 %v12271_v34, %v12271_v34 }
 0x9bc   : > { %v5573_v8 = vmax.f32 %v5508_v31, 0.0  ;;  %v5570_v31 = vmax.f32 %v5417_v32, 0.0  ;;  %v6051_v17 = vsub.f32 %v12055_v29, %v6019_v60 }
 0x9bd   : > { %5988 = vadd.xlane.f32.xlu2 %v12264_v15 }
 0x9be   : > { %v5605_v43 = vpack.c.bf16 %v5573_v8, %v5571_v18  ;;  %v5799_v26 = vpop.f32.mrf.mxu1  ;;  %v5888_v11 = vpop.f32.mrf.mxu2 }
 0x9bf   : > { %v5418_v2 = vpop.f32.mrf.mxu3  ;;  %v5800_v5 = vadd.f32 %v12143_v24, %v5799_v26  ;;  %6150 = vadd.xlane.f32.xlu1 %v6113_v59 }
 0x9c0   : > { %v5419_v50 = vadd.f32 %v5418_v2, %v11493_v46  ;;  %5910 = vmatmul.bf16.gmra.mxu2 %v5605_v43  ;;  %v12283_v46 = vmul.f32 %v13588_v42, %v6051_v17  ;;  %v6020_v43 = vmul.f32 0.015625, %v5965_v16  ;;  %v13603_v2 = vld [vmem:[#allocation91_spill] sm:$0xff]  ;;  %v13604_v16 = vld [vmem:[#allocation114_spill] sm:$0xff] }
 0x9c1   : > { %v5889_v62 = vadd.f32 %v5888_v11, %v5800_v5 }
 0x9c2   : > { %v5572_v33 = vmax.f32 %v5419_v50, 0.0  ;;  %v6052_v60 = vsub.f32 %v12138_v45, %v6020_v43  ;;  %v6115_v11 = vmul.f32 %v12283_v46, %v12283_v46  ;;  %v5967_v50 = vpop.xlane.xlu0 %5966  ;;  %v5969_v43 = vpop.xlane.xlu1 %5968 }
 0x9c3   : > { %v12277_v18 = vadd.f32 %v5889_v62, %v13602_v1  ;;  %v6021_v17 = vmul.f32 0.015625, %v5967_v50 }
 0x9c4   : > { %v5604_v8 = vpack.c.bf16 %v5572_v33, %v5570_v31  ;;  %v12294_v31 = vmul.f32 %v13588_v42, %v6052_v60 }
 0x9c5   : > { %6152 = vadd.xlane.f32.xlu2 %v6114_v3  ;;  %5990 = vadd.xlane.f32.xlu0 %v12277_v18  ;;  %v6053_v45 = vsub.f32 %v12022_v53, %v6021_v17  ;;  %v5971_v17 = vpop.xlane.xlu2 %5970 }
 0x9c6   : > { %5821 = vmatmul.bf16.gmra.mxu1 %v5604_v8  ;;  %v5802_v59 = vpop.f32.mrf.mxu1  ;;  %v5891_v29 = vpop.f32.mrf.mxu2 }
 0x9c7   : > { %v5803_v32 = vadd.f32 %v12143_v24, %v5802_v59  ;;  %v6116_v59 = vmul.f32 %v12294_v31, %v12294_v31 }
 0x9c9   : > { %v5892_v26 = vadd.f32 %v5891_v29, %v5803_v32  ;;  %v12305_v32 = vmul.f32 %v13588_v42, %v6053_v45 }
 0x9cb   : > { %v12288_v5 = vadd.f32 %v5892_v26, %v13603_v2  ;;  %v6022_v26 = vmul.f32 0.015625, %v5969_v43  ;;  %v6117_v53 = vmul.f32 %v12305_v32, %v12305_v32 }
 0x9cd   : > { %6154 = vadd.xlane.f32.xlu0 %v6115_v11  ;;  %5992 = vadd.xlane.f32.xlu1 %v12288_v5  ;;  %v6054_v50 = vsub.f32 %v12065_v13, %v6022_v26  ;;  %v5973_v26 = vpop.xlane.xlu0 %5972 }
 0x9ce   : > { %v5804_v62 = vpop.f32.mrf.mxu1  ;;  %v5893_v1 = vpop.f32.mrf.mxu2 }
 0x9cf   : > { %v5805_v33 = vadd.f32 %v12143_v24, %v5804_v62 }
 0x9d1   : > { %v5894_v3 = vadd.f32 %v5893_v1, %v5805_v33  ;;  %v12316_v1 = vmul.f32 %v13588_v42, %v6054_v50 }
 0x9d3   : > { %v12299_v8 = vadd.f32 %v5894_v3, %v13604_v16  ;;  %v6023_v16 = vmul.f32 0.015625, %v5971_v17  ;;  %v6118_v43 = vmul.f32 %v12316_v1, %v12316_v1 }
 0x9d5   : > { %5994 = vadd.xlane.f32.xlu2 %v12299_v8  ;;  %6156 = vadd.xlane.f32.xlu1 %v6116_v59  ;;  %v6055_v13 = vsub.f32 %v12159_v63, %v6023_v16  ;;  %v5977_v16 = vpop.xlane.xlu2 %5976 }
 0x9d6   : > { %v5807_v29 = vpop.f32.mrf.mxu1  ;;  %v5896_v2 = vpop.f32.mrf.mxu2 }
 0x9d7   : > { %v5808_v60 = vadd.f32 %v12143_v24, %v5807_v29 }
 0x9d9   : > { %v5897_v11 = vadd.f32 %v5896_v2, %v5808_v60 }
 0x9db   : > { %v12312_v62 = vadd.f32 %v5897_v11, %v11936_v23  ;;  %v13605_v23 = vld [vmem:[#allocation94_spill] sm:$0xff]  ;;  %v6024_v11 = vmul.f32 0.015625, %v5973_v26 }
 0x9dd   : > { %6158 = vadd.xlane.f32.xlu2 %v6117_v53  ;;  %5996 = vadd.xlane.f32.xlu0 %v12312_v62  ;;  %v12327_v53 = vmul.f32 %v13588_v42, %v6055_v13 }
 0x9de   : > { %v5809_v33 = vpop.f32.mrf.mxu1  ;;  %v5898_v45 = vpop.f32.mrf.mxu2 }
 0x9df   : > { %v5810_v3 = vadd.f32 %v12143_v24, %v5809_v33  ;;  %v6056_v33 = vsub.f32 %v12132_v22, %v6024_v11  ;;  %v5979_v22 = vpop.xlane.xlu0 %5978 }
 0x9e1   : > { %v5899_v59 = vadd.f32 %v5898_v45, %v5810_v3  ;;  %v6119_v3 = vmul.f32 %v12327_v53, %v12327_v53  ;;  %v5975_v45 = vpop.xlane.xlu1 %5974  ;;  %v12338_v13 = vmul.f32 %v13588_v42, %v6056_v33 }
 0x9e2   : > { %v6025_v26 = vmul.f32 0.015625, %v5975_v45  ;;  %v6026_v45 = vmul.f32 0.015625, %v5977_v16 }
 0x9e3   : > { %v12323_v29 = vadd.f32 %v5899_v59, %v13605_v23  ;;  %13606 = vst [vmem:[#allocation57_spill] sm:$0xff] %v12338_v13 }
 0x9e4   : > { %v6058_v0 = vsub.f32 %v12169_v56, %v6026_v45 }
 0x9e5   : > { %6160 = vadd.xlane.f32.xlu0 %v6118_v43  ;;  %5998 = vadd.xlane.f32.xlu1 %v12323_v29 }
 0x9e6   : > { %v12361_v16 = vmul.f32 %v13588_v42, %v6058_v0 }
 0x9e7   : > { %v5812_v60 = vpop.f32.mrf.mxu1  ;;  %v5901_v2 = vpop.f32.mrf.mxu2 }
 0x9e8   : > { %v5813_v50 = vadd.f32 %v12143_v24, %v5812_v60  ;;  %13608 = vst [vmem:[#allocation71_spill] sm:$0xff] %v12361_v16 }
 0x9ea   : > { %v5902_v17 = vadd.f32 %v5901_v2, %v5813_v50  ;;  %v6057_v2 = vsub.f32 %v12154_v44, %v6025_v26 }
 0x9ec   : > { %v12332_v63 = vadd.f32 %v5902_v17, %v11997_v30  ;;  %v6120_v30 = vmul.f32 %v12338_v13, %v12338_v13 }
 0x9ed   : > { %6162 = vadd.xlane.f32.xlu1 %v6119_v3  ;;  %v12350_v3 = vmul.f32 %v13588_v42, %v6057_v2 }
 0x9ee   : > { %6000 = vadd.xlane.f32.xlu2 %v12332_v63 }
 0x9ef   : > { %v5814_v59 = vpop.f32.mrf.mxu1  ;;  %v5903_v43 = vpop.f32.mrf.mxu2  ;;  %13607 = vst [vmem:[#allocation109_spill] sm:$0xff] %v12350_v3 }
 0x9f0   : > { %v5815_v23 = vadd.f32 %v12143_v24, %v5814_v59  ;;  %v6141_v59 = vpop.xlane.xlu2 %6140 }
 0x9f1   : > { %v6204_v26 = vmul.f32 0.015625, %v6141_v59 }
 0x9f2   : > { %v5904_v60 = vadd.f32 %v5903_v43, %v5815_v23  ;;  %v6143_v43 = vpop.xlane.xlu0 %6142 }
 0x9f4   : > { %v12345_v11 = vadd.f32 %v5904_v60, %v12000_v7  ;;  %v6121_v7 = vmul.f32 %v12350_v3, %v12350_v3 }
 0x9f6   : > { %6164 = vadd.xlane.f32.xlu2 %v6120_v30  ;;  %6002 = vadd.xlane.f32.xlu0 %v12345_v11  ;;  %v6027_v30 = vmul.f32 0.015625, %v5979_v22 }
 0x9f7   : > { %v5817_v50 = vpop.f32.mrf.mxu1 }
 0x9f8   : > { %v5906_v17 = vpop.f32.mrf.mxu2  ;;  %v5818_v33 = vadd.f32 %v12143_v24, %v5817_v50  ;;  %v12363_v50 = vpop.xlane.xlu2 %5982  ;;  %v6059_v45 = vsub.f32 %v12182_v20, %v6027_v30 }
 0x9fa   : > { %v5907_v23 = vadd.f32 %v5906_v17, %v5818_v33  ;;  %v6236_v17 = vadd.f32 1e-05, %v6204_v26  ;;  %v5985_v33 = vpop.xlane.xlu0 %5984  ;;  %v12373_v0 = vmul.f32 %v13588_v42, %v6059_v45 }
 0x9fb   : > { %v6030_v22 = vmul.f32 0.015625, %v5985_v33 }
 0x9fc   : > { %v12354_v44 = vadd.f32 %v5907_v23, %v12028_v19  ;;  %v6122_v23 = vmul.f32 %v12361_v16, %v12361_v16  ;;  %8135 = vrsqrt.f32 %v6236_v17  ;;  %13609 = vst [vmem:[#allocation81_spill] sm:$0xff] %v12373_v0  ;;  %vm6274_vm11 = vweird.f32 %v6236_v17 }
 0x9fe   : > { %6166 = vadd.xlane.f32.xlu0 %v6121_v7  ;;  %6004 = vadd.xlane.f32.xlu1 %v12354_v44  ;;  %v6205_v7 = vmul.f32 0.015625, %v6143_v43 }
 0x9ff   : > { %v5819_v60 = vpop.f32.mrf.mxu1 }
 0xa00   : > { %v5820_v2 = vadd.f32 %v12143_v24, %v5819_v60  ;;  %v5908_v56 = vpop.f32.mrf.mxu2  ;;  %v6147_v26 = vpop.xlane.xlu2 %6146  ;;  %v6237_v20 = vadd.f32 1e-05, %v6205_v7 }
 0xa01   : > { %v12383_v7 = vpop.xlane.xlu1 %5980 }
 0xa02   : > { %v5909_v19 = vadd.f32 %v5908_v56, %v5820_v2  ;;  %v8136_v60 = vpop.eup %8135  ;;  %v6062_v2 = vsub.f32 %v12222_v41, %v6030_v22  ;;  %v6149_v30 = vpop.xlane.xlu0 %6148  ;;  %v6207_v56 = vmul.f32 0.015625, %v6147_v26  ;;  %8137 = vrsqrt.f32 %v6237_v20 }
 0xa03   : > { %vm6275_vm10 = vweird.f32 %v8136_v60  ;;  %vm6284_vm14 = vweird.f32 %v6237_v20 }
 0xa04   : > { %v12367_v59 = vadd.f32 %v5909_v19, %v12031_v52  ;;  %v6123_v52 = vmul.f32 %v12373_v0, %v12373_v0  ;;  %v6269_v19 = vmul.f32 %v8136_v60, %v6236_v17  ;;  %v12379_v16 = vmul.f32 %v13588_v42, %v6062_v2  ;;  %vm6276_vm12 = vmor %vm6274_vm11, %vm6275_vm10 }
 0xa05   : > { %v6239_v45 = vadd.f32 1e-05, %v6207_v56 }
 0xa06   : > { %6006 = vadd.xlane.f32.xlu2 %v12367_v59  ;;  %6168 = vadd.xlane.f32.xlu1 %v6122_v23  ;;  %13610 = vst [vmem:[#allocation50_spill] sm:$0xff] %v12379_v16  ;;  %v6208_v23 = vmul.f32 0.015625, %v6149_v30  ;;  %v6270_v33 = vmul.f32 %v8136_v60, %v6269_v19  ;;  %v6126_v49 = vmul.f32 %v12379_v16, %v12379_v16 }
 0xa07   : > { %8139 = vrsqrt.f32 %v6239_v45  ;;  %vm6304_vm1 = vweird.f32 %v6239_v45 }
 0xa08   : > { %v6240_v43 = vadd.f32 1e-05, %v6208_v23  ;;  %v8138_v41 = vpop.eup %8137  ;;  %v6271_v22 = vmul.f32 0.5, %v6270_v33 }
 0xa09   : > { %v6279_v26 = vmul.f32 %v8138_v41, %v6237_v20  ;;  %vm6285_vm13 = vweird.f32 %v8138_v41 }
 0xa0a   : > { %8141 = vrsqrt.f32 %v6240_v43  ;;  %vm6286_vm15 = vmor %vm6284_vm14, %vm6285_vm13  ;;  %vm6314_vm4 = vweird.f32 %v6240_v43 }
 0xa0b   : > { %v6280_v30 = vmul.f32 %v8138_v41, %v6279_v26 }
 0xa0d   : > { %v8140_v0 = vpop.eup %8139 }
 0xa0e   : > { %6170 = vadd.xlane.f32.xlu2 %v6123_v52  ;;  %v6272_v52 = vsub.f32 1.5, %v6271_v22  ;;  %v6299_v56 = vmul.f32 %v8140_v0, %v6239_v45  ;;  %v12392_v22 = vld [vmem:[%s13088_s13] ss:$0 sm:$0xff]  ;;  %vm6305_vm0 = vweird.f32 %v8140_v0 }
 0xa0f   : > { %vm6306_vm3 = vmor %vm6304_vm1, %vm6305_vm0 }
 0xa10   : > { %v12385_v2 = vpop.eup %8141  ;;  %v6273_v12 = vmul.f32 %v8136_v60, %v6272_v52  ;;  %v6300_v37 = vmul.f32 %v8140_v0, %v6299_v56 }
 0xa11   : > { %v6309_v19 = vmul.f32 %v12385_v2, %v6240_v43  ;;  %vm6315_vm2 = vweird.f32 %v12385_v2 }
 0xa12   : > { %v6277_v33 = vsel %vm6276_vm12, %v8136_v60, %v6273_v12  ;;  %v6301_v17 = vmul.f32 0.5, %v6300_v37  ;;  %v12400_v12 = vld [vmem:[%s13089_s14] ss:$0 sm:$0xff]  ;;  %vm6316_vm6 = vmor %vm6314_vm4, %vm6315_vm2  ;;  %vm7204_vm2 = vcmask 1041409   ;;  %vm7208_vm4 = vcmask 1043459  }
 0xa13   : > { %v6310_v3 = vmul.f32 %v12385_v2, %v6309_v19  ;;  %v6588_v26 = vmul.f32 %v6277_v33, %v12179_v36 }
 0xa15   : > { %v6311_v39 = vmul.f32 0.5, %v6310_v3 }
 0xa16   : > { %6176 = vadd.xlane.f32.xlu2 %v6126_v49  ;;  %v6281_v49 = vmul.f32 0.5, %v6280_v30  ;;  %v6302_v30 = vsub.f32 1.5, %v6301_v17 }
 0xa17   : > { %v6312_v36 = vsub.f32 1.5, %v6311_v39 }
 0xa18   : > { %v6282_v52 = vsub.f32 1.5, %v6281_v49 }
 0xa1a   : > { %v6283_v60 = vmul.f32 %v8138_v41, %v6282_v52 }
 0xa1c   : > { %v6287_v3 = vsel %vm6286_vm15, %v8138_v41, %v6283_v60 }
 0xa1d   : > { %v6589_v13 = vmul.f32 %v6287_v3, %v12194_v35 }
 0xa1f   : > { %v6625_v45 = vmul.f32 %v12392_v22, %v6589_v13 }
 0xa21   : > { %v6661_v13 = vadd.f32 %v12400_v12, %v6625_v45 }
 0xa22   : > { %v6145_v23 = vpop.xlane.xlu1 %6144 }
 0xa23   : > { %v6206_v16 = vmul.f32 0.015625, %v6145_v23  ;;  %v6303_v23 = vmul.f32 %v8140_v0, %v6302_v30 }
 0xa25   : > { %v6238_v58 = vadd.f32 1e-05, %v6206_v16  ;;  %v6624_v16 = vmul.f32 %v12392_v22, %v6588_v26  ;;  %v6313_v26 = vmul.f32 %v12385_v2, %v6312_v36 }
 0xa27   : > { %8143 = vrsqrt.f32 %v6238_v58  ;;  %v6660_v37 = vadd.f32 %v12400_v12, %v6624_v16  ;;  %v6307_v16 = vsel %vm6306_vm3, %v8140_v0, %v6303_v23  ;;  %v6317_v35 = vsel %vm6316_vm6, %v12385_v2, %v6313_v26 }
 0xa28   : > { %vm6294_vm7 = vweird.f32 %v6238_v58  ;;  %v6591_v36 = vmul.f32 %v6307_v16, %v12216_v61  ;;  %v6917_v16 = vmul.f32 %v12123_v9, %v6661_v13  ;;  %vm7206_vm3 = vcmask 1042434  }
 0xa29   : > { %v6916_v39 = vmul.f32 %v12059_v10, %v6660_v37  ;;  %v6592_v37 = vmul.f32 %v6317_v35, %v12230_v28  ;;  %vm7212_vm6 = vcmask 1045509  }
 0xa2a   : > { %v12395_v21 = vpop.xlane.xlu1 %5986  ;;  %v6627_v2 = vmul.f32 %v12392_v22, %v6591_v36  ;;  %v6029_v36 = vmul.f32 0.015625, %v12363_v50 }
 0xa2b   : > { %v6948_v10 = vrot.slane %v6916_v39, 4 }
 0xa2d   : > { %v8144_v56 = vpop.eup %8143 }
 0xa2e   : > { %v6289_v19 = vmul.f32 %v8144_v56, %v6238_v58  ;;  %vm6295_vm5 = vweird.f32 %v8144_v56 }
 0xa2f   : > { %vm6296_vm8 = vmor %vm6294_vm7, %vm6295_vm5  ;;  %vm7210_vm5 = vcmask 1044484   ;;  %vm7214_vm7 = vcmask 1046534  }
 0xa30   : > { %v6290_v49 = vmul.f32 %v8144_v56, %v6289_v19  ;;  %v12404_v33 = vpop.xlane.xlu2 %5988 }
 0xa32   : > { %v6291_v52 = vmul.f32 0.5, %v6290_v49  ;;  %v6151_v20 = vpop.xlane.xlu1 %6150 }
 0xa33   : > { %v6209_v17 = vmul.f32 0.015625, %v6151_v20  ;;  %v6628_v20 = vmul.f32 %v12392_v22, %v6592_v37 }
 0xa34   : > { %v6292_v41 = vsub.f32 1.5, %v6291_v52 }
 0xa35   : > { %v12410_v60 = vadd.f32 1e-05, %v6209_v17 }
 0xa36   : > { %v6293_v30 = vmul.f32 %v8144_v56, %v6292_v41  ;;  %v6663_v41 = vadd.f32 %v12400_v12, %v6627_v2 }
 0xa37   : > { %8145 = vrsqrt.f32 %v12410_v60  ;;  %vm6324_vm10 = vweird.f32 %v12410_v60 }
 0xa38   : > { %v6297_v19 = vsel %vm6296_vm8, %v8144_v56, %v6293_v30  ;;  %v5991_v0 = vpop.xlane.xlu0 %5990  ;;  %v6153_v43 = vpop.xlane.xlu2 %6152  ;;  %v6949_v56 = vadd.f32 %v6948_v10, %v6916_v39  ;;  %v6664_v10 = vadd.f32 %v12400_v12, %v6628_v20  ;;  %v6919_v37 = vmul.f32 %v12151_v4, %v6663_v41 }
 0xa39   : > { %v6590_v3 = vmul.f32 %v6297_v19, %v12246_v14  ;;  %v6033_v23 = vmul.f32 0.015625, %v5991_v0  ;;  %v6210_v49 = vmul.f32 0.015625, %v6153_v43  ;;  %v6028_v14 = vmul.f32 0.015625, %v12383_v7 }
 0xa3a   : > { %v6950_v30 = vrot.slane %v6949_v56, 2  ;;  %v6954_v43 = vrot.slane %v6917_v16, 4  ;;  %v6920_v20 = vmul.f32 %v12069_v48, %v6664_v10  ;;  %v6966_v41 = vrot.slane %v6919_v37, 4 }
 0xa3b   : > { %v6626_v58 = vmul.f32 %v12392_v22, %v6590_v3  ;;  %v6065_v61 = vsub.f32 %v12277_v18, %v6033_v23  ;;  %v12422_v26 = vadd.f32 1e-05, %v6210_v49  ;;  %v6060_v7 = vsub.f32 %v12197_v55, %v6028_v14 }
 0xa3c   : > { %v6061_v55 = vsub.f32 %v12209_v38, %v6029_v36  ;;  %vm7216_vm8 = vcmask 1047559  }
 0xa3d   : > { %v8146_v52 = vpop.eup %8145  ;;  %v12426_v28 = vmul.f32 %v13588_v42, %v6065_v61  ;;  %8147 = vrsqrt.f32 %v12422_v26  ;;  %v6662_v18 = vadd.f32 %v12400_v12, %v6626_v58  ;;  %v6951_v61 = vadd.f32 %v6950_v30, %v6949_v56 }
 0xa3e   : > { %v6319_v17 = vmul.f32 %v8146_v52, %v12410_v60  ;;  %vm6325_vm9 = vweird.f32 %v8146_v52  ;;  %v12455_v48 = vmul.f32 %v13588_v42, %v6060_v7  ;;  %v6972_v30 = vrot.slane %v6920_v20, 4 }
 0xa3f   : > { %v6129_v39 = vmul.f32 %v12426_v28, %v12426_v28  ;;  %v6918_v3 = vmul.f32 %v12062_v25, %v6662_v18  ;;  %vm6326_vm11 = vmor %vm6324_vm10, %vm6325_vm9  ;;  %v6031_v60 = vmul.f32 0.015625, %v12395_v21  ;;  %v12460_v10 = vmul.f32 %v13588_v42, %v6061_v55 }
 0xa40   : > { %v6320_v45 = vmul.f32 %v8146_v52, %v6319_v17  ;;  %v6155_v35 = vpop.xlane.xlu0 %6154  ;;  %v6955_v17 = vadd.f32 %v6954_v43, %v6917_v16  ;;  %v6952_v16 = vrot.slane %v6951_v61, 1  ;;  %vm6334_vm13 = vweird.f32 %v12422_v26 }
 0xa41   : > { %v6211_v19 = vmul.f32 0.015625, %v6155_v35  ;;  %6182 = vadd.xlane.f32.xlu2 %v6129_v39  ;;  %v6960_v18 = vrot.slane %v6918_v3, 4  ;;  %v5993_v39 = vpop.xlane.xlu1 %5992 }
 0xa42   : > { %v6321_v0 = vmul.f32 0.5, %v6320_v45 }
 0xa43   : > { %v8148_v9 = vpop.eup %8147  ;;  %v12441_v23 = vadd.f32 1e-05, %v6211_v19  ;;  %v5822_v49 = vpop.f32.mrf.mxu1  ;;  %v6961_v43 = vadd.f32 %v6960_v18, %v6918_v3 }
 0xa44   : > { %v5911_v13 = vpop.f32.mrf.mxu2  ;;  %v6322_v2 = vsub.f32 1.5, %v6321_v0  ;;  %v6329_v50 = vmul.f32 %v8148_v9, %v12422_v26  ;;  %v5823_v58 = vadd.f32 %v12143_v24, %v5822_v49  ;;  %vm6335_vm12 = vweird.f32 %v8148_v9 }
 0xa45   : > { %8149 = vrsqrt.f32 %v12441_v23  ;;  %v6967_v0 = vadd.f32 %v6966_v41, %v6919_v37  ;;  %vm6336_vm14 = vmor %vm6334_vm13, %vm6335_vm12  ;;  %v6124_v37 = vmul.f32 %v12455_v48, %v12455_v48  ;;  %v12474_v26 = vmul.f32 %v12460_v10, %v12460_v10 }
 0xa46   : > { %v6323_v4 = vmul.f32 %v8146_v52, %v6322_v2  ;;  %v6330_v25 = vmul.f32 %v8148_v9, %v6329_v50  ;;  %v5912_v14 = vadd.f32 %v5911_v13, %v5823_v58  ;;  %v6973_v2 = vadd.f32 %v6972_v30, %v6920_v20 }
 0xa47   : > { %v6063_v50 = vsub.f32 %v12252_v47, %v6031_v60  ;;  %v6968_v18 = vrot.slane %v6967_v0, 2  ;;  %vm6344_vm0 = vweird.f32 %v12441_v23 }
 0xa48   : > { %v6327_v45 = vsel %vm6326_vm11, %v8146_v52, %v6323_v4  ;;  %v6331_v35 = vmul.f32 0.5, %v6330_v25  ;;  %v12450_v56 = vadd.f32 %v5912_v14, %v12100_v57  ;;  %v12452_v38 = vpop.xlane.xlu2 %5994  ;;  %v6956_v52 = vrot.slane %v6955_v17, 2 }
 0xa49   : > { %v6593_v36 = vmul.f32 %v6327_v45, %v12259_v40  ;;  %v12476_v14 = vadd.f32 %v6952_v16, %v6951_v61  ;;  %v12484_v30 = vmul.f32 %v13588_v42, %v6063_v50  ;;  %v6157_v61 = vpop.xlane.xlu1 %6156 }
 0xa4a   : > { %v6332_v19 = vsub.f32 1.5, %v6331_v35  ;;  %6008 = vadd.xlane.f32.xlu0 %v12450_v56  ;;  %v6957_v41 = vadd.f32 %v6956_v52, %v6955_v17 }
 0xa4b   : > { %v8150_v57 = vpop.eup %8149  ;;  %v6629_v7 = vmul.f32 %v12392_v22, %v6593_v36  ;;  %v5824_v49 = vpop.f32.mrf.mxu1 }
 0xa4c   : > { %v6333_v13 = vmul.f32 %v8148_v9, %v6332_v19  ;;  %v6339_v21 = vmul.f32 %v8150_v57, %v12441_v23  ;;  %v5825_v40 = vadd.f32 %v12143_v24, %v5824_v49  ;;  %v5913_v55 = vpop.f32.mrf.mxu2  ;;  %v6962_v24 = vrot.slane %v6961_v43, 2 }
 0xa4d   : > { %v6665_v58 = vadd.f32 %v12400_v12, %v6629_v7  ;;  %v6032_v19 = vmul.f32 0.015625, %v12404_v33  ;;  %vm6345_vm15 = vweird.f32 %v8150_v57  ;;  %v6034_v49 = vmul.f32 0.015625, %v5993_v39 }
 0xa4e   : > { %v6337_v3 = vsel %vm6336_vm14, %v8148_v9, %v6333_v13  ;;  %v6340_v4 = vmul.f32 %v8150_v57, %v6339_v21  ;;  %v5914_v25 = vadd.f32 %v5913_v55, %v5825_v40  ;;  %v6974_v9 = vrot.slane %v6973_v2, 2  ;;  %vm6346_vm1 = vmor %vm6344_vm0, %vm6345_vm15 }
 0xa4f   : > { %v6921_v47 = vmul.f32 %v12166_v27, %v6665_v58  ;;  %v6594_v20 = vmul.f32 %v6337_v3, %v12271_v34  ;;  %v6212_v21 = vmul.f32 0.015625, %v6157_v61  ;;  %v6958_v50 = vrot.slane %v6957_v41, 1 }
 0xa50   : > { %v6341_v45 = vmul.f32 0.5, %v6340_v4  ;;  %v12481_v35 = vadd.f32 %v5914_v25, %v12102_v6  ;;  %v5997_v16 = vpop.xlane.xlu0 %5996  ;;  %v6159_v17 = vpop.xlane.xlu2 %6158  ;;  %v6963_v6 = vadd.f32 %v6962_v24, %v6961_v43  ;;  %v6969_v33 = vadd.f32 %v6968_v18, %v6967_v0 }
 0xa51   : > { %v6978_v60 = vrot.slane %v6921_v47, 4  ;;  %v6630_v36 = vmul.f32 %v12392_v22, %v6594_v20  ;;  %v6036_v34 = vmul.f32 0.015625, %v5997_v16  ;;  %v6213_v55 = vmul.f32 0.015625, %v6159_v17 }
 0xa52   : > { %v6342_v27 = vsub.f32 1.5, %v6341_v45  ;;  %6172 = vadd.xlane.f32.xlu0 %v6124_v37  ;;  %6010 = vadd.xlane.f32.xlu1 %v12481_v35  ;;  %v6975_v37 = vadd.f32 %v6974_v9, %v6973_v2  ;;  %v6064_v43 = vsub.f32 %v12264_v15, %v6032_v19  ;;  %v6964_v39 = vrot.slane %v6963_v6, 1 }
 0xa53   : > { %v6979_v52 = vadd.f32 %v6978_v60, %v6921_v47  ;;  %v6666_v7 = vadd.f32 %v12400_v12, %v6630_v36  ;;  %v6068_v40 = vsub.f32 %v12312_v62, %v6036_v34  ;;  %v6066_v62 = vsub.f32 %v12288_v5, %v6034_v49 }
 0xa54   : > { %v6343_v13 = vmul.f32 %v8150_v57, %v6342_v27  ;;  %v12500_v0 = vadd.f32 1e-05, %v6212_v21  ;;  %v6127_v2 = vmul.f32 %v12484_v30, %v12484_v30  ;;  %v6959_v15 = vadd.f32 %v6958_v50, %v6957_v41 }
 0xa55   : > { %v6922_v58 = vmul.f32 %v12074_v51, %v6666_v7  ;;  %v12496_v4 = vmul.f32 %v13588_v42, %v6068_v40  ;;  %v6980_v25 = vrot.slane %v6979_v52, 2  ;;  %v12507_v20 = vadd.f32 1e-05, %v6213_v55 }
 0xa56   : > { %v6347_v3 = vsel %vm6346_vm1, %v8150_v57, %v6343_v13  ;;  %v6970_v45 = vrot.slane %v6969_v33, 1  ;;  %v6976_v9 = vrot.slane %v6975_v37, 1  ;;  %v6965_v36 = vadd.f32 %v6964_v39, %v6963_v6 }
 0xa57   : > { %v6984_v23 = vrot.slane %v6922_v58, 4  ;;  %v6595_v24 = vmul.f32 %v6347_v3, %v12283_v46  ;;  %v6132_v51 = vmul.f32 %v12496_v4, %v12496_v4  ;;  %v12510_v46 = vmul.f32 %v13588_v42, %v6064_v43 }
 0xa58   : > { %v6161_v18 = vpop.xlane.xlu0 %6160  ;;  %v5999_v60 = vpop.xlane.xlu1 %5998  ;;  %v6981_v61 = vadd.f32 %v6980_v25, %v6979_v52  ;;  %v12515_v19 = vmul.f32 %v13588_v42, %v6066_v62  ;;  %8151 = vrsqrt.f32 %v12500_v0  ;;  %v6035_v49 = vmul.f32 0.015625, %v12452_v38 }
 0xa59   : > { %v6985_v57 = vadd.f32 %v6984_v23, %v6922_v58  ;;  %v6631_v47 = vmul.f32 %v12392_v22, %v6595_v24  ;;  %v6214_v5 = vmul.f32 0.015625, %v6161_v18  ;;  %6188 = vadd.xlane.f32.xlu2 %v6132_v51  ;;  %v6037_v34 = vmul.f32 0.015625, %v5999_v60 }
 0xa5a   : > { %6178 = vadd.xlane.f32.xlu0 %v6127_v2  ;;  %6174 = vadd.xlane.f32.xlu1 %v12474_v26  ;;  %8153 = vrsqrt.f32 %v12507_v20  ;;  %v7140_v6 = vmul.f32 0.16666667, %v12476_v14  ;;  %v7141_v52 = vmul.f32 0.16666667, %v6959_v15  ;;  %v7142_v26 = vmul.f32 0.16666667, %v6965_v36 }
 0xa5b   : > { %v6986_v16 = vrot.slane %v6985_v57, 2  ;;  %v6667_v41 = vadd.f32 %v12400_v12, %v6631_v47  ;;  %v12518_v27 = vadd.f32 1e-05, %v6214_v5  ;;  %v6982_v13 = vrot.slane %v6981_v61, 1 }
 0xa5c   : > { %v6971_v40 = vadd.f32 %v6970_v45, %v6969_v33  ;;  %v6069_v58 = vsub.f32 %v12323_v29, %v6037_v34  ;;  %v6977_v38 = vadd.f32 %v6976_v9, %v6975_v37  ;;  %v6067_v43 = vsub.f32 %v12299_v8, %v6035_v49 }
 0xa5d   : > { %v6987_v17 = vadd.f32 %v6986_v16, %v6985_v57  ;;  %v6923_v7 = vmul.f32 %v12184_v54, %v6667_v41  ;;  %8155 = vrsqrt.f32 %v12518_v27  ;;  %v6130_v54 = vmul.f32 %v12515_v19, %v12515_v19 }
 0xa5e   : > { %v6128_v14 = vmul.f32 %v12510_v46, %v12510_v46  ;;  %v12531_v3 = vpop.eup %8151  ;;  %v7205_v39 = vsel %vm7204_vm2, %v7141_v52, %v7140_v6  ;;  %v6983_v37 = vadd.f32 %v6982_v13, %v6981_v61  ;;  %v7143_v51 = vmul.f32 0.16666667, %v6971_v40 }
 0xa5f   : > { %v6990_v21 = vrot.slane %v6923_v7, 4  ;;  %v6988_v50 = vrot.slane %v6987_v17, 1  ;;  %v7207_v33 = vsel %vm7206_vm3, %v7142_v26, %v7205_v39  ;;  %v12540_v15 = vmul.f32 %v13588_v42, %v6069_v58 }
 0xa60   : > { %v6163_v25 = vpop.xlane.xlu1 %6162  ;;  %v12534_v29 = vpop.eup %8153  ;;  %v7144_v57 = vmul.f32 0.16666667, %v6977_v38  ;;  %v12543_v18 = vmul.f32 %v13588_v42, %v6067_v43  ;;  %v7209_v60 = vsel %vm7208_vm4, %v7143_v51, %v7207_v33  ;;  %v7145_v36 = vmul.f32 0.16666667, %v6983_v37 }
 0xa61   : > { %v6991_v55 = vadd.f32 %v6990_v21, %v6923_v7  ;;  %v6001_v23 = vpop.xlane.xlu2 %6000  ;;  %v6215_v62 = vmul.f32 0.015625, %v6163_v25  ;;  %v6989_v2 = vadd.f32 %v6988_v50, %v6987_v17  ;;  %v6359_v9 = vmul.f32 %v12534_v29, %v12507_v20 }
 0xa62   : > { %6184 = vadd.xlane.f32.xlu0 %v6130_v54  ;;  %6180 = vadd.xlane.f32.xlu1 %v6128_v14  ;;  %v6038_v45 = vmul.f32 0.015625, %v6001_v23  ;;  %v6349_v16 = vmul.f32 %v12531_v3, %v12500_v0  ;;  %v6133_v17 = vmul.f32 %v12540_v15, %v12540_v15  ;;  %v6131_v6 = vmul.f32 %v12543_v18, %v12543_v18 }
 0xa63   : > { %v6992_v24 = vrot.slane %v6991_v55, 2  ;;  %v12537_v8 = vpop.eup %8155  ;;  %v12548_v5 = vadd.f32 1e-05, %v6215_v62  ;;  %v7146_v34 = vmul.f32 0.16666667, %v6989_v2  ;;  %v6360_v52 = vmul.f32 %v12534_v29, %v6359_v9 }
 0xa64   : > { %v6369_v41 = vmul.f32 %v12537_v8, %v12518_v27  ;;  %v6070_v49 = vsub.f32 %v12332_v63, %v6038_v45  ;;  %v7211_v13 = vsel %vm7210_vm5, %v7144_v57, %v7209_v60  ;;  %v6350_v40 = vmul.f32 %v12531_v3, %v6349_v16 }
 0xa65   : > { %v6993_v47 = vadd.f32 %v6992_v24, %v6991_v55  ;;  %8157 = vrsqrt.f32 %v12548_v5  ;;  %v7213_v63 = vsel %vm7212_vm6, %v7145_v36, %v7211_v13  ;;  %v6361_v25 = vmul.f32 0.5, %v6360_v52 }
 0xa66   : > { %v6370_v50 = vmul.f32 %v12537_v8, %v6369_v41  ;;  %v7215_v55 = vsel %vm7214_vm7, %v7146_v34, %v7213_v63  ;;  %v12570_v43 = vmul.f32 %v13588_v42, %v6070_v49  ;;  %v6351_v37 = vmul.f32 0.5, %v6350_v40 }
 0xa67   : > { %v6994_v61 = vrot.slane %v6993_v47, 1  ;;  %v6362_v57 = vsub.f32 1.5, %v6361_v25  ;;  %vm6354_vm9 = vweird.f32 %v12500_v0  ;;  %vm6355_vm10 = vweird.f32 %v12531_v3 }
 0xa68   : > { %v6371_v24 = vmul.f32 0.5, %v6370_v50  ;;  %v6352_v45 = vsub.f32 1.5, %v6351_v37  ;;  %vm6364_vm11 = vweird.f32 %v12507_v20  ;;  %vm6365_vm12 = vweird.f32 %v12534_v29  ;;  %vm12604_vm14 = vmor %vm6354_vm9, %vm6355_vm10 }
 0xa69   : > { %v6995_v7 = vadd.f32 %v6994_v61, %v6993_v47  ;;  %v6165_v26 = vpop.xlane.xlu2 %6164  ;;  %v6003_v58 = vpop.xlane.xlu0 %6002  ;;  %vm6375_vm13 = vweird.f32 %v12537_v8  ;;  %vm12616_vm0 = vmor %vm6364_vm11, %vm6365_vm12  ;;  %vm6374_vm1 = vweird.f32 %v12518_v27  ;;  %vm6384_vm10 = vweird.f32 %v12548_v5 }
 0xa6a   : > { %6190 = vadd.xlane.f32.xlu0 %v6133_v17  ;;  %6186 = vadd.xlane.f32.xlu1 %v6131_v6  ;;  %v6039_v54 = vmul.f32 0.015625, %v6003_v58  ;;  %v6216_v38 = vmul.f32 0.015625, %v6165_v26  ;;  %v6372_v9 = vsub.f32 1.5, %v6371_v24  ;;  %v6353_v52 = vmul.f32 %v12531_v3, %v6352_v45  ;;  %vm12624_vm9 = vmor %vm6374_vm1, %vm6375_vm13 }
 0xa6b   : > { %v7147_v21 = vmul.f32 0.16666667, %v6995_v7  ;;  %v12573_v39 = vpop.eup %8157  ;;  %v6363_v7 = vmul.f32 %v12534_v29, %v6362_v57 }
 0xa6c   : > { %v6071_v23 = vsub.f32 %v12345_v11, %v6039_v54  ;;  %v12576_v33 = vadd.f32 1e-05, %v6216_v38  ;;  %v6379_v62 = vmul.f32 %v12573_v39, %v12548_v5  ;;  %v6134_v11 = vmul.f32 %v12570_v43, %v12570_v43 }
 0xa6d   : > { %v7217_v14 = vsel %vm7216_vm8, %v7147_v21, %v7215_v55  ;;  %v6373_v26 = vmul.f32 %v12537_v8, %v6372_v9  ;;  %vm6385_vm15 = vweird.f32 %v12573_v39  ;;  %v6367_v58 = vsel %vm12616_vm0, %v12534_v29, %v6363_v7  ;;  %v13622_v29 = vld [vmem:[#allocation109_spill] sm:$0xff] }
 0xa6e   : > { %7243 = vst [vmem:[%s12578_s20] sm:$0xff] %v7217_v14  ;;  %v12584_v51 = vmul.f32 %v13588_v42, %v6071_v23  ;;  %8159 = vrsqrt.f32 %v12576_v33  ;;  %v6380_v2 = vmul.f32 %v12573_v39, %v6379_v62  ;;  %v6357_v38 = vsel %vm12604_vm14, %v12531_v3, %v6353_v52  ;;  %vm12637_vm11 = vmor %vm6384_vm10, %vm6385_vm15 }
 0xa6f   : > { %v6377_v27 = vsel %vm12624_vm9, %v12537_v8, %v6373_v26  ;;  %v6597_v37 = vmul.f32 %v6367_v58, %v12305_v32  ;;  %v6596_v62 = vmul.f32 %v6357_v38, %v12294_v31  ;;  %vm6394_vm13 = vweird.f32 %v12576_v33  ;;  %v13620_v58 = vld [vmem:[#allocation93_spill] sm:$0xff]  ;;  %v13621_v38 = vld [vmem:[#allocation119_spill] sm:$0xff] }
 0xa70   : > { %v6135_v47 = vmul.f32 %v12584_v51, %v12584_v51  ;;  %v6381_v60 = vmul.f32 0.5, %v6380_v2  ;;  %v6598_v2 = vmul.f32 %v6377_v27, %v12316_v1 }
 0xa71   : > { %v6167_v36 = vpop.xlane.xlu0 %6166  ;;  %v6005_v61 = vpop.xlane.xlu1 %6004  ;;  %v6633_v32 = vmul.f32 %v12392_v22, %v6597_v37  ;;  %v6632_v1 = vmul.f32 %v12392_v22, %v6596_v62  ;;  %v13625_v37 = vld [vmem:[#allocation65_spill] sm:$0xff] }
 0xa72   : > { %6192 = vadd.xlane.f32.xlu1 %v6134_v11  ;;  %v6217_v16 = vmul.f32 0.015625, %v6167_v36  ;;  %v6040_v41 = vmul.f32 0.015625, %v6005_v61  ;;  %6194 = vadd.xlane.f32.xlu2 %v6135_v47  ;;  %v6382_v34 = vsub.f32 1.5, %v6381_v60 }
 0xa73   : > { %v6668_v26 = vadd.f32 %v12400_v12, %v6632_v1  ;;  %v13626_v1 = vld [vmem:[#allocation103_spill] sm:$0xff] }
 0xa74   : > { %v8160_v17 = vpop.eup %8159  ;;  %v12597_v49 = vadd.f32 1e-05, %v6217_v16  ;;  %v6072_v6 = vsub.f32 %v12354_v44, %v6040_v41  ;;  %v6383_v21 = vmul.f32 %v12573_v39, %v6382_v34 }
 0xa75   : > { %v6389_v0 = vmul.f32 %v8160_v17, %v12576_v33  ;;  %vm6395_vm12 = vweird.f32 %v8160_v17  ;;  %v6634_v33 = vmul.f32 %v12392_v22, %v6598_v2 }
 0xa76   : > { %8161 = vrsqrt.f32 %v12597_v49  ;;  %v12612_v44 = vmul.f32 %v13588_v42, %v6072_v6  ;;  %v6387_v5 = vsel %vm12637_vm11, %v12573_v39, %v6383_v21  ;;  %vm6396_vm14 = vmor %vm6394_vm13, %vm6395_vm12  ;;  %vm6404_vm0 = vweird.f32 %v12597_v49 }
 0xa77   : > { %v6390_v50 = vmul.f32 %v8160_v17, %v6389_v0  ;;  %v6599_v57 = vmul.f32 %v6387_v5, %v12327_v53  ;;  %v13619_v53 = vld [vmem:[#allocation57_spill] sm:$0xff]  ;;  %v6670_v0 = vadd.f32 %v12400_v12, %v6634_v33  ;;  %v13624_v5 = vld [vmem:[#allocation111_spill] sm:$0xff] }
 0xa78   : > { %v6136_v20 = vmul.f32 %v12612_v44, %v12612_v44 }
 0xa79   : > { %v6007_v54 = vpop.xlane.xlu2 %6006  ;;  %v6391_v55 = vmul.f32 0.5, %v6390_v50  ;;  %v6169_v14 = vpop.xlane.xlu1 %6168  ;;  %v6635_v61 = vmul.f32 %v12392_v22, %v6599_v57  ;;  %v6926_v27 = vmul.f32 %v13621_v38, %v6670_v0  ;;  %v13628_v38 = vld [vmem:[#allocation100_spill] sm:$0xff] }
 0xa7a   : > { %v6041_v25 = vmul.f32 0.015625, %v6007_v54  ;;  %v6218_v23 = vmul.f32 0.015625, %v6169_v14  ;;  %6196 = vadd.xlane.f32.xlu0 %v6136_v20  ;;  %v13623_v14 = vld [vmem:[#allocation39_spill] sm:$0xff] }
 0xa7b   : > { %v6392_v3 = vsub.f32 1.5, %v6391_v55  ;;  %v6671_v13 = vadd.f32 %v12400_v12, %v6635_v61 }
 0xa7c   : > { %v6073_v24 = vsub.f32 %v12367_v59, %v6041_v25  ;;  %v8162_v8 = vpop.eup %8161  ;;  %v6250_v11 = vadd.f32 1e-05, %v6218_v23  ;;  %v6924_v25 = vmul.f32 %v13623_v14, %v6668_v26 }
 0xa7d   : > { %v6393_v47 = vmul.f32 %v8160_v17, %v6392_v3  ;;  %v6399_v39 = vmul.f32 %v8162_v8, %v12597_v49  ;;  %vm6405_vm15 = vweird.f32 %v8162_v8  ;;  %v6927_v49 = vmul.f32 %v13624_v5, %v6671_v13 }
 0xa7e   : > { %v12652_v45 = vmul.f32 %v13588_v42, %v6073_v24  ;;  %8163 = vrsqrt.f32 %v6250_v11  ;;  %vm6406_vm1 = vmor %vm6404_vm0, %vm6405_vm15  ;;  %vm6414_vm10 = vweird.f32 %v6250_v11 }
 0xa7f   : > { %v6397_v59 = vsel %vm6396_vm14, %v8160_v17, %v6393_v47  ;;  %v6400_v9 = vmul.f32 %v8162_v8, %v6399_v39  ;;  %v6669_v17 = vadd.f32 %v12400_v12, %v6633_v32  ;;  %v7008_v47 = vrot.slane %v6926_v27, 4 }
 0xa80   : > { %v6137_v31 = vmul.f32 %v12652_v45, %v12652_v45  ;;  %v6600_v60 = vmul.f32 %v6397_v59, %v13619_v53  ;;  %v6996_v32 = vrot.slane %v6924_v25, 4  ;;  %v7014_v59 = vrot.slane %v6927_v49, 4 }
 0xa81   : > { %v6171_v36 = vpop.xlane.xlu2 %6170  ;;  %v6401_v16 = vmul.f32 0.5, %v6400_v9  ;;  %v6925_v63 = vmul.f32 %v13620_v58, %v6669_v17  ;;  %v7009_v61 = vadd.f32 %v7008_v47, %v6926_v27 }
 0xa82   : > { %v6219_v41 = vmul.f32 0.015625, %v6171_v36  ;;  %6198 = vadd.xlane.f32.xlu1 %v6137_v31  ;;  %v6636_v34 = vmul.f32 %v12392_v22, %v6600_v60  ;;  %v7015_v26 = vadd.f32 %v7014_v59, %v6927_v49  ;;  %v13629_v49 = vld [vmem:[#allocation81_spill] sm:$0xff] }
 0xa83   : > { %v6402_v7 = vsub.f32 1.5, %v6401_v16  ;;  %v7002_v2 = vrot.slane %v6925_v63, 4 }
 0xa84   : > { %v6251_v6 = vadd.f32 1e-05, %v6219_v41  ;;  %v8164_v52 = vpop.eup %8163  ;;  %v6672_v50 = vadd.f32 %v12400_v12, %v6636_v34  ;;  %v13627_v41 = vld [vmem:[#allocation71_spill] sm:$0xff] }
 0xa85   : > { %v6403_v21 = vmul.f32 %v8162_v8, %v6402_v7  ;;  %v6409_v40 = vmul.f32 %v8164_v52, %v6250_v11  ;;  %vm6415_vm9 = vweird.f32 %v8164_v52  ;;  %v7003_v60 = vadd.f32 %v7002_v2, %v6925_v63 }
 0xa86   : > { %8165 = vrsqrt.f32 %v6251_v6  ;;  %v6928_v3 = vmul.f32 %v13625_v37, %v6672_v50  ;;  %vm6416_vm11 = vmor %vm6414_vm10, %vm6415_vm9  ;;  %v6997_v7 = vadd.f32 %v6996_v32, %v6924_v25  ;;  %v7010_v50 = vrot.slane %v7009_v61, 2 }
 0xa87   : > { %v6407_v54 = vsel %vm6406_vm1, %v8162_v8, %v6403_v21  ;;  %v6410_v20 = vmul.f32 %v8164_v52, %v6409_v40  ;;  %v7004_v11 = vrot.slane %v7003_v60, 2  ;;  %vm6424_vm13 = vweird.f32 %v6251_v6 }
 0xa88   : > { %v6601_v55 = vmul.f32 %v6407_v54, %v13622_v29  ;;  %v7020_v31 = vrot.slane %v6928_v3, 4  ;;  %v7016_v54 = vrot.slane %v7015_v26, 2  ;;  %v7011_v37 = vadd.f32 %v7010_v50, %v7009_v61 }
 0xa89   : > { %v6411_v23 = vmul.f32 0.5, %v6410_v20  ;;  %v7005_v25 = vadd.f32 %v7004_v11, %v7003_v60 }
 0xa8a   : > { %v6637_v24 = vmul.f32 %v12392_v22, %v6601_v55  ;;  %v7021_v0 = vadd.f32 %v7020_v31, %v6928_v3  ;;  %v12682_v55 = vld [vmem:[%s9425_s29 + $0x18] sm:$0xff]  ;;  %v7017_v2 = vadd.f32 %v7016_v54, %v7015_v26  ;;  %v7012_v32 = vrot.slane %v7011_v37, 1 }
 0xa8b   : > { %v6412_v57 = vsub.f32 1.5, %v6411_v23  ;;  %v6902_v14 = vperm.slane %v12682_v55, 6 }
 0xa8c   : > { %v8166_v62 = vpop.eup %8165  ;;  %v6673_v8 = vadd.f32 %v12400_v12, %v6637_v24  ;;  %v7022_v20 = vrot.slane %v7021_v0, 2  ;;  %v7018_v31 = vrot.slane %v7017_v2, 1 }
 0xa8d   : > { %v6419_v39 = vmul.f32 %v8166_v62, %v6251_v6  ;;  %v6413_v9 = vmul.f32 %v8164_v52, %v6412_v57  ;;  %vm6425_vm12 = vweird.f32 %v8166_v62 }
 0xa8e   : > { %v6929_v33 = vmul.f32 %v13626_v1, %v6673_v8  ;;  %vm6426_vm14 = vmor %vm6424_vm13, %vm6425_vm12  ;;  %v7023_v57 = vadd.f32 %v7022_v20, %v7021_v0  ;;  %v7006_v8 = vrot.slane %v7005_v25, 1  ;;  %v13630_v1 = vld [vmem:[#allocation48_spill] sm:$0xff] }
 0xa8f   : > { %v6420_v53 = vmul.f32 %v8166_v62, %v6419_v39  ;;  %v6417_v36 = vsel %vm6416_vm11, %v8164_v52, %v6413_v9  ;;  %v6998_v52 = vrot.slane %v6997_v7, 2 }
 0xa90   : > { %v7026_v16 = vrot.slane %v6929_v33, 4  ;;  %v6602_v34 = vmul.f32 %v6417_v36, %v13627_v41  ;;  %v7007_v36 = vadd.f32 %v7006_v8, %v7005_v25  ;;  %v7013_v41 = vadd.f32 %v7012_v32, %v7011_v37 }
 0xa91   : > { %v6421_v17 = vmul.f32 0.5, %v6420_v53  ;;  %v6999_v24 = vadd.f32 %v6998_v52, %v6997_v7  ;;  %v7024_v53 = vrot.slane %v7023_v57, 1 }
 0xa92   : > { %v6638_v13 = vmul.f32 %v12392_v22, %v6602_v34  ;;  %v7027_v40 = vadd.f32 %v7026_v16, %v6929_v33  ;;  %v7149_v0 = vmul.f32 0.16666667, %v7007_v36 }
 0xa93   : > { %v6422_v21 = vsub.f32 1.5, %v6421_v17  ;;  %v7000_v9 = vrot.slane %v6999_v24, 1  ;;  %v7019_v17 = vadd.f32 %v7018_v31, %v7017_v2  ;;  %v7025_v26 = vadd.f32 %v7024_v53, %v7023_v57 }
 0xa94   : > { %v6674_v58 = vadd.f32 %v12400_v12, %v6638_v13  ;;  %v7028_v5 = vrot.slane %v7027_v40, 2 }
 0xa95   : > { %v6423_v63 = vmul.f32 %v8166_v62, %v6422_v21  ;;  %v7001_v34 = vadd.f32 %v7000_v9, %v6999_v24  ;;  %v7150_v21 = vmul.f32 0.16666667, %v7013_v41  ;;  %v7151_v50 = vmul.f32 0.16666667, %v7019_v17  ;;  %v8210_v9 = vld [vmem:[%s9425_s29 + $0x10] sm:$0xff]  ;;  %s8229_s29 = scalar_lea.hbm %s8228_s21, 32 }
 0xa96   : > { %v6930_v27 = vmul.f32 %v13628_v38, %v6674_v58  ;;  %v7029_v39 = vadd.f32 %v7028_v5, %v7027_v40  ;;  %v6853_v31 = vperm.slane %v8210_v9, 7  ;;  %v12745_v9 = vld [vmem:[%s13089_s14] ss:$0 sm:$0xff]  ;;  %p8230_p12 = scmp.ne.s32.totalorder %s8228_s21, %s8229_s29  ;;  %p8235_p2 = scmp.lt.s32.totalorder %s8233_s24, %s8229_s29 }
 0xa97   : > { %v6427_v29 = vsel %vm6426_vm14, %v8166_v62, %v6423_v63  ;;  %v7148_v40 = vmul.f32 0.16666667, %v7001_v34  ;;  %v7152_v63 = vmul.f32 0.16666667, %v7025_v26 }
 0xa98   : > { %v6603_v23 = vmul.f32 %v6427_v29, %v13629_v49  ;;  %v7032_v3 = vrot.slane %v6930_v27, 4  ;;  %v7030_v61 = vrot.slane %v7029_v39, 1  ;;  %p8231_p13 = pnand %p8230_p12, %p8399_p5  ;;  %p8236_p3 = por %p8235_p2, %p8234_p1 }
 0xa99   : > { %v7218_v52 = vsel %vm7204_vm2, %v7149_v0, %v7148_v40 }
 0xa9a   : > { %v6639_v6 = vmul.f32 %v12392_v22, %v6603_v23  ;;  %v7033_v47 = vadd.f32 %v7032_v3, %v6930_v27  ;;  %v7031_v13 = vadd.f32 %v7030_v61, %v7029_v39  ;;  %v7219_v38 = vsel %vm7206_vm3, %v7150_v21, %v7218_v52  ;;  %p8232_p0 = pneg %p8231_p13 }
 0xa9b   : > { %6907 = vperm.xlu1 %7806, %v6902_v14   ;;  %v7220_v14 = vsel %vm7208_vm4, %v7151_v50, %v7219_v38 }
 0xa9c   : > { %v6675_v62 = vadd.f32 %v12400_v12, %v6639_v6  ;;  %v7034_v59 = vrot.slane %v7033_v47, 2  ;;  %v7153_v54 = vmul.f32 0.16666667, %v7031_v13  ;;  %v7221_v25 = vsel %vm7210_vm5, %v7152_v63, %v7220_v14  ;;  %p8237_p4 = pnand %p8236_p3, %p8232_p0 }
 0xa9e   : > { %v6931_v33 = vmul.f32 %v13630_v1, %v6675_v62  ;;  %v7035_v60 = vadd.f32 %v7034_v59, %v7033_v47  ;;  %v7222_v49 = vsel %vm7212_vm6, %v7153_v54, %v7221_v25  ;;  %v6177_v59 = vpop.xlane.xlu2 %6176 }
 0xa9f   : > { %v6222_v1 = vmul.f32 0.015625, %v6177_v59 }
 0xaa0   : > { %v7038_v16 = vrot.slane %v6931_v33, 4  ;;  %v7036_v22 = vrot.slane %v7035_v60, 1 }
 0xaa2   : > { %v7039_v7 = vadd.f32 %v7038_v16, %v6931_v33  ;;  %v7037_v11 = vadd.f32 %v7036_v22, %v7035_v60  ;;  %v6254_v33 = vadd.f32 1e-05, %v6222_v1 }
 0xaa4   : > { %v7040_v12 = vrot.slane %v7039_v7, 2  ;;  %v7154_v27 = vmul.f32 0.16666667, %v7037_v11  ;;  %8167 = vrsqrt.f32 %v6254_v33  ;;  %vm6454_vm0 = vweird.f32 %v6254_v33 }
 0xaa6   : > { %v7041_v58 = vadd.f32 %v7040_v12, %v7039_v7  ;;  %v7223_v23 = vsel %vm7214_vm7, %v7154_v27, %v7222_v49 }
 0xaa8   : > { %v7042_v20 = vrot.slane %v7041_v58, 1 }
 0xaaa   : > { %v7043_v29 = vadd.f32 %v7042_v20, %v7041_v58 }
 0xaac   : > { %v7155_v5 = vmul.f32 0.16666667, %v7043_v29  ;;  %v13631_v29 = vld [vmem:[#allocation50_spill] sm:$0xff] }
 0xaae   : > { %v7224_v37 = vsel %vm7216_vm8, %v7155_v5, %v7223_v23 }
 0xaaf   : > { %7244 = vst [vmem:[%s12578_s20 + $0x8] sm:$0xff] %v7224_v37  ;;  %v12730_v37 = vld [vmem:[%s13088_s13] ss:$0 sm:$0xff] }
 0xab4   : > { %v6183_v53 = vpop.xlane.xlu2 %6182 }
 0xab5   : > { %v6225_v60 = vmul.f32 0.015625, %v6183_v53 }
 0xabd   : > { %v6009_v3 = vpop.xlane.xlu0 %6008 }
 0xabe   : > { %v6042_v24 = vmul.f32 0.015625, %v6009_v3 }
 0xac0   : > { %v6074_v2 = vsub.f32 %v12450_v56, %v6042_v24  ;;  %v6909_v56 = vperm.slane %v12682_v55, 7 }
 0xac2   : > { %v12699_v6 = vmul.f32 %v13588_v42, %v6074_v2 }
 0xac4   : > { %v6138_v57 = vmul.f32 %v12699_v6, %v12699_v6 }
 0xac5   : > { %v6011_v47 = vpop.xlane.xlu1 %6010  ;;  %v6173_v36 = vpop.xlane.xlu0 %6172 }
 0xac6   : > { %v6043_v8 = vmul.f32 0.015625, %v6011_v47  ;;  %6200 = vadd.xlane.f32.xlu2 %v6138_v57  ;;  %v6220_v22 = vmul.f32 0.015625, %v6173_v36 }
 0xac8   : > { %v6075_v39 = vsub.f32 %v12481_v35, %v6043_v8  ;;  %v8168_v35 = vpop.eup %8167  ;;  %v12711_v0 = vadd.f32 1e-05, %v6220_v22 }
 0xac9   : > { %v6449_v16 = vmul.f32 %v8168_v35, %v6254_v33  ;;  %vm6455_vm15 = vweird.f32 %v8168_v35 }
 0xaca   : > { %v12705_v62 = vmul.f32 %v13588_v42, %v6075_v39  ;;  %v6257_v42 = vadd.f32 1e-05, %v6225_v60  ;;  %vm6456_vm1 = vmor %vm6454_vm0, %vm6455_vm15  ;;  %vm6434_vm13 = vweird.f32 %v12711_v0 }
 0xacb   : > { %v6450_v41 = vmul.f32 %v8168_v35, %v6449_v16  ;;  %v13632_v16 = vld [vmem:[#allocation97_spill] sm:$0xff] }
 0xacc   : > { %v6139_v32 = vmul.f32 %v12705_v62, %v12705_v62  ;;  %8169 = vrsqrt.f32 %v6257_v42  ;;  %v6189_v27 = vpop.xlane.xlu2 %6188  ;;  %vm6484_vm10 = vweird.f32 %v6257_v42 }
 0xacd   : > { %v6175_v61 = vpop.xlane.xlu1 %6174  ;;  %v6179_v34 = vpop.xlane.xlu0 %6178  ;;  %v6451_v17 = vmul.f32 0.5, %v6450_v41  ;;  %8171 = vrsqrt.f32 %v12711_v0  ;;  %v6228_v23 = vmul.f32 0.015625, %v6189_v27 }
 0xace   : > { %6202 = vadd.xlane.f32.xlu0 %v6139_v32  ;;  %v6221_v21 = vmul.f32 0.015625, %v6175_v61  ;;  %v6223_v40 = vmul.f32 0.015625, %v6179_v34 }
 0xacf   : > { %v6452_v13 = vsub.f32 1.5, %v6451_v17 }
 0xad0   : > { %v12716_v52 = vadd.f32 1e-05, %v6221_v21  ;;  %v12718_v20 = vadd.f32 1e-05, %v6223_v40 }
 0xad1   : > { %v6453_v11 = vmul.f32 %v8168_v35, %v6452_v13 }
 0xad2   : > { %v8170_v55 = vpop.eup %8169  ;;  %8173 = vrsqrt.f32 %v12716_v52 }
 0xad3   : > { %v6479_v26 = vmul.f32 %v8170_v55, %v6257_v42  ;;  %v6457_v54 = vsel %vm6456_vm1, %v8168_v35, %v6453_v11  ;;  %v12720_v38 = vpop.eup %8171  ;;  %8175 = vrsqrt.f32 %v12718_v20  ;;  %vm6485_vm9 = vweird.f32 %v8170_v55 }
 0xad4   : > { %v6606_v14 = vmul.f32 %v6457_v54, %v13631_v29  ;;  %v6429_v5 = vmul.f32 %v12720_v38, %v12711_v0  ;;  %vm6486_vm11 = vmor %vm6484_vm10, %vm6485_vm9  ;;  %vm6435_vm12 = vweird.f32 %v12720_v38  ;;  %vm6444_vm1 = vweird.f32 %v12716_v52 }
 0xad5   : > { %v6181_v7 = vpop.xlane.xlu1 %6180  ;;  %v6480_v12 = vmul.f32 %v8170_v55, %v6479_v26  ;;  %v6185_v50 = vpop.xlane.xlu0 %6184  ;;  %vm6436_vm14 = vmor %vm6434_vm13, %vm6435_vm12  ;;  %vm6464_vm9 = vweird.f32 %v12718_v20 }
 0xad6   : > { %v6224_v49 = vmul.f32 0.015625, %v6181_v7  ;;  %v6642_v3 = vmul.f32 %v12730_v37, %v6606_v14  ;;  %v6430_v57 = vmul.f32 %v12720_v38, %v6429_v5  ;;  %v6226_v47 = vmul.f32 0.015625, %v6185_v50 }
 0xad7   : > { %v6481_v63 = vmul.f32 0.5, %v6480_v12 }
 0xad8   : > { %v12734_v8 = vadd.f32 1e-05, %v6224_v49  ;;  %v12736_v32 = vpop.eup %8173  ;;  %v6431_v33 = vmul.f32 0.5, %v6430_v57  ;;  %v12750_v60 = vadd.f32 1e-05, %v6226_v47 }
 0xad9   : > { %v6482_v25 = vsub.f32 1.5, %v6481_v63  ;;  %v12740_v59 = vpop.eup %8175  ;;  %v6439_v53 = vmul.f32 %v12736_v32, %v12716_v52  ;;  %vm6445_vm0 = vweird.f32 %v12736_v32 }
 0xada   : > { %8177 = vrsqrt.f32 %v12734_v8  ;;  %v6459_v35 = vmul.f32 %v12740_v59, %v12718_v20  ;;  %vm6465_vm15 = vweird.f32 %v12740_v59  ;;  %vm12814_vm10 = vmor %vm6444_vm1, %vm6445_vm0 }
 0xadb   : > { %v6483_v24 = vmul.f32 %v8170_v55, %v6482_v25  ;;  %v6440_v17 = vmul.f32 %v12736_v32, %v6439_v53 }
 0xadc   : > { %v6460_v26 = vmul.f32 %v12740_v59, %v6459_v35 }
 0xadd   : > { %v12714_v58 = vpop.xlane.xlu1 %6186  ;;  %v6191_v2 = vpop.xlane.xlu0 %6190  ;;  %v6487_v1 = vsel %vm6486_vm11, %v8170_v55, %v6483_v24  ;;  %v6432_v55 = vsub.f32 1.5, %v6431_v33  ;;  %v6441_v29 = vmul.f32 0.5, %v6440_v17  ;;  %vm12825_vm11 = vmor %vm6464_vm9, %vm6465_vm15 }
 0xade   : > { %6914 = vperm.xlu2 %7807, %v6909_v56   ;;  %v12738_v56 = vadd.f32 1e-05, %v6228_v23  ;;  %v6229_v36 = vmul.f32 0.015625, %v6191_v2  ;;  %v6609_v22 = vmul.f32 %v6487_v1, %v12426_v28  ;;  %v6461_v14 = vmul.f32 0.5, %v6460_v26 }
 0xadf   : > { %v6433_v27 = vmul.f32 %v12720_v38, %v6432_v55  ;;  %v6227_v55 = vmul.f32 0.015625, %v12714_v58 }
 0xae0   : > { %8179 = vrsqrt.f32 %v12738_v56  ;;  %v12761_v13 = vadd.f32 1e-05, %v6229_v36  ;;  %v12763_v21 = vpop.eup %8177  ;;  %v6645_v63 = vmul.f32 %v12730_v37, %v6609_v22  ;;  %v13633_v36 = vld [vmem:[#allocation85_spill] sm:$0xff]  ;;  %vm6514_vm15 = vweird.f32 %v12738_v56 }
 0xae1   : > { %8181 = vrsqrt.f32 %v12750_v60  ;;  %v6469_v25 = vmul.f32 %v12763_v21, %v12734_v8  ;;  %v6437_v47 = vsel %vm6436_vm14, %v12720_v38, %v6433_v27  ;;  %vm6475_vm12 = vweird.f32 %v12763_v21 }
 0xae2   : > { %6858 = vperm.xlu0 %7808, %v6853_v31   ;;  %v6678_v31 = vadd.f32 %v12745_v9, %v6642_v3  ;;  %8183 = vrsqrt.f32 %v12761_v13  ;;  %v6681_v2 = vadd.f32 %v12745_v9, %v6645_v63  ;;  %vm6474_vm14 = vweird.f32 %v12734_v8 }
 0xae3   : > { %v6470_v1 = vmul.f32 %v12763_v21, %v6469_v25  ;;  %v12837_v25 = vadd.f32 1e-05, %v6227_v55  ;;  %vm12861_vm0 = vmor %vm6474_vm14, %vm6475_vm12  ;;  %vm6524_vm14 = vweird.f32 %v12761_v13 }
 0xae4   : > { %v6934_v41 = vmul.f32 %v13632_v16, %v6678_v31  ;;  %v6462_v31 = vsub.f32 1.5, %v6461_v14 }
 0xae5   : > { %v6193_v39 = vpop.xlane.xlu1 %6192  ;;  %v6195_v61 = vpop.xlane.xlu2 %6194 }
 0xae6   : > { %v6230_v42 = vmul.f32 0.015625, %v6193_v39  ;;  %v6231_v12 = vmul.f32 0.015625, %v6195_v61  ;;  %v12767_v50 = vpop.eup %8179  ;;  %v7056_v28 = vrot.slane %v6934_v41, 4  ;;  %v6442_v39 = vsub.f32 1.5, %v6441_v29 }
 0xae7   : > { %v12777_v49 = vpop.eup %8181  ;;  %v6509_v23 = vmul.f32 %v12767_v50, %v12738_v56  ;;  %v6604_v61 = vmul.f32 %v6437_v47, %v12455_v48  ;;  %vm6515_vm13 = vweird.f32 %v12767_v50 }
 0xae8   : > { %v12765_v11 = vadd.f32 1e-05, %v6230_v42  ;;  %v12775_v5 = vadd.f32 1e-05, %v6231_v12  ;;  %v7057_v24 = vadd.f32 %v7056_v28, %v6934_v41  ;;  %v6489_v0 = vmul.f32 %v12777_v49, %v12750_v60  ;;  %v12795_v53 = vpop.eup %8183  ;;  %vm12867_vm1 = vmor %vm6514_vm15, %vm6515_vm13 }
 0xae9   : > { %v6510_v33 = vmul.f32 %v12767_v50, %v6509_v23  ;;  %v6937_v42 = vmul.f32 %v13633_v36, %v6681_v2  ;;  %v6443_v16 = vmul.f32 %v12736_v32, %v6442_v39  ;;  %v6463_v41 = vmul.f32 %v12740_v59, %v6462_v31 }
 0xaea   : > { %8185 = vrsqrt.f32 %v12765_v11  ;;  %v7058_v35 = vrot.slane %v7057_v24, 2  ;;  %v6490_v22 = vmul.f32 %v12777_v49, %v6489_v0  ;;  %v6640_v52 = vmul.f32 %v12730_v37, %v6604_v61 }
 0xaeb   : > { %8187 = vrsqrt.f32 %v12775_v5  ;;  %v6511_v17 = vmul.f32 0.5, %v6510_v33  ;;  %v7074_v58 = vrot.slane %v6937_v42, 4  ;;  %v6447_v20 = vsel %vm12814_vm10, %v12736_v32, %v6443_v16 }
 0xaec   : > { %v7059_v26 = vadd.f32 %v7058_v35, %v7057_v24  ;;  %v6467_v27 = vsel %vm12825_vm11, %v12740_v59, %v6463_v41  ;;  %v6491_v29 = vmul.f32 0.5, %v6490_v22  ;;  %v6605_v39 = vmul.f32 %v6447_v20, %v12460_v10 }
 0xaed   : > { %v6197_v34 = vpop.xlane.xlu0 %6196  ;;  %v6512_v23 = vsub.f32 1.5, %v6511_v17  ;;  %v7075_v0 = vadd.f32 %v7074_v58, %v6937_v42  ;;  %v6676_v59 = vadd.f32 %v12745_v9, %v6640_v52  ;;  %vm6495_vm9 = vweird.f32 %v12777_v49 }
 0xaee   : > { %v6232_v40 = vmul.f32 0.015625, %v6197_v34  ;;  %v6471_v34 = vmul.f32 0.5, %v6470_v1  ;;  %v7060_v47 = vrot.slane %v7059_v26, 1  ;;  %v6607_v1 = vmul.f32 %v6467_v27, %v12484_v30 }
 0xaef   : > { %v6492_v35 = vsub.f32 1.5, %v6491_v29  ;;  %v6513_v10 = vmul.f32 %v12767_v50, %v6512_v23  ;;  %v6641_v16 = vmul.f32 %v12730_v37, %v6605_v39  ;;  %v7076_v22 = vrot.slane %v7075_v0, 2 }
 0xaf0   : > { %v12783_v3 = vadd.f32 1e-05, %v6232_v40  ;;  %v12799_v38 = vpop.eup %8185  ;;  %v6472_v14 = vsub.f32 1.5, %v6471_v34  ;;  %v13638_v34 = vld [vmem:[#allocation74_spill] sm:$0xff]  ;;  %v6643_v12 = vmul.f32 %v12730_v37, %v6607_v1  ;;  %vm6494_vm10 = vweird.f32 %v12750_v60 }
 0xaf1   : > { %v12811_v48 = vpop.eup %8187  ;;  %v6529_v40 = vmul.f32 %v12799_v38, %v12765_v11  ;;  %v6932_v55 = vmul.f32 %v13638_v34, %v6676_v59  ;;  %v6493_v8 = vmul.f32 %v12777_v49, %v6492_v35  ;;  %v6517_v58 = vsel %vm12867_vm1, %v12767_v50, %v6513_v10  ;;  %vm12885_vm11 = vmor %vm6494_vm10, %vm6495_vm9 }
 0xaf2   : > { %8189 = vrsqrt.f32 %v12783_v3  ;;  %v6539_v2 = vmul.f32 %v12811_v48, %v12775_v5  ;;  %v6473_v36 = vmul.f32 %v12763_v21, %v6472_v14  ;;  %v6677_v27 = vadd.f32 %v12745_v9, %v6641_v16 }
 0xaf3   : > { %v6530_v32 = vmul.f32 %v12799_v38, %v6529_v40  ;;  %v12883_v23 = vadd.f32 %v7060_v47, %v7059_v26  ;;  %v12890_v39 = vadd.f32 %v7076_v22, %v7075_v0  ;;  %v6497_v60 = vsel %vm12885_vm11, %v12777_v49, %v6493_v8 }
 0xaf4   : > { %v6540_v42 = vmul.f32 %v12811_v48, %v6539_v2  ;;  %v6477_v56 = vsel %vm12861_vm0, %v12763_v21, %v6473_v36  ;;  %vm6525_vm12 = vweird.f32 %v12795_v53  ;;  %vm6535_vm13 = vweird.f32 %v12799_v38  ;;  %v13646_v36 = vld [vmem:[#allocation106_spill] sm:$0xff] }
 0xaf5   : > { %v6199_v7 = vpop.xlane.xlu1 %6198  ;;  %v6531_v30 = vmul.f32 0.5, %v6530_v32  ;;  %v6608_v21 = vmul.f32 %v6477_v56, %v12510_v46  ;;  %v6679_v32 = vadd.f32 %v12745_v9, %v6643_v12  ;;  %v13645_v46 = vld [vmem:[#allocation113_spill] sm:$0xff]  ;;  %vm12909_vm15 = vmor %vm6524_vm14, %vm6525_vm12  ;;  %vm6534_vm0 = vweird.f32 %v12765_v11 }
 0xaf6   : > { %v6233_v54 = vmul.f32 0.015625, %v6199_v7  ;;  %v6519_v7 = vmul.f32 %v12795_v53, %v12761_v13  ;;  %v6541_v63 = vmul.f32 0.5, %v6540_v42  ;;  %v6933_v1 = vmul.f32 %v13645_v46, %v6677_v27  ;;  %vm12918_vm1 = vmor %vm6534_vm0, %vm6535_vm13 }
 0xaf7   : > { %v6532_v29 = vsub.f32 1.5, %v6531_v30  ;;  %v6644_v35 = vmul.f32 %v12730_v37, %v6608_v21  ;;  %v6935_v10 = vmul.f32 %v13646_v36, %v6679_v32  ;;  %v6610_v42 = vmul.f32 %v6497_v60, %v12515_v19 }
 0xaf8   : > { %v12786_v57 = vadd.f32 1e-05, %v6233_v54  ;;  %v12820_v28 = vpop.eup %8189  ;;  %v6520_v24 = vmul.f32 %v12795_v53, %v6519_v7  ;;  %v6542_v59 = vsub.f32 1.5, %v6541_v63  ;;  %vm6545_vm9 = vweird.f32 %v12811_v48 }
 0xaf9   : > { %v6549_v31 = vmul.f32 %v12820_v28, %v12783_v3  ;;  %v6533_v0 = vmul.f32 %v12799_v38, %v6532_v29  ;;  %v7050_v19 = vrot.slane %v6933_v1, 4  ;;  %vm6555_vm10 = vweird.f32 %v12820_v28  ;;  %v13657_v29 = vld [vmem:[#allocation70_spill] sm:$0xff] }
 0xafa   : > { %8191 = vrsqrt.f32 %v12786_v57  ;;  %v6521_v61 = vmul.f32 0.5, %v6520_v24  ;;  %v7044_v24 = vrot.slane %v6932_v55, 4  ;;  %v6543_v22 = vmul.f32 %v12811_v48, %v6542_v59 }
 0xafb   : > { %8193 = vrsqrt.f32 %v12837_v25  ;;  %v6550_v41 = vmul.f32 %v12820_v28, %v6549_v31  ;;  %v6612_v31 = vmul.f32 %v6517_v58, %v12496_v4  ;;  %v6537_v34 = vsel %vm12918_vm1, %v12799_v38, %v6533_v0 }
 0xafc   : > { %v6522_v52 = vsub.f32 1.5, %v6521_v61  ;;  %v7045_v4 = vadd.f32 %v7044_v24, %v6932_v55  ;;  %vm6544_vm11 = vweird.f32 %v12775_v5  ;;  %vm6554_vm14 = vweird.f32 %v12783_v3  ;;  %v13658_v24 = vld [vmem:[#allocation105_spill] sm:$0xff] }
 0xafd   : > { %v6551_v14 = vmul.f32 0.5, %v6550_v41  ;;  %v6648_v61 = vmul.f32 %v12730_v37, %v6612_v31  ;;  %vm12935_vm13 = vmor %vm6544_vm11, %vm6545_vm9  ;;  %v6614_v56 = vmul.f32 %v6537_v34, %v12570_v43  ;;  %vm6564_vm0 = vweird.f32 %v12786_v57  ;;  %v13660_v34 = vld [vmem:[#allocation115_spill] sm:$0xff] }
 0xafe   : > { %v6523_v26 = vmul.f32 %v12795_v53, %v6522_v52  ;;  %v6547_v5 = vsel %vm12935_vm13, %v12811_v48, %v6543_v22  ;;  %v6646_v52 = vmul.f32 %v12730_v37, %v6610_v42  ;;  %v7046_v63 = vrot.slane %v7045_v4, 2 }
 0xaff   : > { %v7062_v27 = vrot.slane %v6935_v10, 4  ;;  %v6615_v21 = vmul.f32 %v6547_v5, %v12584_v51  ;;  %v6650_v32 = vmul.f32 %v12730_v37, %v6614_v56  ;;  %v12972_v60 = vmul.f32 0.16666667, %v12883_v23 }
 0xb00   : > { %v12832_v54 = vpop.eup %8191  ;;  %v6527_v30 = vsel %vm12909_vm15, %v12795_v53, %v6523_v26  ;;  %v6680_v53 = vadd.f32 %v12745_v9, %v6644_v35  ;;  %vm12944_vm15 = vmor %vm6554_vm14, %vm6555_vm10  ;;  %v7078_v59 = vrot.slane %v12890_v39, 1  ;;  %v7047_v46 = vadd.f32 %v7046_v63, %v7045_v4  ;;  %v13659_v4 = vld [vmem:[#allocation56_spill] sm:$0xff] }
 0xb01   : > { %v6559_v33 = vmul.f32 %v12832_v54, %v12786_v57  ;;  %v12879_v20 = vpop.eup %8193  ;;  %vm6565_vm12 = vweird.f32 %v12832_v54  ;;  %v6613_v12 = vmul.f32 %v6527_v30, %v12540_v15  ;;  %v7051_v15 = vadd.f32 %v7050_v19, %v6933_v1 }
 0xb02   : > { %v6499_v47 = vmul.f32 %v12879_v20, %v12837_v25  ;;  %vm12955_vm1 = vmor %vm6564_vm0, %vm6565_vm12  ;;  %v7063_v1 = vadd.f32 %v7062_v27, %v6935_v10  ;;  %vm6505_vm9 = vweird.f32 %v12879_v20  ;;  %v6686_v36 = vadd.f32 %v12745_v9, %v6650_v32  ;;  %v13664_v27 = vld [vmem:[#allocation52_spill] sm:$0xff] }
 0xb03   : > { %v6560_v7 = vmul.f32 %v12832_v54, %v6559_v33  ;;  %v6552_v33 = vsub.f32 1.5, %v6551_v14  ;;  %v6936_v14 = vmul.f32 %v13657_v29, %v6680_v53  ;;  %v7052_v26 = vrot.slane %v7051_v15, 2 }
 0xb04   : > { %v6500_v41 = vmul.f32 %v12879_v20, %v6499_v47  ;;  %v6682_v47 = vadd.f32 %v12745_v9, %v6646_v52  ;;  %vm6504_vm10 = vweird.f32 %v12837_v25  ;;  %v7064_v19 = vrot.slane %v7063_v1, 2 }
 0xb05   : > { %v6561_v50 = vmul.f32 0.5, %v6560_v7  ;;  %v6553_v11 = vmul.f32 %v12820_v28, %v6552_v33  ;;  %v6684_v7 = vadd.f32 %v12745_v9, %v6648_v61  ;;  %v7068_v51 = vrot.slane %v6936_v14, 4  ;;  %vm12990_vm11 = vmor %vm6504_vm10, %vm6505_vm9 }
 0xb06   : > { %v6501_v8 = vmul.f32 0.5, %v6500_v41  ;;  %v7053_v42 = vadd.f32 %v7052_v26, %v7051_v15  ;;  %v6938_v10 = vmul.f32 %v13659_v4, %v6682_v47  ;;  %v7048_v41 = vrot.slane %v7047_v46, 1 }
 0xb07   : > { %v6562_v49 = vsub.f32 1.5, %v6561_v50  ;;  %v6557_v3 = vsel %vm12944_vm15, %v12820_v28, %v6553_v11  ;;  %v6940_v2 = vmul.f32 %v13658_v24, %v6684_v7  ;;  %v6649_v28 = vmul.f32 %v12730_v37, %v6613_v12  ;;  %v13665_v24 = vld [vmem:[#allocation45_spill] sm:$0xff] }
 0xb08   : > { %v6502_v50 = vsub.f32 1.5, %v6501_v8  ;;  %v6616_v31 = vmul.f32 %v6557_v3, %v12612_v44  ;;  %v7069_v13 = vadd.f32 %v7068_v51, %v6936_v14  ;;  %v7080_v56 = vrot.slane %v6938_v10, 4 }
 0xb09   : > { %v6563_v55 = vmul.f32 %v12832_v54, %v6562_v49  ;;  %v7092_v33 = vrot.slane %v6940_v2, 4  ;;  %v6685_v35 = vadd.f32 %v12745_v9, %v6649_v28  ;;  %v6651_v49 = vmul.f32 %v12730_v37, %v6615_v21 }
 0xb0a   : > { %v6503_v23 = vmul.f32 %v12879_v20, %v6502_v50  ;;  %v7049_v58 = vadd.f32 %v7048_v41, %v7047_v46  ;;  %v7070_v15 = vrot.slane %v7069_v13, 2  ;;  %v13003_v3 = vadd.f32 %v7078_v59, %v12890_v39 }
 0xb0b   : > { %v6567_v57 = vsel %vm12955_vm1, %v12832_v54, %v6563_v55  ;;  %v6941_v11 = vmul.f32 %v13660_v34, %v6685_v35  ;;  %v6687_v55 = vadd.f32 %v12745_v9, %v6651_v49  ;;  %v7093_v8 = vadd.f32 %v7092_v33, %v6940_v2 }
 0xb0c   : > { %v6617_v54 = vmul.f32 %v6567_v57, %v12652_v45  ;;  %v6652_v45 = vmul.f32 %v12730_v37, %v6616_v31  ;;  %v6507_v25 = vsel %vm12990_vm11, %v12879_v20, %v6503_v23  ;;  %v7065_v43 = vadd.f32 %v7064_v19, %v7063_v1  ;;  %v13666_v31 = vld [vmem:[#allocation53_spill] sm:$0xff] }
 0xb0d   : > { %v7098_v63 = vrot.slane %v6941_v11, 4  ;;  %v6943_v29 = vmul.f32 %v13664_v27, %v6687_v55  ;;  %v6611_v14 = vmul.f32 %v6507_v25, %v12543_v18  ;;  %v7094_v50 = vrot.slane %v7093_v8, 2 }
 0xb0e   : > { %v6653_v16 = vmul.f32 %v12730_v37, %v6617_v54  ;;  %v6688_v12 = vadd.f32 %v12745_v9, %v6652_v45  ;;  %v7081_v32 = vadd.f32 %v7080_v56, %v6938_v10  ;;  %v7071_v47 = vadd.f32 %v7070_v15, %v7069_v13 }
 0xb0f   : > { %v7156_v59 = vmul.f32 0.16666667, %v7049_v58  ;;  %v7099_v46 = vadd.f32 %v7098_v63, %v6941_v11  ;;  %v7110_v18 = vrot.slane %v6943_v29, 4  ;;  %v6647_v1 = vmul.f32 %v12730_v37, %v6611_v14 }
 0xb10   : > { %v6689_v5 = vadd.f32 %v12745_v9, %v6653_v16  ;;  %v6944_v20 = vmul.f32 %v13665_v24, %v6688_v12  ;;  %v7066_v49 = vrot.slane %v7065_v43, 1 }
 0xb11   : > { %v7100_v10 = vrot.slane %v7099_v46, 2  ;;  %v7111_v16 = vadd.f32 %v7110_v18, %v6943_v29  ;;  %v6683_v13 = vadd.f32 %v12745_v9, %v6647_v1 }
 0xb12   : > { %v6945_v26 = vmul.f32 %v13666_v31, %v6689_v5 }
 0xb13   : > { %v7101_v25 = vadd.f32 %v7100_v10, %v7099_v46 }
 0xb14   : > { %v7122_v23 = vrot.slane %v6945_v26, 4 }
 0xb16   : > { %v7123_v53 = vadd.f32 %v7122_v23, %v6945_v26 }
 0xb18   : > { %v7124_v63 = vrot.slane %v7123_v53, 2 }
 0xb39   : > { %v6201_v17 = vpop.xlane.xlu2 %6200 }
 0xb3a   : > { %v6234_v38 = vmul.f32 0.015625, %v6201_v17  ;;  %v13663_v17 = vld [vmem:[#allocation102_spill] sm:$0xff] }
 0xb3b   : > { %v6942_v7 = vmul.f32 %v13663_v17, %v6686_v36 }
 0xb3c   : > { %v12959_v48 = vadd.f32 1e-05, %v6234_v38  ;;  %v7054_v38 = vrot.slane %v7053_v42, 1 }
 0xb3d   : > { %v7104_v57 = vrot.slane %v6942_v7, 4 }
 0xb3e   : > { %8195 = vrsqrt.f32 %v12959_v48  ;;  %v7055_v21 = vadd.f32 %v7054_v38, %v7053_v42  ;;  %vm6574_vm13 = vweird.f32 %v12959_v48  ;;  %v7095_v42 = vadd.f32 %v7094_v50, %v7093_v8 }
 0xb3f   : > { %v7105_v51 = vadd.f32 %v7104_v57, %v6942_v7  ;;  %v6908_v7 = vpop.permute.xlu1 %6907  ;;  %v7112_v38 = vrot.slane %v7111_v16, 2 }
 0xb40   : > { %v7157_v45 = vmul.f32 0.16666667, %v7055_v21 }
 0xb41   : > { %v6203_v0 = vpop.xlane.xlu0 %6202 }
 0xb42   : > { %v6235_v44 = vmul.f32 0.015625, %v6203_v0  ;;  %v7116_v0 = vrot.slane %v6944_v20, 4  ;;  %v7225_v56 = vsel %vm7204_vm2, %v7157_v45, %v7156_v59  ;;  %v6915_v59 = vpop.permute.xlu2 %6914 }
 0xb44   : > { %v8196_v61 = vpop.eup %8195  ;;  %v12985_v30 = vadd.f32 1e-05, %v6235_v44  ;;  %v7082_v44 = vrot.slane %v7081_v32, 2  ;;  %v7117_v19 = vadd.f32 %v7116_v0, %v6944_v20  ;;  %v7102_v20 = vrot.slane %v7101_v25, 1 }
 0xb45   : > { %v6569_v22 = vmul.f32 %v8196_v61, %v12959_v48  ;;  %vm6575_vm12 = vweird.f32 %v8196_v61  ;;  %v7072_v48 = vrot.slane %v7071_v47, 1 }
 0xb46   : > { %8197 = vrsqrt.f32 %v12985_v30  ;;  %vm6576_vm14 = vmor %vm6574_vm13, %vm6575_vm12  ;;  %v7083_v11 = vadd.f32 %v7082_v44, %v7081_v32  ;;  %vm6584_vm0 = vweird.f32 %v12985_v30  ;;  %v7118_v58 = vrot.slane %v7117_v19, 2 }
 0xb47   : > { %v6570_v40 = vmul.f32 %v8196_v61, %v6569_v22  ;;  %v7106_v22 = vrot.slane %v7105_v51, 2  ;;  %v7073_v17 = vadd.f32 %v7072_v48, %v7071_v47  ;;  %v7096_v32 = vrot.slane %v7095_v42, 1 }
 0xb48   : > { %v7084_v57 = vrot.slane %v7083_v11, 1  ;;  %v7125_v47 = vadd.f32 %v7124_v63, %v7123_v53  ;;  %v7103_v1 = vadd.f32 %v7102_v20, %v7101_v25  ;;  %v7161_v44 = vmul.f32 0.16666667, %v13003_v3 }
 0xb49   : > { %v6571_v52 = vmul.f32 0.5, %v6570_v40  ;;  %v7107_v5 = vadd.f32 %v7106_v22, %v7105_v51  ;;  %v7160_v14 = vmul.f32 0.16666667, %v7073_v17  ;;  %v7097_v23 = vadd.f32 %v7096_v32, %v7095_v42 }
 0xb4a   : > { %v7085_v46 = vadd.f32 %v7084_v57, %v7083_v11  ;;  %v7165_v10 = vmul.f32 0.16666667, %v7103_v1 }
 0xb4b   : > { %v6572_v28 = vsub.f32 1.5, %v6571_v52  ;;  %v7108_v31 = vrot.slane %v7107_v5, 1 }
 0xb4c   : > { %v8198_v2 = vpop.eup %8197 }
 0xb4d   : > { %v6573_v39 = vmul.f32 %v8196_v61, %v6572_v28  ;;  %v6579_v54 = vmul.f32 %v8198_v2, %v12985_v30  ;;  %vm6585_vm15 = vweird.f32 %v8198_v2  ;;  %v7226_v30 = vsel %vm7206_vm3, %v12972_v60, %v7225_v56 }
 0xb4e   : > { %vm6586_vm1 = vmor %vm6584_vm0, %vm6585_vm15  ;;  %v7113_v28 = vadd.f32 %v7112_v38, %v7111_v16 }
 0xb4f   : > { %v6577_v33 = vsel %vm6576_vm14, %v8196_v61, %v6573_v39  ;;  %v6580_v35 = vmul.f32 %v8198_v2, %v6579_v54  ;;  %v7067_v61 = vadd.f32 %v7066_v49, %v7065_v43 }
 0xb50   : > { %v6618_v36 = vmul.f32 %v6577_v33, %v12699_v6  ;;  %v7114_v51 = vrot.slane %v7113_v28, 1 }
 0xb51   : > { %v6581_v4 = vmul.f32 0.5, %v6580_v35  ;;  %v7159_v43 = vmul.f32 0.16666667, %v7067_v61  ;;  %v7164_v61 = vmul.f32 0.16666667, %v7097_v23 }
 0xb52   : > { %v6654_v41 = vmul.f32 %v12730_v37, %v6618_v36  ;;  %v7126_v36 = vrot.slane %v7125_v47, 1  ;;  %v7115_v16 = vadd.f32 %v7114_v51, %v7113_v28 }
 0xb53   : > { %v6582_v34 = vsub.f32 1.5, %v6581_v4  ;;  %v7232_v17 = vsel %vm7204_vm2, %v7165_v10, %v7164_v61 }
 0xb54   : > { %v6690_v55 = vadd.f32 %v12745_v9, %v6654_v41  ;;  %v6859_v6 = vpop.permute.xlu0 %6858  ;;  %v7127_v11 = vadd.f32 %v7126_v36, %v7125_v47 }
 0xb55   : > { %v6583_v12 = vmul.f32 %v8198_v2, %v6582_v34  ;;  %v6939_v40 = vmul.f32 %v6859_v6, %v6683_v13  ;;  %v7162_v13 = vmul.f32 0.16666667, %v7085_v46  ;;  %v7167_v6 = vmul.f32 0.16666667, %v7115_v16 }
 0xb56   : > { %v6946_v8 = vmul.f32 %v6908_v7, %v6690_v55  ;;  %v7169_v25 = vmul.f32 0.16666667, %v7127_v11 }
 0xb57   : > { %v6587_v15 = vsel %vm6586_vm1, %v8198_v2, %v6583_v12  ;;  %v7086_v52 = vrot.slane %v6939_v40, 4  ;;  %v7119_v2 = vadd.f32 %v7118_v58, %v7117_v19 }
 0xb58   : > { %v7128_v27 = vrot.slane %v6946_v8, 4  ;;  %v6619_v29 = vmul.f32 %v6587_v15, %v12705_v62  ;;  %v7227_v62 = vsel %vm7208_vm4, %v7159_v43, %v7226_v30 }
 0xb59   : > { %v7087_v24 = vadd.f32 %v7086_v52, %v6939_v40  ;;  %v7228_v60 = vsel %vm7210_vm5, %v7160_v14, %v7227_v62  ;;  %v7120_v35 = vrot.slane %v7119_v2, 1 }
 0xb5a   : > { %v7129_v21 = vadd.f32 %v7128_v27, %v6946_v8  ;;  %v6655_v50 = vmul.f32 %v12730_v37, %v6619_v29  ;;  %v7109_v37 = vadd.f32 %v7108_v31, %v7107_v5  ;;  %v7229_v4 = vsel %vm7212_vm6, %v7161_v44, %v7228_v60 }
 0xb5b   : > { %v7088_v26 = vrot.slane %v7087_v24, 2  ;;  %v7121_v19 = vadd.f32 %v7120_v35, %v7119_v2  ;;  %v7230_v42 = vsel %vm7214_vm7, %v7162_v13, %v7229_v4 }
 0xb5c   : > { %v7130_v39 = vrot.slane %v7129_v21, 2  ;;  %v6691_v54 = vadd.f32 %v12745_v9, %v6655_v50  ;;  %v7166_v22 = vmul.f32 0.16666667, %v7109_v37 }
 0xb5d   : > { %v7089_v18 = vadd.f32 %v7088_v26, %v7087_v24  ;;  %v7168_v12 = vmul.f32 0.16666667, %v7121_v19 }
 0xb5e   : > { %v7131_v0 = vadd.f32 %v7130_v39, %v7129_v21  ;;  %v6947_v33 = vmul.f32 %v6915_v59, %v6691_v54  ;;  %v7233_v40 = vsel %vm7206_vm3, %v7166_v22, %v7232_v17 }
 0xb5f   : > { %v7090_v49 = vrot.slane %v7089_v18, 1  ;;  %v7234_v56 = vsel %vm7208_vm4, %v7167_v6, %v7233_v40 }
 0xb60   : > { %v7134_v45 = vrot.slane %v6947_v33, 4  ;;  %v7132_v9 = vrot.slane %v7131_v0, 1  ;;  %v7235_v58 = vsel %vm7210_vm5, %v7168_v12, %v7234_v56 }
 0xb61   : > { %v7091_v48 = vadd.f32 %v7090_v49, %v7089_v18  ;;  %v7236_v15 = vsel %vm7212_vm6, %v7169_v25, %v7235_v58 }
 0xb62   : > { %v7135_v41 = vadd.f32 %v7134_v45, %v6947_v33  ;;  %v7133_v53 = vadd.f32 %v7132_v9, %v7131_v0 }
 0xb63   : > { %v7163_v34 = vmul.f32 0.16666667, %v7091_v48 }
 0xb64   : > { %v7136_v3 = vrot.slane %v7135_v41, 2  ;;  %v7170_v8 = vmul.f32 0.16666667, %v7133_v53 }
 0xb65   : > { %v7231_v55 = vsel %vm7216_vm8, %v7163_v34, %v7230_v42 }
 0xb66   : > { %v7137_v7 = vadd.f32 %v7136_v3, %v7135_v41  ;;  %7245 = vst [vmem:[%s12578_s20 + $0x10] sm:$0xff] %v7231_v55  ;;  %v7237_v43 = vsel %vm7214_vm7, %v7170_v8, %v7236_v15 }
 0xb68   : > { %v7138_v38 = vrot.slane %v7137_v7, 1 }
 0xb6a   : > { %v7139_v5 = vadd.f32 %v7138_v38, %v7137_v7 }
 0xb6c   : > { %v7171_v52 = vmul.f32 0.16666667, %v7139_v5 }
 0xb6e   : > { %v7238_v63 = vsel %vm7216_vm8, %v7171_v52, %v7237_v43 }
 0xb6f   : > { %7246 = vst [vmem:[%s12578_s20 + $0x18] sm:$0xff] %v7238_v63 }
 0xb70   : > { %8240 = shalt.err (!%p8237_p4)
}
 0xb71   : > { %s8279_s18 = smov 128   ;;  %s8280_s20 = smov 8  }
 0xb72   : > { %7763 = dma.vmem_to_hbm [thread:$0]  (%p8399_p5), %s7261_s27, 512, %s7263_s23, %s7248_s17, %s8279_s18, %s8279_s18, %s8280_s20  }
 0xb73 PF: > { %s13668_s16 = sld [smem:[#allocation7_spill]] }
 0xb74   : > { %s13669_s0 = sld [smem:[#allocation5_spill]] }
 0xb79   : > { %p7769_p7 = scmp.ge.s32.totalorder %s13668_s16, 2 }
 0xb7a   : > { %s7277_s22 = sand.u32 1, %s13669_s0  }
 0xb7b   : > { %p7766_p8 = pnand %p7769_p7, %p8403_p6  ;;  %s7278_s28 = scalar_lea.sflag [#allocation3], %s7277_s22 }
 0xb7d   : > { %p7767_p9 = pneg %p7766_p8 }
 0xb7f   : > { %8258 = dma.done.wait (%p7767_p9), %s7278_s28, 512  }
 0xb80   : > { %8260 = vsyncadd (%p7767_p9), %s7278_s28, 4294966784  ;;  %s13671_s21 = sld [smem:[#allocation8_spill]]  ;;  %s13674_s18 = smov %s8267_s19 }
 0xb81   : > { %s13672_s29 = sld [smem:[#allocation6_spill]] }
 0xb82   : > { %s13673_s20 = sld [smem:[#allocation9_spill]] }
 0xb86   : > { %p25_p10 = scmp.ge.s32.totalorder %s13671_s21, 4  }
 0xb87   : > { %s13675_s19 = smov %s13672_s29 }
 0xb88   :  { %27 = sbr.rel (!%p25_p10) target bundleno = 6 (0x6), region = 118 }
 0xb8d   :  { %7284 = vsyncpa [#allocation3], 1 }
 0xb8e   :  { %7286 = vsyncpa [#allocation3 + $0x1], 1 }

</bundles_post_ra>
